<compile_context>
chip_gen: v7x
topology: tpu7x:2x2x1
jax: 0.10.0
libtpu: 0.0.40
codegen_flags: <defaults>
</compile_context>

<pallas_src>
import functools

import jax
import jax.numpy as jnp
from jax.experimental import pallas as pl
from jax.experimental.pallas import tpu as pltpu

BN_EPS = 1e-5
NUM_EXPERTS = 16
EXPERT_H1 = 128
EXPERT_H2 = 64
ROUTER_H1 = 64
ROUTER_H2 = 32
EXPERT_ROWS = NUM_EXPERTS * EXPERT_H1          # 2048
FUSED_ROWS = EXPERT_ROWS + ROUTER_H1           # 2112
H2_ROWS = NUM_EXPERTS * EXPERT_H2              # 1024


# ----------------------------------------------------------------------------- kernel

def fairness_branch_kernel(
    x_ref,                                     # (D, TB)       matmul dtype
    w1_ref, b1_ref,                            # (2112, D),    (2112, 1)
    wr2_ref, br2_ref,                          # (32, 64),     (32, 1)
    wr3_ref, br3_ref,                          # (16, 32),     (16, 1)
    we2p_ref, be2p_ref,                        # (8, 128, 256),(8, 128, 1)  paired block-diag
    w3bd_ref, be3_ref,                         # (16, 1024),   (16, 1)      block-diag
    rw_ref, eo_ref, pred_ref,                  # (16, TB), (16, TB), (1, TB)
):
    mm_dtype = w1_ref.dtype
    x_t = x_ref[...]                                                   # (D, TB)

    # Fused layer 1: 16 experts (rows [0,2048)) + router (rows [2048,2112)).
    # BatchNorm is already folded into w1/b1 by the wrapper.
    h1 = jnp.dot(w1_ref[...], x_t, preferred_element_type=jnp.float32) + b1_ref[...]
    # Single ReLU + single cast; the full-size f32 h1 dies here (cuts vreg/VMEM pressure).
    h1_mm = jnp.maximum(h1, 0.0).astype(mm_dtype)                      # (2112, TB)

    # ---------------- router ----------------
    hr1 = h1_mm[EXPERT_ROWS:, :]                                       # (64, TB)
    hr2 = jnp.dot(wr2_ref[...], hr1, preferred_element_type=jnp.float32) + br2_ref[...]
    hr2 = jnp.maximum(hr2, 0.0).astype(mm_dtype)                       # (32, TB)
    logits = jnp.dot(wr3_ref[...], hr2, preferred_element_type=jnp.float32) + br3_ref[...]
    m = jnp.max(logits, axis=0, keepdims=True)                         # (1, TB)
    ex = jnp.exp(logits - m)
    inv = pl.reciprocal(jnp.sum(ex, axis=0, keepdims=True), approx=True)
    rw_t = ex * inv                                                    # (16, TB) softmax
    rw_ref[...] = rw_t

    # ---------------- experts ----------------
    # Layer 2: experts paired into block-diagonal (128,256) weight tiles -> 8 matmuls
    # that fill the 256x256 MXU on v6e/v7x (neutral on v5e's 128x128 MXU).
    h2_chunks = []
    for p in range(NUM_EXPERTS // 2):
        h1p = h1_mm[p * 2 * EXPERT_H1:(p + 1) * 2 * EXPERT_H1, :]      # (256, TB)
        h2p = jnp.dot(we2p_ref[p], h1p, preferred_element_type=jnp.float32) + be2p_ref[p]
        h2_chunks.append(jnp.maximum(h2p, 0.0).astype(mm_dtype))       # (128, TB)
    h2_all = jnp.concatenate(h2_chunks, axis=0)                        # (1024, TB), expert-major

    # Layer 3: all 16 logits in one block-diagonal matmul (MXU slot instead of
    # 16 VPU multiplies + XLU cross-sublane reductions).
    lg = jnp.dot(w3bd_ref[...], h2_all, preferred_element_type=jnp.float32) + be3_ref[...]
    # sigmoid via EUP exp + approx reciprocal; clamp at 30 keeps exp well inside f32 range.
    en = jnp.exp(jnp.minimum(-lg, 30.0))
    eo_t = pl.reciprocal(1.0 + en, approx=True)                        # (16, TB)

    # Single dense store per output; weighted prediction from the in-register value.
    eo_ref[...] = eo_t
    pred_ref[...] = jnp.sum(rw_t * eo_t, axis=0, keepdims=True)        # (1, TB)


# ----------------------------------------------------------------------------- wrapper

def _round_up(n, m):
    return ((n + m - 1) // m) * m


def _resident_spec(shape):
    # Constant index_map -> the block never changes -> fetched once, stays in VMEM.
    nd = len(shape)
    return pl.BlockSpec(shape, lambda i, _nd=nd: (0,) * _nd)


def _vmem_budget(weight_args, D, tb, mm_itemsize):
    """Derive the scoped-VMEM limit from actual sizes (review: don't hardcode 32 MiB)."""
    weight_bytes = sum(int(w.size) * w.dtype.itemsize for w in weight_args)
    act_bytes = tb * (
        2 * D * mm_itemsize                        # double-buffered x tile
        + FUSED_ROWS * (4 + mm_itemsize)           # h1 f32 + cast copy
        + H2_ROWS * (4 + mm_itemsize)              # h2 f32 + cast copy
        + 2 * 2 * (2 * NUM_EXPERTS + 1) * 4        # double-buffered outputs + softmax temps
    )
    est = 2 * weight_bytes + act_bytes + (8 << 20)  # weights double-buffered + DMA slack
    return int(min(max(est, 32 << 20), 100 << 20))


@functools.partial(jax.jit, static_argnames=("tb",))
def fairness_branch_forward(x, params, tb=512):
    """x: (B, D) float32.  params: output of prepare_params().
    Returns (weighted_pred [B], routing_weights [B, E], expert_outputs [B, E])."""
    B, D = x.shape
    E = NUM_EXPERTS
    mm_dtype = params["w1t"].dtype
    mm_itemsize = jnp.dtype(mm_dtype).itemsize

    # Batch tile (lane dim): multiple of 128, default 512, clamped to the padded batch.
    tb_eff = max(128, (int(tb) // 128) * 128)
    tb_eff = min(tb_eff, _round_up(max(B, 1), 128))
    Bp = _round_up(B, tb_eff)
    # Keep >= 2 grid tiles when the batch allows so both v7x TensorCores get work.
    if Bp // tb_eff < 2 and tb_eff > 128:
        tb_eff = max(128, _round_up(tb_eff // 2, 128))
        Bp = _round_up(B, tb_eff)
    n_tiles = Bp // tb_eff

    # Layout plumbing in the wrapper: one fused transpose+cast+pad (no zeros+set copy).
    x_t = jnp.pad(x.T.astype(mm_dtype), ((0, 0), (0, Bp - B)))

    weight_args = (
        params["w1t"], params["b1"], params["wr2t"], params["br2"],
        params["wr3t"], params["br3"], params["we2p"], params["be2p"],
        params["w3bd"], params["be3"],
    )

    out_shape = (
        jax.ShapeDtypeStruct((E, Bp), jnp.float32),   # routing weights (transposed)
        jax.ShapeDtypeStruct((E, Bp), jnp.float32),   # expert outputs  (transposed)
        jax.ShapeDtypeStruct((1, Bp), jnp.float32),   # weighted pred
    )
    in_specs = [pl.BlockSpec((D, tb_eff), lambda i: (0, i))]
    in_specs += [_resident_spec(w.shape) for w in weight_args]
    out_specs = (
        pl.BlockSpec((E, tb_eff), lambda i: (0, i)),
        pl.BlockSpec((E, tb_eff), lambda i: (0, i)),
        pl.BlockSpec((1, tb_eff), lambda i: (0, i)),
    )

    rw_t, eo_t, pred_t = pl.pallas_call(
        fairness_branch_kernel,
        grid=(n_tiles,),
        in_specs=in_specs,
        out_specs=out_specs,
        out_shape=out_shape,
        compiler_params=pltpu.CompilerParams(
            dimension_semantics=("parallel",),        # independent batch tiles (megacore)
            vmem_limit_bytes=_vmem_budget(weight_args, D, tb_eff, mm_itemsize),
        ),
    )(x_t, *weight_args)

    return pred_t[0, :B], rw_t[:, :B].T, eo_t[:, :B].T


# ----------------------------------------------------------------------------- params

def prepare_params(p, matmul_dtype=jnp.bfloat16):
    """Fold BatchNorm (running stats) into first-layer weights, fuse all first layers
    into one (2112, D) matrix, pair experts into block-diagonal (128,256) layer-2 tiles,
    build the block-diagonal (16,1024) layer-3 matrix, and pre-transpose everything into
    the kernel's (features-on-sublanes, batch-on-lanes) layout."""
    E, H1, H2 = NUM_EXPERTS, EXPERT_H1, EXPERT_H2
    f32 = jnp.float32

    # ----- router: BN fold -----
    rbn = p["rbn"]                                           # (4, D): gamma, beta, mean, var
    r_scale = rbn[0] * jax.lax.rsqrt(rbn[3] + BN_EPS)        # (D,)
    r_shift = rbn[1] - rbn[2] * r_scale                      # (D,)
    wr1f = p["wr1"] * r_scale[:, None]                       # (D, 64)
    br1f = p["br1"][0] + r_shift @ p["wr1"]                  # (64,)

    # ----- experts: BN fold -----
    ebn = p["ebn"]                                           # (E, 4, D)
    e_scale = ebn[:, 0] * jax.lax.rsqrt(ebn[:, 3] + BN_EPS)  # (E, D)
    e_shift = ebn[:, 1] - ebn[:, 2] * e_scale                # (E, D)
    we1f = p["we1"] * e_scale[:, :, None]                    # (E, D, H1)
    be1f = p["be1"] + jnp.einsum("ed,edh->eh", e_shift, p["we1"])   # (E, H1)

    # ----- fused layer 1: experts at rows [0, E*H1), router at rows [E*H1, E*H1+64) -----
    w1_exp = jnp.transpose(we1f, (0, 2, 1)).reshape(E * H1, -1)     # (2048, D)
    w1_all = jnp.concatenate([w1_exp, wr1f.T], axis=0)              # (2112, D)
    b1_all = jnp.concatenate([be1f.reshape(-1), br1f])[:, None]     # (2112, 1)

    # ----- expert layer 2: pair experts (2p, 2p+1) into block-diagonal (128, 256) tiles -----
    we2t = jnp.transpose(p["we2"], (0, 2, 1))                       # (E, 64, 128)
    z = jnp.zeros((E // 2, H2, H1), we2t.dtype)
    top = jnp.concatenate([we2t[0::2], z], axis=2)                  # (8, 64, 256) expert 2p
    bot = jnp.concatenate([z, we2t[1::2]], axis=2)                  # (8, 64, 256) expert 2p+1
    we2p = jnp.concatenate([top, bot], axis=1)                      # (8, 128, 256)
    be2p = jnp.concatenate([p["be2"][0::2], p["be2"][1::2]], axis=1)[:, :, None]  # (8,128,1)

    # ----- expert layer 3: block-diagonal (16, 16*64); row e holds we3[e] in block e -----
    w3bd = (jnp.eye(E, dtype=f32)[:, :, None] * p["we3"][None, :, :]).reshape(E, E * H2)

    return {
        "w1t": w1_all.astype(matmul_dtype),
        "b1": b1_all.astype(f32),
        "wr2t": p["wr2"].T.astype(matmul_dtype),                    # (32, 64)
        "br2": p["br2"].reshape(ROUTER_H2, 1).astype(f32),
        "wr3t": p["wr3"].T.astype(matmul_dtype),                    # (16, 32)
        "br3": p["br3"].reshape(NUM_EXPERTS, 1).astype(f32),
        "we2p": we2p.astype(matmul_dtype),                          # (8, 128, 256)
        "be2p": be2p.astype(f32),                                   # (8, 128, 1)
        "w3bd": w3bd.astype(matmul_dtype),                          # (16, 1024)
        "be3": p["be3"].reshape(NUM_EXPERTS, 1).astype(f32),        # (16, 1)
    }


def init_params(key, D):
    """Raw parameters in the PyTorch module's layout/initialization."""
    E, H1, H2, R1, R2 = NUM_EXPERTS, EXPERT_H1, EXPERT_H2, ROUTER_H1, ROUTER_H2
    keys = jax.random.split(key, 12)

    def xavier(k, shape, fan_in, fan_out, gain):
        bound = gain * (6.0 / (fan_in + fan_out)) ** 0.5
        return jax.random.uniform(k, shape, jnp.float32, -bound, bound)

    def kaiming(k, shape, fan_in):
        bound = 1.0 / (fan_in ** 0.5)
        return jax.random.uniform(k, shape, jnp.float32, -bound, bound)

    # BatchNorm1d defaults: gamma=1, beta=0, running_mean=0, running_var=1.
    bn_default = jnp.stack([jnp.ones(D), jnp.zeros(D), jnp.zeros(D), jnp.ones(D)]
                           ).astype(jnp.float32)                      # (4, D)

    return {
        # ---- router (default PyTorch Linear init) ----
        'rbn': bn_default,
        'wr1': kaiming(keys[0], (D, R1), D),
        'br1': kaiming(keys[1], (1, R1), D),
        'wr2': kaiming(keys[2], (R1, R2), R1),
        'br2': kaiming(keys[3], (1, R2), R1),
        'wr3': kaiming(keys[4], (R2, E), R2),
        'br3': kaiming(keys[5], (1, E), R2),
        # ---- experts (xavier_uniform gain=2.0, bias=0.1), stacked on axis 0 ----
        'ebn': jnp.broadcast_to(bn_default[None], (E, 4, D)).astype(jnp.float32),
        'we1': xavier(keys[6], (E, D, H1), D, H1, 2.0),
        'be1': jnp.full((E, H1), 0.1, jnp.float32),
        'we2': xavier(keys[7], (E, H1, H2), H1, H2, 2.0),
        'be2': jnp.full((E, H2), 0.1, jnp.float32),
        'we3': xavier(keys[8], (E, H2), H2, 1, 2.0),
        'be3': jnp.full((1, E), 0.1, jnp.float32),
    }


def reference_forward(x, p):
    """Pure-JAX f32 reference (same eval-mode semantics as the PyTorch module)."""
    rbn = p['rbn']
    xr = (x - rbn[2]) * jax.lax.rsqrt(rbn[3] + BN_EPS) * rbn[0] + rbn[1]
    h = jnp.maximum(xr @ p['wr1'] + p['br1'], 0.0)
    h = jnp.maximum(h @ p['wr2'] + p['br2'], 0.0)
    logits = h @ p['wr3'] + p['br3']
    rw = jax.nn.softmax(logits, axis=1)

    ebn = p['ebn']
    xe = (x[None] - ebn[:, 2][:, None]) * jax.lax.rsqrt(ebn[:, 3] + BN_EPS)[:, None] \
         * ebn[:, 0][:, None] + ebn[:, 1][:, None]
    h1 = jnp.maximum(jnp.einsum('ebd,edh->ebh', xe, p['we1']) + p['be1'][:, None], 0.0)
    h2 = jnp.maximum(jnp.einsum('ebh,ehk->ebk', h1, p['we2']) + p['be2'][:, None], 0.0)
    lg = jnp.sum(h2 * p['we3'][:, None], axis=-1) + p['be3'].T
    eo = jax.nn.sigmoid(lg).T
    pred = jnp.sum(rw * eo, axis=1)
    return pred, rw, eo


if __name__ == "__main__":
    B, D = 8, 32
    key = jax.random.PRNGKey(0)
    kx, kp = jax.random.split(key)
    x = jax.random.normal(kx, (B, D), jnp.float32)
    raw = init_params(kp, D)

    pred_r, rw_r, eo_r = reference_forward(x, raw)

    # f32 matmul operands: numerical parity with the (f32) PyTorch module.
    params_f32 = prepare_params(raw, matmul_dtype=jnp.float32)
    pred, rw, eo = fairness_branch_forward(x, params_f32)
    jax.block_until_ready((pred, rw, eo))
    assert pred.shape == (B,) and rw.shape == (B, NUM_EXPERTS) and eo.shape == (B, NUM_EXPERTS)
    assert jnp.allclose(pred, pred_r, atol=5e-3, rtol=5e-3)
    assert jnp.allclose(rw, rw_r, atol=5e-3, rtol=5e-3)
    assert jnp.allclose(eo, eo_r, atol=5e-3, rtol=5e-3)

    # bf16 matmul operands with f32 accumulation: production fast path, looser tolerance.
    params_bf16 = prepare_params(raw, matmul_dtype=jnp.bfloat16)
    pred_b, rw_b, eo_b = fairness_branch_forward(x, params_bf16)
    jax.block_until_ready((pred_b, rw_b, eo_b))
    assert jnp.allclose(pred_b, pred_r, atol=7e-2, rtol=7e-2)
    assert jnp.allclose(rw_b, rw_r, atol=7e-2, rtol=7e-2)
    assert jnp.allclose(eo_b, eo_r, atol=7e-2, rtol=7e-2)

    print("KERNEL_OK")
</pallas_src>

<mosaic_0001>
module attributes {stable_mosaic.version = 11 : i64} {
  func.func @fairness_branch_kernel(%arg0: i32, %arg1: memref<32x128xf32, #tpu.memory_space<vmem>>, %arg2: memref<2112x32xf32, #tpu.memory_space<vmem>>, %arg3: memref<2112x1xf32, #tpu.memory_space<vmem>>, %arg4: memref<32x64xf32, #tpu.memory_space<vmem>>, %arg5: memref<32x1xf32, #tpu.memory_space<vmem>>, %arg6: memref<16x32xf32, #tpu.memory_space<vmem>>, %arg7: memref<16x1xf32, #tpu.memory_space<vmem>>, %arg8: memref<8x128x256xf32, #tpu.memory_space<vmem>>, %arg9: memref<8x128x1xf32, #tpu.memory_space<vmem>>, %arg10: memref<16x1024xf32, #tpu.memory_space<vmem>>, %arg11: memref<16x1xf32, #tpu.memory_space<vmem>>, %arg12: memref<16x128xf32, #tpu.memory_space<vmem>>, %arg13: memref<16x128xf32, #tpu.memory_space<vmem>>, %arg14: memref<1x128xf32, #tpu.memory_space<vmem>>) attributes {dimension_semantics = [#tpu.dimension_semantics<parallel>], iteration_bounds = array<i64: 1>, scalar_prefetch = 0 : i64, scratch_operands = 0 : i64, tpu.core_type = #tpu.core_type<tc>, window_params = [{transform_indices = @transform_0, window_bounds = array<i64: 32, 128>}, {pipeline_mode = #tpu.pipeline_mode<synchronous>, transform_indices = @transform_1, window_bounds = array<i64: 2112, 32>}, {pipeline_mode = #tpu.pipeline_mode<synchronous>, transform_indices = @transform_2, window_bounds = array<i64: 2112, 1>}, {pipeline_mode = #tpu.pipeline_mode<synchronous>, transform_indices = @transform_3, window_bounds = array<i64: 32, 64>}, {pipeline_mode = #tpu.pipeline_mode<synchronous>, transform_indices = @transform_4, window_bounds = array<i64: 32, 1>}, {pipeline_mode = #tpu.pipeline_mode<synchronous>, transform_indices = @transform_5, window_bounds = array<i64: 16, 32>}, {pipeline_mode = #tpu.pipeline_mode<synchronous>, transform_indices = @transform_6, window_bounds = array<i64: 16, 1>}, {pipeline_mode = #tpu.pipeline_mode<synchronous>, transform_indices = @transform_7, window_bounds = array<i64: 8, 128, 256>}, {pipeline_mode = #tpu.pipeline_mode<synchronous>, transform_indices = @transform_8, window_bounds = array<i64: 8, 128, 1>}, {pipeline_mode = #tpu.pipeline_mode<synchronous>, transform_indices = @transform_9, window_bounds = array<i64: 16, 1024>}, {pipeline_mode = #tpu.pipeline_mode<synchronous>, transform_indices = @transform_10, window_bounds = array<i64: 16, 1>}, {transform_indices = @transform_11, window_bounds = array<i64: 16, 128>}, {transform_indices = @transform_12, window_bounds = array<i64: 16, 128>}, {transform_indices = @transform_13, window_bounds = array<i64: 1, 128>}]} {
    %c0 = arith.constant 0 : index
    %c0_0 = arith.constant 0 : index
    %0 = vector.load %arg1[%c0, %c0_0] : memref<32x128xf32, #tpu.memory_space<vmem>>, vector<32x128xf32>
    %c0_1 = arith.constant 0 : index
    %c0_2 = arith.constant 0 : index
    %1 = vector.load %arg2[%c0_1, %c0_2] : memref<2112x32xf32, #tpu.memory_space<vmem>>, vector<2112x32xf32>
    %cst = arith.constant dense<0.000000e+00> : vector<2112x128xf32>
    %2 = tpu.matmul %1, %0, %cst {dimension_numbers = #tpu.dot_dimension_numbers<[1], [0], [0], [1], [0, 0, 1, 1], [], []>} : vector<2112x32xf32>, vector<32x128xf32>, vector<2112x128xf32> -> vector<2112x128xf32>
    %c0_3 = arith.constant 0 : index
    %c0_4 = arith.constant 0 : index
    %3 = vector.load %arg3[%c0_3, %c0_4] : memref<2112x1xf32, #tpu.memory_space<vmem>>, vector<2112x1xf32>
    %4 = vector.broadcast %3 : vector<2112x1xf32> to vector<2112x128xf32>
    %5 = arith.addf %2, %4 : vector<2112x128xf32>
    %cst_5 = arith.constant 0.000000e+00 : f32
    %6 = vector.broadcast %cst_5 : f32 to vector<2112x128xf32>
    %7 = arith.maximumf %5, %6 : vector<2112x128xf32>
    %8 = vector.extract_strided_slice %7 {offsets = [2048, 0], sizes = [64, 128], strides = [1, 1]} : vector<2112x128xf32> to vector<64x128xf32>
    %c0_6 = arith.constant 0 : index
    %c0_7 = arith.constant 0 : index
    %9 = vector.load %arg4[%c0_6, %c0_7] : memref<32x64xf32, #tpu.memory_space<vmem>>, vector<32x64xf32>
    %cst_8 = arith.constant dense<0.000000e+00> : vector<32x128xf32>
    %10 = tpu.matmul %9, %8, %cst_8 {dimension_numbers = #tpu.dot_dimension_numbers<[1], [0], [0], [1], [0, 0, 1, 1], [], []>} : vector<32x64xf32>, vector<64x128xf32>, vector<32x128xf32> -> vector<32x128xf32>
    %c0_9 = arith.constant 0 : index
    %c0_10 = arith.constant 0 : index
    %11 = vector.load %arg5[%c0_9, %c0_10] : memref<32x1xf32, #tpu.memory_space<vmem>>, vector<32x1xf32>
    %12 = vector.broadcast %11 : vector<32x1xf32> to vector<32x128xf32>
    %13 = arith.addf %10, %12 : vector<32x128xf32>
    %cst_11 = arith.constant 0.000000e+00 : f32
    %14 = vector.broadcast %cst_11 : f32 to vector<32x128xf32>
    %15 = arith.maximumf %13, %14 : vector<32x128xf32>
    %c0_12 = arith.constant 0 : index
    %c0_13 = arith.constant 0 : index
    %16 = vector.load %arg6[%c0_12, %c0_13] : memref<16x32xf32, #tpu.memory_space<vmem>>, vector<16x32xf32>
    %cst_14 = arith.constant dense<0.000000e+00> : vector<16x128xf32>
    %17 = tpu.matmul %16, %15, %cst_14 {dimension_numbers = #tpu.dot_dimension_numbers<[1], [0], [0], [1], [0, 0, 1, 1], [], []>} : vector<16x32xf32>, vector<32x128xf32>, vector<16x128xf32> -> vector<16x128xf32>
    %c0_15 = arith.constant 0 : index
    %c0_16 = arith.constant 0 : index
    %18 = vector.load %arg7[%c0_15, %c0_16] : memref<16x1xf32, #tpu.memory_space<vmem>>, vector<16x1xf32>
    %19 = vector.broadcast %18 : vector<16x1xf32> to vector<16x128xf32>
    %20 = arith.addf %17, %19 : vector<16x128xf32>
    %cst_17 = arith.constant dense<0xFF800000> : vector<128xf32>
    %21 = vector.multi_reduction <maximumf>, %20, %cst_17 [0] : vector<16x128xf32> to vector<128xf32>
    %22 = vector.shape_cast %21 : vector<128xf32> to vector<1x128xf32>
    %23 = vector.broadcast %22 : vector<1x128xf32> to vector<16x128xf32>
    %24 = arith.subf %20, %23 : vector<16x128xf32>
    %25 = math.exp %24 : vector<16x128xf32>
    %cst_18 = arith.constant dense<0.000000e+00> : vector<128xf32>
    %26 = vector.multi_reduction <add>, %25, %cst_18 [0] : vector<16x128xf32> to vector<128xf32>
    %27 = vector.shape_cast %26 : vector<128xf32> to vector<1x128xf32>
    %28 = tpu.reciprocal %27 {approx = true} : vector<1x128xf32> -> vector<1x128xf32>
    %29 = vector.broadcast %28 : vector<1x128xf32> to vector<16x128xf32>
    %30 = arith.mulf %25, %29 : vector<16x128xf32>
    %c0_19 = arith.constant 0 : index
    %c0_20 = arith.constant 0 : index
    %31 = vector.load %arg12[%c0_19, %c0_20] : memref<16x128xf32, #tpu.memory_space<vmem>>, vector<16x128xf32>
    tpu.vector_store %arg12[%c0_19, %c0_20], %30 {strides = array<i32>} : memref<16x128xf32, #tpu.memory_space<vmem>>, vector<16x128xf32>,
    %32 = vector.extract_strided_slice %7 {offsets = [0, 0], sizes = [256, 128], strides = [1, 1]} : vector<2112x128xf32> to vector<256x128xf32>
    %c0_21 = arith.constant 0 : index
    %c0_22 = arith.constant 0 : index
    %c0_23 = arith.constant 0 : index
    %33 = vector.load %arg8[%c0_21, %c0_22, %c0_23] : memref<8x128x256xf32, #tpu.memory_space<vmem>>, vector<1x128x256xf32>
    %34 = vector.shape_cast %33 : vector<1x128x256xf32> to vector<128x256xf32>
    %cst_24 = arith.constant dense<0.000000e+00> : vector<128x128xf32>
    %35 = tpu.matmul %34, %32, %cst_24 {dimension_numbers = #tpu.dot_dimension_numbers<[1], [0], [0], [1], [0, 0, 1, 1], [], []>} : vector<128x256xf32>, vector<256x128xf32>, vector<128x128xf32> -> vector<128x128xf32>
    %c0_25 = arith.constant 0 : index
    %c0_26 = arith.constant 0 : index
    %c0_27 = arith.constant 0 : index
    %36 = vector.load %arg9[%c0_25, %c0_26, %c0_27] : memref<8x128x1xf32, #tpu.memory_space<vmem>>, vector<1x128x1xf32>
    %37 = vector.shape_cast %36 : vector<1x128x1xf32> to vector<128x1xf32>
    %38 = vector.broadcast %37 : vector<128x1xf32> to vector<128x128xf32>
    %39 = arith.addf %35, %38 : vector<128x128xf32>
    %cst_28 = arith.constant 0.000000e+00 : f32
    %40 = vector.broadcast %cst_28 : f32 to vector<128x128xf32>
    %41 = arith.maximumf %39, %40 : vector<128x128xf32>
    %42 = vector.extract_strided_slice %7 {offsets = [256, 0], sizes = [256, 128], strides = [1, 1]} : vector<2112x128xf32> to vector<256x128xf32>
    %c1 = arith.constant 1 : index
    %c0_29 = arith.constant 0 : index
    %c0_30 = arith.constant 0 : index
    %43 = vector.load %arg8[%c1, %c0_29, %c0_30] : memref<8x128x256xf32, #tpu.memory_space<vmem>>, vector<1x128x256xf32>
    %44 = vector.shape_cast %43 : vector<1x128x256xf32> to vector<128x256xf32>
    %cst_31 = arith.constant dense<0.000000e+00> : vector<128x128xf32>
    %45 = tpu.matmul %44, %42, %cst_31 {dimension_numbers = #tpu.dot_dimension_numbers<[1], [0], [0], [1], [0, 0, 1, 1], [], []>} : vector<128x256xf32>, vector<256x128xf32>, vector<128x128xf32> -> vector<128x128xf32>
    %c1_32 = arith.constant 1 : index
    %c0_33 = arith.constant 0 : index
    %c0_34 = arith.constant 0 : index
    %46 = vector.load %arg9[%c1_32, %c0_33, %c0_34] : memref<8x128x1xf32, #tpu.memory_space<vmem>>, vector<1x128x1xf32>
    %47 = vector.shape_cast %46 : vector<1x128x1xf32> to vector<128x1xf32>
    %48 = vector.broadcast %47 : vector<128x1xf32> to vector<128x128xf32>
    %49 = arith.addf %45, %48 : vector<128x128xf32>
    %cst_35 = arith.constant 0.000000e+00 : f32
    %50 = vector.broadcast %cst_35 : f32 to vector<128x128xf32>
    %51 = arith.maximumf %49, %50 : vector<128x128xf32>
    %52 = vector.extract_strided_slice %7 {offsets = [512, 0], sizes = [256, 128], strides = [1, 1]} : vector<2112x128xf32> to vector<256x128xf32>
    %c2 = arith.constant 2 : index
    %c0_36 = arith.constant 0 : index
    %c0_37 = arith.constant 0 : index
    %53 = vector.load %arg8[%c2, %c0_36, %c0_37] : memref<8x128x256xf32, #tpu.memory_space<vmem>>, vector<1x128x256xf32>
    %54 = vector.shape_cast %53 : vector<1x128x256xf32> to vector<128x256xf32>
    %cst_38 = arith.constant dense<0.000000e+00> : vector<128x128xf32>
    %55 = tpu.matmul %54, %52, %cst_38 {dimension_numbers = #tpu.dot_dimension_numbers<[1], [0], [0], [1], [0, 0, 1, 1], [], []>} : vector<128x256xf32>, vector<256x128xf32>, vector<128x128xf32> -> vector<128x128xf32>
    %c2_39 = arith.constant 2 : index
    %c0_40 = arith.constant 0 : index
    %c0_41 = arith.constant 0 : index
    %56 = vector.load %arg9[%c2_39, %c0_40, %c0_41] : memref<8x128x1xf32, #tpu.memory_space<vmem>>, vector<1x128x1xf32>
    %57 = vector.shape_cast %56 : vector<1x128x1xf32> to vector<128x1xf32>
    %58 = vector.broadcast %57 : vector<128x1xf32> to vector<128x128xf32>
    %59 = arith.addf %55, %58 : vector<128x128xf32>
    %cst_42 = arith.constant 0.000000e+00 : f32
    %60 = vector.broadcast %cst_42 : f32 to vector<128x128xf32>
    %61 = arith.maximumf %59, %60 : vector<128x128xf32>
    %62 = vector.extract_strided_slice %7 {offsets = [768, 0], sizes = [256, 128], strides = [1, 1]} : vector<2112x128xf32> to vector<256x128xf32>
    %c3 = arith.constant 3 : index
    %c0_43 = arith.constant 0 : index
    %c0_44 = arith.constant 0 : index
    %63 = vector.load %arg8[%c3, %c0_43, %c0_44] : memref<8x128x256xf32, #tpu.memory_space<vmem>>, vector<1x128x256xf32>
    %64 = vector.shape_cast %63 : vector<1x128x256xf32> to vector<128x256xf32>
    %cst_45 = arith.constant dense<0.000000e+00> : vector<128x128xf32>
    %65 = tpu.matmul %64, %62, %cst_45 {dimension_numbers = #tpu.dot_dimension_numbers<[1], [0], [0], [1], [0, 0, 1, 1], [], []>} : vector<128x256xf32>, vector<256x128xf32>, vector<128x128xf32> -> vector<128x128xf32>
    %c3_46 = arith.constant 3 : index
    %c0_47 = arith.constant 0 : index
    %c0_48 = arith.constant 0 : index
    %66 = vector.load %arg9[%c3_46, %c0_47, %c0_48] : memref<8x128x1xf32, #tpu.memory_space<vmem>>, vector<1x128x1xf32>
    %67 = vector.shape_cast %66 : vector<1x128x1xf32> to vector<128x1xf32>
    %68 = vector.broadcast %67 : vector<128x1xf32> to vector<128x128xf32>
    %69 = arith.addf %65, %68 : vector<128x128xf32>
    %cst_49 = arith.constant 0.000000e+00 : f32
    %70 = vector.broadcast %cst_49 : f32 to vector<128x128xf32>
    %71 = arith.maximumf %69, %70 : vector<128x128xf32>
    %72 = vector.extract_strided_slice %7 {offsets = [1024, 0], sizes = [256, 128], strides = [1, 1]} : vector<2112x128xf32> to vector<256x128xf32>
    %c4 = arith.constant 4 : index
    %c0_50 = arith.constant 0 : index
    %c0_51 = arith.constant 0 : index
    %73 = vector.load %arg8[%c4, %c0_50, %c0_51] : memref<8x128x256xf32, #tpu.memory_space<vmem>>, vector<1x128x256xf32>
    %74 = vector.shape_cast %73 : vector<1x128x256xf32> to vector<128x256xf32>
    %cst_52 = arith.constant dense<0.000000e+00> : vector<128x128xf32>
    %75 = tpu.matmul %74, %72, %cst_52 {dimension_numbers = #tpu.dot_dimension_numbers<[1], [0], [0], [1], [0, 0, 1, 1], [], []>} : vector<128x256xf32>, vector<256x128xf32>, vector<128x128xf32> -> vector<128x128xf32>
    %c4_53 = arith.constant 4 : index
    %c0_54 = arith.constant 0 : index
    %c0_55 = arith.constant 0 : index
    %76 = vector.load %arg9[%c4_53, %c0_54, %c0_55] : memref<8x128x1xf32, #tpu.memory_space<vmem>>, vector<1x128x1xf32>
    %77 = vector.shape_cast %76 : vector<1x128x1xf32> to vector<128x1xf32>
    %78 = vector.broadcast %77 : vector<128x1xf32> to vector<128x128xf32>
    %79 = arith.addf %75, %78 : vector<128x128xf32>
    %cst_56 = arith.constant 0.000000e+00 : f32
    %80 = vector.broadcast %cst_56 : f32 to vector<128x128xf32>
    %81 = arith.maximumf %79, %80 : vector<128x128xf32>
    %82 = vector.extract_strided_slice %7 {offsets = [1280, 0], sizes = [256, 128], strides = [1, 1]} : vector<2112x128xf32> to vector<256x128xf32>
    %c5 = arith.constant 5 : index
    %c0_57 = arith.constant 0 : index
    %c0_58 = arith.constant 0 : index
    %83 = vector.load %arg8[%c5, %c0_57, %c0_58] : memref<8x128x256xf32, #tpu.memory_space<vmem>>, vector<1x128x256xf32>
    %84 = vector.shape_cast %83 : vector<1x128x256xf32> to vector<128x256xf32>
    %cst_59 = arith.constant dense<0.000000e+00> : vector<128x128xf32>
    %85 = tpu.matmul %84, %82, %cst_59 {dimension_numbers = #tpu.dot_dimension_numbers<[1], [0], [0], [1], [0, 0, 1, 1], [], []>} : vector<128x256xf32>, vector<256x128xf32>, vector<128x128xf32> -> vector<128x128xf32>
    %c5_60 = arith.constant 5 : index
    %c0_61 = arith.constant 0 : index
    %c0_62 = arith.constant 0 : index
    %86 = vector.load %arg9[%c5_60, %c0_61, %c0_62] : memref<8x128x1xf32, #tpu.memory_space<vmem>>, vector<1x128x1xf32>
    %87 = vector.shape_cast %86 : vector<1x128x1xf32> to vector<128x1xf32>
    %88 = vector.broadcast %87 : vector<128x1xf32> to vector<128x128xf32>
    %89 = arith.addf %85, %88 : vector<128x128xf32>
    %cst_63 = arith.constant 0.000000e+00 : f32
    %90 = vector.broadcast %cst_63 : f32 to vector<128x128xf32>
    %91 = arith.maximumf %89, %90 : vector<128x128xf32>
    %92 = vector.extract_strided_slice %7 {offsets = [1536, 0], sizes = [256, 128], strides = [1, 1]} : vector<2112x128xf32> to vector<256x128xf32>
    %c6 = arith.constant 6 : index
    %c0_64 = arith.constant 0 : index
    %c0_65 = arith.constant 0 : index
    %93 = vector.load %arg8[%c6, %c0_64, %c0_65] : memref<8x128x256xf32, #tpu.memory_space<vmem>>, vector<1x128x256xf32>
    %94 = vector.shape_cast %93 : vector<1x128x256xf32> to vector<128x256xf32>
    %cst_66 = arith.constant dense<0.000000e+00> : vector<128x128xf32>
    %95 = tpu.matmul %94, %92, %cst_66 {dimension_numbers = #tpu.dot_dimension_numbers<[1], [0], [0], [1], [0, 0, 1, 1], [], []>} : vector<128x256xf32>, vector<256x128xf32>, vector<128x128xf32> -> vector<128x128xf32>
    %c6_67 = arith.constant 6 : index
    %c0_68 = arith.constant 0 : index
    %c0_69 = arith.constant 0 : index
    %96 = vector.load %arg9[%c6_67, %c0_68, %c0_69] : memref<8x128x1xf32, #tpu.memory_space<vmem>>, vector<1x128x1xf32>
    %97 = vector.shape_cast %96 : vector<1x128x1xf32> to vector<128x1xf32>
    %98 = vector.broadcast %97 : vector<128x1xf32> to vector<128x128xf32>
    %99 = arith.addf %95, %98 : vector<128x128xf32>
    %cst_70 = arith.constant 0.000000e+00 : f32
    %100 = vector.broadcast %cst_70 : f32 to vector<128x128xf32>
    %101 = arith.maximumf %99, %100 : vector<128x128xf32>
    %102 = vector.extract_strided_slice %7 {offsets = [1792, 0], sizes = [256, 128], strides = [1, 1]} : vector<2112x128xf32> to vector<256x128xf32>
    %c7 = arith.constant 7 : index
    %c0_71 = arith.constant 0 : index
    %c0_72 = arith.constant 0 : index
    %103 = vector.load %arg8[%c7, %c0_71, %c0_72] : memref<8x128x256xf32, #tpu.memory_space<vmem>>, vector<1x128x256xf32>
    %104 = vector.shape_cast %103 : vector<1x128x256xf32> to vector<128x256xf32>
    %cst_73 = arith.constant dense<0.000000e+00> : vector<128x128xf32>
    %105 = tpu.matmul %104, %102, %cst_73 {dimension_numbers = #tpu.dot_dimension_numbers<[1], [0], [0], [1], [0, 0, 1, 1], [], []>} : vector<128x256xf32>, vector<256x128xf32>, vector<128x128xf32> -> vector<128x128xf32>
    %c7_74 = arith.constant 7 : index
    %c0_75 = arith.constant 0 : index
    %c0_76 = arith.constant 0 : index
    %106 = vector.load %arg9[%c7_74, %c0_75, %c0_76] : memref<8x128x1xf32, #tpu.memory_space<vmem>>, vector<1x128x1xf32>
    %107 = vector.shape_cast %106 : vector<1x128x1xf32> to vector<128x1xf32>
    %108 = vector.broadcast %107 : vector<128x1xf32> to vector<128x128xf32>
    %109 = arith.addf %105, %108 : vector<128x128xf32>
    %cst_77 = arith.constant 0.000000e+00 : f32
    %110 = vector.broadcast %cst_77 : f32 to vector<128x128xf32>
    %111 = arith.maximumf %109, %110 : vector<128x128xf32>
    %112 = tpu.concatenate %41, %51, %61, %71, %81, %91, %101, %111 in 0 : vector<128x128xf32>, vector<128x128xf32>, vector<128x128xf32>, vector<128x128xf32>, vector<128x128xf32>, vector<128x128xf32>, vector<128x128xf32>, vector<128x128xf32> -> vector<1024x128xf32>
    %c0_78 = arith.constant 0 : index
    %c0_79 = arith.constant 0 : index
    %113 = vector.load %arg10[%c0_78, %c0_79] : memref<16x1024xf32, #tpu.memory_space<vmem>>, vector<16x1024xf32>
    %cst_80 = arith.constant dense<0.000000e+00> : vector<16x128xf32>
    %114 = tpu.matmul %113, %112, %cst_80 {dimension_numbers = #tpu.dot_dimension_numbers<[1], [0], [0], [1], [0, 0, 1, 1], [], []>} : vector<16x1024xf32>, vector<1024x128xf32>, vector<16x128xf32> -> vector<16x128xf32>
    %c0_81 = arith.constant 0 : index
    %c0_82 = arith.constant 0 : index
    %115 = vector.load %arg11[%c0_81, %c0_82] : memref<16x1xf32, #tpu.memory_space<vmem>>, vector<16x1xf32>
    %116 = vector.broadcast %115 : vector<16x1xf32> to vector<16x128xf32>
    %117 = arith.addf %114, %116 : vector<16x128xf32>
    %cst_83 = arith.constant 0.000000e+00 : f32
    %118 = vector.broadcast %cst_83 : f32 to vector<16x128xf32>
    %119 = arith.subf %118, %117 : vector<16x128xf32>
    %cst_84 = arith.constant 3.000000e+01 : f32
    %120 = vector.broadcast %cst_84 : f32 to vector<16x128xf32>
    %121 = arith.minimumf %119, %120 : vector<16x128xf32>
    %122 = math.exp %121 : vector<16x128xf32>
    %cst_85 = arith.constant 1.000000e+00 : f32
    %123 = vector.broadcast %cst_85 : f32 to vector<16x128xf32>
    %124 = arith.addf %123, %122 : vector<16x128xf32>
    %125 = tpu.reciprocal %124 {approx = true} : vector<16x128xf32> -> vector<16x128xf32>
    %c0_86 = arith.constant 0 : index
    %c0_87 = arith.constant 0 : index
    %126 = vector.load %arg13[%c0_86, %c0_87] : memref<16x128xf32, #tpu.memory_space<vmem>>, vector<16x128xf32>
    tpu.vector_store %arg13[%c0_86, %c0_87], %125 {strides = array<i32>} : memref<16x128xf32, #tpu.memory_space<vmem>>, vector<16x128xf32>,
    %127 = arith.mulf %30, %125 : vector<16x128xf32>
    %cst_88 = arith.constant dense<0.000000e+00> : vector<128xf32>
    %128 = vector.multi_reduction <add>, %127, %cst_88 [0] : vector<16x128xf32> to vector<128xf32>
    %129 = vector.shape_cast %128 : vector<128xf32> to vector<1x128xf32>
    %c0_89 = arith.constant 0 : index
    %c0_90 = arith.constant 0 : index
    %130 = vector.load %arg14[%c0_89, %c0_90] : memref<1x128xf32, #tpu.memory_space<vmem>>, vector<1x128xf32>
    tpu.vector_store %arg14[%c0_89, %c0_90], %129 {strides = array<i32>} : memref<1x128xf32, #tpu.memory_space<vmem>>, vector<1x128xf32>,
    return
  }
  func.func @transform_0(%arg0: i32) -> (i32, i32) {
    %c0_i32 = arith.constant 0 : i32
    %c0_i32_0 = arith.constant 0 : i32
    return %c0_i32, %arg0 : i32, i32
  }
  func.func @transform_1(%arg0: i32) -> (i32, i32) {
    %c0_i32 = arith.constant 0 : i32
    %c0_i32_0 = arith.constant 0 : i32
    %c0_i32_1 = arith.constant 0 : i32
    return %c0_i32, %c0_i32_0 : i32, i32
  }
  func.func @transform_2(%arg0: i32) -> (i32, i32) {
    %c0_i32 = arith.constant 0 : i32
    %c0_i32_0 = arith.constant 0 : i32
    %c0_i32_1 = arith.constant 0 : i32
    return %c0_i32, %c0_i32_0 : i32, i32
  }
  func.func @transform_3(%arg0: i32) -> (i32, i32) {
    %c0_i32 = arith.constant 0 : i32
    %c0_i32_0 = arith.constant 0 : i32
    %c0_i32_1 = arith.constant 0 : i32
    return %c0_i32, %c0_i32_0 : i32, i32
  }
  func.func @transform_4(%arg0: i32) -> (i32, i32) {
    %c0_i32 = arith.constant 0 : i32
    %c0_i32_0 = arith.constant 0 : i32
    %c0_i32_1 = arith.constant 0 : i32
    return %c0_i32, %c0_i32_0 : i32, i32
  }
  func.func @transform_5(%arg0: i32) -> (i32, i32) {
    %c0_i32 = arith.constant 0 : i32
    %c0_i32_0 = arith.constant 0 : i32
    %c0_i32_1 = arith.constant 0 : i32
    return %c0_i32, %c0_i32_0 : i32, i32
  }
  func.func @transform_6(%arg0: i32) -> (i32, i32) {
    %c0_i32 = arith.constant 0 : i32
    %c0_i32_0 = arith.constant 0 : i32
    %c0_i32_1 = arith.constant 0 : i32
    return %c0_i32, %c0_i32_0 : i32, i32
  }
  func.func @transform_7(%arg0: i32) -> (i32, i32, i32) {
    %c0_i32 = arith.constant 0 : i32
    %c0_i32_0 = arith.constant 0 : i32
    %c0_i32_1 = arith.constant 0 : i32
    %c0_i32_2 = arith.constant 0 : i32
    return %c0_i32, %c0_i32_0, %c0_i32_1 : i32, i32, i32
  }
  func.func @transform_8(%arg0: i32) -> (i32, i32, i32) {
    %c0_i32 = arith.constant 0 : i32
    %c0_i32_0 = arith.constant 0 : i32
    %c0_i32_1 = arith.constant 0 : i32
    %c0_i32_2 = arith.constant 0 : i32
    return %c0_i32, %c0_i32_0, %c0_i32_1 : i32, i32, i32
  }
  func.func @transform_9(%arg0: i32) -> (i32, i32) {
    %c0_i32 = arith.constant 0 : i32
    %c0_i32_0 = arith.constant 0 : i32
    %c0_i32_1 = arith.constant 0 : i32
    return %c0_i32, %c0_i32_0 : i32, i32
  }
  func.func @transform_10(%arg0: i32) -> (i32, i32) {
    %c0_i32 = arith.constant 0 : i32
    %c0_i32_0 = arith.constant 0 : i32
    %c0_i32_1 = arith.constant 0 : i32
    return %c0_i32, %c0_i32_0 : i32, i32
  }
  func.func @transform_11(%arg0: i32) -> (i32, i32) {
    %c0_i32 = arith.constant 0 : i32
    %c0_i32_0 = arith.constant 0 : i32
    return %c0_i32, %arg0 : i32, i32
  }
  func.func @transform_12(%arg0: i32) -> (i32, i32) {
    %c0_i32 = arith.constant 0 : i32
    %c0_i32_0 = arith.constant 0 : i32
    return %c0_i32, %arg0 : i32, i32
  }
  func.func @transform_13(%arg0: i32) -> (i32, i32) {
    %c0_i32 = arith.constant 0 : i32
    %c0_i32_0 = arith.constant 0 : i32
    return %c0_i32, %arg0 : i32, i32
  }
}

</mosaic_0001>

<bundles_post_ra>
// kernel: fairness_branch_forward.1
= control target key start
LH: loop header
LB: loop body
LE: loop exit
PB: predicated region body
PF: predicated region fallthrough
CT: control target
= control target key end

     0   :  { %v9835_v0 = vmov 0   ;;  %vm1893_vm0 = vcmask 261120   ;;  %vm4363_vm1 = vcmask 523264   ;;  %s14713_s2 = inlined_call_operand.vmem [shape: f32[2112,1], index: 2, kind: input, shape index: {}]   ;;  %s14714_s0 = inlined_call_operand.vmem [shape: f32[32,128], index: 0, kind: input, shape index: {}]   ;;  %s14715_s1 = inlined_call_operand.vmem [shape: f32[2112,32], index: 1, kind: input, shape index: {}]   ;;  %s14716_s3 = inlined_call_operand.vmem [shape: f32[32,64], index: 3, kind: input, shape index: {}]   ;;  %s14717_s4 = inlined_call_operand.vmem [shape: f32[32,1], index: 4, kind: input, shape index: {}]   ;;  %s14718_s5 = inlined_call_operand.vmem [shape: f32[16,32], index: 5, kind: input, shape index: {}]   ;;  %s14719_s7 = inlined_call_operand.vmem [shape: f32[8,128,256], index: 7, kind: input, shape index: {}]   ;;  %s14720_s6 = inlined_call_operand.vmem [shape: f32[16,1], index: 6, kind: input, shape index: {}]   ;;  %s14721_s8 = inlined_call_operand.vmem [shape: f32[8,128,1], index: 8, kind: input, shape index: {}]   ;;  %s14722_s9 = inlined_call_operand.vmem [shape: f32[16,1024], index: 9, kind: input, shape index: {}]   ;;  %s14723_s11 = inlined_call_operand.vmem [shape: f32[16,128], index: 11, kind: output, shape index: {0}]   ;;  %s14724_s10 = inlined_call_operand.vmem [shape: f32[16,1], index: 10, kind: input, shape index: {}]   ;;  %s14725_s12 = inlined_call_operand.vmem [shape: f32[16,128], index: 12, kind: output, shape index: {1}]   ;;  %s14726_s13 = inlined_call_operand.vmem [shape: f32[1,128], index: 13, kind: output, shape index: {2}]  }
   0x1   :  { %9818 = vset.pattern.permute.xlu1 %v9835_v0  ;;  %9817 = vset.pattern.permute.xlu0 %v9835_v0  ;;  %v311_v1 = vld [vmem:[%s14713_s2 + $0x10] sm:$0xff]  ;;  %v309_v2 = vld [vmem:[%s14713_s2] sm:$0xff]  ;;  %v42_v4 = vld [vmem:[%s14714_s0 + $0x8] sm:$0xff] }
   0x2   :  { %v41_v3 = vld [vmem:[%s14714_s0] sm:$0xff]  ;;  %585 = vperm.xlu1 %9818, %v311_v1   ;;  %575 = vperm.xlu0 %9817, %v309_v2   ;;  %v312_v6 = vld [vmem:[%s14713_s2 + $0x18] sm:$0xff]  ;;  %v43_v7 = vld [vmem:[%s14714_s0 + $0x10] sm:$0xff] }
   0x3   :  { %v9396_v5 = vpack.c.bf16 %v42_v4, %v41_v3  ;;  %v44_v8 = vld [vmem:[%s14714_s0 + $0x18] sm:$0xff]  ;;  %v310_v9 = vld [vmem:[%s14713_s2 + $0x8] sm:$0xff]  ;;  %v45_v11 = vld [vmem:[%s14715_s1] sm:$0xff] }
   0x4   :  { %v9400_v10 = vpack.c.bf16 %v44_v8, %v43_v7  ;;  %8967 = vmatprep.mubr.msk.f32.mxu0 %vm1893_vm0, %v45_v11  ;;  %v314_v12 = vld [vmem:[%s14713_s2 + $0x28] sm:$0xff]  ;;  %v313_v13 = vld [vmem:[%s14713_s2 + $0x20] sm:$0xff]  ;;  %v316_v15 = vld [vmem:[%s14713_s2 + $0x38] sm:$0xff] }
   0x5   :  { %9397 = vmatprep.subr.bf16.mxu0 %v9396_v5  ;;  %9812 = vmatprep.subr.bf16.mxu1 %v9396_v5  ;;  %v46_v14 = vld [vmem:[%s14715_s1 + $0x8] sm:$0xff]  ;;  %v47_v16 = vld [vmem:[%s14715_s1 + $0x10] sm:$0xff]  ;;  %v48_v18 = vld [vmem:[%s14715_s1 + $0x18] sm:$0xff] }
   0x6   :  { %9399 = vmatpush3.bf16.msra.mxu0 %v9396_v5  ;;  %590 = vperm.xlu1 %9818, %v312_v6   ;;  %v315_v17 = vld [vmem:[%s14713_s2 + $0x30] sm:$0xff]  ;;  %v300_v20 = vld [vmem:[%s14715_s1 + $0x7f8] sm:$0xff]  ;;  %v318_v21 = vld [vmem:[%s14713_s2 + $0x48] sm:$0xff] }
   0x7   :  { %580 = vperm.xlu0 %9817, %v310_v9   ;;  %9401 = vmatprep.subr.bf16.mxu0 %v9400_v10  ;;  %v299_v19 = vld [vmem:[%s14715_s1 + $0x7f0] sm:$0xff]  ;;  %v49_v22 = vld [vmem:[%s14715_s1 + $0x20] sm:$0xff]  ;;  %v302_v25 = vld [vmem:[%s14715_s1 + $0x808] sm:$0xff] }
   0x8   :  { %9814 = vmatpush3.bf16.msra.mxu1 %v9396_v5  ;;  %9348 = vmatprep.mubr.msk.f32.mxu1 %vm1893_vm0, %v299_v19  ;;  %v317_v23 = vld [vmem:[%s14713_s2 + $0x40] sm:$0xff]  ;;  %v50_v26 = vld [vmem:[%s14715_s1 + $0x28] sm:$0xff]  ;;  %v303_v27 = vld [vmem:[%s14715_s1 + $0x810] sm:$0xff] }
   0x9   :  { %9813 = vmatprep.subr.bf16.mxu1 %v9400_v10  ;;  %v301_v24 = vld [vmem:[%s14715_s1 + $0x800] sm:$0xff]  ;;  %v320_v28 = vld [vmem:[%s14713_s2 + $0x58] sm:$0xff]  ;;  %v51_v29 = vld [vmem:[%s14715_s1 + $0x30] sm:$0xff] }
   0xa   :  { %9403 = vmatpush3.bf16.msra.mxu0 %v9400_v10  ;;  %600 = vperm.xlu1 %9818, %v314_v12   ;;  %v319_v30 = vld [vmem:[%s14713_s2 + $0x50] sm:$0xff]  ;;  %v304_v31 = vld [vmem:[%s14715_s1 + $0x818] sm:$0xff]  ;;  %v305_v33 = vld [vmem:[%s14715_s1 + $0x820] sm:$0xff] }
   0xb   :  { %595 = vperm.xlu0 %9817, %v313_v13   ;;  %v52_v32 = vld [vmem:[%s14715_s1 + $0x38] sm:$0xff]  ;;  %v322_v34 = vld [vmem:[%s14713_s2 + $0x68] sm:$0xff]  ;;  %v53_v35 = vld [vmem:[%s14715_s1 + $0x40] sm:$0xff] }
   0xc   :  { %9815 = vmatpush3.bf16.msra.mxu1 %v9400_v10  ;;  %v321_v36 = vld [vmem:[%s14713_s2 + $0x60] sm:$0xff]  ;;  %v306_v37 = vld [vmem:[%s14715_s1 + $0x828] sm:$0xff]  ;;  %v307_v39 = vld [vmem:[%s14715_s1 + $0x830] sm:$0xff] }
   0xd   :  { %8968 = vmatmul.mubr.msk.f32.vlgmr.msra.gmra.mrb[0].mxu0 %vm1893_vm0, %v46_v14  ;;  %v54_v38 = vld [vmem:[%s14715_s1 + $0x48] sm:$0xff]  ;;  %v324_v40 = vld [vmem:[%s14713_s2 + $0x78] sm:$0xff]  ;;  %v55_v41 = vld [vmem:[%s14715_s1 + $0x50] sm:$0xff] }
   0xe   :  { %610 = vperm.xlu1 %9818, %v316_v15   ;;  %8970 = vmatprep.mubr.msk.f32.mxu0 %vm1893_vm0, %v47_v16  ;;  %v323_v42 = vld [vmem:[%s14713_s2 + $0x70] sm:$0xff]  ;;  %v308_v43 = vld [vmem:[%s14715_s1 + $0x838] sm:$0xff]  ;;  %v326_v45 = vld [vmem:[%s14713_s2 + $0x88] sm:$0xff] }
   0xf   :  { %605 = vperm.xlu0 %9817, %v315_v17   ;;  %9349 = vmatmul.mubr.msk.f32.vlgmr.msra.gmra.mrb[0].mxu1 %vm1893_vm0, %v300_v20  ;;  %v56_v44 = vld [vmem:[%s14715_s1 + $0x58] sm:$0xff]  ;;  %v57_v46 = vld [vmem:[%s14715_s1 + $0x60] sm:$0xff]  ;;  %v58_v48 = vld [vmem:[%s14715_s1 + $0x68] sm:$0xff] }
  0x10   :  { %9351 = vmatprep.mubr.msk.f32.mxu1 %vm1893_vm0, %v301_v24  ;;  %v325_v47 = vld [vmem:[%s14713_s2 + $0x80] sm:$0xff]  ;;  %v328_v49 = vld [vmem:[%s14713_s2 + $0x98] sm:$0xff]  ;;  %v59_v50 = vld [vmem:[%s14715_s1 + $0x70] sm:$0xff] }
  0x11   :  { %8971 = vmatmul.mubr.msk.f32.gmra.mrb[2].mxu0 %vm1893_vm0, %v48_v18  ;;  %v327_v51 = vld [vmem:[%s14713_s2 + $0x90] sm:$0xff]  ;;  %v60_v52 = vld [vmem:[%s14715_s1 + $0x78] sm:$0xff]  ;;  %v330_v53 = vld [vmem:[%s14713_s2 + $0xa8] sm:$0xff] }
  0x12   :  { %620 = vperm.xlu1 %9818, %v318_v21   ;;  %8973 = vmatprep.mubr.msk.f32.mxu0 %vm1893_vm0, %v49_v22  ;;  %v61_v54 = vld [vmem:[%s14715_s1 + $0x80] sm:$0xff]  ;;  %v62_v56 = vld [vmem:[%s14715_s1 + $0x88] sm:$0xff]  ;;  %v332_v57 = vld [vmem:[%s14713_s2 + $0xb8] sm:$0xff] }
  0x13   :  { %615 = vperm.xlu0 %9817, %v317_v23   ;;  %9352 = vmatmul.mubr.msk.f32.gmra.mrb[2].mxu1 %vm1893_vm0, %v302_v25  ;;  %v329_v55 = vld [vmem:[%s14713_s2 + $0xa0] sm:$0xff]  ;;  %v63_v58 = vld [vmem:[%s14715_s1 + $0x90] sm:$0xff]  ;;  %v64_v60 = vld [vmem:[%s14715_s1 + $0x98] sm:$0xff] }
  0x14   :  { %9354 = vmatprep.mubr.msk.f32.mxu1 %vm1893_vm0, %v303_v27  ;;  %v331_v59 = vld [vmem:[%s14713_s2 + $0xb0] sm:$0xff]  ;;  %v334_v61 = vld [vmem:[%s14713_s2 + $0xc8] sm:$0xff]  ;;  %v65_v62 = vld [vmem:[%s14715_s1 + $0xa0] sm:$0xff] }
  0x15   :  { %8974 = vmatmul.mubr.msk.f32.gmra.mrb[4].mxu0 %vm1893_vm0, %v50_v26  ;;  %v333_v63 = vld [vmem:[%s14713_s2 + $0xc0] sm:$0xff]  ;;  %v66_v0 = vld [vmem:[%s14715_s1 + $0xa8] sm:$0xff]  ;;  %v336_v1 = vld [vmem:[%s14713_s2 + $0xd8] sm:$0xff] }
  0x16   :  { %630 = vperm.xlu1 %9818, %v320_v28   ;;  %8976 = vmatprep.mubr.msk.f32.mxu0 %vm1893_vm0, %v51_v29  ;;  %v67_v2 = vld [vmem:[%s14715_s1 + $0xb0] sm:$0xff]  ;;  %v68_v4 = vld [vmem:[%s14715_s1 + $0xb8] sm:$0xff]  ;;  %v338_v5 = vld [vmem:[%s14713_s2 + $0xe8] sm:$0xff] }
  0x17   :  { %625 = vperm.xlu0 %9817, %v319_v30   ;;  %9355 = vmatmul.mubr.msk.f32.gmra.mrb[4].mxu1 %vm1893_vm0, %v304_v31  ;;  %v335_v3 = vld [vmem:[%s14713_s2 + $0xd0] sm:$0xff]  ;;  %v69_v6 = vld [vmem:[%s14715_s1 + $0xc0] sm:$0xff]  ;;  %v70_v8 = vld [vmem:[%s14715_s1 + $0xc8] sm:$0xff] }
  0x18   :  { %9357 = vmatprep.mubr.msk.f32.mxu1 %vm1893_vm0, %v305_v33  ;;  %v337_v7 = vld [vmem:[%s14713_s2 + $0xe0] sm:$0xff]  ;;  %v340_v9 = vld [vmem:[%s14713_s2 + $0xf8] sm:$0xff]  ;;  %v71_v10 = vld [vmem:[%s14715_s1 + $0xd0] sm:$0xff] }
  0x19   :  { %8977 = vmatmul.mubr.msk.f32.gmra.mrb[6].mxu0 %vm1893_vm0, %v52_v32  ;;  %v339_v11 = vld [vmem:[%s14713_s2 + $0xf0] sm:$0xff]  ;;  %v72_v12 = vld [vmem:[%s14715_s1 + $0xd8] sm:$0xff]  ;;  %v342_v13 = vld [vmem:[%s14713_s2 + $0x108] sm:$0xff] }
  0x1a   :  { %640 = vperm.xlu1 %9818, %v322_v34   ;;  %8979 = vmatprep.mubr.msk.f32.mxu0 %vm1893_vm0, %v53_v35  ;;  %v73_v14 = vld [vmem:[%s14715_s1 + $0xe0] sm:$0xff]  ;;  %v74_v16 = vld [vmem:[%s14715_s1 + $0xe8] sm:$0xff]  ;;  %v344_v17 = vld [vmem:[%s14713_s2 + $0x118] sm:$0xff] }
  0x1b   :  { %635 = vperm.xlu0 %9817, %v321_v36   ;;  %9358 = vmatmul.mubr.msk.f32.gmra.mrb[6].mxu1 %vm1893_vm0, %v306_v37  ;;  %v341_v15 = vld [vmem:[%s14713_s2 + $0x100] sm:$0xff]  ;;  %v75_v18 = vld [vmem:[%s14715_s1 + $0xf0] sm:$0xff]  ;;  %v76_v20 = vld [vmem:[%s14715_s1 + $0xf8] sm:$0xff] }
  0x1c   :  { %9360 = vmatprep.mubr.msk.f32.mxu1 %vm1893_vm0, %v307_v39  ;;  %v343_v19 = vld [vmem:[%s14713_s2 + $0x110] sm:$0xff]  ;;  %v346_v21 = vld [vmem:[%s14713_s2 + $0x128] sm:$0xff]  ;;  %v77_v22 = vld [vmem:[%s14715_s1 + $0x100] sm:$0xff] }
  0x1d   :  { %8980 = vmatmul.mubr.msk.f32.gmra.mrb[8].mxu0 %vm1893_vm0, %v54_v38  ;;  %v345_v23 = vld [vmem:[%s14713_s2 + $0x120] sm:$0xff]  ;;  %v78_v24 = vld [vmem:[%s14715_s1 + $0x108] sm:$0xff]  ;;  %v348_v25 = vld [vmem:[%s14713_s2 + $0x138] sm:$0xff] }
  0x1e   :  { %650 = vperm.xlu1 %9818, %v324_v40   ;;  %8982 = vmatprep.mubr.msk.f32.mxu0 %vm1893_vm0, %v55_v41  ;;  %v79_v26 = vld [vmem:[%s14715_s1 + $0x110] sm:$0xff]  ;;  %v80_v28 = vld [vmem:[%s14715_s1 + $0x118] sm:$0xff]  ;;  %v350_v29 = vld [vmem:[%s14713_s2 + $0x148] sm:$0xff] }
  0x1f   :  { %645 = vperm.xlu0 %9817, %v323_v42   ;;  %9361 = vmatmul.mubr.msk.f32.gmra.mrb[8].mxu1 %vm1893_vm0, %v308_v43  ;;  %v347_v27 = vld [vmem:[%s14713_s2 + $0x130] sm:$0xff]  ;;  %v81_v30 = vld [vmem:[%s14715_s1 + $0x120] sm:$0xff]  ;;  %v82_v32 = vld [vmem:[%s14715_s1 + $0x128] sm:$0xff] }
  0x20   :  { %v349_v31 = vld [vmem:[%s14713_s2 + $0x140] sm:$0xff]  ;;  %v352_v33 = vld [vmem:[%s14713_s2 + $0x158] sm:$0xff]  ;;  %v83_v34 = vld [vmem:[%s14715_s1 + $0x130] sm:$0xff] }
  0x21   :  { %8983 = vmatmul.mubr.msk.f32.gmra.mrb[10].mxu0 %vm1893_vm0, %v56_v44  ;;  %v351_v35 = vld [vmem:[%s14713_s2 + $0x150] sm:$0xff]  ;;  %v84_v36 = vld [vmem:[%s14715_s1 + $0x138] sm:$0xff]  ;;  %v354_v37 = vld [vmem:[%s14713_s2 + $0x168] sm:$0xff] }
  0x22   :  { %660 = vperm.xlu1 %9818, %v326_v45   ;;  %8985 = vmatprep.mubr.msk.f32.mxu0 %vm1893_vm0, %v57_v46  ;;  %v85_v38 = vld [vmem:[%s14715_s1 + $0x140] sm:$0xff]  ;;  %v86_v40 = vld [vmem:[%s14715_s1 + $0x148] sm:$0xff]  ;;  %v356_v41 = vld [vmem:[%s14713_s2 + $0x178] sm:$0xff] }
  0x23   :  { %655 = vperm.xlu0 %9817, %v325_v47   ;;  %v353_v39 = vld [vmem:[%s14713_s2 + $0x160] sm:$0xff]  ;;  %v87_v42 = vld [vmem:[%s14715_s1 + $0x150] sm:$0xff]  ;;  %v88_v44 = vld [vmem:[%s14715_s1 + $0x158] sm:$0xff] }
  0x24   :  { %v355_v43 = vld [vmem:[%s14713_s2 + $0x170] sm:$0xff]  ;;  %v358_v45 = vld [vmem:[%s14713_s2 + $0x188] sm:$0xff]  ;;  %v89_v46 = vld [vmem:[%s14715_s1 + $0x160] sm:$0xff] }
  0x25   :  { %8986 = vmatmul.mubr.msk.f32.gmra.mrb[12].mxu0 %vm1893_vm0, %v58_v48  ;;  %v357_v47 = vld [vmem:[%s14713_s2 + $0x180] sm:$0xff]  ;;  %v90_v48 = vld [vmem:[%s14715_s1 + $0x168] sm:$0xff] }
  0x26   :  { %670 = vperm.xlu1 %9818, %v328_v49   ;;  %8988 = vmatprep.mubr.msk.f32.mxu0 %vm1893_vm0, %v59_v50  ;;  %v360_v49 = vld [vmem:[%s14713_s2 + $0x198] sm:$0xff]  ;;  %v91_v50 = vld [vmem:[%s14715_s1 + $0x170] sm:$0xff] }
  0x27   :  { %665 = vperm.xlu0 %9817, %v327_v51   ;;  %v359_v51 = vld [vmem:[%s14713_s2 + $0x190] sm:$0xff] }
  0x29   :  { %8989 = vmatmul.mubr.msk.f32.gmra.mrb[14].mxu0 %vm1893_vm0, %v60_v52  ;;  %v92_v52 = vld [vmem:[%s14715_s1 + $0x178] sm:$0xff] }
  0x2a   :  { %680 = vperm.xlu1 %9818, %v330_v53   ;;  %8991 = vmatprep.mubr.msk.f32.mxu0 %vm1893_vm0, %v61_v54  ;;  %v362_v53 = vld [vmem:[%s14713_s2 + $0x1a8] sm:$0xff]  ;;  %v93_v54 = vld [vmem:[%s14715_s1 + $0x180] sm:$0xff] }
  0x2b   :  { %675 = vperm.xlu0 %9817, %v329_v55   ;;  %v361_v55 = vld [vmem:[%s14713_s2 + $0x1a0] sm:$0xff] }
  0x2d   :  { %8992 = vmatmul.mubr.msk.f32.gmra.mrb[16].mxu0 %vm1893_vm0, %v62_v56  ;;  %v94_v56 = vld [vmem:[%s14715_s1 + $0x188] sm:$0xff] }
  0x2e   :  { %690 = vperm.xlu1 %9818, %v332_v57   ;;  %8994 = vmatprep.mubr.msk.f32.mxu0 %vm1893_vm0, %v63_v58  ;;  %v364_v57 = vld [vmem:[%s14713_s2 + $0x1b8] sm:$0xff]  ;;  %v95_v58 = vld [vmem:[%s14715_s1 + $0x190] sm:$0xff] }
  0x2f   :  { %685 = vperm.xlu0 %9817, %v331_v59   ;;  %v363_v59 = vld [vmem:[%s14713_s2 + $0x1b0] sm:$0xff] }
  0x31   :  { %8995 = vmatmul.mubr.msk.f32.gmra.mrb[18].mxu0 %vm1893_vm0, %v64_v60  ;;  %v96_v60 = vld [vmem:[%s14715_s1 + $0x198] sm:$0xff] }
  0x32   :  { %700 = vperm.xlu1 %9818, %v334_v61   ;;  %8997 = vmatprep.mubr.msk.f32.mxu0 %vm1893_vm0, %v65_v62  ;;  %v366_v61 = vld [vmem:[%s14713_s2 + $0x1c8] sm:$0xff]  ;;  %v97_v62 = vld [vmem:[%s14715_s1 + $0x1a0] sm:$0xff] }
  0x33   :  { %695 = vperm.xlu0 %9817, %v333_v63   ;;  %v365_v63 = vld [vmem:[%s14713_s2 + $0x1c0] sm:$0xff] }
  0x35   :  { %8998 = vmatmul.mubr.msk.f32.gmra.mrb[20].mxu0 %vm1893_vm0, %v66_v0  ;;  %v98_v0 = vld [vmem:[%s14715_s1 + $0x1a8] sm:$0xff] }
  0x36   :  { %710 = vperm.xlu1 %9818, %v336_v1   ;;  %9000 = vmatprep.mubr.msk.f32.mxu0 %vm1893_vm0, %v67_v2  ;;  %v368_v1 = vld [vmem:[%s14713_s2 + $0x1d8] sm:$0xff]  ;;  %v99_v2 = vld [vmem:[%s14715_s1 + $0x1b0] sm:$0xff] }
  0x37   :  { %705 = vperm.xlu0 %9817, %v335_v3   ;;  %v367_v3 = vld [vmem:[%s14713_s2 + $0x1d0] sm:$0xff] }
  0x39   :  { %9001 = vmatmul.mubr.msk.f32.gmra.mrb[22].mxu0 %vm1893_vm0, %v68_v4  ;;  %v100_v4 = vld [vmem:[%s14715_s1 + $0x1b8] sm:$0xff] }
  0x3a   :  { %720 = vperm.xlu1 %9818, %v338_v5   ;;  %9003 = vmatprep.mubr.msk.f32.mxu0 %vm1893_vm0, %v69_v6  ;;  %v370_v5 = vld [vmem:[%s14713_s2 + $0x1e8] sm:$0xff]  ;;  %v101_v6 = vld [vmem:[%s14715_s1 + $0x1c0] sm:$0xff] }
  0x3b   :  { %715 = vperm.xlu0 %9817, %v337_v7   ;;  %v369_v7 = vld [vmem:[%s14713_s2 + $0x1e0] sm:$0xff] }
  0x3d   :  { %9004 = vmatmul.mubr.msk.f32.gmra.mrb[24].mxu0 %vm1893_vm0, %v70_v8  ;;  %v102_v8 = vld [vmem:[%s14715_s1 + $0x1c8] sm:$0xff] }
  0x3e   :  { %730 = vperm.xlu1 %9818, %v340_v9   ;;  %9006 = vmatprep.mubr.msk.f32.mxu0 %vm1893_vm0, %v71_v10  ;;  %v372_v9 = vld [vmem:[%s14713_s2 + $0x1f8] sm:$0xff]  ;;  %v103_v10 = vld [vmem:[%s14715_s1 + $0x1d0] sm:$0xff] }
  0x3f   :  { %725 = vperm.xlu0 %9817, %v339_v11   ;;  %v371_v11 = vld [vmem:[%s14713_s2 + $0x1f0] sm:$0xff] }
  0x41   :  { %9007 = vmatmul.mubr.msk.f32.gmra.mrb[26].mxu0 %vm1893_vm0, %v72_v12  ;;  %v104_v12 = vld [vmem:[%s14715_s1 + $0x1d8] sm:$0xff] }
  0x42   :  { %740 = vperm.xlu1 %9818, %v342_v13   ;;  %9009 = vmatprep.mubr.msk.f32.mxu0 %vm1893_vm0, %v73_v14  ;;  %v566_v13 = vld [vmem:[%s14713_s2 + $0x808] sm:$0xff]  ;;  %v105_v14 = vld [vmem:[%s14715_s1 + $0x1e0] sm:$0xff] }
  0x43   :  { %735 = vperm.xlu0 %9817, %v341_v15   ;;  %v565_v15 = vld [vmem:[%s14713_s2 + $0x800] sm:$0xff] }
  0x45   :  { %9010 = vmatmul.mubr.msk.f32.gmra.mrb[28].mxu0 %vm1893_vm0, %v74_v16 }
  0x46   :  { %750 = vperm.xlu1 %9818, %v344_v17   ;;  %9012 = vmatprep.mubr.msk.f32.mxu0 %vm1893_vm0, %v75_v18  ;;  %v106_v18 = vld [vmem:[%s14715_s1 + $0x1e8] sm:$0xff] }
  0x47   :  { %745 = vperm.xlu0 %9817, %v343_v19   ;;  %v568_v19 = vld [vmem:[%s14713_s2 + $0x818] sm:$0xff] }
  0x49   :  { %9013 = vmatmul.mubr.msk.f32.gmra.mrb[30].mxu0 %vm1893_vm0, %v76_v20  ;;  %v107_v20 = vld [vmem:[%s14715_s1 + $0x1f0] sm:$0xff] }
  0x4a   :  { %760 = vperm.xlu1 %9818, %v346_v21   ;;  %9015 = vmatprep.mubr.msk.f32.mxu0 %vm1893_vm0, %v77_v22  ;;  %v567_v21 = vld [vmem:[%s14713_s2 + $0x810] sm:$0xff] }
  0x4b   :  { %755 = vperm.xlu0 %9817, %v345_v23  }
  0x4d   :  { %9016 = vmatmul.mubr.msk.f32.gmra.mrb[32].mxu0 %vm1893_vm0, %v78_v24  ;;  %v108_v24 = vld [vmem:[%s14715_s1 + $0x1f8] sm:$0xff] }
  0x4e   :  { %770 = vperm.xlu1 %9818, %v348_v25   ;;  %9018 = vmatprep.mubr.msk.f32.mxu0 %vm1893_vm0, %v79_v26  ;;  %v570_v25 = vld [vmem:[%s14713_s2 + $0x828] sm:$0xff]  ;;  %v109_v26 = vld [vmem:[%s14715_s1 + $0x200] sm:$0xff] }
  0x4f   :  { %765 = vperm.xlu0 %9817, %v347_v27   ;;  %v569_v27 = vld [vmem:[%s14713_s2 + $0x820] sm:$0xff] }
  0x51   :  { %9019 = vmatmul.mubr.msk.f32.gmra.mrb[34].mxu0 %vm1893_vm0, %v80_v28 }
  0x52   :  { %780 = vperm.xlu1 %9818, %v350_v29   ;;  %9021 = vmatprep.mubr.msk.f32.mxu0 %vm1893_vm0, %v81_v30  ;;  %v110_v30 = vld [vmem:[%s14715_s1 + $0x208] sm:$0xff] }
  0x53   :  { %775 = vperm.xlu0 %9817, %v349_v31   ;;  %v572_v31 = vld [vmem:[%s14713_s2 + $0x838] sm:$0xff] }
  0x55   :  { %9022 = vmatmul.mubr.msk.f32.gmra.mrb[36].mxu0 %vm1893_vm0, %v82_v32  ;;  %v111_v32 = vld [vmem:[%s14715_s1 + $0x210] sm:$0xff] }
  0x56   :  { %790 = vperm.xlu1 %9818, %v352_v33   ;;  %9024 = vmatprep.mubr.msk.f32.mxu0 %vm1893_vm0, %v83_v34  ;;  %v571_v33 = vld [vmem:[%s14713_s2 + $0x830] sm:$0xff] }
  0x57   :  { %785 = vperm.xlu0 %9817, %v351_v35  }
  0x59   :  { %9025 = vmatmul.mubr.msk.f32.gmra.mrb[38].mxu0 %vm1893_vm0, %v84_v36  ;;  %v112_v36 = vld [vmem:[%s14715_s1 + $0x218] sm:$0xff] }
  0x5a   :  { %800 = vperm.xlu1 %9818, %v354_v37   ;;  %9027 = vmatprep.mubr.msk.f32.mxu0 %vm1893_vm0, %v85_v38  ;;  %v374_v37 = vld [vmem:[%s14713_s2 + $0x208] sm:$0xff]  ;;  %v113_v38 = vld [vmem:[%s14715_s1 + $0x220] sm:$0xff] }
  0x5b   :  { %795 = vperm.xlu0 %9817, %v353_v39   ;;  %v373_v39 = vld [vmem:[%s14713_s2 + $0x200] sm:$0xff] }
  0x5d   :  { %9028 = vmatmul.mubr.msk.f32.gmra.mrb[40].mxu0 %vm1893_vm0, %v86_v40 }
  0x5e   :  { %810 = vperm.xlu1 %9818, %v356_v41   ;;  %9030 = vmatprep.mubr.msk.f32.mxu0 %vm1893_vm0, %v87_v42  ;;  %v114_v42 = vld [vmem:[%s14715_s1 + $0x228] sm:$0xff] }
  0x5f   :  { %805 = vperm.xlu0 %9817, %v355_v43   ;;  %v376_v43 = vld [vmem:[%s14713_s2 + $0x218] sm:$0xff] }
  0x61   :  { %9031 = vmatmul.mubr.msk.f32.gmra.mrb[42].mxu0 %vm1893_vm0, %v88_v44  ;;  %v115_v44 = vld [vmem:[%s14715_s1 + $0x230] sm:$0xff] }
  0x62   :  { %820 = vperm.xlu1 %9818, %v358_v45   ;;  %9033 = vmatprep.mubr.msk.f32.mxu0 %vm1893_vm0, %v89_v46  ;;  %v375_v45 = vld [vmem:[%s14713_s2 + $0x210] sm:$0xff] }
  0x63   :  { %815 = vperm.xlu0 %9817, %v357_v47  }
  0x65   :  { %9034 = vmatmul.mubr.msk.f32.gmra.mrb[44].mxu0 %vm1893_vm0, %v90_v48  ;;  %v116_v48 = vld [vmem:[%s14715_s1 + $0x238] sm:$0xff] }
  0x66   :  { %830 = vperm.xlu1 %9818, %v360_v49   ;;  %9036 = vmatprep.mubr.msk.f32.mxu0 %vm1893_vm0, %v91_v50  ;;  %v378_v49 = vld [vmem:[%s14713_s2 + $0x228] sm:$0xff]  ;;  %v117_v50 = vld [vmem:[%s14715_s1 + $0x240] sm:$0xff] }
  0x67   :  { %825 = vperm.xlu0 %9817, %v359_v51   ;;  %v4335_v51 = vld [vmem:[%s14716_s3] sm:$0xff] }
  0x68   :  { %9379 = vmatprep.mubr.msk.f32.mxu1 %vm4363_vm1, %v4335_v51  ;;  %v134_v51 = vld [vmem:[%s14715_s1 + $0x2c8] sm:$0xff] }
  0x69   :  { %9037 = vmatmul.mubr.msk.f32.gmra.mrb[46].mxu0 %vm1893_vm0, %v92_v52  ;;  %v377_v52 = vld [vmem:[%s14713_s2 + $0x220] sm:$0xff] }
  0x6a   :  { %840 = vperm.xlu1 %9818, %v362_v53   ;;  %9039 = vmatprep.mubr.msk.f32.mxu0 %vm1893_vm0, %v93_v54 }
  0x6b   :  { %835 = vperm.xlu0 %9817, %v361_v55   ;;  %v118_v55 = vld [vmem:[%s14715_s1 + $0x248] sm:$0xff] }
  0x6d   :  { %9040 = vmatmul.mubr.msk.f32.gmra.mrb[48].mxu0 %vm1893_vm0, %v94_v56  ;;  %v380_v56 = vld [vmem:[%s14713_s2 + $0x238] sm:$0xff] }
  0x6e   :  { %850 = vperm.xlu1 %9818, %v364_v57   ;;  %9042 = vmatprep.mubr.msk.f32.mxu0 %vm1893_vm0, %v95_v58  ;;  %v119_v57 = vld [vmem:[%s14715_s1 + $0x250] sm:$0xff] }
  0x6f   :  { %845 = vperm.xlu0 %9817, %v363_v59   ;;  %v379_v58 = vld [vmem:[%s14713_s2 + $0x230] sm:$0xff] }
  0x71   :  { %9043 = vmatmul.mubr.msk.f32.gmra.mrb[50].mxu0 %vm1893_vm0, %v96_v60 }
  0x72   :  { %860 = vperm.xlu1 %9818, %v366_v61   ;;  %9045 = vmatprep.mubr.msk.f32.mxu0 %vm1893_vm0, %v97_v62  ;;  %v120_v61 = vld [vmem:[%s14715_s1 + $0x258] sm:$0xff]  ;;  %v382_v62 = vld [vmem:[%s14713_s2 + $0x248] sm:$0xff] }
  0x73   :  { %855 = vperm.xlu0 %9817, %v365_v63   ;;  %v121_v63 = vld [vmem:[%s14715_s1 + $0x260] sm:$0xff] }
  0x75   :  { %9046 = vmatmul.mubr.msk.f32.gmra.mrb[52].mxu0 %vm1893_vm0, %v98_v0  ;;  %v381_v0 = vld [vmem:[%s14713_s2 + $0x240] sm:$0xff] }
  0x76   :  { %870 = vperm.xlu1 %9818, %v368_v1   ;;  %9048 = vmatprep.mubr.msk.f32.mxu0 %vm1893_vm0, %v99_v2 }
  0x77   :  { %865 = vperm.xlu0 %9817, %v367_v3   ;;  %v122_v3 = vld [vmem:[%s14715_s1 + $0x268] sm:$0xff] }
  0x79   :  { %9049 = vmatmul.mubr.msk.f32.gmra.mrb[54].mxu0 %vm1893_vm0, %v100_v4  ;;  %v384_v4 = vld [vmem:[%s14713_s2 + $0x258] sm:$0xff] }
  0x7a   :  { %880 = vperm.xlu1 %9818, %v370_v5   ;;  %9051 = vmatprep.mubr.msk.f32.mxu0 %vm1893_vm0, %v101_v6  ;;  %v123_v5 = vld [vmem:[%s14715_s1 + $0x270] sm:$0xff] }
  0x7b   :  { %875 = vperm.xlu0 %9817, %v369_v7   ;;  %v383_v6 = vld [vmem:[%s14713_s2 + $0x250] sm:$0xff] }
  0x7d   :  { %9052 = vmatmul.mubr.msk.f32.gmra.mrb[56].mxu0 %vm1893_vm0, %v102_v8 }
  0x7e   :  { %890 = vperm.xlu1 %9818, %v372_v9   ;;  %9054 = vmatprep.mubr.msk.f32.mxu0 %vm1893_vm0, %v103_v10  ;;  %v124_v9 = vld [vmem:[%s14715_s1 + $0x278] sm:$0xff]  ;;  %v386_v10 = vld [vmem:[%s14713_s2 + $0x268] sm:$0xff] }
  0x7f   :  { %885 = vperm.xlu0 %9817, %v371_v11   ;;  %v125_v11 = vld [vmem:[%s14715_s1 + $0x280] sm:$0xff] }
  0x81   :  { %9055 = vmatmul.mubr.msk.f32.gmra.mrb[58].mxu0 %vm1893_vm0, %v104_v12  ;;  %v10399_v16 = vpop.permute.xlu1 %585  ;;  %v10401_v17 = vpop.permute.xlu0 %575  ;;  %v385_v12 = vld [vmem:[%s14713_s2 + $0x260] sm:$0xff] }
  0x82   :  { %1860 = vperm.xlu1 %9818, %v566_v13   ;;  %9057 = vmatprep.mubr.msk.f32.mxu0 %vm1893_vm0, %v105_v14 }
  0x83   :  { %1855 = vperm.xlu0 %9817, %v565_v15   ;;  %v126_v15 = vld [vmem:[%s14715_s1 + $0x288] sm:$0xff] }
  0x85   :  { %9058 = vmatmul.mubr.msk.f32.gmra.mrb[60].mxu0 %vm1893_vm0, %v106_v18  ;;  %v10417_v22 = vpop.permute.xlu1 %590  ;;  %v388_v18 = vld [vmem:[%s14713_s2 + $0x278] sm:$0xff] }
  0x86   :  { %v10419_v23 = vpop.permute.xlu0 %580  ;;  %1870 = vperm.xlu1 %9818, %v568_v19   ;;  %9060 = vmatprep.mubr.msk.f32.mxu0 %vm1893_vm0, %v107_v20  ;;  %v127_v19 = vld [vmem:[%s14715_s1 + $0x290] sm:$0xff] }
  0x87   :  { %1865 = vperm.xlu0 %9817, %v567_v21   ;;  %v387_v20 = vld [vmem:[%s14713_s2 + $0x270] sm:$0xff] }
  0x89   :  { %9061 = vmatmul.mubr.msk.f32.gmra.mrb[62].mxu0 %vm1893_vm0, %v108_v24  ;;  %v10435_v28 = vpop.permute.xlu1 %600 }
  0x8a   :  { %v10437_v29 = vpop.permute.xlu0 %595  ;;  %1880 = vperm.xlu1 %9818, %v570_v25   ;;  %9063 = vmatprep.mubr.msk.f32.mxu0 %vm1893_vm0, %v109_v26  ;;  %v128_v25 = vld [vmem:[%s14715_s1 + $0x298] sm:$0xff]  ;;  %v390_v26 = vld [vmem:[%s14713_s2 + $0x288] sm:$0xff] }
  0x8b   :  { %1875 = vperm.xlu0 %9817, %v569_v27   ;;  %v129_v27 = vld [vmem:[%s14715_s1 + $0x2a0] sm:$0xff] }
  0x8d   :  { %9064 = vmatmul.mubr.msk.f32.gmra.mrb[64].mxu0 %vm1893_vm0, %v110_v30  ;;  %v10453_v34 = vpop.permute.xlu1 %610  ;;  %v389_v30 = vld [vmem:[%s14713_s2 + $0x280] sm:$0xff] }
  0x8e   :  { %v10455_v35 = vpop.permute.xlu0 %605  ;;  %1890 = vperm.xlu1 %9818, %v572_v31   ;;  %9066 = vmatprep.mubr.msk.f32.mxu0 %vm1893_vm0, %v111_v32 }
  0x8f   :  { %1885 = vperm.xlu0 %9817, %v571_v33   ;;  %v130_v33 = vld [vmem:[%s14715_s1 + $0x2a8] sm:$0xff] }
  0x91   :  { %9067 = vmatmul.mubr.msk.f32.gmra.mrb[66].mxu0 %vm1893_vm0, %v112_v36  ;;  %v10471_v40 = vpop.permute.xlu1 %620  ;;  %v392_v36 = vld [vmem:[%s14713_s2 + $0x298] sm:$0xff] }
  0x92   :  { %v10473_v41 = vpop.permute.xlu0 %615  ;;  %900 = vperm.xlu1 %9818, %v374_v37   ;;  %9069 = vmatprep.mubr.msk.f32.mxu0 %vm1893_vm0, %v113_v38  ;;  %v131_v37 = vld [vmem:[%s14715_s1 + $0x2b0] sm:$0xff] }
  0x93   :  { %895 = vperm.xlu0 %9817, %v373_v39   ;;  %v391_v38 = vld [vmem:[%s14713_s2 + $0x290] sm:$0xff] }
  0x95   :  { %9070 = vmatmul.mubr.msk.f32.gmra.mrb[68].mxu0 %vm1893_vm0, %v114_v42  ;;  %v10489_v46 = vpop.permute.xlu1 %630 }
  0x96   :  { %v10491_v47 = vpop.permute.xlu0 %625  ;;  %910 = vperm.xlu1 %9818, %v376_v43   ;;  %9072 = vmatprep.mubr.msk.f32.mxu0 %vm1893_vm0, %v115_v44  ;;  %v132_v43 = vld [vmem:[%s14715_s1 + $0x2b8] sm:$0xff]  ;;  %v394_v44 = vld [vmem:[%s14713_s2 + $0x2a8] sm:$0xff] }
  0x97   :  { %905 = vperm.xlu0 %9817, %v375_v45   ;;  %v133_v45 = vld [vmem:[%s14715_s1 + $0x2c0] sm:$0xff] }
  0x99   :  { %9073 = vmatmul.mubr.msk.f32.gmra.mrb[70].mxu0 %vm1893_vm0, %v116_v48  ;;  %v10511_v53 = vpop.permute.xlu1 %640  ;;  %v393_v48 = vld [vmem:[%s14713_s2 + $0x2a0] sm:$0xff] }
  0x9a   :  { %v10513_v54 = vpop.permute.xlu0 %635  ;;  %920 = vperm.xlu1 %9818, %v378_v49   ;;  %9075 = vmatprep.mubr.msk.f32.mxu0 %vm1893_vm0, %v117_v50 }
  0x9b   :  { %915 = vperm.xlu0 %9817, %v377_v52   ;;  %v396_v52 = vld [vmem:[%s14713_s2 + $0x2b8] sm:$0xff] }
  0x9d   :  { %9076 = vmatmul.mubr.msk.f32.gmra.mrb[72].mxu0 %vm1893_vm0, %v118_v55  ;;  %v10529_v59 = vpop.permute.xlu1 %650  ;;  %v135_v55 = vld [vmem:[%s14715_s1 + $0x2d0] sm:$0xff] }
  0x9e   :  { %v10531_v60 = vpop.permute.xlu0 %645  ;;  %930 = vperm.xlu1 %9818, %v380_v56   ;;  %9078 = vmatprep.mubr.msk.f32.mxu0 %vm1893_vm0, %v119_v57  ;;  %v395_v56 = vld [vmem:[%s14713_s2 + $0x2b0] sm:$0xff] }
  0x9f   :  { %925 = vperm.xlu0 %9817, %v379_v58  }
  0xa1   :  { %9079 = vmatmul.mubr.msk.f32.gmra.mrb[74].mxu0 %vm1893_vm0, %v120_v61  ;;  %v10547_v1 = vpop.permute.xlu1 %660  ;;  %v136_v61 = vld [vmem:[%s14715_s1 + $0x2d8] sm:$0xff] }
  0xa2   :  { %v10549_v2 = vpop.permute.xlu0 %655  ;;  %940 = vperm.xlu1 %9818, %v382_v62   ;;  %9081 = vmatprep.mubr.msk.f32.mxu0 %vm1893_vm0, %v121_v63  ;;  %v398_v62 = vld [vmem:[%s14713_s2 + $0x2c8] sm:$0xff]  ;;  %v137_v63 = vld [vmem:[%s14715_s1 + $0x2e0] sm:$0xff] }
  0xa3   :  { %935 = vperm.xlu0 %9817, %v381_v0   ;;  %v397_v0 = vld [vmem:[%s14713_s2 + $0x2c0] sm:$0xff] }
  0xa5   :  { %9082 = vmatmul.mubr.msk.f32.gmra.mrb[76].mxu0 %vm1893_vm0, %v122_v3  ;;  %v10565_v7 = vpop.permute.xlu1 %670 }
  0xa6   :  { %v10567_v8 = vpop.permute.xlu0 %665  ;;  %950 = vperm.xlu1 %9818, %v384_v4   ;;  %9084 = vmatprep.mubr.msk.f32.mxu0 %vm1893_vm0, %v123_v5  ;;  %v138_v5 = vld [vmem:[%s14715_s1 + $0x2e8] sm:$0xff] }
  0xa7   :  { %945 = vperm.xlu0 %9817, %v383_v6   ;;  %v400_v6 = vld [vmem:[%s14713_s2 + $0x2d8] sm:$0xff] }
  0xa9   :  { %9085 = vmatmul.mubr.msk.f32.gmra.mrb[78].mxu0 %vm1893_vm0, %v124_v9  ;;  %v10583_v13 = vpop.permute.xlu1 %680  ;;  %v139_v9 = vld [vmem:[%s14715_s1 + $0x2f0] sm:$0xff] }
  0xaa   :  { %v10585_v14 = vpop.permute.xlu0 %675  ;;  %960 = vperm.xlu1 %9818, %v386_v10   ;;  %9087 = vmatprep.mubr.msk.f32.mxu0 %vm1893_vm0, %v125_v11  ;;  %v399_v10 = vld [vmem:[%s14713_s2 + $0x2d0] sm:$0xff] }
  0xab   :  { %955 = vperm.xlu0 %9817, %v385_v12  }
  0xad   :  { %9088 = vmatmul.mubr.msk.f32.gmra.mrb[80].mxu0 %vm1893_vm0, %v126_v15  ;;  %v10601_v21 = vpop.permute.xlu1 %690  ;;  %v140_v15 = vld [vmem:[%s14715_s1 + $0x2f8] sm:$0xff] }
  0xae   :  { %v10603_v24 = vpop.permute.xlu0 %685  ;;  %970 = vperm.xlu1 %9818, %v388_v18   ;;  %9090 = vmatprep.mubr.msk.f32.mxu0 %vm1893_vm0, %v127_v19  ;;  %v402_v18 = vld [vmem:[%s14713_s2 + $0x2e8] sm:$0xff]  ;;  %v141_v19 = vld [vmem:[%s14715_s1 + $0x300] sm:$0xff] }
  0xaf   :  { %965 = vperm.xlu0 %9817, %v387_v20   ;;  %v401_v20 = vld [vmem:[%s14713_s2 + $0x2e0] sm:$0xff] }
  0xb1   :  { %9091 = vmatmul.mubr.msk.f32.gmra.mrb[82].mxu0 %vm1893_vm0, %v128_v25  ;;  %v10619_v31 = vpop.permute.xlu1 %700 }
  0xb2   :  { %v10621_v32 = vpop.permute.xlu0 %695  ;;  %980 = vperm.xlu1 %9818, %v390_v26   ;;  %9093 = vmatprep.mubr.msk.f32.mxu0 %vm1893_vm0, %v129_v27  ;;  %v142_v27 = vld [vmem:[%s14715_s1 + $0x308] sm:$0xff] }
  0xb3   :  { %975 = vperm.xlu0 %9817, %v389_v30   ;;  %v404_v30 = vld [vmem:[%s14713_s2 + $0x2f8] sm:$0xff] }
  0xb5   :  { %9094 = vmatmul.mubr.msk.f32.gmra.mrb[84].mxu0 %vm1893_vm0, %v130_v33  ;;  %v10637_v39 = vpop.permute.xlu1 %710  ;;  %v143_v33 = vld [vmem:[%s14715_s1 + $0x310] sm:$0xff] }
  0xb6   :  { %v10639_v42 = vpop.permute.xlu0 %705  ;;  %990 = vperm.xlu1 %9818, %v392_v36   ;;  %9096 = vmatprep.mubr.msk.f32.mxu0 %vm1893_vm0, %v131_v37  ;;  %v403_v36 = vld [vmem:[%s14713_s2 + $0x2f0] sm:$0xff] }
  0xb7   :  { %985 = vperm.xlu0 %9817, %v391_v38  }
  0xb9   :  { %9097 = vmatmul.mubr.msk.f32.gmra.mrb[86].mxu0 %vm1893_vm0, %v132_v43  ;;  %v10655_v49 = vpop.permute.xlu1 %720  ;;  %v144_v43 = vld [vmem:[%s14715_s1 + $0x318] sm:$0xff] }
  0xba   :  { %v10657_v50 = vpop.permute.xlu0 %715  ;;  %1000 = vperm.xlu1 %9818, %v394_v44   ;;  %9099 = vmatprep.mubr.msk.f32.mxu0 %vm1893_vm0, %v133_v45  ;;  %v406_v44 = vld [vmem:[%s14713_s2 + $0x308] sm:$0xff]  ;;  %v145_v45 = vld [vmem:[%s14715_s1 + $0x320] sm:$0xff] }
  0xbb   :  { %995 = vperm.xlu0 %9817, %v393_v48   ;;  %v405_v48 = vld [vmem:[%s14713_s2 + $0x300] sm:$0xff] }
  0xbd   :  { %9100 = vmatmul.mubr.msk.f32.gmra.mrb[88].mxu0 %vm1893_vm0, %v134_v51  ;;  %v10673_v57 = vpop.permute.xlu1 %730 }
  0xbe   :  { %v10675_v58 = vpop.permute.xlu0 %725  ;;  %1010 = vperm.xlu1 %9818, %v396_v52   ;;  %9102 = vmatprep.mubr.msk.f32.mxu0 %vm1893_vm0, %v135_v55  ;;  %v146_v55 = vld [vmem:[%s14715_s1 + $0x328] sm:$0xff] }
  0xbf   :  { %1005 = vperm.xlu0 %9817, %v395_v56   ;;  %v408_v56 = vld [vmem:[%s14713_s2 + $0x318] sm:$0xff] }
  0xc1   :  { %9103 = vmatmul.mubr.msk.f32.gmra.mrb[90].mxu0 %vm1893_vm0, %v136_v61  ;;  %v10691_v3 = vpop.permute.xlu1 %740  ;;  %v147_v61 = vld [vmem:[%s14715_s1 + $0x330] sm:$0xff] }
  0xc2   :  { %v10693_v4 = vpop.permute.xlu0 %735  ;;  %1020 = vperm.xlu1 %9818, %v398_v62   ;;  %9105 = vmatprep.mubr.msk.f32.mxu0 %vm1893_vm0, %v137_v63  ;;  %v407_v62 = vld [vmem:[%s14713_s2 + $0x310] sm:$0xff] }
  0xc3   :  { %1015 = vperm.xlu0 %9817, %v397_v0  }
  0xc5   :  { %9106 = vmatmul.mubr.msk.f32.gmra.mrb[92].mxu0 %vm1893_vm0, %v138_v5  ;;  %v10709_v11 = vpop.permute.xlu1 %750  ;;  %v148_v5 = vld [vmem:[%s14715_s1 + $0x338] sm:$0xff] }
  0xc6   :  { %v10711_v12 = vpop.permute.xlu0 %745  ;;  %1030 = vperm.xlu1 %9818, %v400_v6   ;;  %9108 = vmatprep.mubr.msk.f32.mxu0 %vm1893_vm0, %v139_v9  ;;  %v410_v6 = vld [vmem:[%s14713_s2 + $0x328] sm:$0xff]  ;;  %v149_v9 = vld [vmem:[%s14715_s1 + $0x340] sm:$0xff] }
  0xc7   :  { %1025 = vperm.xlu0 %9817, %v399_v10   ;;  %v409_v10 = vld [vmem:[%s14713_s2 + $0x320] sm:$0xff] }
  0xc9   :  { %9109 = vmatmul.mubr.msk.f32.gmra.mrb[94].mxu0 %vm1893_vm0, %v140_v15  ;;  %v10727_v25 = vpop.permute.xlu1 %760 }
  0xca   :  { %v10729_v26 = vpop.permute.xlu0 %755  ;;  %1040 = vperm.xlu1 %9818, %v402_v18   ;;  %9111 = vmatprep.mubr.msk.f32.mxu0 %vm1893_vm0, %v141_v19  ;;  %v150_v19 = vld [vmem:[%s14715_s1 + $0x348] sm:$0xff] }
  0xcb   :  { %1035 = vperm.xlu0 %9817, %v401_v20   ;;  %v412_v20 = vld [vmem:[%s14713_s2 + $0x338] sm:$0xff] }
  0xcd   :  { %9112 = vmatmul.mubr.msk.f32.gmra.mrb[96].mxu0 %vm1893_vm0, %v142_v27  ;;  %v10745_v37 = vpop.permute.xlu1 %770  ;;  %v151_v27 = vld [vmem:[%s14715_s1 + $0x350] sm:$0xff] }
  0xce   :  { %v10747_v38 = vpop.permute.xlu0 %765  ;;  %1050 = vperm.xlu1 %9818, %v404_v30   ;;  %9114 = vmatprep.mubr.msk.f32.mxu0 %vm1893_vm0, %v143_v33  ;;  %v411_v30 = vld [vmem:[%s14713_s2 + $0x330] sm:$0xff] }
  0xcf   :  { %1045 = vperm.xlu0 %9817, %v403_v36  }
  0xd1   :  { %9115 = vmatmul.mubr.msk.f32.gmra.mrb[98].mxu0 %vm1893_vm0, %v144_v43  ;;  %v10763_v51 = vpop.permute.xlu1 %780  ;;  %v152_v43 = vld [vmem:[%s14715_s1 + $0x358] sm:$0xff] }
  0xd2   :  { %v10765_v52 = vpop.permute.xlu0 %775  ;;  %1060 = vperm.xlu1 %9818, %v406_v44   ;;  %9117 = vmatprep.mubr.msk.f32.mxu0 %vm1893_vm0, %v145_v45  ;;  %v414_v44 = vld [vmem:[%s14713_s2 + $0x348] sm:$0xff]  ;;  %v153_v45 = vld [vmem:[%s14715_s1 + $0x360] sm:$0xff] }
  0xd3   :  { %1055 = vperm.xlu0 %9817, %v405_v48  }
  0xd5   :  { %9118 = vmatmul.mubr.msk.f32.gmra.mrb[100].mxu0 %vm1893_vm0, %v146_v55  ;;  %v10781_v63 = vpop.permute.xlu1 %790  ;;  %v413_v55 = vld [vmem:[%s14713_s2 + $0x340] sm:$0xff] }
  0xd6   :  { %v10783_v0 = vpop.permute.xlu0 %785  ;;  %1070 = vperm.xlu1 %9818, %v408_v56   ;;  %9120 = vmatprep.mubr.msk.f32.mxu0 %vm1893_vm0, %v147_v61 }
  0xd7   :  { %1065 = vperm.xlu0 %9817, %v407_v62  }
  0xd9   :  { %9121 = vmatmul.mubr.msk.f32.gmra.mrb[102].mxu0 %vm1893_vm0, %v148_v5  ;;  %v10799_v15 = vpop.permute.xlu1 %800 }
  0xda   :  { %v10801_v18 = vpop.permute.xlu0 %795  ;;  %1080 = vperm.xlu1 %9818, %v410_v6   ;;  %9123 = vmatprep.mubr.msk.f32.mxu0 %vm1893_vm0, %v149_v9  ;;  %v154_v9 = vld [vmem:[%s14715_s1 + $0x368] sm:$0xff] }
  0xdb   :  { %1075 = vperm.xlu0 %9817, %v409_v10  }
  0xdd   :  { %9124 = vmatmul.mubr.msk.f32.gmra.mrb[104].mxu0 %vm1893_vm0, %v150_v19  ;;  %v10817_v33 = vpop.permute.xlu1 %810  ;;  %v155_v19 = vld [vmem:[%s14715_s1 + $0x370] sm:$0xff] }
  0xde   :  { %v10819_v36 = vpop.permute.xlu0 %805  ;;  %1090 = vperm.xlu1 %9818, %v412_v20   ;;  %9126 = vmatprep.mubr.msk.f32.mxu0 %vm1893_vm0, %v151_v27 }
  0xdf   :  { %1085 = vperm.xlu0 %9817, %v411_v30   ;;  %v415_v30 = vld [vmem:[%s14713_s2 + $0x350] sm:$0xff] }
  0xe0   :  { %v8969_v48 = vpop.f32.mrb[0].mxu0 }
  0xe1   :  { %v2758_v56 = vadd.f32 %v8969_v48, %v10419_v23  ;;  %v2752_v61 = vpop.f32.mrb[1].mxu0  ;;  %9127 = vmatmul.mubr.msk.f32.gmra.mrb[106].mxu0 %vm1893_vm0, %v152_v43  ;;  %v10836_v62 = vpop.permute.xlu1 %820  ;;  %v416_v23 = vld [vmem:[%s14713_s2 + $0x358] sm:$0xff] }
  0xe2   :  { %v2753_v5 = vadd.f32 %v2752_v61, %v10401_v17  ;;  %v10839_v6 = vpop.permute.xlu0 %815  ;;  %1100 = vperm.xlu1 %9818, %v414_v44   ;;  %9129 = vmatprep.mubr.msk.f32.mxu0 %vm1893_vm0, %v153_v45  ;;  %v10851_v17 = vpop.f32.mrb[0].mxu1 }
  0xe3   :  { %v4072_v10 = vmax.f32 %v2758_v56, 0.0  ;;  %1095 = vperm.xlu0 %9817, %v413_v55   ;;  %14727 = vst [vmem:[#allocation2_spill] sm:$0xff] %v10851_v17  ;;  %v10856_v43 = vpop.f32.mrb[1].mxu1 }
  0xe4   :  { %v4071_v20 = vmax.f32 %v2753_v5, 0.0  ;;  %v8972_v27 = vpop.f32.mrb[2].mxu0  ;;  %14728 = vst [vmem:[#allocation3_spill] sm:$0xff] %v10856_v43  ;;  %v156_v5 = vld [vmem:[%s14715_s1 + $0x378] sm:$0xff] }
  0xe5   :  { %v2768_v44 = vadd.f32 %v8972_v27, %v10417_v22  ;;  %v2762_v45 = vpop.f32.mrb[3].mxu0  ;;  %9130 = vmatmul.mubr.msk.f32.gmra.mrb[108].mxu0 %vm1893_vm0, %v154_v9  ;;  %v10860_v48 = vpop.permute.xlu1 %830  ;;  %v418_v22 = vld [vmem:[%s14713_s2 + $0x368] sm:$0xff]  ;;  %v157_v9 = vld [vmem:[%s14715_s1 + $0x380] sm:$0xff] }
  0xe6   :  { %v10862_v55 = vpack.c.bf16 %v4072_v10, %v4071_v20  ;;  %v2763_v56 = vadd.f32 %v2762_v45, %v10399_v16  ;;  %v10865_v61 = vpop.permute.xlu0 %825  ;;  %1110 = vperm.xlu1 %9818, %v416_v23   ;;  %9132 = vmatprep.mubr.msk.f32.mxu0 %vm1893_vm0, %v155_v19  ;;  %v10877_v16 = vpop.f32.mrb[2].mxu1  ;;  %v417_v19 = vld [vmem:[%s14713_s2 + $0x360] sm:$0xff] }
  0xe7   :  { %14730 = vst [vmem:[#allocation5_spill] sm:$0xff] %v10865_v61  ;;  %v4074_v43 = vmax.f32 %v2768_v44, 0.0  ;;  %1105 = vperm.xlu0 %9817, %v415_v30   ;;  %v10882_v20 = vpop.f32.mrb[3].mxu1 }
  0xe8   :  { %14729 = vst [vmem:[#allocation4_spill] sm:$0xff] %v10862_v55  ;;  %v4073_v10 = vmax.f32 %v2763_v56, 0.0  ;;  %v8975_v23 = vpop.f32.mrb[4].mxu0  ;;  %v158_v56 = vld [vmem:[%s14715_s1 + $0x388] sm:$0xff] }
  0xe9   :  { %v2778_v27 = vadd.f32 %v8975_v23, %v10435_v28  ;;  %v2772_v30 = vpop.f32.mrb[5].mxu0  ;;  %9133 = vmatmul.mubr.msk.f32.gmra.mrb[110].mxu0 %vm1893_vm0, %v156_v5  ;;  %v10886_v44 = vpop.permute.xlu1 %840  ;;  %v420_v28 = vld [vmem:[%s14713_s2 + $0x378] sm:$0xff] }
  0xea   :  { %14731 = vst [vmem:[#allocation6_spill] sm:$0xff] %v10886_v44  ;;  %v10888_v45 = vpack.c.bf16 %v4074_v43, %v4073_v10  ;;  %v2773_v17 = vadd.f32 %v2772_v30, %v10437_v29  ;;  %v10891_v55 = vpop.permute.xlu0 %835  ;;  %1120 = vperm.xlu1 %9818, %v418_v22   ;;  %9135 = vmatprep.mubr.msk.f32.mxu0 %vm1893_vm0, %v157_v9  ;;  %v159_v43 = vld [vmem:[%s14715_s1 + $0x390] sm:$0xff]  ;;  %v10903_v29 = vpop.f32.mrb[4].mxu1 }
  0xeb   :  { %14733 = vst [vmem:[#allocation8_spill] sm:$0xff] %v10891_v55  ;;  %v4076_v61 = vmax.f32 %v2778_v27, 0.0  ;;  %1115 = vperm.xlu0 %9817, %v417_v19   ;;  %v419_v9 = vld [vmem:[%s14713_s2 + $0x370] sm:$0xff]  ;;  %v10908_v10 = vpop.f32.mrb[5].mxu1 }
  0xec   :  { %14732 = vst [vmem:[#allocation7_spill] sm:$0xff] %v10888_v45  ;;  %v4075_v5 = vmax.f32 %v2773_v17, 0.0  ;;  %v8978_v22 = vpop.f32.mrb[6].mxu0  ;;  %v160_v17 = vld [vmem:[%s14715_s1 + $0x398] sm:$0xff] }
  0xed   :  { %v2788_v23 = vadd.f32 %v8978_v22, %v10453_v34  ;;  %v2782_v19 = vpop.f32.mrb[7].mxu0  ;;  %9136 = vmatmul.mubr.msk.f32.gmra.mrb[112].mxu0 %vm1893_vm0, %v158_v56  ;;  %v10912_v27 = vpop.permute.xlu1 %850  ;;  %v422_v34 = vld [vmem:[%s14713_s2 + $0x388] sm:$0xff] }
  0xee   :  { %14734 = vst [vmem:[#allocation9_spill] sm:$0xff] %v10912_v27  ;;  %v10914_v30 = vpack.c.bf16 %v4076_v61, %v4075_v5  ;;  %v2783_v45 = vadd.f32 %v2782_v19, %v10455_v35  ;;  %v10917_v55 = vpop.permute.xlu0 %845  ;;  %1130 = vperm.xlu1 %9818, %v420_v28   ;;  %9138 = vmatprep.mubr.msk.f32.mxu0 %vm1893_vm0, %v159_v43  ;;  %v161_v61 = vld [vmem:[%s14715_s1 + $0x3a0] sm:$0xff]  ;;  %v10929_v35 = vpop.f32.mrb[6].mxu1 }
  0xef   :  { %14736 = vst [vmem:[#allocation11_spill] sm:$0xff] %v10917_v55  ;;  %v4078_v44 = vmax.f32 %v2788_v23, 0.0  ;;  %1125 = vperm.xlu0 %9817, %v419_v9   ;;  %v421_v43 = vld [vmem:[%s14713_s2 + $0x380] sm:$0xff]  ;;  %v10934_v5 = vpop.f32.mrb[7].mxu1 }
  0xf0   :  { %14735 = vst [vmem:[#allocation10_spill] sm:$0xff] %v10914_v30  ;;  %v4077_v56 = vmax.f32 %v2783_v45, 0.0  ;;  %v8981_v28 = vpop.f32.mrb[8].mxu0  ;;  %v162_v45 = vld [vmem:[%s14715_s1 + $0x3a8] sm:$0xff] }
  0xf1   :  { %v2798_v22 = vadd.f32 %v8981_v28, %v10471_v40  ;;  %v2792_v9 = vpop.f32.mrb[9].mxu0  ;;  %9139 = vmatmul.mubr.msk.f32.gmra.mrb[114].mxu0 %vm1893_vm0, %v160_v17  ;;  %v10938_v23 = vpop.permute.xlu1 %860  ;;  %v4339_v40 = vld [vmem:[%s14717_s4] sm:$0xff] }
  0xf2   :  { %14737 = vst [vmem:[#allocation12_spill] sm:$0xff] %v10938_v23  ;;  %v10940_v19 = vpack.c.bf16 %v4078_v44, %v4077_v56  ;;  %v2793_v30 = vadd.f32 %v2792_v9, %v10473_v41  ;;  %v10943_v55 = vpop.permute.xlu0 %855  ;;  %1140 = vperm.xlu1 %9818, %v422_v34   ;;  %9141 = vmatprep.mubr.msk.f32.mxu0 %vm1893_vm0, %v161_v61  ;;  %v163_v44 = vld [vmem:[%s14715_s1 + $0x3b0] sm:$0xff]  ;;  %v10955_v41 = vpop.f32.mrb[8].mxu1 }
  0xf3   :  { %14739 = vst [vmem:[#allocation14_spill] sm:$0xff] %v10943_v55  ;;  %v4080_v27 = vmax.f32 %v2798_v22, 0.0  ;;  %1135 = vperm.xlu0 %9817, %v421_v43   ;;  %v423_v61 = vld [vmem:[%s14713_s2 + $0x390] sm:$0xff]  ;;  %v10960_v56 = vpop.f32.mrb[9].mxu1 }
  0xf4   :  { %14738 = vst [vmem:[#allocation13_spill] sm:$0xff] %v10940_v19  ;;  %v4079_v17 = vmax.f32 %v2793_v30, 0.0  ;;  %v8984_v34 = vpop.f32.mrb[10].mxu0  ;;  %v164_v30 = vld [vmem:[%s14715_s1 + $0x3b8] sm:$0xff] }
  0xf5   :  { %v2808_v28 = vadd.f32 %v8984_v34, %v10489_v46  ;;  %v2802_v43 = vpop.f32.mrb[11].mxu0  ;;  %9142 = vmatmul.mubr.msk.f32.gmra.mrb[116].mxu0 %vm1893_vm0, %v162_v45  ;;  %v10964_v22 = vpop.permute.xlu1 %870  ;;  %v4341_v46 = vld [vmem:[%s14717_s4 + $0x10] sm:$0xff] }
  0xf6   :  { %v10966_v9 = vpack.c.bf16 %v4080_v27, %v4079_v17  ;;  %v2803_v19 = vadd.f32 %v2802_v43, %v10491_v47  ;;  %v10969_v55 = vpop.permute.xlu0 %865  ;;  %4345 = vperm.xlu1 %9818, %v4339_v40   ;;  %9144 = vmatprep.mubr.msk.f32.mxu0 %vm1893_vm0, %v163_v44  ;;  %v165_v27 = vld [vmem:[%s14715_s1 + $0x3c0] sm:$0xff]  ;;  %v4340_v40 = vld [vmem:[%s14717_s4 + $0x8] sm:$0xff] }
  0xf7   :  { %v4082_v23 = vmax.f32 %v2808_v28, 0.0  ;;  %1145 = vperm.xlu0 %9817, %v423_v61  }
  0xf8   :  { %14740 = vst [vmem:[#allocation15_spill] sm:$0xff] %v10966_v9  ;;  %v4081_v47 = vmax.f32 %v2803_v19, 0.0  ;;  %v8987_v45 = vpop.f32.mrb[12].mxu0  ;;  %v166_v19 = vld [vmem:[%s14715_s1 + $0x3c8] sm:$0xff] }
  0xf9   :  { %v2818_v44 = vadd.f32 %v8987_v45, %v10511_v53  ;;  %v2812_v17 = vpop.f32.mrb[13].mxu0  ;;  %9145 = vmatmul.mubr.msk.f32.gmra.mrb[118].mxu0 %vm1893_vm0, %v164_v30  ;;  %v10986_v34 = vpop.permute.xlu1 %880  ;;  %v424_v53 = vld [vmem:[%s14713_s2 + $0x398] sm:$0xff] }
  0xfa   :  { %v10988_v61 = vpack.c.bf16 %v4082_v23, %v4081_v47  ;;  %v2813_v28 = vadd.f32 %v2812_v17, %v10513_v54  ;;  %v10991_v43 = vpop.permute.xlu0 %875  ;;  %4355 = vperm.xlu1 %9818, %v4341_v46   ;;  %9147 = vmatprep.mubr.msk.f32.mxu0 %vm1893_vm0, %v165_v27  ;;  %v167_v23 = vld [vmem:[%s14715_s1 + $0x3d0] sm:$0xff]  ;;  %v4342_v46 = vld [vmem:[%s14717_s4 + $0x18] sm:$0xff] }
  0xfb   :  { %v4084_v9 = vmax.f32 %v2818_v44, 0.0  ;;  %4350 = vperm.xlu0 %9817, %v4340_v40  }
  0xfc   :  { %14741 = vst [vmem:[#allocation16_spill] sm:$0xff] %v10988_v61  ;;  %v4083_v54 = vmax.f32 %v2813_v28, 0.0  ;;  %v8990_v30 = vpop.f32.mrb[14].mxu0  ;;  %v168_v28 = vld [vmem:[%s14715_s1 + $0x3d8] sm:$0xff] }
  0xfd   :  { %v2828_v27 = vadd.f32 %v8990_v30, %v10529_v59  ;;  %v2822_v47 = vpop.f32.mrb[15].mxu0  ;;  %9148 = vmatmul.mubr.msk.f32.gmra.mrb[120].mxu0 %vm1893_vm0, %v166_v19  ;;  %v11008_v45 = vpop.permute.xlu1 %890  ;;  %v426_v59 = vld [vmem:[%s14713_s2 + $0x3a8] sm:$0xff] }
  0xfe   :  { %v11010_v40 = vpack.c.bf16 %v4084_v9, %v4083_v54  ;;  %v2823_v44 = vadd.f32 %v2822_v47, %v10531_v60  ;;  %v11013_v17 = vpop.permute.xlu0 %885  ;;  %1150 = vperm.xlu1 %9818, %v424_v53   ;;  %9150 = vmatprep.mubr.msk.f32.mxu0 %vm1893_vm0, %v167_v23  ;;  %v169_v9 = vld [vmem:[%s14715_s1 + $0x3e0] sm:$0xff] }
  0xff   :  { %14743 = vst [vmem:[#allocation18_spill] sm:$0xff] %v11013_v17  ;;  %v4086_v61 = vmax.f32 %v2828_v27, 0.0  ;;  %4360 = vperm.xlu0 %9817, %v4342_v46   ;;  %v425_v53 = vld [vmem:[%s14713_s2 + $0x3a0] sm:$0xff] }
 0x100   :  { %14742 = vst [vmem:[#allocation17_spill] sm:$0xff] %v11010_v40  ;;  %v4085_v60 = vmax.f32 %v2823_v44, 0.0  ;;  %v8993_v19 = vpop.f32.mrb[16].mxu0  ;;  %v170_v44 = vld [vmem:[%s14715_s1 + $0x3e8] sm:$0xff] }
 0x101   :  { %v2838_v23 = vadd.f32 %v8993_v19, %v10547_v1  ;;  %v2832_v54 = vpop.f32.mrb[17].mxu0  ;;  %9151 = vmatmul.mubr.msk.f32.gmra.mrb[122].mxu0 %vm1893_vm0, %v168_v28  ;;  %v1861_v30 = vpop.permute.xlu1 %1860 }
 0x102   :  { %v11030_v46 = vpack.c.bf16 %v4086_v61, %v4085_v60  ;;  %v2833_v27 = vadd.f32 %v2832_v54, %v10549_v2  ;;  %v4038_v47 = vadd.f32 %v10877_v16, %v1861_v30  ;;  %v1856_v40 = vpop.permute.xlu0 %1855  ;;  %1160 = vperm.xlu1 %9818, %v426_v59   ;;  %9153 = vmatprep.mubr.msk.f32.mxu0 %vm1893_vm0, %v169_v9  ;;  %v428_v61 = vld [vmem:[%s14713_s2 + $0x3b8] sm:$0xff]  ;;  %v171_v2 = vld [vmem:[%s14715_s1 + $0x3f0] sm:$0xff] }
 0x103   :  { %v4088_v17 = vmax.f32 %v2838_v23, 0.0  ;;  %v4033_v1 = vadd.f32 %v10882_v20, %v1856_v40  ;;  %1155 = vperm.xlu0 %9817, %v425_v53   ;;  %v427_v9 = vld [vmem:[%s14713_s2 + $0x3b0] sm:$0xff] }
 0x104   :  { %v4087_v16 = vmax.f32 %v2833_v27, 0.0  ;;  %v4328_v28 = vmax.f32 %v4038_v47, 0.0  ;;  %v8996_v59 = vpop.f32.mrb[18].mxu0  ;;  %v172_v27 = vld [vmem:[%s14715_s1 + $0x3f8] sm:$0xff] }
 0x105   :  { %v4327_v60 = vmax.f32 %v4033_v1, 0.0  ;;  %v2848_v19 = vadd.f32 %v8996_v59, %v10565_v7  ;;  %v2842_v20 = vpop.f32.mrb[19].mxu0  ;;  %9154 = vmatmul.mubr.msk.f32.gmra.mrb[124].mxu0 %vm1893_vm0, %v170_v44  ;;  %v1871_v40 = vpop.permute.xlu1 %1870 }
 0x106   :  { %v11050_v53 = vpack.c.bf16 %v4088_v17, %v4087_v16  ;;  %v2843_v23 = vadd.f32 %v2842_v20, %v10567_v8  ;;  %v4048_v54 = vadd.f32 %v10903_v29, %v1871_v40  ;;  %v1866_v30 = vpop.permute.xlu0 %1865  ;;  %1170 = vperm.xlu1 %9818, %v428_v61   ;;  %9156 = vmatprep.mubr.msk.f32.mxu0 %vm1893_vm0, %v171_v2  ;;  %v430_v17 = vld [vmem:[%s14713_s2 + $0x3c8] sm:$0xff]  ;;  %v429_v61 = vld [vmem:[%s14713_s2 + $0x3c0] sm:$0xff] }
 0x107   :  { %v4090_v47 = vmax.f32 %v2848_v19, 0.0  ;;  %v4043_v7 = vadd.f32 %v10908_v10, %v1866_v30  ;;  %1165 = vperm.xlu0 %9817, %v427_v9   ;;  %v9404_v44 = vpack.c.bf16 %v4328_v28, %v4327_v60  ;;  %v173_v2 = vld [vmem:[%s14715_s1 + $0x400] sm:$0xff]  ;;  %v174_v40 = vld [vmem:[%s14715_s1 + $0x408] sm:$0xff] }
 0x108   :  { %v4089_v8 = vmax.f32 %v2843_v23, 0.0  ;;  %v4330_v1 = vmax.f32 %v4048_v54, 0.0  ;;  %v8999_v29 = vpop.f32.mrb[20].mxu0 }
 0x109   :  { %v4329_v16 = vmax.f32 %v4043_v7, 0.0  ;;  %v2858_v10 = vadd.f32 %v8999_v29, %v10583_v13  ;;  %v2852_v59 = vpop.f32.mrb[21].mxu0  ;;  %9157 = vmatmul.mubr.msk.f32.gmra.mrb[126].mxu0 %vm1893_vm0, %v172_v27  ;;  %9405 = vmatprep.subr.bf16.mxu1 %v9404_v44  ;;  %v1881_v28 = vpop.permute.xlu1 %1880  ;;  %v175_v7 = vld [vmem:[%s14715_s1 + $0x410] sm:$0xff] }
 0x10a   :  { %v11070_v9 = vpack.c.bf16 %v4090_v47, %v4089_v8  ;;  %v2853_v60 = vadd.f32 %v2852_v59, %v10585_v14  ;;  %v4058_v19 = vadd.f32 %v10929_v35, %v1881_v28  ;;  %v1876_v20 = vpop.permute.xlu0 %1875  ;;  %9407 = vmatpush3.bf16.msra.mxu1 %v9404_v44  ;;  %1180 = vperm.xlu1 %9818, %v430_v17   ;;  %v432_v14 = vld [vmem:[%s14713_s2 + $0x3d8] sm:$0xff]  ;;  %v431_v47 = vld [vmem:[%s14713_s2 + $0x3d0] sm:$0xff] }
 0x10b   :  { %v4092_v23 = vmax.f32 %v2858_v10, 0.0  ;;  %v4053_v13 = vadd.f32 %v10934_v5, %v1876_v20  ;;  %1175 = vperm.xlu0 %9817, %v429_v61   ;;  %9159 = vmatprep.mubr.msk.f32.mxu0 %vm1893_vm0, %v173_v2  ;;  %v9408_v54 = vpack.c.bf16 %v4330_v1, %v4329_v16  ;;  %v176_v16 = vld [vmem:[%s14715_s1 + $0x418] sm:$0xff]  ;;  %v177_v20 = vld [vmem:[%s14715_s1 + $0x420] sm:$0xff] }
 0x10c   :  { %v4091_v30 = vmax.f32 %v2853_v60, 0.0  ;;  %v4332_v35 = vmax.f32 %v4058_v19, 0.0  ;;  %v9002_v27 = vpop.f32.mrb[22].mxu0  ;;  %v433_v19 = vld [vmem:[%s14713_s2 + $0x3e0] sm:$0xff] }
 0x10d   :  { %v4331_v5 = vmax.f32 %v4053_v13, 0.0  ;;  %v2868_v44 = vadd.f32 %v9002_v27, %v10601_v21  ;;  %v2862_v17 = vpop.f32.mrb[23].mxu0  ;;  %9160 = vmatmul.mubr.msk.f32.gmra.mrb[128].mxu0 %vm1893_vm0, %v174_v40  ;;  %9409 = vmatprep.subr.bf16.mxu1 %v9408_v54  ;;  %v1891_v8 = vpop.permute.xlu1 %1890 }
 0x10e   :  { %v11090_v1 = vpack.c.bf16 %v4092_v23, %v4091_v30  ;;  %v2863_v29 = vadd.f32 %v2862_v17, %v10603_v24  ;;  %v4068_v61 = vadd.f32 %v10955_v41, %v1891_v8  ;;  %v1886_v2 = vpop.permute.xlu0 %1885  ;;  %9411 = vmatpush3.bf16.msra.mxu1 %v9408_v54  ;;  %1190 = vperm.xlu1 %9818, %v432_v14   ;;  %v434_v24 = vld [vmem:[%s14713_s2 + $0x3e8] sm:$0xff] }
 0x10f   :  { %v4094_v10 = vmax.f32 %v2868_v44, 0.0  ;;  %v4063_v21 = vadd.f32 %v10960_v56, %v1886_v2  ;;  %1185 = vperm.xlu0 %9817, %v431_v47   ;;  %9162 = vmatprep.mubr.msk.f32.mxu0 %vm1893_vm0, %v175_v7  ;;  %v9412_v59 = vpack.c.bf16 %v4332_v35, %v4331_v5  ;;  %v178_v35 = vld [vmem:[%s14715_s1 + $0x428] sm:$0xff]  ;;  %v436_v47 = vld [vmem:[%s14713_s2 + $0x3f8] sm:$0xff]  ;;  %v179_v44 = vld [vmem:[%s14715_s1 + $0x430] sm:$0xff] }
 0x110   :  { %v4093_v28 = vmax.f32 %v2863_v29, 0.0  ;;  %v4334_v41 = vmax.f32 %v4068_v61, 0.0  ;;  %v9005_v60 = vpop.f32.mrb[24].mxu0 }
 0x111   :  { %v4333_v56 = vmax.f32 %v4063_v21, 0.0  ;;  %v2878_v40 = vadd.f32 %v9005_v60, %v10619_v31  ;;  %v2872_v23 = vpop.f32.mrb[25].mxu0  ;;  %9163 = vmatmul.mubr.msk.f32.gmra.mrb[130].mxu0 %vm1893_vm0, %v176_v16  ;;  %9413 = vmatprep.subr.bf16.mxu1 %v9412_v59  ;;  %v11110_v13 = vpop.permute.xlu1 %900  ;;  %v4337_v60 = vld [vmem:[%s14716_s3 + $0x10] sm:$0xff] }
 0x112   :  { %v11112_v54 = vpack.c.bf16 %v4094_v10, %v4093_v28  ;;  %v2873_v14 = vadd.f32 %v2872_v23, %v10621_v32  ;;  %v11115_v30 = vpop.permute.xlu0 %895  ;;  %9415 = vmatpush3.bf16.msra.mxu1 %v9412_v59  ;;  %1200 = vperm.xlu1 %9818, %v434_v24   ;;  %v435_v32 = vld [vmem:[%s14713_s2 + $0x3f0] sm:$0xff]  ;;  %v180_v10 = vld [vmem:[%s14715_s1 + $0x438] sm:$0xff]  ;;  %v181_v59 = vld [vmem:[%s14715_s1 + $0x440] sm:$0xff] }
 0x113   :  { %v4096_v27 = vmax.f32 %v2878_v40, 0.0  ;;  %1195 = vperm.xlu0 %9817, %v433_v19   ;;  %9165 = vmatprep.mubr.msk.f32.mxu0 %vm1893_vm0, %v177_v20  ;;  %v9416_v31 = vpack.c.bf16 %v4334_v41, %v4333_v56  ;;  %v437_v41 = vld [vmem:[%s14713_s2 + $0x400] sm:$0xff] }
 0x114   :  { %v4095_v7 = vmax.f32 %v2873_v14, 0.0  ;;  %v9008_v5 = vpop.f32.mrb[26].mxu0 }
 0x115   :  { %v2888_v17 = vadd.f32 %v9008_v5, %v10637_v39  ;;  %v2882_v8 = vpop.f32.mrb[27].mxu0  ;;  %9166 = vmatmul.mubr.msk.f32.gmra.mrb[132].mxu0 %vm1893_vm0, %v178_v35  ;;  %9417 = vmatprep.subr.bf16.mxu1 %v9416_v31  ;;  %v11132_v29 = vpop.permute.xlu1 %910  ;;  %v4336_v39 = vld [vmem:[%s14716_s3 + $0x8] sm:$0xff]  ;;  %v4338_v35 = vld [vmem:[%s14716_s3 + $0x18] sm:$0xff]  ;;  %v439_v5 = vld [vmem:[%s14713_s2 + $0x410] sm:$0xff] }
 0x116   :  { %v11134_v61 = vpack.c.bf16 %v4096_v27, %v4095_v7  ;;  %v2883_v2 = vadd.f32 %v2882_v8, %v10639_v42  ;;  %v11137_v16 = vpop.permute.xlu0 %905  ;;  %9419 = vmatpush3.bf16.msra.mxu1 %v9416_v31  ;;  %1210 = vperm.xlu1 %9818, %v436_v47   ;;  %v438_v42 = vld [vmem:[%s14713_s2 + $0x408] sm:$0xff]  ;;  %v183_v31 = vld [vmem:[%s14715_s1 + $0x450] sm:$0xff] }
 0x117   :  { %v4098_v21 = vmax.f32 %v2888_v17, 0.0  ;;  %1205 = vperm.xlu0 %9817, %v435_v32   ;;  %9168 = vmatprep.mubr.msk.f32.mxu0 %vm1893_vm0, %v179_v44 }
 0x118   :  { %v4097_v24 = vmax.f32 %v2883_v2, 0.0  ;;  %v9011_v28 = vpop.f32.mrb[28].mxu0 }
 0x119   :  { %v2898_v19 = vadd.f32 %v9011_v28, %v10655_v49  ;;  %v2892_v20 = vpop.f32.mrb[29].mxu0  ;;  %9169 = vmatmul.mubr.msk.f32.gmra.mrb[134].mxu0 %vm1893_vm0, %v180_v10  ;;  %9380 = vmatmul.mubr.msk.f32.vlgmr.msra.gmra.mrb[10].mxu1 %vm4363_vm1, %v4336_v39  ;;  %v11161_v56 = vpop.permute.xlu1 %920  ;;  %v182_v49 = vld [vmem:[%s14715_s1 + $0x448] sm:$0xff] }
 0x11a   :  { %v11163_v40 = vpack.c.bf16 %v4098_v21, %v4097_v24  ;;  %v2893_v23 = vadd.f32 %v2892_v20, %v10657_v50  ;;  %v11166_v14 = vpop.permute.xlu0 %915  ;;  %1220 = vperm.xlu1 %9818, %v438_v42   ;;  %9171 = vmatprep.mubr.msk.f32.mxu0 %vm1893_vm0, %v181_v59  ;;  %v440_v50 = vld [vmem:[%s14713_s2 + $0x418] sm:$0xff]  ;;  %v442_v21 = vld [vmem:[%s14713_s2 + $0x428] sm:$0xff]  ;;  %v185_v42 = vld [vmem:[%s14715_s1 + $0x460] sm:$0xff] }
 0x11b   :  { %v4100_v27 = vmax.f32 %v2898_v19, 0.0  ;;  %1215 = vperm.xlu0 %9817, %v437_v41   ;;  %9382 = vmatprep.mubr.msk.f32.mxu1 %vm4363_vm1, %v4337_v60  ;;  %v441_v24 = vld [vmem:[%s14713_s2 + $0x420] sm:$0xff] }
 0x11c   :  { %v4099_v47 = vmax.f32 %v2893_v23, 0.0  ;;  %v9014_v7 = vpop.f32.mrb[30].mxu0 }
 0x11d   :  { %v2908_v32 = vadd.f32 %v9014_v7, %v10673_v57  ;;  %v2902_v44 = vpop.f32.mrb[31].mxu0  ;;  %9172 = vmatmul.mubr.msk.f32.gmra.mrb[136].mxu0 %vm1893_vm0, %v182_v49  ;;  %9383 = vmatmul.mubr.msk.f32.gmra.mrb[12].mxu1 %vm4363_vm1, %v4338_v35  ;;  %v11188_v17 = vpop.permute.xlu1 %930  ;;  %v184_v57 = vld [vmem:[%s14715_s1 + $0x458] sm:$0xff]  ;;  %v186_v49 = vld [vmem:[%s14715_s1 + $0x468] sm:$0xff] }
 0x11e   :  { %v11190_v8 = vpack.c.bf16 %v4100_v27, %v4099_v47  ;;  %v2903_v2 = vadd.f32 %v2902_v44, %v10675_v58  ;;  %v11193_v10 = vpop.permute.xlu0 %925  ;;  %1230 = vperm.xlu1 %9818, %v440_v50   ;;  %9174 = vmatprep.mubr.msk.f32.mxu0 %vm1893_vm0, %v183_v31  ;;  %v187_v27 = vld [vmem:[%s14715_s1 + $0x470] sm:$0xff] }
 0x11f   :  { %v4102_v39 = vmax.f32 %v2908_v32, 0.0  ;;  %1225 = vperm.xlu0 %9817, %v439_v5   ;;  %v443_v31 = vld [vmem:[%s14713_s2 + $0x430] sm:$0xff] }
 0x120   :  { %v4101_v58 = vmax.f32 %v2903_v2, 0.0  ;;  %v9017_v59 = vpop.f32.mrb[32].mxu0 }
 0x121   :  { %v2918_v28 = vadd.f32 %v9017_v59, %v10691_v3  ;;  %v2912_v41 = vpop.f32.mrb[33].mxu0  ;;  %9175 = vmatmul.mubr.msk.f32.gmra.mrb[138].mxu0 %vm1893_vm0, %v184_v57  ;;  %v11210_v60 = vpop.permute.xlu1 %940  ;;  %v444_v3 = vld [vmem:[%s14713_s2 + $0x438] sm:$0xff] }
 0x122   :  { %v11212_v19 = vpack.c.bf16 %v4102_v39, %v4101_v58  ;;  %v2913_v20 = vadd.f32 %v2912_v41, %v10693_v4  ;;  %v11215_v23 = vpop.permute.xlu0 %935  ;;  %1240 = vperm.xlu1 %9818, %v442_v21   ;;  %9177 = vmatprep.mubr.msk.f32.mxu0 %vm1893_vm0, %v185_v42  ;;  %v188_v57 = vld [vmem:[%s14715_s1 + $0x478] sm:$0xff]  ;;  %v189_v21 = vld [vmem:[%s14715_s1 + $0x480] sm:$0xff] }
 0x123   :  { %v4104_v35 = vmax.f32 %v2918_v28, 0.0  ;;  %1235 = vperm.xlu0 %9817, %v441_v24   ;;  %v445_v58 = vld [vmem:[%s14713_s2 + $0x440] sm:$0xff] }
 0x124   :  { %v4103_v4 = vmax.f32 %v2913_v20, 0.0  ;;  %v9020_v50 = vpop.f32.mrb[34].mxu0 }
 0x125   :  { %v2928_v47 = vadd.f32 %v9020_v50, %v10709_v11  ;;  %v2922_v7 = vpop.f32.mrb[35].mxu0  ;;  %9178 = vmatmul.mubr.msk.f32.gmra.mrb[140].mxu0 %vm1893_vm0, %v186_v49  ;;  %v11232_v5 = vpop.permute.xlu1 %950  ;;  %v446_v11 = vld [vmem:[%s14713_s2 + $0x448] sm:$0xff]  ;;  %v447_v50 = vld [vmem:[%s14713_s2 + $0x450] sm:$0xff] }
 0x126   :  { %v11234_v32 = vpack.c.bf16 %v4104_v35, %v4103_v4  ;;  %v2923_v44 = vadd.f32 %v2922_v7, %v10711_v12  ;;  %v11237_v2 = vpop.permute.xlu0 %945  ;;  %1250 = vperm.xlu1 %9818, %v444_v3   ;;  %9180 = vmatprep.mubr.msk.f32.mxu0 %vm1893_vm0, %v187_v27  ;;  %v190_v35 = vld [vmem:[%s14715_s1 + $0x488] sm:$0xff]  ;;  %v191_v27 = vld [vmem:[%s14715_s1 + $0x490] sm:$0xff] }
 0x127   :  { %v4106_v39 = vmax.f32 %v2928_v47, 0.0  ;;  %1245 = vperm.xlu0 %9817, %v443_v31  }
 0x128   :  { %14744 = vst [vmem:[#allocation19_spill] sm:$0xff] %v11234_v32  ;;  %v4105_v12 = vmax.f32 %v2923_v44, 0.0  ;;  %v9023_v42 = vpop.f32.mrb[36].mxu0 }
 0x129   :  { %v2938_v59 = vadd.f32 %v9023_v42, %v10727_v25  ;;  %v2932_v24 = vpop.f32.mrb[37].mxu0  ;;  %9181 = vmatmul.mubr.msk.f32.gmra.mrb[142].mxu0 %vm1893_vm0, %v188_v57  ;;  %v11254_v28 = vpop.permute.xlu1 %960  ;;  %v448_v25 = vld [vmem:[%s14713_s2 + $0x458] sm:$0xff] }
 0x12a   :  { %v11256_v41 = vpack.c.bf16 %v4106_v39, %v4105_v12  ;;  %v2933_v20 = vadd.f32 %v2932_v24, %v10729_v26  ;;  %v11259_v49 = vpop.permute.xlu0 %955  ;;  %1260 = vperm.xlu1 %9818, %v446_v11   ;;  %9183 = vmatprep.mubr.msk.f32.mxu0 %vm1893_vm0, %v189_v21  ;;  %v192_v11 = vld [vmem:[%s14715_s1 + $0x498] sm:$0xff]  ;;  %v193_v12 = vld [vmem:[%s14715_s1 + $0x4a0] sm:$0xff] }
 0x12b   :  { %v4108_v3 = vmax.f32 %v2938_v59, 0.0  ;;  %1255 = vperm.xlu0 %9817, %v445_v58   ;;  %v449_v58 = vld [vmem:[%s14713_s2 + $0x460] sm:$0xff] }
 0x12c   :  { %14745 = vst [vmem:[#allocation20_spill] sm:$0xff] %v11256_v41  ;;  %v4107_v26 = vmax.f32 %v2933_v20, 0.0  ;;  %v9026_v4 = vpop.f32.mrb[38].mxu0 }
 0x12d   :  { %v2948_v31 = vadd.f32 %v9026_v4, %v10745_v37  ;;  %v2942_v47 = vpop.f32.mrb[39].mxu0  ;;  %9184 = vmatmul.mubr.msk.f32.gmra.mrb[144].mxu0 %vm1893_vm0, %v190_v35  ;;  %v11276_v7 = vpop.permute.xlu1 %970  ;;  %v450_v37 = vld [vmem:[%s14713_s2 + $0x468] sm:$0xff]  ;;  %v195_v4 = vld [vmem:[%s14715_s1 + $0x4b0] sm:$0xff] }
 0x12e   :  { %v11278_v44 = vpack.c.bf16 %v4108_v3, %v4107_v26  ;;  %v2943_v57 = vadd.f32 %v2942_v47, %v10747_v38  ;;  %v11281_v39 = vpop.permute.xlu0 %965  ;;  %1270 = vperm.xlu1 %9818, %v448_v25   ;;  %9186 = vmatprep.mubr.msk.f32.mxu0 %vm1893_vm0, %v191_v27  ;;  %v194_v27 = vld [vmem:[%s14715_s1 + $0x4a8] sm:$0xff] }
 0x12f   :  { %v4110_v21 = vmax.f32 %v2948_v31, 0.0  ;;  %1265 = vperm.xlu0 %9817, %v447_v50   ;;  %v451_v31 = vld [vmem:[%s14713_s2 + $0x470] sm:$0xff] }
 0x130   :  { %14746 = vst [vmem:[#allocation21_spill] sm:$0xff] %v11278_v44  ;;  %v4109_v38 = vmax.f32 %v2943_v57, 0.0  ;;  %v9029_v42 = vpop.f32.mrb[40].mxu0 }
 0x131   :  { %v2958_v59 = vadd.f32 %v9029_v42, %v10763_v51  ;;  %v2952_v24 = vpop.f32.mrb[41].mxu0  ;;  %9187 = vmatmul.mubr.msk.f32.gmra.mrb[146].mxu0 %vm1893_vm0, %v192_v11  ;;  %v11298_v20 = vpop.permute.xlu1 %980  ;;  %v452_v51 = vld [vmem:[%s14713_s2 + $0x478] sm:$0xff] }
 0x132   :  { %v11300_v35 = vpack.c.bf16 %v4110_v21, %v4109_v38  ;;  %v2953_v3 = vadd.f32 %v2952_v24, %v10765_v52  ;;  %v11303_v25 = vpop.permute.xlu0 %975  ;;  %1280 = vperm.xlu1 %9818, %v450_v37   ;;  %9189 = vmatprep.mubr.msk.f32.mxu0 %vm1893_vm0, %v193_v12  ;;  %v196_v38 = vld [vmem:[%s14715_s1 + $0x4b8] sm:$0xff]  ;;  %v453_v24 = vld [vmem:[%s14713_s2 + $0x480] sm:$0xff] }
 0x133   :  { %v4112_v26 = vmax.f32 %v2958_v59, 0.0  ;;  %1275 = vperm.xlu0 %9817, %v449_v58   ;;  %v197_v58 = vld [vmem:[%s14715_s1 + $0x4c0] sm:$0xff] }
 0x134   :  { %14747 = vst [vmem:[#allocation22_spill] sm:$0xff] %v11300_v35  ;;  %v4111_v52 = vmax.f32 %v2953_v3, 0.0  ;;  %v9032_v50 = vpop.f32.mrb[42].mxu0 }
 0x135   :  { %v2968_v47 = vadd.f32 %v9032_v50, %v10781_v63  ;;  %v2962_v57 = vpop.f32.mrb[43].mxu0  ;;  %9190 = vmatmul.mubr.msk.f32.gmra.mrb[148].mxu0 %vm1893_vm0, %v194_v27  ;;  %v11320_v11 = vpop.permute.xlu1 %990  ;;  %v454_v63 = vld [vmem:[%s14713_s2 + $0x488] sm:$0xff] }
 0x136   :  { %v11322_v21 = vpack.c.bf16 %v4112_v26, %v4111_v52  ;;  %v2963_v37 = vadd.f32 %v2962_v57, %v10783_v0  ;;  %v11325_v12 = vpop.permute.xlu0 %985  ;;  %1290 = vperm.xlu1 %9818, %v452_v51   ;;  %9192 = vmatprep.mubr.msk.f32.mxu0 %vm1893_vm0, %v195_v4  ;;  %v198_v50 = vld [vmem:[%s14715_s1 + $0x4c8] sm:$0xff] }
 0x137   :  { %v4114_v42 = vmax.f32 %v2968_v47, 0.0  ;;  %1285 = vperm.xlu0 %9817, %v451_v31   ;;  %v199_v47 = vld [vmem:[%s14715_s1 + $0x4d0] sm:$0xff] }
 0x138   :  { %14748 = vst [vmem:[#allocation23_spill] sm:$0xff] %v11322_v21  ;;  %v4113_v0 = vmax.f32 %v2963_v37, 0.0  ;;  %v9035_v59 = vpop.f32.mrb[44].mxu0  ;;  %v455_v37 = vld [vmem:[%s14713_s2 + $0x490] sm:$0xff] }
 0x139   :  { %v2978_v3 = vadd.f32 %v9035_v59, %v10799_v15  ;;  %v2972_v27 = vpop.f32.mrb[45].mxu0  ;;  %9193 = vmatmul.mubr.msk.f32.gmra.mrb[150].mxu0 %vm1893_vm0, %v196_v38  ;;  %v11342_v26 = vpop.permute.xlu1 %1000  ;;  %v456_v15 = vld [vmem:[%s14713_s2 + $0x498] sm:$0xff] }
 0x13a   :  { %v11344_v51 = vpack.c.bf16 %v4114_v42, %v4113_v0  ;;  %v2973_v4 = vadd.f32 %v2972_v27, %v10801_v18  ;;  %v11347_v52 = vpop.permute.xlu0 %995  ;;  %1300 = vperm.xlu1 %9818, %v454_v63   ;;  %9195 = vmatprep.mubr.msk.f32.mxu0 %vm1893_vm0, %v197_v58  ;;  %v201_v27 = vld [vmem:[%s14715_s1 + $0x4e0] sm:$0xff] }
 0x13b   :  { %v4116_v31 = vmax.f32 %v2978_v3, 0.0  ;;  %1295 = vperm.xlu0 %9817, %v453_v24   ;;  %v200_v24 = vld [vmem:[%s14715_s1 + $0x4d8] sm:$0xff] }
 0x13c   :  { %14749 = vst [vmem:[#allocation24_spill] sm:$0xff] %v11344_v51  ;;  %v4115_v18 = vmax.f32 %v2973_v4, 0.0  ;;  %v9038_v57 = vpop.f32.mrb[46].mxu0 }
 0x13d   :  { %v2988_v38 = vadd.f32 %v9038_v57, %v10817_v33  ;;  %v2982_v42 = vpop.f32.mrb[47].mxu0  ;;  %9196 = vmatmul.mubr.msk.f32.gmra.mrb[152].mxu0 %vm1893_vm0, %v198_v50  ;;  %v11364_v63 = vpop.permute.xlu1 %1010  ;;  %v458_v33 = vld [vmem:[%s14713_s2 + $0x4a8] sm:$0xff]  ;;  %v457_v50 = vld [vmem:[%s14713_s2 + $0x4a0] sm:$0xff] }
 0x13e   :  { %v11366_v58 = vpack.c.bf16 %v4116_v31, %v4115_v18  ;;  %v2983_v0 = vadd.f32 %v2982_v42, %v10819_v36  ;;  %v11369_v59 = vpop.permute.xlu0 %1005  ;;  %1310 = vperm.xlu1 %9818, %v456_v15   ;;  %9198 = vmatprep.mubr.msk.f32.mxu0 %vm1893_vm0, %v199_v47 }
 0x13f   :  { %v4118_v3 = vmax.f32 %v2988_v38, 0.0  ;;  %1305 = vperm.xlu0 %9817, %v455_v37   ;;  %v202_v38 = vld [vmem:[%s14715_s1 + $0x4e8] sm:$0xff] }
 0x140   :  { %14750 = vst [vmem:[#allocation25_spill] sm:$0xff] %v11366_v58  ;;  %v4117_v36 = vmax.f32 %v2983_v0, 0.0  ;;  %v9041_v4 = vpop.f32.mrb[48].mxu0  ;;  %v203_v0 = vld [vmem:[%s14715_s1 + $0x4f0] sm:$0xff] }
 0x141   :  { %v2998_v31 = vadd.f32 %v9041_v4, %v10836_v62  ;;  %v2992_v15 = vpop.f32.mrb[49].mxu0  ;;  %9199 = vmatmul.mubr.msk.f32.gmra.mrb[154].mxu0 %vm1893_vm0, %v200_v24  ;;  %v11386_v47 = vpop.permute.xlu1 %1020  ;;  %v460_v62 = vld [vmem:[%s14713_s2 + $0x4b8] sm:$0xff] }
 0x142   :  { %v11388_v18 = vpack.c.bf16 %v4118_v3, %v4117_v36  ;;  %v2993_v57 = vadd.f32 %v2992_v15, %v10839_v6  ;;  %v11391_v37 = vpop.permute.xlu0 %1015  ;;  %1320 = vperm.xlu1 %9818, %v458_v33   ;;  %9201 = vmatprep.mubr.msk.f32.mxu0 %vm1893_vm0, %v201_v27  ;;  %v459_v3 = vld [vmem:[%s14713_s2 + $0x4b0] sm:$0xff] }
 0x143   :  { %v4120_v42 = vmax.f32 %v2998_v31, 0.0  ;;  %1315 = vperm.xlu0 %9817, %v457_v50   ;;  %v14753_v50 = vld [vmem:[#allocation5_spill] sm:$0xff] }
 0x144   :  { %14751 = vst [vmem:[#allocation26_spill] sm:$0xff] %v11388_v18  ;;  %v4119_v6 = vmax.f32 %v2993_v57, 0.0  ;;  %v9044_v24 = vpop.f32.mrb[50].mxu0  ;;  %v204_v57 = vld [vmem:[%s14715_s1 + $0x4f8] sm:$0xff] }
 0x145   :  { %v3008_v33 = vadd.f32 %v9044_v24, %v10860_v48  ;;  %v3002_v27 = vpop.f32.mrb[51].mxu0  ;;  %9202 = vmatmul.mubr.msk.f32.gmra.mrb[156].mxu0 %vm1893_vm0, %v202_v38  ;;  %v11408_v36 = vpop.permute.xlu1 %1030  ;;  %v462_v48 = vld [vmem:[%s14713_s2 + $0x4c8] sm:$0xff]  ;;  %v205_v38 = vld [vmem:[%s14715_s1 + $0x500] sm:$0xff] }
 0x146   :  { %v11410_v4 = vpack.c.bf16 %v4120_v42, %v4119_v6  ;;  %v3003_v31 = vadd.f32 %v3002_v27, %v14753_v50  ;;  %v11413_v15 = vpop.permute.xlu0 %1025  ;;  %1330 = vperm.xlu1 %9818, %v460_v62   ;;  %9204 = vmatprep.mubr.msk.f32.mxu0 %vm1893_vm0, %v203_v0  ;;  %v461_v62 = vld [vmem:[%s14713_s2 + $0x4c0] sm:$0xff]  ;;  %v14756_v50 = vld [vmem:[#allocation8_spill] sm:$0xff] }
 0x147   :  { %v4122_v18 = vmax.f32 %v3008_v33, 0.0  ;;  %1325 = vperm.xlu0 %9817, %v459_v3   ;;  %v14754_v0 = vld [vmem:[#allocation6_spill] sm:$0xff] }
 0x148   :  { %14752 = vst [vmem:[#allocation27_spill] sm:$0xff] %v11410_v4  ;;  %v4121_v42 = vmax.f32 %v3003_v31, 0.0  ;;  %v9047_v6 = vpop.f32.mrb[52].mxu0  ;;  %v206_v31 = vld [vmem:[%s14715_s1 + $0x508] sm:$0xff] }
 0x149   :  { %v3018_v24 = vadd.f32 %v9047_v6, %v14754_v0  ;;  %v3012_v27 = vpop.f32.mrb[53].mxu0  ;;  %9205 = vmatmul.mubr.msk.f32.gmra.mrb[158].mxu0 %vm1893_vm0, %v204_v57  ;;  %v11430_v3 = vpop.permute.xlu1 %1040  ;;  %v464_v57 = vld [vmem:[%s14713_s2 + $0x4d8] sm:$0xff] }
 0x14a   :  { %v11432_v33 = vpack.c.bf16 %v4122_v18, %v4121_v42  ;;  %v3013_v58 = vadd.f32 %v3012_v27, %v14756_v50  ;;  %v11435_v51 = vpop.permute.xlu0 %1035  ;;  %1340 = vperm.xlu1 %9818, %v462_v48   ;;  %9207 = vmatprep.mubr.msk.f32.mxu0 %vm1893_vm0, %v205_v38  ;;  %v207_v18 = vld [vmem:[%s14715_s1 + $0x510] sm:$0xff]  ;;  %v14757_v38 = vld [vmem:[#allocation9_spill] sm:$0xff]  ;;  %v14759_v50 = vld [vmem:[#allocation11_spill] sm:$0xff] }
 0x14b   :  { %v4124_v21 = vmax.f32 %v3018_v24, 0.0  ;;  %1335 = vperm.xlu0 %9817, %v461_v62   ;;  %v463_v48 = vld [vmem:[%s14713_s2 + $0x4d0] sm:$0xff] }
 0x14c   :  { %14755 = vst [vmem:[#allocation5_spill] sm:$0xff] %v11432_v33  ;;  %v4123_v42 = vmax.f32 %v3013_v58, 0.0  ;;  %v9050_v6 = vpop.f32.mrb[54].mxu0  ;;  %v208_v58 = vld [vmem:[%s14715_s1 + $0x518] sm:$0xff] }
 0x14d   :  { %v3028_v0 = vadd.f32 %v9050_v6, %v14757_v38  ;;  %v3022_v27 = vpop.f32.mrb[55].mxu0  ;;  %9208 = vmatmul.mubr.msk.f32.gmra.mrb[160].mxu0 %vm1893_vm0, %v206_v31  ;;  %v11452_v62 = vpop.permute.xlu1 %1050  ;;  %v466_v31 = vld [vmem:[%s14713_s2 + $0x4e8] sm:$0xff] }
 0x14e   :  { %v11454_v24 = vpack.c.bf16 %v4124_v21, %v4123_v42  ;;  %v3023_v35 = vadd.f32 %v3022_v27, %v14759_v50  ;;  %v11457_v44 = vpop.permute.xlu0 %1045  ;;  %1350 = vperm.xlu1 %9818, %v464_v57   ;;  %9210 = vmatprep.mubr.msk.f32.mxu0 %vm1893_vm0, %v207_v18  ;;  %v209_v21 = vld [vmem:[%s14715_s1 + $0x520] sm:$0xff]  ;;  %v14760_v18 = vld [vmem:[#allocation12_spill] sm:$0xff] }
 0x14f   :  { %v4126_v41 = vmax.f32 %v3028_v0, 0.0  ;;  %1345 = vperm.xlu0 %9817, %v463_v48   ;;  %v465_v57 = vld [vmem:[%s14713_s2 + $0x4e0] sm:$0xff] }
 0x150   :  { %14758 = vst [vmem:[#allocation6_spill] sm:$0xff] %v11454_v24  ;;  %v4125_v42 = vmax.f32 %v3023_v35, 0.0  ;;  %v9053_v6 = vpop.f32.mrb[56].mxu0  ;;  %v14762_v50 = vld [vmem:[#allocation14_spill] sm:$0xff]  ;;  %v210_v35 = vld [vmem:[%s14715_s1 + $0x528] sm:$0xff] }
 0x151   :  { %v3038_v38 = vadd.f32 %v9053_v6, %v14760_v18  ;;  %v3032_v27 = vpop.f32.mrb[57].mxu0  ;;  %9211 = vmatmul.mubr.msk.f32.gmra.mrb[162].mxu0 %vm1893_vm0, %v208_v58  ;;  %v11474_v48 = vpop.permute.xlu1 %1060  ;;  %v468_v58 = vld [vmem:[%s14713_s2 + $0x4f8] sm:$0xff] }
 0x152   :  { %v11476_v0 = vpack.c.bf16 %v4126_v41, %v4125_v42  ;;  %v3033_v24 = vadd.f32 %v3032_v27, %v14762_v50  ;;  %v11479_v33 = vpop.permute.xlu0 %1055  ;;  %1360 = vperm.xlu1 %9818, %v466_v31   ;;  %9213 = vmatprep.mubr.msk.f32.mxu0 %vm1893_vm0, %v209_v21  ;;  %v211_v41 = vld [vmem:[%s14715_s1 + $0x530] sm:$0xff] }
 0x153   :  { %v4128_v32 = vmax.f32 %v3038_v38, 0.0  ;;  %1355 = vperm.xlu0 %9817, %v465_v57   ;;  %v467_v31 = vld [vmem:[%s14713_s2 + $0x4f0] sm:$0xff] }
 0x154   :  { %14761 = vst [vmem:[#allocation8_spill] sm:$0xff] %v11476_v0  ;;  %v4127_v42 = vmax.f32 %v3033_v24, 0.0  ;;  %v9056_v6 = vpop.f32.mrb[58].mxu0  ;;  %v212_v24 = vld [vmem:[%s14715_s1 + $0x538] sm:$0xff] }
 0x155   :  { %v3048_v21 = vadd.f32 %v9056_v6, %v10964_v22  ;;  %v3042_v18 = vpop.f32.mrb[59].mxu0  ;;  %9214 = vmatmul.mubr.msk.f32.gmra.mrb[164].mxu0 %vm1893_vm0, %v210_v35  ;;  %v11496_v57 = vpop.permute.xlu1 %1070  ;;  %v470_v22 = vld [vmem:[%s14713_s2 + $0x508] sm:$0xff] }
 0x156   :  { %v11498_v38 = vpack.c.bf16 %v4128_v32, %v4127_v42  ;;  %v3043_v27 = vadd.f32 %v3042_v18, %v10969_v55  ;;  %v11501_v50 = vpop.permute.xlu0 %1065  ;;  %1370 = vperm.xlu1 %9818, %v468_v58   ;;  %9216 = vmatprep.mubr.msk.f32.mxu0 %vm1893_vm0, %v211_v41  ;;  %v213_v32 = vld [vmem:[%s14715_s1 + $0x540] sm:$0xff] }
 0x157   :  { %v4130_v0 = vmax.f32 %v3048_v21, 0.0  ;;  %1365 = vperm.xlu0 %9817, %v467_v31   ;;  %v469_v58 = vld [vmem:[%s14713_s2 + $0x500] sm:$0xff] }
 0x158   :  { %14763 = vst [vmem:[#allocation9_spill] sm:$0xff] %v11498_v38  ;;  %v4129_v55 = vmax.f32 %v3043_v27, 0.0  ;;  %v9059_v35 = vpop.f32.mrb[60].mxu0  ;;  %v214_v27 = vld [vmem:[%s14715_s1 + $0x548] sm:$0xff] }
 0x159   :  { %v3058_v41 = vadd.f32 %v9059_v35, %v10986_v34  ;;  %v3052_v42 = vpop.f32.mrb[61].mxu0  ;;  %9217 = vmatmul.mubr.msk.f32.gmra.mrb[166].mxu0 %vm1893_vm0, %v212_v24  ;;  %v11518_v6 = vpop.permute.xlu1 %1080  ;;  %v472_v34 = vld [vmem:[%s14713_s2 + $0x518] sm:$0xff] }
 0x15a   :  { %v11520_v31 = vpack.c.bf16 %v4130_v0, %v4129_v55  ;;  %v3053_v21 = vadd.f32 %v3052_v42, %v10991_v43  ;;  %v11523_v18 = vpop.permute.xlu0 %1075  ;;  %1380 = vperm.xlu1 %9818, %v470_v22   ;;  %9219 = vmatprep.mubr.msk.f32.mxu0 %vm1893_vm0, %v213_v32  ;;  %v215_v0 = vld [vmem:[%s14715_s1 + $0x550] sm:$0xff] }
 0x15b   :  { %v4132_v38 = vmax.f32 %v3058_v41, 0.0  ;;  %1375 = vperm.xlu0 %9817, %v469_v58   ;;  %v471_v22 = vld [vmem:[%s14713_s2 + $0x510] sm:$0xff]  ;;  %v14766_v41 = vld [vmem:[#allocation18_spill] sm:$0xff] }
 0x15c   :  { %14764 = vst [vmem:[#allocation11_spill] sm:$0xff] %v11520_v31  ;;  %v4131_v43 = vmax.f32 %v3053_v21, 0.0  ;;  %v9062_v24 = vpop.f32.mrb[62].mxu0  ;;  %v216_v21 = vld [vmem:[%s14715_s1 + $0x558] sm:$0xff] }
 0x15d   :  { %v3068_v32 = vadd.f32 %v9062_v24, %v11008_v45  ;;  %v3062_v55 = vpop.f32.mrb[63].mxu0  ;;  %9220 = vmatmul.mubr.msk.f32.gmra.mrb[168].mxu0 %vm1893_vm0, %v214_v27  ;;  %v11540_v35 = vpop.permute.xlu1 %1090  ;;  %v474_v45 = vld [vmem:[%s14713_s2 + $0x528] sm:$0xff] }
 0x15e   :  { %v11542_v58 = vpack.c.bf16 %v4132_v38, %v4131_v43  ;;  %v3063_v42 = vadd.f32 %v3062_v55, %v14766_v41  ;;  %v11545_v31 = vpop.permute.xlu0 %1085  ;;  %1390 = vperm.xlu1 %9818, %v472_v34   ;;  %9222 = vmatprep.mubr.msk.f32.mxu0 %vm1893_vm0, %v215_v0  ;;  %v217_v38 = vld [vmem:[%s14715_s1 + $0x560] sm:$0xff] }
 0x15f   :  { %v4134_v4 = vmax.f32 %v3068_v32, 0.0  ;;  %1385 = vperm.xlu0 %9817, %v471_v22   ;;  %v473_v34 = vld [vmem:[%s14713_s2 + $0x520] sm:$0xff] }
 0x160   :  { %14765 = vst [vmem:[#allocation12_spill] sm:$0xff] %v11542_v58  ;;  %v4133_v27 = vmax.f32 %v3063_v42, 0.0  ;;  %v9065_v43 = vpop.f32.mrb[64].mxu0  ;;  %v218_v42 = vld [vmem:[%s14715_s1 + $0x568] sm:$0xff] }
 0x161   :  { %v3078_v0 = vadd.f32 %v9065_v43, %v11110_v13  ;;  %v3072_v24 = vpop.f32.mrb[65].mxu0  ;;  %9223 = vmatmul.mubr.msk.f32.gmra.mrb[170].mxu0 %vm1893_vm0, %v216_v21  ;;  %v11562_v22 = vpop.permute.xlu1 %1100  ;;  %v476_v13 = vld [vmem:[%s14713_s2 + $0x538] sm:$0xff] }
 0x162   :  { %v11564_v32 = vpack.c.bf16 %v4134_v4, %v4133_v27  ;;  %v3073_v55 = vadd.f32 %v3072_v24, %v11115_v30  ;;  %v11567_v41 = vpop.permute.xlu0 %1095  ;;  %1400 = vperm.xlu1 %9818, %v474_v45   ;;  %9225 = vmatprep.mubr.msk.f32.mxu0 %vm1893_vm0, %v217_v38  ;;  %v219_v4 = vld [vmem:[%s14715_s1 + $0x570] sm:$0xff] }
 0x163   :  { %v4136_v58 = vmax.f32 %v3078_v0, 0.0  ;;  %1395 = vperm.xlu0 %9817, %v473_v34   ;;  %v475_v45 = vld [vmem:[%s14713_s2 + $0x530] sm:$0xff] }
 0x164   :  { %14767 = vst [vmem:[#allocation14_spill] sm:$0xff] %v11564_v32  ;;  %v4135_v30 = vmax.f32 %v3073_v55, 0.0  ;;  %v9068_v21 = vpop.f32.mrb[66].mxu0  ;;  %v220_v55 = vld [vmem:[%s14715_s1 + $0x578] sm:$0xff] }
 0x165   :  { %v3088_v38 = vadd.f32 %v9068_v21, %v11132_v29  ;;  %v3082_v27 = vpop.f32.mrb[67].mxu0  ;;  %9226 = vmatmul.mubr.msk.f32.gmra.mrb[172].mxu0 %vm1893_vm0, %v218_v42  ;;  %v11584_v43 = vpop.permute.xlu1 %1110  ;;  %v478_v29 = vld [vmem:[%s14713_s2 + $0x548] sm:$0xff] }
 0x166   :  { %v11586_v34 = vpack.c.bf16 %v4136_v58, %v4135_v30  ;;  %v3083_v0 = vadd.f32 %v3082_v27, %v11137_v16  ;;  %v11589_v24 = vpop.permute.xlu0 %1105  ;;  %1410 = vperm.xlu1 %9818, %v476_v13   ;;  %9228 = vmatprep.mubr.msk.f32.mxu0 %vm1893_vm0, %v219_v4  ;;  %v221_v58 = vld [vmem:[%s14715_s1 + $0x580] sm:$0xff] }
 0x167   :  { %v4138_v32 = vmax.f32 %v3088_v38, 0.0  ;;  %1405 = vperm.xlu0 %9817, %v475_v45   ;;  %v477_v13 = vld [vmem:[%s14713_s2 + $0x540] sm:$0xff] }
 0x168   :  { %14768 = vst [vmem:[#allocation18_spill] sm:$0xff] %v11586_v34  ;;  %v4137_v16 = vmax.f32 %v3083_v0, 0.0  ;;  %v9071_v42 = vpop.f32.mrb[68].mxu0  ;;  %v222_v0 = vld [vmem:[%s14715_s1 + $0x588] sm:$0xff] }
 0x169   :  { %v3098_v4 = vadd.f32 %v9071_v42, %v11161_v56  ;;  %v3092_v30 = vpop.f32.mrb[69].mxu0  ;;  %9229 = vmatmul.mubr.msk.f32.gmra.mrb[174].mxu0 %vm1893_vm0, %v220_v55  ;;  %v11606_v21 = vpop.permute.xlu1 %1120  ;;  %v480_v56 = vld [vmem:[%s14713_s2 + $0x558] sm:$0xff] }
 0x16a   :  { %v11608_v45 = vpack.c.bf16 %v4138_v32, %v4137_v16  ;;  %v3093_v38 = vadd.f32 %v3092_v30, %v11166_v14  ;;  %v11611_v27 = vpop.permute.xlu0 %1115  ;;  %1420 = vperm.xlu1 %9818, %v478_v29   ;;  %9231 = vmatprep.mubr.msk.f32.mxu0 %vm1893_vm0, %v221_v58  ;;  %v223_v32 = vld [vmem:[%s14715_s1 + $0x590] sm:$0xff] }
 0x16b   :  { %v4140_v34 = vmax.f32 %v3098_v4, 0.0  ;;  %1415 = vperm.xlu0 %9817, %v477_v13   ;;  %v479_v29 = vld [vmem:[%s14713_s2 + $0x550] sm:$0xff] }
 0x16c   :  { %14769 = vst [vmem:[#allocation28_spill] sm:$0xff] %v11608_v45  ;;  %v4139_v14 = vmax.f32 %v3093_v38, 0.0  ;;  %v9074_v55 = vpop.f32.mrb[70].mxu0  ;;  %v224_v38 = vld [vmem:[%s14715_s1 + $0x598] sm:$0xff] }
 0x16d   :  { %v3108_v58 = vadd.f32 %v9074_v55, %v11188_v17  ;;  %v3102_v16 = vpop.f32.mrb[71].mxu0  ;;  %9232 = vmatmul.mubr.msk.f32.gmra.mrb[176].mxu0 %vm1893_vm0, %v222_v0  ;;  %v11628_v42 = vpop.permute.xlu1 %1130  ;;  %v482_v17 = vld [vmem:[%s14713_s2 + $0x568] sm:$0xff] }
 0x16e   :  { %v11630_v13 = vpack.c.bf16 %v4140_v34, %v4139_v14  ;;  %v3103_v4 = vadd.f32 %v3102_v16, %v11193_v10  ;;  %v11633_v30 = vpop.permute.xlu0 %1125  ;;  %1430 = vperm.xlu1 %9818, %v480_v56   ;;  %9234 = vmatprep.mubr.msk.f32.mxu0 %vm1893_vm0, %v223_v32  ;;  %v225_v34 = vld [vmem:[%s14715_s1 + $0x5a0] sm:$0xff] }
 0x16f   :  { %v4142_v45 = vmax.f32 %v3108_v58, 0.0  ;;  %1425 = vperm.xlu0 %9817, %v479_v29   ;;  %v481_v56 = vld [vmem:[%s14713_s2 + $0x560] sm:$0xff] }
 0x170   :  { %14770 = vst [vmem:[#allocation29_spill] sm:$0xff] %v11630_v13  ;;  %v4141_v10 = vmax.f32 %v3103_v4, 0.0  ;;  %v9077_v0 = vpop.f32.mrb[72].mxu0  ;;  %v226_v4 = vld [vmem:[%s14715_s1 + $0x5a8] sm:$0xff] }
 0x171   :  { %v3118_v32 = vadd.f32 %v9077_v0, %v11210_v60  ;;  %v3112_v14 = vpop.f32.mrb[73].mxu0  ;;  %9235 = vmatmul.mubr.msk.f32.gmra.mrb[178].mxu0 %vm1893_vm0, %v224_v38  ;;  %v11650_v55 = vpop.permute.xlu1 %1140  ;;  %v484_v60 = vld [vmem:[%s14713_s2 + $0x578] sm:$0xff] }
 0x172   :  { %v11652_v29 = vpack.c.bf16 %v4142_v45, %v4141_v10  ;;  %v3113_v58 = vadd.f32 %v3112_v14, %v11215_v23  ;;  %v11655_v16 = vpop.permute.xlu0 %1135  ;;  %1440 = vperm.xlu1 %9818, %v482_v17   ;;  %9237 = vmatprep.mubr.msk.f32.mxu0 %vm1893_vm0, %v225_v34  ;;  %v227_v45 = vld [vmem:[%s14715_s1 + $0x5b0] sm:$0xff] }
 0x173   :  { %v4144_v13 = vmax.f32 %v3118_v32, 0.0  ;;  %1435 = vperm.xlu0 %9817, %v481_v56   ;;  %v483_v17 = vld [vmem:[%s14713_s2 + $0x570] sm:$0xff] }
 0x174   :  { %14771 = vst [vmem:[#allocation30_spill] sm:$0xff] %v11652_v29  ;;  %v4143_v23 = vmax.f32 %v3113_v58, 0.0  ;;  %v9080_v38 = vpop.f32.mrb[74].mxu0  ;;  %v228_v58 = vld [vmem:[%s14715_s1 + $0x5b8] sm:$0xff] }
 0x175   :  { %v3128_v34 = vadd.f32 %v9080_v38, %v11232_v5  ;;  %v3122_v10 = vpop.f32.mrb[75].mxu0  ;;  %9238 = vmatmul.mubr.msk.f32.gmra.mrb[180].mxu0 %vm1893_vm0, %v226_v4  ;;  %v11672_v0 = vpop.permute.xlu1 %4345  ;;  %v486_v5 = vld [vmem:[%s14713_s2 + $0x588] sm:$0xff] }
 0x176   :  { %v11674_v56 = vpack.c.bf16 %v4144_v13, %v4143_v23  ;;  %v3123_v32 = vadd.f32 %v3122_v10, %v11237_v2  ;;  %v11677_v14 = vpop.permute.xlu0 %1145  ;;  %1450 = vperm.xlu1 %9818, %v484_v60   ;;  %9240 = vmatprep.mubr.msk.f32.mxu0 %vm1893_vm0, %v227_v45  ;;  %v229_v13 = vld [vmem:[%s14715_s1 + $0x5c0] sm:$0xff] }
 0x177   :  { %v4146_v29 = vmax.f32 %v3128_v34, 0.0  ;;  %1445 = vperm.xlu0 %9817, %v483_v17   ;;  %v485_v60 = vld [vmem:[%s14713_s2 + $0x580] sm:$0xff] }
 0x178   :  { %14772 = vst [vmem:[#allocation31_spill] sm:$0xff] %v11674_v56  ;;  %v4145_v2 = vmax.f32 %v3123_v32, 0.0  ;;  %v9083_v4 = vpop.f32.mrb[76].mxu0  ;;  %v230_v32 = vld [vmem:[%s14715_s1 + $0x5c8] sm:$0xff] }
 0x179   :  { %v3138_v45 = vadd.f32 %v9083_v4, %v11254_v28  ;;  %v3132_v23 = vpop.f32.mrb[77].mxu0  ;;  %9241 = vmatmul.mubr.msk.f32.gmra.mrb[182].mxu0 %vm1893_vm0, %v228_v58  ;;  %v11694_v38 = vpop.permute.xlu1 %4355  ;;  %v488_v28 = vld [vmem:[%s14713_s2 + $0x598] sm:$0xff] }
 0x17a   :  { %v11696_v17 = vpack.c.bf16 %v4146_v29, %v4145_v2  ;;  %v3133_v34 = vadd.f32 %v3132_v23, %v11259_v49  ;;  %v11699_v10 = vpop.permute.xlu0 %4350  ;;  %1460 = vperm.xlu1 %9818, %v486_v5   ;;  %9243 = vmatprep.mubr.msk.f32.mxu0 %vm1893_vm0, %v229_v13  ;;  %v231_v29 = vld [vmem:[%s14715_s1 + $0x5d0] sm:$0xff]  ;;  %v4465_v49 = vld [vmem:[%s14718_s5] sm:$0xff] }
 0x17b   :  { %v4148_v56 = vmax.f32 %v3138_v45, 0.0  ;;  %1455 = vperm.xlu0 %9817, %v485_v60   ;;  %v487_v13 = vld [vmem:[%s14713_s2 + $0x590] sm:$0xff]  ;;  %9393 = vmatprep.mubr.msk.f32.mxu1 %vm1893_vm0, %v4465_v49 }
 0x17c   :  { %14773 = vst [vmem:[#allocation32_spill] sm:$0xff] %v11696_v17  ;;  %v4147_v58 = vmax.f32 %v3133_v34, 0.0  ;;  %v9086_v5 = vpop.f32.mrb[78].mxu0  ;;  %v232_v34 = vld [vmem:[%s14715_s1 + $0x5d8] sm:$0xff] }
 0x17d   :  { %v3148_v2 = vadd.f32 %v9086_v5, %v11276_v7  ;;  %v3142_v4 = vpop.f32.mrb[79].mxu0  ;;  %9244 = vmatmul.mubr.msk.f32.gmra.mrb[184].mxu0 %vm1893_vm0, %v230_v32  ;;  %v11720_v60 = vpop.permute.xlu1 %1150  ;;  %v490_v7 = vld [vmem:[%s14713_s2 + $0x5a8] sm:$0xff] }
 0x17e   :  { %v11722_v45 = vpack.c.bf16 %v4148_v56, %v4147_v58  ;;  %v3143_v23 = vadd.f32 %v3142_v4, %v11281_v39  ;;  %v11725_v17 = vpop.permute.xlu0 %4360  ;;  %1470 = vperm.xlu1 %9818, %v488_v28   ;;  %9246 = vmatprep.mubr.msk.f32.mxu0 %vm1893_vm0, %v231_v29  ;;  %v233_v56 = vld [vmem:[%s14715_s1 + $0x5e0] sm:$0xff] }
 0x17f   :  { %v4150_v49 = vmax.f32 %v3148_v2, 0.0  ;;  %1465 = vperm.xlu0 %9817, %v487_v13   ;;  %v489_v28 = vld [vmem:[%s14713_s2 + $0x5a0] sm:$0xff] }
 0x180   :  { %14774 = vst [vmem:[#allocation33_spill] sm:$0xff] %v11722_v45  ;;  %v4149_v39 = vmax.f32 %v3143_v23, 0.0  ;;  %v9089_v32 = vpop.f32.mrb[80].mxu0  ;;  %v234_v23 = vld [vmem:[%s14715_s1 + $0x5e8] sm:$0xff] }
 0x181   :  { %v3158_v29 = vadd.f32 %v9089_v32, %v11298_v20  ;;  %v3152_v58 = vpop.f32.mrb[81].mxu0  ;;  %9247 = vmatmul.mubr.msk.f32.gmra.mrb[186].mxu0 %vm1893_vm0, %v232_v34  ;;  %v11742_v5 = vpop.permute.xlu1 %1160  ;;  %v492_v20 = vld [vmem:[%s14713_s2 + $0x5b8] sm:$0xff]  ;;  %v235_v34 = vld [vmem:[%s14715_s1 + $0x5f0] sm:$0xff] }
 0x182   :  { %v11744_v13 = vpack.c.bf16 %v4150_v49, %v4149_v39  ;;  %v3153_v2 = vadd.f32 %v3152_v58, %v11303_v25  ;;  %v11747_v4 = vpop.permute.xlu0 %1155  ;;  %1480 = vperm.xlu1 %9818, %v490_v7   ;;  %9249 = vmatprep.mubr.msk.f32.mxu0 %vm1893_vm0, %v233_v56  ;;  %v491_v7 = vld [vmem:[%s14713_s2 + $0x5b0] sm:$0xff] }
 0x183   :  { %v4152_v45 = vmax.f32 %v3158_v29, 0.0  ;;  %1475 = vperm.xlu0 %9817, %v489_v28  }
 0x184   :  { %14775 = vst [vmem:[#allocation34_spill] sm:$0xff] %v11744_v13  ;;  %v4151_v25 = vmax.f32 %v3153_v2, 0.0  ;;  %v9092_v49 = vpop.f32.mrb[82].mxu0  ;;  %v236_v2 = vld [vmem:[%s14715_s1 + $0x5f8] sm:$0xff] }
 0x185   :  { %v3168_v56 = vadd.f32 %v9092_v49, %v11320_v11  ;;  %v3162_v39 = vpop.f32.mrb[83].mxu0  ;;  %9250 = vmatmul.mubr.msk.f32.gmra.mrb[188].mxu0 %vm1893_vm0, %v234_v23  ;;  %v11764_v32 = vpop.permute.xlu1 %1170  ;;  %v494_v11 = vld [vmem:[%s14713_s2 + $0x5c8] sm:$0xff] }
 0x186   :  { %v11766_v28 = vpack.c.bf16 %v4152_v45, %v4151_v25  ;;  %v3163_v29 = vadd.f32 %v3162_v39, %v11325_v12  ;;  %v11769_v58 = vpop.permute.xlu0 %1165  ;;  %1490 = vperm.xlu1 %9818, %v492_v20   ;;  %9252 = vmatprep.mubr.msk.f32.mxu0 %vm1893_vm0, %v235_v34  ;;  %v237_v45 = vld [vmem:[%s14715_s1 + $0x600] sm:$0xff] }
 0x187   :  { %v4154_v13 = vmax.f32 %v3168_v56, 0.0  ;;  %1485 = vperm.xlu0 %9817, %v491_v7   ;;  %v493_v20 = vld [vmem:[%s14713_s2 + $0x5c0] sm:$0xff] }
 0x188   :  { %14776 = vst [vmem:[#allocation35_spill] sm:$0xff] %v11766_v28  ;;  %v4153_v12 = vmax.f32 %v3163_v29, 0.0  ;;  %v9095_v23 = vpop.f32.mrb[84].mxu0  ;;  %v238_v29 = vld [vmem:[%s14715_s1 + $0x608] sm:$0xff] }
 0x189   :  { %v3178_v34 = vadd.f32 %v9095_v23, %v11342_v26  ;;  %v3172_v25 = vpop.f32.mrb[85].mxu0  ;;  %9253 = vmatmul.mubr.msk.f32.gmra.mrb[190].mxu0 %vm1893_vm0, %v236_v2  ;;  %v11786_v49 = vpop.permute.xlu1 %1180  ;;  %v496_v26 = vld [vmem:[%s14713_s2 + $0x5d8] sm:$0xff] }
 0x18a   :  { %v11788_v7 = vpack.c.bf16 %v4154_v13, %v4153_v12  ;;  %v3173_v56 = vadd.f32 %v3172_v25, %v11347_v52  ;;  %v11791_v39 = vpop.permute.xlu0 %1175  ;;  %1500 = vperm.xlu1 %9818, %v494_v11   ;;  %9255 = vmatprep.mubr.msk.f32.mxu0 %vm1893_vm0, %v237_v45  ;;  %v239_v13 = vld [vmem:[%s14715_s1 + $0x610] sm:$0xff] }
 0x18b   :  { %v4156_v28 = vmax.f32 %v3178_v34, 0.0  ;;  %1495 = vperm.xlu0 %9817, %v493_v20   ;;  %v495_v11 = vld [vmem:[%s14713_s2 + $0x5d0] sm:$0xff] }
 0x18c   :  { %14777 = vst [vmem:[#allocation36_spill] sm:$0xff] %v11788_v7  ;;  %v4155_v52 = vmax.f32 %v3173_v56, 0.0  ;;  %v9098_v2 = vpop.f32.mrb[86].mxu0  ;;  %v240_v56 = vld [vmem:[%s14715_s1 + $0x618] sm:$0xff] }
 0x18d   :  { %v3188_v45 = vadd.f32 %v9098_v2, %v11364_v63  ;;  %v3182_v12 = vpop.f32.mrb[87].mxu0  ;;  %9256 = vmatmul.mubr.msk.f32.gmra.mrb[192].mxu0 %vm1893_vm0, %v238_v29  ;;  %v11808_v23 = vpop.permute.xlu1 %1190  ;;  %v498_v63 = vld [vmem:[%s14713_s2 + $0x5e8] sm:$0xff] }
 0x18e   :  { %v11810_v20 = vpack.c.bf16 %v4156_v28, %v4155_v52  ;;  %v3183_v34 = vadd.f32 %v3182_v12, %v11369_v59  ;;  %v11813_v25 = vpop.permute.xlu0 %1185  ;;  %1510 = vperm.xlu1 %9818, %v496_v26   ;;  %9258 = vmatprep.mubr.msk.f32.mxu0 %vm1893_vm0, %v239_v13  ;;  %v241_v28 = vld [vmem:[%s14715_s1 + $0x620] sm:$0xff] }
 0x18f   :  { %v4158_v7 = vmax.f32 %v3188_v45, 0.0  ;;  %1505 = vperm.xlu0 %9817, %v495_v11   ;;  %v497_v26 = vld [vmem:[%s14713_s2 + $0x5e0] sm:$0xff] }
 0x190   :  { %14778 = vst [vmem:[#allocation37_spill] sm:$0xff] %v11810_v20  ;;  %v4157_v59 = vmax.f32 %v3183_v34, 0.0  ;;  %v9101_v29 = vpop.f32.mrb[88].mxu0  ;;  %v242_v34 = vld [vmem:[%s14715_s1 + $0x628] sm:$0xff] }
 0x191   :  { %v3198_v13 = vadd.f32 %v9101_v29, %v11386_v47  ;;  %v3192_v52 = vpop.f32.mrb[89].mxu0  ;;  %9259 = vmatmul.mubr.msk.f32.gmra.mrb[194].mxu0 %vm1893_vm0, %v240_v56  ;;  %v11830_v2 = vpop.permute.xlu1 %1200  ;;  %v500_v47 = vld [vmem:[%s14713_s2 + $0x5f8] sm:$0xff] }
 0x192   :  { %v11832_v11 = vpack.c.bf16 %v4158_v7, %v4157_v59  ;;  %v3193_v45 = vadd.f32 %v3192_v52, %v11391_v37  ;;  %v11835_v12 = vpop.permute.xlu0 %1195  ;;  %1520 = vperm.xlu1 %9818, %v498_v63   ;;  %9261 = vmatprep.mubr.msk.f32.mxu0 %vm1893_vm0, %v241_v28  ;;  %v243_v7 = vld [vmem:[%s14715_s1 + $0x630] sm:$0xff] }
 0x193   :  { %v4160_v20 = vmax.f32 %v3198_v13, 0.0  ;;  %1515 = vperm.xlu0 %9817, %v497_v26   ;;  %v499_v63 = vld [vmem:[%s14713_s2 + $0x5f0] sm:$0xff] }
 0x194   :  { %14779 = vst [vmem:[#allocation38_spill] sm:$0xff] %v11832_v11  ;;  %v4159_v37 = vmax.f32 %v3193_v45, 0.0  ;;  %v9104_v56 = vpop.f32.mrb[90].mxu0  ;;  %v244_v45 = vld [vmem:[%s14715_s1 + $0x638] sm:$0xff] }
 0x195   :  { %v3208_v28 = vadd.f32 %v9104_v56, %v11408_v36  ;;  %v3202_v59 = vpop.f32.mrb[91].mxu0  ;;  %9262 = vmatmul.mubr.msk.f32.gmra.mrb[196].mxu0 %vm1893_vm0, %v242_v34  ;;  %v11852_v29 = vpop.permute.xlu1 %1210  ;;  %v502_v36 = vld [vmem:[%s14713_s2 + $0x608] sm:$0xff] }
 0x196   :  { %v11854_v26 = vpack.c.bf16 %v4160_v20, %v4159_v37  ;;  %v3203_v13 = vadd.f32 %v3202_v59, %v11413_v15  ;;  %v11857_v52 = vpop.permute.xlu0 %1205  ;;  %1530 = vperm.xlu1 %9818, %v500_v47   ;;  %9264 = vmatprep.mubr.msk.f32.mxu0 %vm1893_vm0, %v243_v7  ;;  %v245_v20 = vld [vmem:[%s14715_s1 + $0x640] sm:$0xff] }
 0x197   :  { %v4162_v11 = vmax.f32 %v3208_v28, 0.0  ;;  %1525 = vperm.xlu0 %9817, %v499_v63   ;;  %v501_v47 = vld [vmem:[%s14713_s2 + $0x600] sm:$0xff] }
 0x198   :  { %14780 = vst [vmem:[#allocation39_spill] sm:$0xff] %v11854_v26  ;;  %v4161_v15 = vmax.f32 %v3203_v13, 0.0  ;;  %v9107_v34 = vpop.f32.mrb[92].mxu0  ;;  %v246_v13 = vld [vmem:[%s14715_s1 + $0x648] sm:$0xff] }
 0x199   :  { %v3218_v7 = vadd.f32 %v9107_v34, %v11430_v3  ;;  %v3212_v37 = vpop.f32.mrb[93].mxu0  ;;  %9265 = vmatmul.mubr.msk.f32.gmra.mrb[198].mxu0 %vm1893_vm0, %v244_v45  ;;  %v11874_v56 = vpop.permute.xlu1 %1220  ;;  %v504_v3 = vld [vmem:[%s14713_s2 + $0x618] sm:$0xff] }
 0x19a   :  { %v11876_v63 = vpack.c.bf16 %v4162_v11, %v4161_v15  ;;  %v3213_v28 = vadd.f32 %v3212_v37, %v11435_v51  ;;  %v11879_v59 = vpop.permute.xlu0 %1215  ;;  %1540 = vperm.xlu1 %9818, %v502_v36   ;;  %9267 = vmatprep.mubr.msk.f32.mxu0 %vm1893_vm0, %v245_v20  ;;  %v247_v11 = vld [vmem:[%s14715_s1 + $0x650] sm:$0xff] }
 0x19b   :  { %v4164_v26 = vmax.f32 %v3218_v7, 0.0  ;;  %1535 = vperm.xlu0 %9817, %v501_v47   ;;  %v503_v36 = vld [vmem:[%s14713_s2 + $0x610] sm:$0xff] }
 0x19c   :  { %14781 = vst [vmem:[#allocation40_spill] sm:$0xff] %v11876_v63  ;;  %v4163_v51 = vmax.f32 %v3213_v28, 0.0  ;;  %v9110_v45 = vpop.f32.mrb[94].mxu0  ;;  %v248_v28 = vld [vmem:[%s14715_s1 + $0x658] sm:$0xff] }
 0x19d   :  { %v3228_v20 = vadd.f32 %v9110_v45, %v11452_v62  ;;  %v3222_v15 = vpop.f32.mrb[95].mxu0  ;;  %9268 = vmatmul.mubr.msk.f32.gmra.mrb[200].mxu0 %vm1893_vm0, %v246_v13  ;;  %v11896_v34 = vpop.permute.xlu1 %1230  ;;  %v506_v62 = vld [vmem:[%s14713_s2 + $0x628] sm:$0xff] }
 0x19e   :  { %v11898_v47 = vpack.c.bf16 %v4164_v26, %v4163_v51  ;;  %v3223_v7 = vadd.f32 %v3222_v15, %v11457_v44  ;;  %v11901_v37 = vpop.permute.xlu0 %1225  ;;  %1550 = vperm.xlu1 %9818, %v504_v3   ;;  %9270 = vmatprep.mubr.msk.f32.mxu0 %vm1893_vm0, %v247_v11  ;;  %v249_v26 = vld [vmem:[%s14715_s1 + $0x660] sm:$0xff] }
 0x19f   :  { %v4166_v63 = vmax.f32 %v3228_v20, 0.0  ;;  %1545 = vperm.xlu0 %9817, %v503_v36   ;;  %v505_v3 = vld [vmem:[%s14713_s2 + $0x620] sm:$0xff] }
 0x1a0   :  { %14782 = vst [vmem:[#allocation41_spill] sm:$0xff] %v11898_v47  ;;  %v4165_v44 = vmax.f32 %v3223_v7, 0.0  ;;  %v9113_v13 = vpop.f32.mrb[96].mxu0  ;;  %v250_v7 = vld [vmem:[%s14715_s1 + $0x668] sm:$0xff] }
 0x1a1   :  { %v3238_v11 = vadd.f32 %v9113_v13, %v11474_v48  ;;  %v3232_v51 = vpop.f32.mrb[97].mxu0  ;;  %9271 = vmatmul.mubr.msk.f32.gmra.mrb[202].mxu0 %vm1893_vm0, %v248_v28  ;;  %v11918_v45 = vpop.permute.xlu1 %1240  ;;  %v508_v48 = vld [vmem:[%s14713_s2 + $0x638] sm:$0xff] }
 0x1a2   :  { %v11920_v36 = vpack.c.bf16 %v4166_v63, %v4165_v44  ;;  %v3233_v20 = vadd.f32 %v3232_v51, %v11479_v33  ;;  %v11923_v15 = vpop.permute.xlu0 %1235  ;;  %1560 = vperm.xlu1 %9818, %v506_v62   ;;  %9273 = vmatprep.mubr.msk.f32.mxu0 %vm1893_vm0, %v249_v26  ;;  %v251_v63 = vld [vmem:[%s14715_s1 + $0x670] sm:$0xff] }
 0x1a3   :  { %v4168_v47 = vmax.f32 %v3238_v11, 0.0  ;;  %1555 = vperm.xlu0 %9817, %v505_v3   ;;  %v507_v62 = vld [vmem:[%s14713_s2 + $0x630] sm:$0xff] }
 0x1a4   :  { %14783 = vst [vmem:[#allocation42_spill] sm:$0xff] %v11920_v36  ;;  %v4167_v33 = vmax.f32 %v3233_v20, 0.0  ;;  %v9116_v28 = vpop.f32.mrb[98].mxu0  ;;  %v252_v20 = vld [vmem:[%s14715_s1 + $0x678] sm:$0xff] }
 0x1a5   :  { %v3248_v26 = vadd.f32 %v9116_v28, %v11496_v57  ;;  %v3242_v44 = vpop.f32.mrb[99].mxu0  ;;  %9274 = vmatmul.mubr.msk.f32.gmra.mrb[204].mxu0 %vm1893_vm0, %v250_v7  ;;  %v11940_v13 = vpop.permute.xlu1 %1250  ;;  %v510_v57 = vld [vmem:[%s14713_s2 + $0x648] sm:$0xff] }
 0x1a6   :  { %v11942_v3 = vpack.c.bf16 %v4168_v47, %v4167_v33  ;;  %v3243_v11 = vadd.f32 %v3242_v44, %v11501_v50  ;;  %v11945_v51 = vpop.permute.xlu0 %1245  ;;  %1570 = vperm.xlu1 %9818, %v508_v48   ;;  %9276 = vmatprep.mubr.msk.f32.mxu0 %vm1893_vm0, %v251_v63  ;;  %v253_v47 = vld [vmem:[%s14715_s1 + $0x680] sm:$0xff] }
 0x1a7   :  { %v4170_v36 = vmax.f32 %v3248_v26, 0.0  ;;  %1565 = vperm.xlu0 %9817, %v507_v62   ;;  %v509_v48 = vld [vmem:[%s14713_s2 + $0x640] sm:$0xff] }
 0x1a8   :  { %14784 = vst [vmem:[#allocation43_spill] sm:$0xff] %v11942_v3  ;;  %v4169_v50 = vmax.f32 %v3243_v11, 0.0  ;;  %v9119_v7 = vpop.f32.mrb[100].mxu0  ;;  %v254_v11 = vld [vmem:[%s14715_s1 + $0x688] sm:$0xff] }
 0x1a9   :  { %v3258_v63 = vadd.f32 %v9119_v7, %v11518_v6  ;;  %v3252_v33 = vpop.f32.mrb[101].mxu0  ;;  %9277 = vmatmul.mubr.msk.f32.gmra.mrb[206].mxu0 %vm1893_vm0, %v252_v20  ;;  %v11962_v28 = vpop.permute.xlu1 %1260  ;;  %v512_v6 = vld [vmem:[%s14713_s2 + $0x658] sm:$0xff] }
 0x1aa   :  { %v11964_v62 = vpack.c.bf16 %v4170_v36, %v4169_v50  ;;  %v3253_v26 = vadd.f32 %v3252_v33, %v11523_v18  ;;  %v11967_v44 = vpop.permute.xlu0 %1255  ;;  %1580 = vperm.xlu1 %9818, %v510_v57   ;;  %9279 = vmatprep.mubr.msk.f32.mxu0 %vm1893_vm0, %v253_v47  ;;  %v255_v36 = vld [vmem:[%s14715_s1 + $0x690] sm:$0xff] }
 0x1ab   :  { %v4172_v3 = vmax.f32 %v3258_v63, 0.0  ;;  %1575 = vperm.xlu0 %9817, %v509_v48   ;;  %v511_v57 = vld [vmem:[%s14713_s2 + $0x650] sm:$0xff] }
 0x1ac   :  { %14785 = vst [vmem:[#allocation44_spill] sm:$0xff] %v11964_v62  ;;  %v4171_v18 = vmax.f32 %v3253_v26, 0.0  ;;  %v9122_v20 = vpop.f32.mrb[102].mxu0  ;;  %v256_v26 = vld [vmem:[%s14715_s1 + $0x698] sm:$0xff] }
 0x1ad   :  { %v3268_v47 = vadd.f32 %v9122_v20, %v11540_v35  ;;  %v3262_v50 = vpop.f32.mrb[103].mxu0  ;;  %9280 = vmatmul.mubr.msk.f32.gmra.mrb[208].mxu0 %vm1893_vm0, %v254_v11  ;;  %v11984_v7 = vpop.permute.xlu1 %1270  ;;  %v514_v35 = vld [vmem:[%s14713_s2 + $0x668] sm:$0xff] }
 0x1ae   :  { %v11986_v48 = vpack.c.bf16 %v4172_v3, %v4171_v18  ;;  %v3263_v63 = vadd.f32 %v3262_v50, %v11545_v31  ;;  %v11989_v33 = vpop.permute.xlu0 %1265  ;;  %1590 = vperm.xlu1 %9818, %v512_v6   ;;  %9282 = vmatprep.mubr.msk.f32.mxu0 %vm1893_vm0, %v255_v36  ;;  %v257_v3 = vld [vmem:[%s14715_s1 + $0x6a0] sm:$0xff] }
 0x1af   :  { %v4174_v62 = vmax.f32 %v3268_v47, 0.0  ;;  %1585 = vperm.xlu0 %9817, %v511_v57   ;;  %v513_v6 = vld [vmem:[%s14713_s2 + $0x660] sm:$0xff] }
 0x1b0   :  { %14786 = vst [vmem:[#allocation45_spill] sm:$0xff] %v11986_v48  ;;  %v4173_v31 = vmax.f32 %v3263_v63, 0.0  ;;  %v9125_v11 = vpop.f32.mrb[104].mxu0  ;;  %v258_v63 = vld [vmem:[%s14715_s1 + $0x6a8] sm:$0xff] }
 0x1b1   :  { %v3278_v36 = vadd.f32 %v9125_v11, %v11562_v22  ;;  %v3272_v18 = vpop.f32.mrb[105].mxu0  ;;  %9283 = vmatmul.mubr.msk.f32.gmra.mrb[210].mxu0 %vm1893_vm0, %v256_v26  ;;  %v12006_v20 = vpop.permute.xlu1 %1280  ;;  %v516_v22 = vld [vmem:[%s14713_s2 + $0x678] sm:$0xff] }
 0x1b2   :  { %v12008_v57 = vpack.c.bf16 %v4174_v62, %v4173_v31  ;;  %v3273_v47 = vadd.f32 %v3272_v18, %v11567_v41  ;;  %v12011_v50 = vpop.permute.xlu0 %1275  ;;  %1600 = vperm.xlu1 %9818, %v514_v35   ;;  %9285 = vmatprep.mubr.msk.f32.mxu0 %vm1893_vm0, %v257_v3  ;;  %v259_v62 = vld [vmem:[%s14715_s1 + $0x6b0] sm:$0xff] }
 0x1b3   :  { %v4176_v48 = vmax.f32 %v3278_v36, 0.0  ;;  %1595 = vperm.xlu0 %9817, %v513_v6   ;;  %v515_v35 = vld [vmem:[%s14713_s2 + $0x670] sm:$0xff] }
 0x1b4   :  { %14787 = vst [vmem:[#allocation46_spill] sm:$0xff] %v12008_v57  ;;  %v4175_v41 = vmax.f32 %v3273_v47, 0.0  ;;  %v9128_v26 = vpop.f32.mrb[106].mxu0  ;;  %v260_v47 = vld [vmem:[%s14715_s1 + $0x6b8] sm:$0xff] }
 0x1b5   :  { %v3288_v3 = vadd.f32 %v9128_v26, %v11584_v43  ;;  %v3282_v31 = vpop.f32.mrb[107].mxu0  ;;  %9286 = vmatmul.mubr.msk.f32.gmra.mrb[212].mxu0 %vm1893_vm0, %v258_v63  ;;  %v12028_v11 = vpop.permute.xlu1 %1290  ;;  %v518_v43 = vld [vmem:[%s14713_s2 + $0x688] sm:$0xff] }
 0x1b6   :  { %v12030_v6 = vpack.c.bf16 %v4176_v48, %v4175_v41  ;;  %v3283_v36 = vadd.f32 %v3282_v31, %v11589_v24  ;;  %v12033_v18 = vpop.permute.xlu0 %1285  ;;  %1610 = vperm.xlu1 %9818, %v516_v22   ;;  %9288 = vmatprep.mubr.msk.f32.mxu0 %vm1893_vm0, %v259_v62  ;;  %v261_v48 = vld [vmem:[%s14715_s1 + $0x6c0] sm:$0xff] }
 0x1b7   :  { %v4178_v57 = vmax.f32 %v3288_v3, 0.0  ;;  %1605 = vperm.xlu0 %9817, %v515_v35   ;;  %v517_v22 = vld [vmem:[%s14713_s2 + $0x680] sm:$0xff] }
 0x1b8   :  { %14788 = vst [vmem:[#allocation47_spill] sm:$0xff] %v12030_v6  ;;  %v4177_v24 = vmax.f32 %v3283_v36, 0.0  ;;  %v9131_v63 = vpop.f32.mrb[108].mxu0  ;;  %v262_v36 = vld [vmem:[%s14715_s1 + $0x6c8] sm:$0xff] }
 0x1b9   :  { %v3298_v62 = vadd.f32 %v9131_v63, %v11606_v21  ;;  %v3292_v41 = vpop.f32.mrb[109].mxu0  ;;  %9289 = vmatmul.mubr.msk.f32.gmra.mrb[214].mxu0 %vm1893_vm0, %v260_v47  ;;  %v12050_v26 = vpop.permute.xlu1 %1300  ;;  %v520_v21 = vld [vmem:[%s14713_s2 + $0x698] sm:$0xff] }
 0x1ba   :  { %v12052_v35 = vpack.c.bf16 %v4178_v57, %v4177_v24  ;;  %v3293_v3 = vadd.f32 %v3292_v41, %v11611_v27  ;;  %v12055_v31 = vpop.permute.xlu0 %1295  ;;  %1620 = vperm.xlu1 %9818, %v518_v43   ;;  %9291 = vmatprep.mubr.msk.f32.mxu0 %vm1893_vm0, %v261_v48  ;;  %v263_v57 = vld [vmem:[%s14715_s1 + $0x6d0] sm:$0xff] }
 0x1bb   :  { %v4180_v6 = vmax.f32 %v3298_v62, 0.0  ;;  %1615 = vperm.xlu0 %9817, %v517_v22   ;;  %v519_v43 = vld [vmem:[%s14713_s2 + $0x690] sm:$0xff] }
 0x1bc   :  { %14789 = vst [vmem:[#allocation48_spill] sm:$0xff] %v12052_v35  ;;  %v4179_v27 = vmax.f32 %v3293_v3, 0.0  ;;  %v9134_v47 = vpop.f32.mrb[110].mxu0  ;;  %v264_v3 = vld [vmem:[%s14715_s1 + $0x6d8] sm:$0xff] }
 0x1bd   :  { %v3308_v48 = vadd.f32 %v9134_v47, %v11628_v42  ;;  %v3302_v24 = vpop.f32.mrb[111].mxu0  ;;  %9292 = vmatmul.mubr.msk.f32.gmra.mrb[216].mxu0 %vm1893_vm0, %v262_v36  ;;  %v12072_v63 = vpop.permute.xlu1 %1310  ;;  %v522_v42 = vld [vmem:[%s14713_s2 + $0x6a8] sm:$0xff] }
 0x1be   :  { %v12074_v22 = vpack.c.bf16 %v4180_v6, %v4179_v27  ;;  %v3303_v62 = vadd.f32 %v3302_v24, %v11633_v30  ;;  %v12077_v41 = vpop.permute.xlu0 %1305  ;;  %1630 = vperm.xlu1 %9818, %v520_v21   ;;  %9294 = vmatprep.mubr.msk.f32.mxu0 %vm1893_vm0, %v263_v57  ;;  %v265_v6 = vld [vmem:[%s14715_s1 + $0x6e0] sm:$0xff] }
 0x1bf   :  { %v4182_v35 = vmax.f32 %v3308_v48, 0.0  ;;  %1625 = vperm.xlu0 %9817, %v519_v43   ;;  %v521_v21 = vld [vmem:[%s14713_s2 + $0x6a0] sm:$0xff] }
 0x1c0   :  { %14790 = vst [vmem:[#allocation49_spill] sm:$0xff] %v12074_v22  ;;  %v4181_v30 = vmax.f32 %v3303_v62, 0.0  ;;  %v9137_v36 = vpop.f32.mrb[112].mxu0  ;;  %v266_v62 = vld [vmem:[%s14715_s1 + $0x6e8] sm:$0xff] }
 0x1c1   :  { %v3318_v57 = vadd.f32 %v9137_v36, %v11650_v55  ;;  %v3312_v27 = vpop.f32.mrb[113].mxu0  ;;  %9295 = vmatmul.mubr.msk.f32.gmra.mrb[218].mxu0 %vm1893_vm0, %v264_v3  ;;  %v12094_v47 = vpop.permute.xlu1 %1320  ;;  %v524_v55 = vld [vmem:[%s14713_s2 + $0x6b8] sm:$0xff] }
 0x1c2   :  { %v12096_v43 = vpack.c.bf16 %v4182_v35, %v4181_v30  ;;  %v3313_v48 = vadd.f32 %v3312_v27, %v11655_v16  ;;  %v12099_v24 = vpop.permute.xlu0 %1315  ;;  %1640 = vperm.xlu1 %9818, %v522_v42   ;;  %9297 = vmatprep.mubr.msk.f32.mxu0 %vm1893_vm0, %v265_v6  ;;  %v267_v35 = vld [vmem:[%s14715_s1 + $0x6f0] sm:$0xff] }
 0x1c3   :  { %v4184_v22 = vmax.f32 %v3318_v57, 0.0  ;;  %1635 = vperm.xlu0 %9817, %v521_v21   ;;  %v523_v42 = vld [vmem:[%s14713_s2 + $0x6b0] sm:$0xff] }
 0x1c4   :  { %14791 = vst [vmem:[#allocation50_spill] sm:$0xff] %v12096_v43  ;;  %v4183_v16 = vmax.f32 %v3313_v48, 0.0  ;;  %v9140_v3 = vpop.f32.mrb[114].mxu0  ;;  %v268_v48 = vld [vmem:[%s14715_s1 + $0x6f8] sm:$0xff] }
 0x1c5   :  { %v3328_v6 = vadd.f32 %v9140_v3, %v11720_v60  ;;  %v3322_v30 = vpop.f32.mrb[115].mxu0  ;;  %9298 = vmatmul.mubr.msk.f32.gmra.mrb[220].mxu0 %vm1893_vm0, %v266_v62  ;;  %v12116_v36 = vpop.permute.xlu1 %1330  ;;  %v526_v60 = vld [vmem:[%s14713_s2 + $0x6c8] sm:$0xff] }
 0x1c6   :  { %v12118_v21 = vpack.c.bf16 %v4184_v22, %v4183_v16  ;;  %v3323_v57 = vadd.f32 %v3322_v30, %v11677_v14  ;;  %v12121_v27 = vpop.permute.xlu0 %1325  ;;  %1650 = vperm.xlu1 %9818, %v524_v55   ;;  %9300 = vmatprep.mubr.msk.f32.mxu0 %vm1893_vm0, %v267_v35  ;;  %v269_v22 = vld [vmem:[%s14715_s1 + $0x700] sm:$0xff] }
 0x1c7   :  { %v4186_v43 = vmax.f32 %v3328_v6, 0.0  ;;  %1645 = vperm.xlu0 %9817, %v523_v42   ;;  %v525_v55 = vld [vmem:[%s14713_s2 + $0x6c0] sm:$0xff] }
 0x1c8   :  { %14792 = vst [vmem:[#allocation51_spill] sm:$0xff] %v12118_v21  ;;  %v4185_v14 = vmax.f32 %v3323_v57, 0.0  ;;  %v9143_v62 = vpop.f32.mrb[116].mxu0  ;;  %v270_v57 = vld [vmem:[%s14715_s1 + $0x708] sm:$0xff] }
 0x1c9   :  { %v3338_v35 = vadd.f32 %v9143_v62, %v11742_v5  ;;  %v3332_v16 = vpop.f32.mrb[117].mxu0  ;;  %9301 = vmatmul.mubr.msk.f32.gmra.mrb[222].mxu0 %vm1893_vm0, %v268_v48  ;;  %v12138_v3 = vpop.permute.xlu1 %1340  ;;  %v528_v5 = vld [vmem:[%s14713_s2 + $0x6d8] sm:$0xff] }
 0x1ca   :  { %v12140_v42 = vpack.c.bf16 %v4186_v43, %v4185_v14  ;;  %v3333_v6 = vadd.f32 %v3332_v16, %v11747_v4  ;;  %v12143_v30 = vpop.permute.xlu0 %1335  ;;  %1660 = vperm.xlu1 %9818, %v526_v60   ;;  %9303 = vmatprep.mubr.msk.f32.mxu0 %vm1893_vm0, %v269_v22  ;;  %v271_v43 = vld [vmem:[%s14715_s1 + $0x710] sm:$0xff] }
 0x1cb   :  { %v4188_v21 = vmax.f32 %v3338_v35, 0.0  ;;  %1655 = vperm.xlu0 %9817, %v525_v55   ;;  %v527_v60 = vld [vmem:[%s14713_s2 + $0x6d0] sm:$0xff] }
 0x1cc   :  { %14793 = vst [vmem:[#allocation52_spill] sm:$0xff] %v12140_v42  ;;  %v4187_v4 = vmax.f32 %v3333_v6, 0.0  ;;  %v9146_v48 = vpop.f32.mrb[118].mxu0  ;;  %v272_v6 = vld [vmem:[%s14715_s1 + $0x718] sm:$0xff] }
 0x1cd   :  { %v3348_v22 = vadd.f32 %v9146_v48, %v11764_v32  ;;  %v3342_v14 = vpop.f32.mrb[119].mxu0  ;;  %9304 = vmatmul.mubr.msk.f32.gmra.mrb[224].mxu0 %vm1893_vm0, %v270_v57  ;;  %v12160_v62 = vpop.permute.xlu1 %1350  ;;  %v530_v32 = vld [vmem:[%s14713_s2 + $0x6e8] sm:$0xff] }
 0x1ce   :  { %v12162_v55 = vpack.c.bf16 %v4188_v21, %v4187_v4  ;;  %v3343_v35 = vadd.f32 %v3342_v14, %v11769_v58  ;;  %v12165_v16 = vpop.permute.xlu0 %1345  ;;  %1670 = vperm.xlu1 %9818, %v528_v5   ;;  %9306 = vmatprep.mubr.msk.f32.mxu0 %vm1893_vm0, %v271_v43  ;;  %v273_v21 = vld [vmem:[%s14715_s1 + $0x720] sm:$0xff] }
 0x1cf   :  { %v4190_v42 = vmax.f32 %v3348_v22, 0.0  ;;  %1665 = vperm.xlu0 %9817, %v527_v60   ;;  %v529_v5 = vld [vmem:[%s14713_s2 + $0x6e0] sm:$0xff] }
 0x1d0   :  { %14794 = vst [vmem:[#allocation53_spill] sm:$0xff] %v12162_v55  ;;  %v4189_v58 = vmax.f32 %v3343_v35, 0.0  ;;  %v9149_v57 = vpop.f32.mrb[120].mxu0  ;;  %v274_v35 = vld [vmem:[%s14715_s1 + $0x728] sm:$0xff] }
 0x1d1   :  { %v3358_v43 = vadd.f32 %v9149_v57, %v11786_v49  ;;  %v3352_v4 = vpop.f32.mrb[121].mxu0  ;;  %9307 = vmatmul.mubr.msk.f32.gmra.mrb[226].mxu0 %vm1893_vm0, %v272_v6  ;;  %v12182_v48 = vpop.permute.xlu1 %1360  ;;  %v532_v49 = vld [vmem:[%s14713_s2 + $0x6f8] sm:$0xff] }
 0x1d2   :  { %v12184_v60 = vpack.c.bf16 %v4190_v42, %v4189_v58  ;;  %v3353_v22 = vadd.f32 %v3352_v4, %v11791_v39  ;;  %v12187_v14 = vpop.permute.xlu0 %1355  ;;  %1680 = vperm.xlu1 %9818, %v530_v32   ;;  %9309 = vmatprep.mubr.msk.f32.mxu0 %vm1893_vm0, %v273_v21  ;;  %v275_v42 = vld [vmem:[%s14715_s1 + $0x730] sm:$0xff] }
 0x1d3   :  { %v4192_v55 = vmax.f32 %v3358_v43, 0.0  ;;  %1675 = vperm.xlu0 %9817, %v529_v5   ;;  %v531_v32 = vld [vmem:[%s14713_s2 + $0x6f0] sm:$0xff] }
 0x1d4   :  { %14795 = vst [vmem:[#allocation54_spill] sm:$0xff] %v12184_v60  ;;  %v4191_v39 = vmax.f32 %v3353_v22, 0.0  ;;  %v9152_v6 = vpop.f32.mrb[122].mxu0  ;;  %v276_v22 = vld [vmem:[%s14715_s1 + $0x738] sm:$0xff] }
 0x1d5   :  { %v3368_v21 = vadd.f32 %v9152_v6, %v11808_v23  ;;  %v3362_v58 = vpop.f32.mrb[123].mxu0  ;;  %9310 = vmatmul.mubr.msk.f32.gmra.mrb[228].mxu0 %vm1893_vm0, %v274_v35  ;;  %v12204_v57 = vpop.permute.xlu1 %1370  ;;  %v549_v23 = vld [vmem:[%s14713_s2 + $0x780] sm:$0xff] }
 0x1d6   :  { %v12206_v5 = vpack.c.bf16 %v4192_v55, %v4191_v39  ;;  %v3363_v43 = vadd.f32 %v3362_v58, %v11813_v25  ;;  %v12209_v4 = vpop.permute.xlu0 %1365  ;;  %1690 = vperm.xlu1 %9818, %v532_v49   ;;  %9312 = vmatprep.mubr.msk.f32.mxu0 %vm1893_vm0, %v275_v42  ;;  %v277_v55 = vld [vmem:[%s14715_s1 + $0x740] sm:$0xff] }
 0x1d7   :  { %v4194_v60 = vmax.f32 %v3368_v21, 0.0  ;;  %1685 = vperm.xlu0 %9817, %v531_v32   ;;  %v533_v49 = vld [vmem:[%s14713_s2 + $0x700] sm:$0xff] }
 0x1d8   :  { %14796 = vst [vmem:[#allocation55_spill] sm:$0xff] %v12206_v5  ;;  %v4193_v25 = vmax.f32 %v3363_v43, 0.0  ;;  %v9155_v35 = vpop.f32.mrb[124].mxu0  ;;  %v278_v43 = vld [vmem:[%s14715_s1 + $0x748] sm:$0xff] }
 0x1d9   :  { %v3378_v42 = vadd.f32 %v9155_v35, %v11830_v2  ;;  %v3372_v39 = vpop.f32.mrb[125].mxu0  ;;  %9313 = vmatmul.mubr.msk.f32.gmra.mrb[230].mxu0 %vm1893_vm0, %v276_v22  ;;  %v12226_v6 = vpop.permute.xlu1 %1380  ;;  %v534_v2 = vld [vmem:[%s14713_s2 + $0x708] sm:$0xff] }
 0x1da   :  { %v12228_v32 = vpack.c.bf16 %v4194_v60, %v4193_v25  ;;  %v3373_v21 = vadd.f32 %v3372_v39, %v11835_v12  ;;  %v12231_v58 = vpop.permute.xlu0 %1375  ;;  %1775 = vperm.xlu1 %9818, %v549_v23   ;;  %9315 = vmatprep.mubr.msk.f32.mxu0 %vm1893_vm0, %v277_v55  ;;  %v279_v60 = vld [vmem:[%s14715_s1 + $0x750] sm:$0xff]  ;;  %v550_v23 = vld [vmem:[%s14713_s2 + $0x788] sm:$0xff] }
 0x1db   :  { %v4196_v5 = vmax.f32 %v3378_v42, 0.0  ;;  %1695 = vperm.xlu0 %9817, %v533_v49  }
 0x1dc   :  { %14797 = vst [vmem:[#allocation56_spill] sm:$0xff] %v12228_v32  ;;  %v4195_v12 = vmax.f32 %v3373_v21, 0.0  ;;  %v9158_v22 = vpop.f32.mrb[126].mxu0  ;;  %v280_v21 = vld [vmem:[%s14715_s1 + $0x758] sm:$0xff] }
 0x1dd   :  { %v3388_v55 = vadd.f32 %v9158_v22, %v11852_v29  ;;  %v3382_v25 = vpop.f32.mrb[127].mxu0  ;;  %9316 = vmatmul.mubr.msk.f32.gmra.mrb[232].mxu0 %vm1893_vm0, %v278_v43  ;;  %v12248_v35 = vpop.permute.xlu1 %1390  ;;  %v552_v29 = vld [vmem:[%s14713_s2 + $0x798] sm:$0xff] }
 0x1de   :  { %v12250_v49 = vpack.c.bf16 %v4196_v5, %v4195_v12  ;;  %v3383_v42 = vadd.f32 %v3382_v25, %v11857_v52  ;;  %v12253_v39 = vpop.permute.xlu0 %1385  ;;  %1700 = vperm.xlu1 %9818, %v534_v2   ;;  %9318 = vmatprep.mubr.msk.f32.mxu0 %vm1893_vm0, %v279_v60  ;;  %v281_v5 = vld [vmem:[%s14715_s1 + $0x760] sm:$0xff]  ;;  %v551_v2 = vld [vmem:[%s14713_s2 + $0x790] sm:$0xff] }
 0x1df   :  { %v4198_v32 = vmax.f32 %v3388_v55, 0.0  ;;  %1780 = vperm.xlu0 %9817, %v550_v23  }
 0x1e0   :  { %14798 = vst [vmem:[#allocation57_spill] sm:$0xff] %v12250_v49  ;;  %v4197_v52 = vmax.f32 %v3383_v42, 0.0  ;;  %v9161_v43 = vpop.f32.mrb[128].mxu0  ;;  %v282_v42 = vld [vmem:[%s14715_s1 + $0x768] sm:$0xff] }
 0x1e1   :  { %v3398_v60 = vadd.f32 %v9161_v43, %v11874_v56  ;;  %v3392_v12 = vpop.f32.mrb[129].mxu0  ;;  %9319 = vmatmul.mubr.msk.f32.gmra.mrb[234].mxu0 %vm1893_vm0, %v280_v21  ;;  %v12270_v22 = vpop.permute.xlu1 %1400  ;;  %v536_v56 = vld [vmem:[%s14713_s2 + $0x718] sm:$0xff] }
 0x1e2   :  { %v12272_v23 = vpack.c.bf16 %v4198_v32, %v4197_v52  ;;  %v3393_v55 = vadd.f32 %v3392_v12, %v11879_v59  ;;  %v12275_v25 = vpop.permute.xlu0 %1395  ;;  %1790 = vperm.xlu1 %9818, %v552_v29   ;;  %9321 = vmatprep.mubr.msk.f32.mxu0 %vm1893_vm0, %v281_v5  ;;  %v283_v32 = vld [vmem:[%s14715_s1 + $0x770] sm:$0xff] }
 0x1e3   :  { %v4200_v49 = vmax.f32 %v3398_v60, 0.0  ;;  %1785 = vperm.xlu0 %9817, %v551_v2   ;;  %v535_v29 = vld [vmem:[%s14713_s2 + $0x710] sm:$0xff] }
 0x1e4   :  { %14799 = vst [vmem:[#allocation58_spill] sm:$0xff] %v12272_v23  ;;  %v4199_v59 = vmax.f32 %v3393_v55, 0.0  ;;  %v9164_v21 = vpop.f32.mrb[130].mxu0  ;;  %v284_v55 = vld [vmem:[%s14715_s1 + $0x778] sm:$0xff] }
 0x1e5   :  { %v3408_v5 = vadd.f32 %v9164_v21, %v11896_v34  ;;  %v3402_v52 = vpop.f32.mrb[131].mxu0  ;;  %9322 = vmatmul.mubr.msk.f32.gmra.mrb[236].mxu0 %vm1893_vm0, %v282_v42  ;;  %v12292_v43 = vpop.permute.xlu1 %1410  ;;  %v554_v34 = vld [vmem:[%s14713_s2 + $0x7a8] sm:$0xff] }
 0x1e6   :  { %v12294_v2 = vpack.c.bf16 %v4200_v49, %v4199_v59  ;;  %v3403_v60 = vadd.f32 %v3402_v52, %v11901_v37  ;;  %v12297_v12 = vpop.permute.xlu0 %1405  ;;  %1710 = vperm.xlu1 %9818, %v536_v56   ;;  %9324 = vmatprep.mubr.msk.f32.mxu0 %vm1893_vm0, %v283_v32  ;;  %v285_v49 = vld [vmem:[%s14715_s1 + $0x780] sm:$0xff] }
 0x1e7   :  { %v4202_v23 = vmax.f32 %v3408_v5, 0.0  ;;  %1705 = vperm.xlu0 %9817, %v535_v29   ;;  %v553_v56 = vld [vmem:[%s14713_s2 + $0x7a0] sm:$0xff] }
 0x1e8   :  { %14800 = vst [vmem:[#allocation59_spill] sm:$0xff] %v12294_v2  ;;  %v4201_v37 = vmax.f32 %v3403_v60, 0.0  ;;  %v9167_v42 = vpop.f32.mrb[132].mxu0  ;;  %v286_v60 = vld [vmem:[%s14715_s1 + $0x788] sm:$0xff] }
 0x1e9   :  { %v3418_v32 = vadd.f32 %v9167_v42, %v11918_v45  ;;  %v3412_v59 = vpop.f32.mrb[133].mxu0  ;;  %9325 = vmatmul.mubr.msk.f32.gmra.mrb[238].mxu0 %vm1893_vm0, %v284_v55  ;;  %v12314_v21 = vpop.permute.xlu1 %1420  ;;  %v538_v45 = vld [vmem:[%s14713_s2 + $0x728] sm:$0xff] }
 0x1ea   :  { %14801 = vst [vmem:[#allocation60_spill] sm:$0xff] %v12314_v21  ;;  %v12316_v29 = vpack.c.bf16 %v4202_v23, %v4201_v37  ;;  %v3413_v5 = vadd.f32 %v3412_v59, %v11923_v15  ;;  %v12319_v52 = vpop.permute.xlu0 %1415  ;;  %1800 = vperm.xlu1 %9818, %v554_v34   ;;  %9327 = vmatprep.mubr.msk.f32.mxu0 %vm1893_vm0, %v285_v49  ;;  %v287_v23 = vld [vmem:[%s14715_s1 + $0x790] sm:$0xff]  ;;  %v537_v34 = vld [vmem:[%s14713_s2 + $0x720] sm:$0xff] }
 0x1eb   :  { %14803 = vst [vmem:[#allocation62_spill] sm:$0xff] %v12319_v52  ;;  %v4204_v2 = vmax.f32 %v3418_v32, 0.0  ;;  %1795 = vperm.xlu0 %9817, %v553_v56  }
 0x1ec   :  { %14802 = vst [vmem:[#allocation61_spill] sm:$0xff] %v12316_v29  ;;  %v4203_v15 = vmax.f32 %v3413_v5, 0.0  ;;  %v9170_v55 = vpop.f32.mrb[134].mxu0  ;;  %v9381_v37 = vpop.f32.mrb[10].mxu1 }
 0x1ed   :  { %v3428_v49 = vadd.f32 %v9170_v55, %v11940_v13  ;;  %v4448_v42 = vadd.f32 %v9381_v37, %v11699_v10  ;;  %v3422_v56 = vpop.f32.mrb[135].mxu0  ;;  %9328 = vmatmul.mubr.msk.f32.gmra.mrb[240].mxu0 %vm1893_vm0, %v286_v60  ;;  %v4442_v32 = vpop.f32.mrb[11].mxu1  ;;  %v288_v10 = vld [vmem:[%s14715_s1 + $0x798] sm:$0xff] }
 0x1ee   :  { %v12337_v59 = vpack.c.bf16 %v4204_v2, %v4203_v15  ;;  %v3423_v29 = vadd.f32 %v3422_v56, %v11945_v51  ;;  %v4443_v5 = vadd.f32 %v4442_v32, %v11672_v0  ;;  %v12341_v52 = vpop.permute.xlu1 %1430  ;;  %v12343_v21 = vpop.permute.xlu0 %1425  ;;  %1720 = vperm.xlu1 %9818, %v538_v45   ;;  %9330 = vmatprep.mubr.msk.f32.mxu0 %vm1893_vm0, %v287_v23  ;;  %v556_v51 = vld [vmem:[%s14713_s2 + $0x7b8] sm:$0xff]  ;;  %v289_v0 = vld [vmem:[%s14715_s1 + $0x7a0] sm:$0xff]  ;;  %v555_v23 = vld [vmem:[%s14713_s2 + $0x7b0] sm:$0xff] }
 0x1ef   :  { %v4206_v13 = vmax.f32 %v3428_v49, 0.0  ;;  %v4462_v60 = vmax.f32 %v4448_v42, 0.0  ;;  %1715 = vperm.xlu0 %9817, %v537_v34  }
 0x1f0   :  { %14804 = vst [vmem:[#allocation63_spill] sm:$0xff] %v12337_v59  ;;  %v4205_v2 = vmax.f32 %v3423_v29, 0.0  ;;  %v4461_v15 = vmax.f32 %v4443_v5, 0.0  ;;  %v9173_v45 = vpop.f32.mrb[136].mxu0  ;;  %v9384_v55 = vpop.f32.mrb[12].mxu1 }
 0x1f1   :  { %v3438_v37 = vadd.f32 %v9173_v45, %v11962_v28  ;;  %v4458_v34 = vadd.f32 %v9384_v55, %v11725_v17  ;;  %v3432_v49 = vpop.f32.mrb[137].mxu0  ;;  %9331 = vmatmul.mubr.msk.f32.gmra.mrb[242].mxu0 %vm1893_vm0, %v288_v10  ;;  %v4452_v42 = vpop.f32.mrb[13].mxu1  ;;  %v290_v17 = vld [vmem:[%s14715_s1 + $0x7a8] sm:$0xff] }
 0x1f2   :  { %v12361_v56 = vpack.c.bf16 %v4206_v13, %v4205_v2  ;;  %v3433_v32 = vadd.f32 %v3432_v49, %v11967_v44  ;;  %v4453_v29 = vadd.f32 %v4452_v42, %v11694_v38  ;;  %v12365_v5 = vpop.permute.xlu1 %1440  ;;  %v12367_v59 = vpop.permute.xlu0 %1435  ;;  %1810 = vperm.xlu1 %9818, %v556_v51   ;;  %9333 = vmatprep.mubr.msk.f32.mxu0 %vm1893_vm0, %v289_v0  ;;  %v540_v44 = vld [vmem:[%s14713_s2 + $0x738] sm:$0xff]  ;;  %v539_v51 = vld [vmem:[%s14713_s2 + $0x730] sm:$0xff] }
 0x1f3   :  { %v4208_v28 = vmax.f32 %v3438_v37, 0.0  ;;  %v4464_v10 = vmax.f32 %v4458_v34, 0.0  ;;  %1805 = vperm.xlu0 %9817, %v555_v23   ;;  %v9420_v13 = vpack.c.bf16 %v4462_v60, %v4461_v15  ;;  %v291_v0 = vld [vmem:[%s14715_s1 + $0x7b0] sm:$0xff]  ;;  %v292_v42 = vld [vmem:[%s14715_s1 + $0x7b8] sm:$0xff] }
 0x1f4   :  { %v4207_v38 = vmax.f32 %v3433_v32, 0.0  ;;  %v4463_v2 = vmax.f32 %v4453_v29, 0.0  ;;  %v9176_v45 = vpop.f32.mrb[138].mxu0  ;;  %v558_v32 = vld [vmem:[%s14713_s2 + $0x7c8] sm:$0xff] }
 0x1f5   :  { %v3448_v55 = vadd.f32 %v9176_v45, %v11984_v7  ;;  %9421 = vmatprep.subr.bf16.mxu1 %v9420_v13  ;;  %v3442_v23 = vpop.f32.mrb[139].mxu0  ;;  %9334 = vmatmul.mubr.msk.f32.gmra.mrb[244].mxu0 %vm1893_vm0, %v290_v17  ;;  %v557_v17 = vld [vmem:[%s14713_s2 + $0x7c0] sm:$0xff] }
 0x1f6   :  { %v12384_v60 = vpack.c.bf16 %v4208_v28, %v4207_v38  ;;  %v3443_v15 = vadd.f32 %v3442_v23, %v11989_v33  ;;  %9423 = vmatpush3.bf16.msra.mxu1 %v9420_v13  ;;  %v12387_v37 = vpop.permute.xlu1 %1450  ;;  %v12389_v34 = vpop.permute.xlu0 %1445  ;;  %1730 = vperm.xlu1 %9818, %v540_v44   ;;  %v9424_v49 = vpack.c.bf16 %v4464_v10, %v4463_v2  ;;  %v293_v13 = vld [vmem:[%s14715_s1 + $0x7c0] sm:$0xff] }
 0x1f7   :  { %v4210_v7 = vmax.f32 %v3448_v55, 0.0  ;;  %1725 = vperm.xlu0 %9817, %v539_v51   ;;  %9336 = vmatprep.mubr.msk.f32.mxu0 %vm1893_vm0, %v291_v0  ;;  %v294_v51 = vld [vmem:[%s14715_s1 + $0x7c8] sm:$0xff] }
 0x1f8   :  { %v4209_v33 = vmax.f32 %v3443_v15, 0.0  ;;  %v9179_v29 = vpop.f32.mrb[140].mxu0  ;;  %9425 = vmatprep.subr.bf16.mxu1 %v9424_v49  ;;  %v541_v15 = vld [vmem:[%s14713_s2 + $0x740] sm:$0xff] }
 0x1f9   :  { %v3458_v28 = vadd.f32 %v9179_v29, %v12006_v20  ;;  %v3452_v10 = vpop.f32.mrb[141].mxu0  ;;  %9337 = vmatmul.mubr.msk.f32.gmra.mrb[246].mxu0 %vm1893_vm0, %v292_v42  ;;  %v4466_v20 = vld [vmem:[%s14718_s5 + $0x8] sm:$0xff]  ;;  %v14806_v29 = vld [vmem:[#allocation4_spill] sm:$0xff] }
 0x1fa   :  { %v12406_v44 = vpack.c.bf16 %v4210_v7, %v4209_v33  ;;  %v3453_v38 = vadd.f32 %v3452_v10, %v12011_v50  ;;  %9427 = vmatpush3.bf16.msra.mxu1 %v9424_v49  ;;  %v12409_v2 = vpop.permute.xlu1 %1460  ;;  %v12411_v45 = vpop.permute.xlu0 %1455  ;;  %1820 = vperm.xlu1 %9818, %v558_v32   ;;  %v542_v50 = vld [vmem:[%s14713_s2 + $0x748] sm:$0xff] }
 0x1fb   :  { %v4212_v0 = vmax.f32 %v3458_v28, 0.0  ;;  %9429 = vmatprep.subr.bf16.mxu1 %v11050_v53  ;;  %1815 = vperm.xlu0 %9817, %v557_v17   ;;  %v295_v53 = vld [vmem:[%s14715_s1 + $0x7d0] sm:$0xff]  ;;  %v4586_v7 = vld [vmem:[%s14719_s7 + $0x8] sm:$0xff]  ;;  %v296_v28 = vld [vmem:[%s14715_s1 + $0x7d8] sm:$0xff] }
 0x1fc   :  { %v4211_v55 = vmax.f32 %v3453_v38, 0.0  ;;  %v9182_v23 = vpop.f32.mrb[142].mxu0  ;;  %9339 = vmatprep.mubr.msk.f32.mxu0 %vm1893_vm0, %v293_v13  ;;  %v560_v13 = vld [vmem:[%s14713_s2 + $0x7d8] sm:$0xff] }
 0x1fd   :  { %v3468_v49 = vadd.f32 %v9182_v23, %v12028_v11  ;;  %9394 = vmatmul.mubr.msk.f32.vlgmr.msra.gmra.mrb[14].mxu1 %vm1893_vm0, %v4466_v20  ;;  %v3462_v42 = vpop.f32.mrb[143].mxu0  ;;  %9340 = vmatmul.mubr.msk.f32.gmra.mrb[248].mxu0 %vm1893_vm0, %v294_v51  ;;  %v559_v20 = vld [vmem:[%s14713_s2 + $0x7d0] sm:$0xff]  ;;  %v14808_v23 = vld [vmem:[#allocation7_spill] sm:$0xff] }
 0x1fe   :  { %v12436_v32 = vpack.c.bf16 %v4212_v0, %v4211_v55  ;;  %v3463_v33 = vadd.f32 %v3462_v42, %v12033_v18  ;;  %9431 = vmatpush3.bf16.msra.mxu1 %v14806_v29  ;;  %v12440_v11 = vpop.permute.xlu1 %1470  ;;  %v12442_v17 = vpop.permute.xlu0 %1465  ;;  %1740 = vperm.xlu1 %9818, %v542_v50  }
 0x1ff   :  { %v4214_v10 = vmax.f32 %v3468_v49, 0.0  ;;  %9433 = vmatprep.subr.bf16.mxu1 %v11070_v9  ;;  %1735 = vperm.xlu0 %9817, %v541_v15   ;;  %v297_v9 = vld [vmem:[%s14715_s1 + $0x7e0] sm:$0xff] }
 0x200   :  { %14805 = vst [vmem:[#allocation64_spill] sm:$0xff] %v12436_v32  ;;  %v4213_v18 = vmax.f32 %v3463_v33, 0.0  ;;  %v9185_v38 = vpop.f32.mrb[144].mxu0  ;;  %9342 = vmatprep.mubr.msk.f32.mxu0 %vm1893_vm0, %v295_v53  ;;  %4777 = vmatprep.mubr.f32.mxu1 %v4586_v7  ;;  %v544_v53 = vld [vmem:[%s14713_s2 + $0x758] sm:$0xff]  ;;  %v543_v33 = vld [vmem:[%s14713_s2 + $0x750] sm:$0xff]  ;;  %v14879_v32 = vld [vmem:[#allocation3_spill] sm:$0xff] }
 0x201   :  { %v3478_v51 = vadd.f32 %v9185_v38, %v12050_v26  ;;  %v3472_v0 = vpop.f32.mrb[145].mxu0  ;;  %9343 = vmatmul.mubr.msk.f32.gmra.mrb[250].mxu0 %vm1893_vm0, %v296_v28  ;;  %v298_v26 = vld [vmem:[%s14715_s1 + $0x7e8] sm:$0xff] }
 0x202   :  { %v12460_v50 = vpack.c.bf16 %v4214_v10, %v4213_v18  ;;  %v3473_v55 = vadd.f32 %v3472_v0, %v12055_v31  ;;  %9435 = vmatpush3.bf16.msra.mxu1 %v14808_v23  ;;  %v12464_v15 = vpop.permute.xlu1 %1480  ;;  %v12466_v49 = vpop.permute.xlu0 %1475  ;;  %1830 = vperm.xlu1 %9818, %v560_v13   ;;  %v14809_v13 = vld [vmem:[#allocation10_spill] sm:$0xff] }
 0x203   :  { %v4216_v42 = vmax.f32 %v3478_v51, 0.0  ;;  %9437 = vmatprep.subr.bf16.mxu1 %v11090_v1  ;;  %1825 = vperm.xlu0 %9817, %v559_v20  }
 0x204   :  { %14807 = vst [vmem:[#allocation4_spill] sm:$0xff] %v12460_v50  ;;  %v4215_v31 = vmax.f32 %v3473_v55, 0.0  ;;  %v9188_v7 = vpop.f32.mrb[146].mxu0  ;;  %9345 = vmatprep.mubr.msk.f32.mxu0 %vm1893_vm0, %v297_v9  ;;  %v14878_v50 = vld [vmem:[#allocation2_spill] sm:$0xff] }
 0x205   :  { %v3488_v29 = vadd.f32 %v9188_v7, %v12072_v63  ;;  %v3482_v28 = vpop.f32.mrb[147].mxu0  ;;  %9346 = vmatmul.mubr.msk.f32.gmra.mrb[252].mxu0 %vm1893_vm0, %v298_v26  ;;  %v562_v63 = vld [vmem:[%s14713_s2 + $0x7e8] sm:$0xff] }
 0x206   :  { %v12481_v10 = vpack.c.bf16 %v4216_v42, %v4215_v31  ;;  %v3483_v1 = vadd.f32 %v3482_v28, %v12077_v41  ;;  %9439 = vmatpush3.bf16.msra.mxu1 %v14809_v13  ;;  %v12485_v18 = vpop.permute.xlu1 %1490  ;;  %v12487_v38 = vpop.permute.xlu0 %1485  ;;  %1750 = vperm.xlu1 %9818, %v544_v53   ;;  %v561_v41 = vld [vmem:[%s14713_s2 + $0x7e0] sm:$0xff]  ;;  %v14810_v42 = vld [vmem:[#allocation13_spill] sm:$0xff] }
 0x207   :  { %v4218_v20 = vmax.f32 %v3488_v29, 0.0  ;;  %9441 = vmatprep.subr.bf16.mxu1 %v11112_v54  ;;  %1745 = vperm.xlu0 %9817, %v543_v33  }
 0x208   :  { %v4217_v51 = vmax.f32 %v3483_v1, 0.0  ;;  %v9191_v0 = vpop.f32.mrb[148].mxu0 }
 0x209   :  { %v3498_v9 = vadd.f32 %v9191_v0, %v12094_v47  ;;  %v3492_v55 = vpop.f32.mrb[149].mxu0  ;;  %v546_v47 = vld [vmem:[%s14713_s2 + $0x768] sm:$0xff] }
 0x20a   :  { %v12497_v23 = vpack.c.bf16 %v4218_v20, %v4217_v51  ;;  %v3493_v26 = vadd.f32 %v3492_v55, %v12099_v24  ;;  %9443 = vmatpush3.bf16.msra.mxu1 %v14810_v42  ;;  %v12501_v54 = vpop.permute.xlu1 %1500  ;;  %v12503_v53 = vpop.permute.xlu0 %1495  ;;  %1840 = vperm.xlu1 %9818, %v562_v63   ;;  %v545_v24 = vld [vmem:[%s14713_s2 + $0x760] sm:$0xff]  ;;  %v14811_v20 = vld [vmem:[#allocation15_spill] sm:$0xff] }
 0x20b   :  { %v4220_v31 = vmax.f32 %v3498_v9, 0.0  ;;  %9445 = vmatprep.subr.bf16.mxu1 %v11134_v61  ;;  %1835 = vperm.xlu0 %9817, %v561_v41  }
 0x20c   :  { %v4219_v7 = vmax.f32 %v3493_v26, 0.0  ;;  %v9194_v33 = vpop.f32.mrb[150].mxu0 }
 0x20d   :  { %v3508_v29 = vadd.f32 %v9194_v33, %v12116_v36  ;;  %v3502_v28 = vpop.f32.mrb[151].mxu0  ;;  %v564_v36 = vld [vmem:[%s14713_s2 + $0x7f8] sm:$0xff] }
 0x20e   :  { %v12513_v1 = vpack.c.bf16 %v4220_v31, %v4219_v7  ;;  %v3503_v13 = vadd.f32 %v3502_v28, %v12121_v27  ;;  %9447 = vmatpush3.bf16.msra.mxu1 %v14811_v20  ;;  %v12517_v61 = vpop.permute.xlu1 %1510  ;;  %v12519_v63 = vpop.permute.xlu0 %1505  ;;  %1760 = vperm.xlu1 %9818, %v546_v47   ;;  %v563_v27 = vld [vmem:[%s14713_s2 + $0x7f0] sm:$0xff] }
 0x20f   :  { %v4222_v51 = vmax.f32 %v3508_v29, 0.0  ;;  %9449 = vmatprep.subr.bf16.mxu1 %v11163_v40  ;;  %1755 = vperm.xlu0 %9817, %v545_v24   ;;  %v14812_v31 = vld [vmem:[#allocation16_spill] sm:$0xff] }
 0x210   :  { %v4221_v0 = vmax.f32 %v3503_v13, 0.0  ;;  %v9197_v41 = vpop.f32.mrb[152].mxu0 }
 0x211   :  { %v3518_v9 = vadd.f32 %v9197_v41, %v12138_v3  ;;  %v3512_v55 = vpop.f32.mrb[153].mxu0  ;;  %v548_v3 = vld [vmem:[%s14713_s2 + $0x778] sm:$0xff] }
 0x212   :  { %v12529_v26 = vpack.c.bf16 %v4222_v51, %v4221_v0  ;;  %v3513_v42 = vadd.f32 %v3512_v55, %v12143_v30  ;;  %9451 = vmatpush3.bf16.msra.mxu1 %v14812_v31  ;;  %v12533_v40 = vpop.permute.xlu1 %1520  ;;  %v12535_v47 = vpop.permute.xlu0 %1515  ;;  %1850 = vperm.xlu1 %9818, %v564_v36   ;;  %v547_v30 = vld [vmem:[%s14713_s2 + $0x770] sm:$0xff]  ;;  %v14813_v51 = vld [vmem:[#allocation17_spill] sm:$0xff] }
 0x213   :  { %v4224_v7 = vmax.f32 %v3518_v9, 0.0  ;;  %9453 = vmatprep.subr.bf16.mxu1 %v11190_v8  ;;  %1845 = vperm.xlu0 %9817, %v563_v27  }
 0x214   :  { %v4223_v33 = vmax.f32 %v3513_v42, 0.0  ;;  %v9200_v24 = vpop.f32.mrb[154].mxu0 }
 0x215   :  { %v3528_v29 = vadd.f32 %v9200_v24, %v12160_v62  ;;  %v3522_v28 = vpop.f32.mrb[155].mxu0  ;;  %v4468_v62 = vld [vmem:[%s14720_s6 + $0x8] sm:$0xff] }
 0x216   :  { %v12545_v13 = vpack.c.bf16 %v4224_v7, %v4223_v33  ;;  %v3523_v20 = vadd.f32 %v3522_v28, %v12165_v16  ;;  %9455 = vmatpush3.bf16.msra.mxu1 %v14813_v51  ;;  %v12549_v8 = vpop.permute.xlu1 %1530  ;;  %v12551_v36 = vpop.permute.xlu0 %1525  ;;  %1770 = vperm.xlu1 %9818, %v548_v3   ;;  %v4467_v16 = vld [vmem:[%s14720_s6] sm:$0xff]  ;;  %v14814_v24 = vld [vmem:[#allocation27_spill] sm:$0xff] }
 0x217   :  { %v4226_v0 = vmax.f32 %v3528_v29, 0.0  ;;  %9457 = vmatprep.subr.bf16.mxu1 %v11212_v19  ;;  %1765 = vperm.xlu0 %9817, %v547_v30   ;;  %v4585_v3 = vld [vmem:[%s14719_s7] sm:$0xff] }
 0x218   :  { %v4225_v41 = vmax.f32 %v3523_v20, 0.0  ;;  %v9203_v27 = vpop.f32.mrb[156].mxu0  ;;  %v4588_v20 = vld [vmem:[%s14719_s7 + $0x18] sm:$0xff] }
 0x219   :  { %v3538_v9 = vadd.f32 %v9203_v27, %v12182_v48  ;;  %v3532_v55 = vpop.f32.mrb[157].mxu0  ;;  %v4618_v48 = vld [vmem:[%s14721_s8 + $0x8] sm:$0xff] }
 0x21a   :  { %v12561_v42 = vpack.c.bf16 %v4226_v0, %v4225_v41  ;;  %v3533_v31 = vadd.f32 %v3532_v55, %v12187_v14  ;;  %9459 = vmatpush3.bf16.msra.mxu1 %v11030_v46  ;;  %v12565_v19 = vpop.permute.xlu1 %1540  ;;  %v12567_v7 = vpop.permute.xlu0 %1535  ;;  %4476 = vperm.xlu1 %9818, %v4468_v62   ;;  %v4617_v46 = vld [vmem:[%s14721_s8] sm:$0xff]  ;;  %v14816_v62 = vld [vmem:[#allocation19_spill] sm:$0xff]  ;;  %v4620_v55 = vld [vmem:[%s14721_s8 + $0x18] sm:$0xff] }
 0x21b   :  { %v4228_v33 = vmax.f32 %v3538_v9, 0.0  ;;  %9461 = vmatprep.subr.bf16.mxu1 %v14814_v24  ;;  %4471 = vperm.xlu0 %9817, %v4467_v16   ;;  %v14817_v9 = vld [vmem:[#allocation5_spill] sm:$0xff] }
 0x21c   :  { %v4227_v14 = vmax.f32 %v3533_v31, 0.0  ;;  %v9206_v30 = vpop.f32.mrb[158].mxu0 }
 0x21d   :  { %v3548_v29 = vadd.f32 %v9206_v30, %v12204_v57  ;;  %4778 = vmatmul.mubr.f32.vlgmr.msra.gmra.mrb[16].mxu1 %v4585_v3  ;;  %v3542_v28 = vpop.f32.mrb[159].mxu0  ;;  %v4587_v57 = vld [vmem:[%s14719_s7 + $0x10] sm:$0xff] }
 0x21e   :  { %v12583_v51 = vpack.c.bf16 %v4228_v33, %v4227_v14  ;;  %v3543_v0 = vadd.f32 %v3542_v28, %v12209_v4  ;;  %9463 = vmatpush3.bf16.msra.mxu1 %v14816_v62  ;;  %v12587_v41 = vpop.permute.xlu1 %1550  ;;  %v12589_v27 = vpop.permute.xlu0 %1545  ;;  %4640 = vperm.xlu1 %9818, %v4618_v48   ;;  %v4619_v3 = vld [vmem:[%s14721_s8 + $0x10] sm:$0xff]  ;;  %v4590_v48 = vld [vmem:[%s14719_s7 + $0x28] sm:$0xff] }
 0x21f   :  { %v4230_v16 = vmax.f32 %v3548_v29, 0.0  ;;  %9465 = vmatprep.subr.bf16.mxu1 %v14817_v9  ;;  %4635 = vperm.xlu0 %9817, %v4617_v46   ;;  %v14819_v46 = vld [vmem:[#allocation20_spill] sm:$0xff]  ;;  %v4622_v62 = vld [vmem:[%s14721_s8 + $0x28] sm:$0xff] }
 0x220   :  { %14815 = vst [vmem:[#allocation7_spill] sm:$0xff] %v12583_v51  ;;  %v4229_v4 = vmax.f32 %v3543_v0, 0.0  ;;  %4782 = vmatprep.mubr.f32.mxu1 %v4588_v20  ;;  %v9209_v31 = vpop.f32.mrb[160].mxu0  ;;  %v14820_v0 = vld [vmem:[#allocation6_spill] sm:$0xff] }
 0x221   :  { %v3558_v33 = vadd.f32 %v9209_v31, %v12226_v6  ;;  %4783 = vmatmul.mubr.f32.gmra.mrb[18].mxu1 %v4587_v57  ;;  %v3552_v24 = vpop.f32.mrb[161].mxu0  ;;  %v4589_v6 = vld [vmem:[%s14719_s7 + $0x20] sm:$0xff] }
 0x222   :  { %v12605_v14 = vpack.c.bf16 %v4230_v16, %v4229_v4  ;;  %v3553_v30 = vadd.f32 %v3552_v24, %v12231_v58  ;;  %9467 = vmatpush3.bf16.msra.mxu1 %v14819_v46  ;;  %v12609_v29 = vpop.permute.xlu1 %1560  ;;  %v12611_v28 = vpop.permute.xlu0 %1555  ;;  %4650 = vperm.xlu1 %9818, %v4620_v55   ;;  %v4621_v16 = vld [vmem:[%s14721_s8 + $0x20] sm:$0xff]  ;;  %v4592_v4 = vld [vmem:[%s14719_s7 + $0x38] sm:$0xff]  ;;  %v14823_v46 = vld [vmem:[#allocation8_spill] sm:$0xff] }
 0x223   :  { %v4232_v20 = vmax.f32 %v3558_v33, 0.0  ;;  %9469 = vmatprep.subr.bf16.mxu1 %v14820_v0  ;;  %4645 = vperm.xlu0 %9817, %v4619_v3   ;;  %v14822_v33 = vld [vmem:[#allocation21_spill] sm:$0xff]  ;;  %v4623_v0 = vld [vmem:[%s14721_s8 + $0x30] sm:$0xff] }
 0x224   :  { %14818 = vst [vmem:[#allocation10_spill] sm:$0xff] %v12605_v14  ;;  %v4231_v58 = vmax.f32 %v3553_v30, 0.0  ;;  %4787 = vmatprep.mubr.f32.mxu1 %v4590_v48  ;;  %v9212_v57 = vpop.f32.mrb[162].mxu0 }
 0x225   :  { %v3568_v9 = vadd.f32 %v9212_v57, %v12248_v35  ;;  %4788 = vmatmul.mubr.f32.gmra.mrb[20].mxu1 %v4589_v6  ;;  %v3562_v55 = vpop.f32.mrb[163].mxu0  ;;  %v4591_v35 = vld [vmem:[%s14719_s7 + $0x30] sm:$0xff]  ;;  %v4624_v6 = vld [vmem:[%s14721_s8 + $0x38] sm:$0xff]  ;;  %v4594_v57 = vld [vmem:[%s14719_s7 + $0x48] sm:$0xff] }
 0x226   :  { %v12627_v31 = vpack.c.bf16 %v4232_v20, %v4231_v58  ;;  %v3563_v3 = vadd.f32 %v3562_v55, %v12253_v39  ;;  %9471 = vmatpush3.bf16.msra.mxu1 %v14822_v33  ;;  %v12631_v24 = vpop.permute.xlu1 %1570  ;;  %v12633_v48 = vpop.permute.xlu0 %1565  ;;  %4660 = vperm.xlu1 %9818, %v4622_v62   ;;  %v14825_v55 = vld [vmem:[#allocation22_spill] sm:$0xff] }
 0x227   :  { %v4234_v30 = vmax.f32 %v3568_v9, 0.0  ;;  %9473 = vmatprep.subr.bf16.mxu1 %v14823_v46  ;;  %4655 = vperm.xlu0 %9817, %v4621_v16  }
 0x228   :  { %14821 = vst [vmem:[#allocation13_spill] sm:$0xff] %v12627_v31  ;;  %v4233_v39 = vmax.f32 %v3563_v3, 0.0  ;;  %4792 = vmatprep.mubr.f32.mxu1 %v4592_v4  ;;  %v9215_v20 = vpop.f32.mrb[164].mxu0 }
 0x229   :  { %v3578_v62 = vadd.f32 %v9215_v20, %v12270_v22  ;;  %4793 = vmatmul.mubr.f32.gmra.mrb[22].mxu1 %v4591_v35  ;;  %v3572_v58 = vpop.f32.mrb[165].mxu0  ;;  %v4593_v22 = vld [vmem:[%s14719_s7 + $0x40] sm:$0xff]  ;;  %v14826_v35 = vld [vmem:[#allocation9_spill] sm:$0xff] }
 0x22a   :  { %v12649_v16 = vpack.c.bf16 %v4234_v30, %v4233_v39  ;;  %v3573_v9 = vadd.f32 %v3572_v58, %v12275_v25  ;;  %9475 = vmatpush3.bf16.msra.mxu1 %v14825_v55  ;;  %v12653_v4 = vpop.permute.xlu1 %1580  ;;  %v12655_v3 = vpop.permute.xlu0 %1575  ;;  %4670 = vperm.xlu1 %9818, %v4624_v6   ;;  %v4626_v30 = vld [vmem:[%s14721_s8 + $0x48] sm:$0xff]  ;;  %v4625_v39 = vld [vmem:[%s14721_s8 + $0x40] sm:$0xff] }
 0x22b   :  { %v4236_v33 = vmax.f32 %v3578_v62, 0.0  ;;  %9477 = vmatprep.subr.bf16.mxu1 %v14826_v35  ;;  %4665 = vperm.xlu0 %9817, %v4623_v0   ;;  %v4596_v62 = vld [vmem:[%s14719_s7 + $0x58] sm:$0xff]  ;;  %v14828_v55 = vld [vmem:[#allocation23_spill] sm:$0xff] }
 0x22c   :  { %14824 = vst [vmem:[#allocation15_spill] sm:$0xff] %v12649_v16  ;;  %v4235_v25 = vmax.f32 %v3573_v9, 0.0  ;;  %4797 = vmatprep.mubr.f32.mxu1 %v4594_v57  ;;  %v9218_v46 = vpop.f32.mrb[166].mxu0  ;;  %v14829_v35 = vld [vmem:[#allocation11_spill] sm:$0xff]  ;;  %v14833_v16 = vld [vmem:[#allocation24_spill] sm:$0xff] }
 0x22d   :  { %v3588_v6 = vadd.f32 %v9218_v46, %v12292_v43  ;;  %4798 = vmatmul.mubr.f32.gmra.mrb[24].mxu1 %v4593_v22  ;;  %v3582_v20 = vpop.f32.mrb[167].mxu0  ;;  %v4595_v43 = vld [vmem:[%s14719_s7 + $0x50] sm:$0xff] }
 0x22e   :  { %v12671_v0 = vpack.c.bf16 %v4236_v33, %v4235_v25  ;;  %v3583_v58 = vadd.f32 %v3582_v20, %v12297_v12  ;;  %9479 = vmatpush3.bf16.msra.mxu1 %v14828_v55  ;;  %v12675_v57 = vpop.permute.xlu1 %1590  ;;  %v12677_v9 = vpop.permute.xlu0 %1585  ;;  %4680 = vperm.xlu1 %9818, %v4626_v30   ;;  %v4628_v33 = vld [vmem:[%s14721_s8 + $0x58] sm:$0xff]  ;;  %v4627_v46 = vld [vmem:[%s14721_s8 + $0x50] sm:$0xff] }
 0x22f   :  { %v4238_v22 = vmax.f32 %v3588_v6, 0.0  ;;  %9481 = vmatprep.subr.bf16.mxu1 %v14829_v35  ;;  %4675 = vperm.xlu0 %9817, %v4625_v39   ;;  %v14830_v30 = vld [vmem:[#allocation60_spill] sm:$0xff]  ;;  %v4598_v6 = vld [vmem:[%s14719_s7 + $0x68] sm:$0xff]  ;;  %v14832_v35 = vld [vmem:[#allocation62_spill] sm:$0xff] }
 0x230   :  { %14827 = vst [vmem:[#allocation16_spill] sm:$0xff] %v12671_v0  ;;  %v4237_v12 = vmax.f32 %v3583_v58, 0.0  ;;  %4802 = vmatprep.mubr.f32.mxu1 %v4596_v62  ;;  %v9221_v25 = vpop.f32.mrb[168].mxu0 }
 0x231   :  { %v3598_v20 = vadd.f32 %v9221_v25, %v14830_v30  ;;  %4803 = vmatmul.mubr.f32.gmra.mrb[26].mxu1 %v4595_v43  ;;  %v3592_v55 = vpop.f32.mrb[169].mxu0  ;;  %v4597_v43 = vld [vmem:[%s14719_s7 + $0x60] sm:$0xff]  ;;  %v14834_v30 = vld [vmem:[#allocation12_spill] sm:$0xff] }
 0x232   :  { %v12693_v39 = vpack.c.bf16 %v4238_v22, %v4237_v12  ;;  %v3593_v0 = vadd.f32 %v3592_v55, %v14832_v35  ;;  %9483 = vmatpush3.bf16.msra.mxu1 %v14833_v16  ;;  %v12697_v62 = vpop.permute.xlu1 %1600  ;;  %v12699_v58 = vpop.permute.xlu0 %1595  ;;  %4690 = vperm.xlu1 %9818, %v4628_v33   ;;  %v4630_v22 = vld [vmem:[%s14721_s8 + $0x68] sm:$0xff]  ;;  %v4629_v55 = vld [vmem:[%s14721_s8 + $0x60] sm:$0xff] }
 0x233   :  { %v4240_v25 = vmax.f32 %v3598_v20, 0.0  ;;  %9485 = vmatprep.subr.bf16.mxu1 %v14834_v30  ;;  %4685 = vperm.xlu0 %9817, %v4627_v46   ;;  %v4600_v20 = vld [vmem:[%s14719_s7 + $0x78] sm:$0xff] }
 0x234   :  { %14831 = vst [vmem:[#allocation17_spill] sm:$0xff] %v12693_v39  ;;  %v4239_v12 = vmax.f32 %v3593_v0, 0.0  ;;  %4807 = vmatprep.mubr.f32.mxu1 %v4598_v6  ;;  %v9224_v16 = vpop.f32.mrb[170].mxu0  ;;  %v14836_v39 = vld [vmem:[#allocation25_spill] sm:$0xff] }
 0x235   :  { %v3608_v33 = vadd.f32 %v9224_v16, %v12341_v52  ;;  %4808 = vmatmul.mubr.f32.gmra.mrb[28].mxu1 %v4597_v43  ;;  %v3602_v35 = vpop.f32.mrb[171].mxu0  ;;  %v4599_v52 = vld [vmem:[%s14719_s7 + $0x70] sm:$0xff]  ;;  %v14837_v16 = vld [vmem:[#allocation14_spill] sm:$0xff] }
 0x236   :  { %v12715_v46 = vpack.c.bf16 %v4240_v25, %v4239_v12  ;;  %v3603_v30 = vadd.f32 %v3602_v35, %v12343_v21  ;;  %9487 = vmatpush3.bf16.msra.mxu1 %v14836_v39  ;;  %v12719_v0 = vpop.permute.xlu1 %1610  ;;  %v12721_v6 = vpop.permute.xlu0 %1605  ;;  %4700 = vperm.xlu1 %9818, %v4630_v22   ;;  %v4632_v25 = vld [vmem:[%s14721_s8 + $0x78] sm:$0xff]  ;;  %v4631_v12 = vld [vmem:[%s14721_s8 + $0x70] sm:$0xff] }
 0x237   :  { %v4242_v43 = vmax.f32 %v3608_v33, 0.0  ;;  %9489 = vmatprep.subr.bf16.mxu1 %v14837_v16  ;;  %4695 = vperm.xlu0 %9817, %v4629_v55   ;;  %v4602_v33 = vld [vmem:[%s14719_s7 + $0x88] sm:$0xff] }
 0x238   :  { %14835 = vst [vmem:[#allocation27_spill] sm:$0xff] %v12715_v46  ;;  %v4241_v21 = vmax.f32 %v3603_v30, 0.0  ;;  %4812 = vmatprep.mubr.f32.mxu1 %v4600_v20  ;;  %v9227_v39 = vpop.f32.mrb[172].mxu0  ;;  %v14839_v46 = vld [vmem:[#allocation26_spill] sm:$0xff] }
 0x239   :  { %v3618_v22 = vadd.f32 %v9227_v39, %v12365_v5  ;;  %4813 = vmatmul.mubr.f32.gmra.mrb[30].mxu1 %v4599_v52  ;;  %v3612_v35 = vpop.f32.mrb[173].mxu0  ;;  %v4601_v5 = vld [vmem:[%s14719_s7 + $0x80] sm:$0xff]  ;;  %v14840_v39 = vld [vmem:[#allocation35_spill] sm:$0xff] }
 0x23a   :  { %v12737_v55 = vpack.c.bf16 %v4242_v43, %v4241_v21  ;;  %v3613_v16 = vadd.f32 %v3612_v35, %v12367_v59  ;;  %9491 = vmatpush3.bf16.msra.mxu1 %v14839_v46  ;;  %v12741_v20 = vpop.permute.xlu1 %1620  ;;  %v12743_v30 = vpop.permute.xlu0 %1615  ;;  %4710 = vperm.xlu1 %9818, %v4632_v25   ;;  %v7578_v43 = vld [vmem:[%s14721_s8 + $0x88] sm:$0xff]  ;;  %v4604_v59 = vld [vmem:[%s14719_s7 + $0x98] sm:$0xff]  ;;  %v7577_v25 = vld [vmem:[%s14721_s8 + $0x80] sm:$0xff] }
 0x23b   :  { %v4244_v52 = vmax.f32 %v3618_v22, 0.0  ;;  %9493 = vmatprep.subr.bf16.mxu1 %v14840_v39  ;;  %4705 = vperm.xlu0 %9817, %v4631_v12  }
 0x23c   :  { %14838 = vst [vmem:[#allocation19_spill] sm:$0xff] %v12737_v55  ;;  %v4243_v46 = vmax.f32 %v3613_v16, 0.0  ;;  %4817 = vmatprep.mubr.f32.mxu1 %v4602_v33  ;;  %v9230_v21 = vpop.f32.mrb[174].mxu0  ;;  %v4603_v33 = vld [vmem:[%s14719_s7 + $0x90] sm:$0xff] }
 0x23d   :  { %v3628_v22 = vadd.f32 %v9230_v21, %v12387_v37  ;;  %4818 = vmatmul.mubr.f32.gmra.mrb[32].mxu1 %v4601_v5  ;;  %v3622_v35 = vpop.f32.mrb[175].mxu0  ;;  %v7580_v37 = vld [vmem:[%s14721_s8 + $0x98] sm:$0xff] }
 0x23e   :  { %v12759_v12 = vpack.c.bf16 %v4244_v52, %v4243_v46  ;;  %v3623_v39 = vadd.f32 %v3622_v35, %v12389_v34  ;;  %v12762_v55 = vpop.permute.xlu1 %1630  ;;  %v12764_v31 = vpop.permute.xlu0 %1625  ;;  %4931 = vperm.xlu1 %9818, %v7578_v43   ;;  %4822 = vmatprep.mubr.f32.mxu1 %v4604_v59  ;;  %v4606_v34 = vld [vmem:[%s14719_s7 + $0xa8] sm:$0xff]  ;;  %v7579_v43 = vld [vmem:[%s14721_s8 + $0x90] sm:$0xff] }
 0x23f   :  { %v4246_v16 = vmax.f32 %v3628_v22, 0.0  ;;  %4926 = vperm.xlu0 %9817, %v7577_v25  }
 0x240   :  { %14841 = vst [vmem:[#allocation5_spill] sm:$0xff] %v12759_v12  ;;  %v4245_v5 = vmax.f32 %v3623_v39, 0.0  ;;  %v9233_v52 = vpop.f32.mrb[176].mxu0  ;;  %v4605_v39 = vld [vmem:[%s14719_s7 + $0xa0] sm:$0xff] }
 0x241   :  { %v3638_v59 = vadd.f32 %v9233_v52, %v12409_v2  ;;  %4823 = vmatmul.mubr.f32.gmra.mrb[34].mxu1 %v4603_v33  ;;  %v3632_v46 = vpop.f32.mrb[177].mxu0  ;;  %v7582_v2 = vld [vmem:[%s14721_s8 + $0xa8] sm:$0xff] }
 0x242   :  { %v12779_v21 = vpack.c.bf16 %v4246_v16, %v4245_v5  ;;  %v3633_v25 = vadd.f32 %v3632_v46, %v12411_v45  ;;  %v12782_v22 = vpop.permute.xlu1 %1640  ;;  %v12784_v35 = vpop.permute.xlu0 %1635  ;;  %4941 = vperm.xlu1 %9818, %v7580_v37   ;;  %4827 = vmatprep.mubr.f32.mxu1 %v4606_v34  ;;  %v4608_v45 = vld [vmem:[%s14719_s7 + $0xb8] sm:$0xff]  ;;  %v7581_v37 = vld [vmem:[%s14721_s8 + $0xa0] sm:$0xff] }
 0x243   :  { %v4248_v12 = vmax.f32 %v3638_v59, 0.0  ;;  %4936 = vperm.xlu0 %9817, %v7579_v43  }
 0x244   :  { %14842 = vst [vmem:[#allocation20_spill] sm:$0xff] %v12779_v21  ;;  %v4247_v33 = vmax.f32 %v3633_v25, 0.0  ;;  %v9236_v16 = vpop.f32.mrb[178].mxu0  ;;  %v4607_v25 = vld [vmem:[%s14719_s7 + $0xb0] sm:$0xff] }
 0x245   :  { %v3648_v34 = vadd.f32 %v9236_v16, %v12440_v11  ;;  %4828 = vmatmul.mubr.f32.gmra.mrb[36].mxu1 %v4605_v39  ;;  %v3642_v5 = vpop.f32.mrb[179].mxu0  ;;  %v7584_v11 = vld [vmem:[%s14721_s8 + $0xb8] sm:$0xff] }
 0x246   :  { %v12799_v52 = vpack.c.bf16 %v4248_v12, %v4247_v33  ;;  %v3643_v43 = vadd.f32 %v3642_v5, %v12442_v17  ;;  %v12802_v59 = vpop.permute.xlu1 %1650  ;;  %v12804_v46 = vpop.permute.xlu0 %1645  ;;  %4951 = vperm.xlu1 %9818, %v7582_v2   ;;  %4832 = vmatprep.mubr.f32.mxu1 %v4608_v45  ;;  %v4610_v17 = vld [vmem:[%s14719_s7 + $0xc8] sm:$0xff]  ;;  %v7583_v2 = vld [vmem:[%s14721_s8 + $0xb0] sm:$0xff] }
 0x247   :  { %v4250_v21 = vmax.f32 %v3648_v34, 0.0  ;;  %4946 = vperm.xlu0 %9817, %v7581_v37  }
 0x248   :  { %14843 = vst [vmem:[#allocation6_spill] sm:$0xff] %v12799_v52  ;;  %v4249_v12 = vmax.f32 %v3643_v43, 0.0  ;;  %v9239_v39 = vpop.f32.mrb[180].mxu0  ;;  %v4609_v43 = vld [vmem:[%s14719_s7 + $0xc0] sm:$0xff] }
 0x249   :  { %v3658_v45 = vadd.f32 %v9239_v39, %v12464_v15  ;;  %4833 = vmatmul.mubr.f32.gmra.mrb[38].mxu1 %v4607_v25  ;;  %v3652_v33 = vpop.f32.mrb[181].mxu0  ;;  %v7586_v15 = vld [vmem:[%s14721_s8 + $0xc8] sm:$0xff] }
 0x24a   :  { %v12819_v16 = vpack.c.bf16 %v4250_v21, %v4249_v12  ;;  %v3653_v37 = vadd.f32 %v3652_v33, %v12466_v49  ;;  %v12822_v34 = vpop.permute.xlu1 %1660  ;;  %v12824_v5 = vpop.permute.xlu0 %1655  ;;  %4961 = vperm.xlu1 %9818, %v7584_v11   ;;  %4837 = vmatprep.mubr.f32.mxu1 %v4610_v17  ;;  %v4612_v49 = vld [vmem:[%s14719_s7 + $0xd8] sm:$0xff]  ;;  %v7585_v11 = vld [vmem:[%s14721_s8 + $0xc0] sm:$0xff] }
 0x24b   :  { %v4252_v52 = vmax.f32 %v3658_v45, 0.0  ;;  %4956 = vperm.xlu0 %9817, %v7583_v2  }
 0x24c   :  { %14844 = vst [vmem:[#allocation21_spill] sm:$0xff] %v12819_v16  ;;  %v4251_v21 = vmax.f32 %v3653_v37, 0.0  ;;  %v9242_v25 = vpop.f32.mrb[182].mxu0  ;;  %v4611_v37 = vld [vmem:[%s14719_s7 + $0xd0] sm:$0xff] }
 0x24d   :  { %v3668_v17 = vadd.f32 %v9242_v25, %v12485_v18  ;;  %4838 = vmatmul.mubr.f32.gmra.mrb[40].mxu1 %v4609_v43  ;;  %v3662_v12 = vpop.f32.mrb[183].mxu0  ;;  %v7588_v18 = vld [vmem:[%s14721_s8 + $0xd8] sm:$0xff] }
 0x24e   :  { %v12839_v39 = vpack.c.bf16 %v4252_v52, %v4251_v21  ;;  %v3663_v2 = vadd.f32 %v3662_v12, %v12487_v38  ;;  %v12842_v45 = vpop.permute.xlu1 %1670  ;;  %v12844_v33 = vpop.permute.xlu0 %1665  ;;  %4971 = vperm.xlu1 %9818, %v7586_v15   ;;  %4842 = vmatprep.mubr.f32.mxu1 %v4612_v49  ;;  %v4614_v38 = vld [vmem:[%s14719_s7 + $0xe8] sm:$0xff]  ;;  %v7587_v15 = vld [vmem:[%s14721_s8 + $0xd0] sm:$0xff] }
 0x24f   :  { %v4254_v16 = vmax.f32 %v3668_v17, 0.0  ;;  %4966 = vperm.xlu0 %9817, %v7585_v11  }
 0x250   :  { %14845 = vst [vmem:[#allocation8_spill] sm:$0xff] %v12839_v39  ;;  %v4253_v52 = vmax.f32 %v3663_v2, 0.0  ;;  %v9245_v43 = vpop.f32.mrb[184].mxu0  ;;  %v4613_v2 = vld [vmem:[%s14719_s7 + $0xe0] sm:$0xff] }
 0x251   :  { %v3678_v49 = vadd.f32 %v9245_v43, %v12501_v54  ;;  %4843 = vmatmul.mubr.f32.gmra.mrb[42].mxu1 %v4611_v37  ;;  %v3672_v21 = vpop.f32.mrb[185].mxu0  ;;  %v7590_v54 = vld [vmem:[%s14721_s8 + $0xe8] sm:$0xff] }
 0x252   :  { %v12859_v25 = vpack.c.bf16 %v4254_v16, %v4253_v52  ;;  %v3673_v11 = vadd.f32 %v3672_v21, %v12503_v53  ;;  %v12862_v17 = vpop.permute.xlu1 %1680  ;;  %v12864_v12 = vpop.permute.xlu0 %1675  ;;  %4981 = vperm.xlu1 %9818, %v7588_v18   ;;  %4847 = vmatprep.mubr.f32.mxu1 %v4614_v38  ;;  %v4616_v53 = vld [vmem:[%s14719_s7 + $0xf8] sm:$0xff]  ;;  %v7589_v18 = vld [vmem:[%s14721_s8 + $0xe0] sm:$0xff] }
 0x253   :  { %v4256_v39 = vmax.f32 %v3678_v49, 0.0  ;;  %4976 = vperm.xlu0 %9817, %v7587_v15  }
 0x254   :  { %14846 = vst [vmem:[#allocation22_spill] sm:$0xff] %v12859_v25  ;;  %v4255_v16 = vmax.f32 %v3673_v11, 0.0  ;;  %v9248_v37 = vpop.f32.mrb[186].mxu0  ;;  %v4615_v11 = vld [vmem:[%s14719_s7 + $0xf0] sm:$0xff] }
 0x255   :  { %v3688_v38 = vadd.f32 %v9248_v37, %v12517_v61  ;;  %4848 = vmatmul.mubr.f32.gmra.mrb[44].mxu1 %v4613_v2  ;;  %v3682_v52 = vpop.f32.mrb[187].mxu0  ;;  %v7592_v61 = vld [vmem:[%s14721_s8 + $0xf8] sm:$0xff] }
 0x256   :  { %v12879_v43 = vpack.c.bf16 %v4256_v39, %v4255_v16  ;;  %v3683_v15 = vadd.f32 %v3682_v52, %v12519_v63  ;;  %v12882_v49 = vpop.permute.xlu1 %1690  ;;  %v12884_v21 = vpop.permute.xlu0 %1685  ;;  %4991 = vperm.xlu1 %9818, %v7590_v54   ;;  %4852 = vmatprep.mubr.f32.mxu1 %v4616_v53  ;;  %v7546_v63 = vld [vmem:[%s14719_s7 + $0x108] sm:$0xff]  ;;  %v7591_v54 = vld [vmem:[%s14721_s8 + $0xf0] sm:$0xff] }
 0x257   :  { %v4258_v25 = vmax.f32 %v3688_v38, 0.0  ;;  %4986 = vperm.xlu0 %9817, %v7589_v18  }
 0x258   :  { %14847 = vst [vmem:[#allocation9_spill] sm:$0xff] %v12879_v43  ;;  %v4257_v39 = vmax.f32 %v3683_v15, 0.0  ;;  %v9251_v2 = vpop.f32.mrb[188].mxu0  ;;  %v7545_v15 = vld [vmem:[%s14719_s7 + $0x100] sm:$0xff] }
 0x259   :  { %v3698_v53 = vadd.f32 %v9251_v2, %v12533_v40  ;;  %4853 = vmatmul.mubr.f32.gmra.mrb[46].mxu1 %v4615_v11  ;;  %v3692_v16 = vpop.f32.mrb[189].mxu0  ;;  %v7674_v40 = vld [vmem:[%s14721_s8 + $0x188] sm:$0xff] }
 0x25a   :  { %v12899_v37 = vpack.c.bf16 %v4258_v25, %v4257_v39  ;;  %v3693_v18 = vadd.f32 %v3692_v16, %v12535_v47  ;;  %v12902_v38 = vpop.permute.xlu1 %1775  ;;  %v12904_v52 = vpop.permute.xlu0 %1695  ;;  %5001 = vperm.xlu1 %9818, %v7592_v61   ;;  %5068 = vmatprep.mubr.f32.mxu1 %v7546_v63  ;;  %v7673_v47 = vld [vmem:[%s14721_s8 + $0x180] sm:$0xff]  ;;  %v7548_v63 = vld [vmem:[%s14719_s7 + $0x118] sm:$0xff] }
 0x25b   :  { %v4260_v43 = vmax.f32 %v3698_v53, 0.0  ;;  %4996 = vperm.xlu0 %9817, %v7591_v54   ;;  %v14850_v54 = vld [vmem:[#allocation18_spill] sm:$0xff] }
 0x25c   :  { %14848 = vst [vmem:[#allocation23_spill] sm:$0xff] %v12899_v37  ;;  %v4259_v25 = vmax.f32 %v3693_v18, 0.0  ;;  %v9254_v11 = vpop.f32.mrb[190].mxu0 }
 0x25d   :  { %v3708_v39 = vadd.f32 %v9254_v11, %v12549_v8  ;;  %5069 = vmatmul.mubr.f32.vlgmr.msra.gmra.mrb[48].mxu1 %v7545_v15  ;;  %v3702_v61 = vpop.f32.mrb[191].mxu0  ;;  %v7547_v8 = vld [vmem:[%s14719_s7 + $0x110] sm:$0xff] }
 0x25e   :  { %v12919_v2 = vpack.c.bf16 %v4260_v43, %v4259_v25  ;;  %9495 = vmatpush3.bf16.msra.mxu1 %v14850_v54  ;;  %v3703_v53 = vadd.f32 %v3702_v61, %v12551_v36  ;;  %v12923_v16 = vpop.permute.xlu1 %1700  ;;  %v12925_v18 = vpop.permute.xlu0 %1780  ;;  %5513 = vperm.xlu1 %9818, %v7674_v40   ;;  %v14851_v11 = vld [vmem:[#allocation36_spill] sm:$0xff]  ;;  %v7626_v43 = vld [vmem:[%s14721_s8 + $0x108] sm:$0xff]  ;;  %v7625_v61 = vld [vmem:[%s14721_s8 + $0x100] sm:$0xff] }
 0x25f   :  { %v4262_v15 = vmax.f32 %v3708_v39, 0.0  ;;  %9497 = vmatprep.subr.bf16.mxu1 %v14851_v11  ;;  %5508 = vperm.xlu0 %9817, %v7673_v47   ;;  %v7550_v39 = vld [vmem:[%s14719_s7 + $0x128] sm:$0xff]  ;;  %v14853_v11 = vld [vmem:[#allocation28_spill] sm:$0xff] }
 0x260   :  { %14849 = vst [vmem:[#allocation11_spill] sm:$0xff] %v12919_v2  ;;  %v4261_v25 = vmax.f32 %v3703_v53, 0.0  ;;  %5073 = vmatprep.mubr.f32.mxu1 %v7548_v63  ;;  %v9257_v36 = vpop.f32.mrb[192].mxu0 }
 0x261   :  { %v3718_v40 = vadd.f32 %v9257_v36, %v12565_v19  ;;  %5074 = vmatmul.mubr.f32.gmra.mrb[50].mxu1 %v7547_v8  ;;  %v3712_v54 = vpop.f32.mrb[193].mxu0  ;;  %v7549_v19 = vld [vmem:[%s14719_s7 + $0x120] sm:$0xff]  ;;  %v14854_v36 = vld [vmem:[#allocation37_spill] sm:$0xff] }
 0x262   :  { %v12941_v47 = vpack.c.bf16 %v4262_v15, %v4261_v25  ;;  %9499 = vmatpush3.bf16.msra.mxu1 %v14853_v11  ;;  %v3713_v53 = vadd.f32 %v3712_v54, %v12567_v7  ;;  %v12945_v63 = vpop.permute.xlu1 %1790  ;;  %v12947_v2 = vpop.permute.xlu0 %1785  ;;  %5222 = vperm.xlu1 %9818, %v7626_v43   ;;  %v7676_v15 = vld [vmem:[%s14721_s8 + $0x198] sm:$0xff]  ;;  %v7675_v54 = vld [vmem:[%s14721_s8 + $0x190] sm:$0xff] }
 0x263   :  { %v4264_v8 = vmax.f32 %v3718_v40, 0.0  ;;  %9501 = vmatprep.subr.bf16.mxu1 %v14854_v36  ;;  %5217 = vperm.xlu0 %9817, %v7625_v61   ;;  %v7552_v40 = vld [vmem:[%s14719_s7 + $0x138] sm:$0xff] }
 0x264   :  { %14852 = vst [vmem:[#allocation60_spill] sm:$0xff] %v12941_v47  ;;  %v4263_v25 = vmax.f32 %v3713_v53, 0.0  ;;  %5078 = vmatprep.mubr.f32.mxu1 %v7550_v39  ;;  %v9260_v7 = vpop.f32.mrb[194].mxu0  ;;  %v14856_v36 = vld [vmem:[#allocation29_spill] sm:$0xff] }
 0x265   :  { %v3728_v43 = vadd.f32 %v9260_v7, %v12587_v41  ;;  %5079 = vmatmul.mubr.f32.gmra.mrb[52].mxu1 %v7549_v19  ;;  %v3722_v11 = vpop.f32.mrb[195].mxu0  ;;  %v7551_v41 = vld [vmem:[%s14719_s7 + $0x130] sm:$0xff]  ;;  %v14857_v7 = vld [vmem:[#allocation38_spill] sm:$0xff] }
 0x266   :  { %v12963_v61 = vpack.c.bf16 %v4264_v8, %v4263_v25  ;;  %9503 = vmatpush3.bf16.msra.mxu1 %v14856_v36  ;;  %v3723_v53 = vadd.f32 %v3722_v11, %v12589_v27  ;;  %v12967_v39 = vpop.permute.xlu1 %1710  ;;  %v12969_v47 = vpop.permute.xlu0 %1705  ;;  %5523 = vperm.xlu1 %9818, %v7676_v15   ;;  %v7628_v8 = vld [vmem:[%s14721_s8 + $0x118] sm:$0xff]  ;;  %v7627_v11 = vld [vmem:[%s14721_s8 + $0x110] sm:$0xff] }
 0x267   :  { %v4266_v19 = vmax.f32 %v3728_v43, 0.0  ;;  %9505 = vmatprep.subr.bf16.mxu1 %v14857_v7  ;;  %5518 = vperm.xlu0 %9817, %v7675_v54   ;;  %v7554_v43 = vld [vmem:[%s14719_s7 + $0x148] sm:$0xff]  ;;  %v14859_v7 = vld [vmem:[#allocation30_spill] sm:$0xff] }
 0x268   :  { %14855 = vst [vmem:[#allocation62_spill] sm:$0xff] %v12963_v61  ;;  %v4265_v25 = vmax.f32 %v3723_v53, 0.0  ;;  %5083 = vmatprep.mubr.f32.mxu1 %v7552_v40  ;;  %v9263_v27 = vpop.f32.mrb[196].mxu0 }
 0x269   :  { %v3738_v15 = vadd.f32 %v9263_v27, %v12609_v29  ;;  %5084 = vmatmul.mubr.f32.gmra.mrb[54].mxu1 %v7551_v41  ;;  %v3732_v36 = vpop.f32.mrb[197].mxu0  ;;  %v7553_v29 = vld [vmem:[%s14719_s7 + $0x140] sm:$0xff]  ;;  %v14860_v27 = vld [vmem:[#allocation39_spill] sm:$0xff] }
 0x26a   :  { %v12985_v54 = vpack.c.bf16 %v4266_v19, %v4265_v25  ;;  %9507 = vmatpush3.bf16.msra.mxu1 %v14859_v7  ;;  %v3733_v53 = vadd.f32 %v3732_v36, %v12611_v28  ;;  %v12989_v40 = vpop.permute.xlu1 %1800  ;;  %v12991_v61 = vpop.permute.xlu0 %1795  ;;  %5232 = vperm.xlu1 %9818, %v7628_v8   ;;  %v7678_v19 = vld [vmem:[%s14721_s8 + $0x1a8] sm:$0xff]  ;;  %v7677_v36 = vld [vmem:[%s14721_s8 + $0x1a0] sm:$0xff] }
 0x26b   :  { %v4268_v41 = vmax.f32 %v3738_v15, 0.0  ;;  %9509 = vmatprep.subr.bf16.mxu1 %v14860_v27  ;;  %5227 = vperm.xlu0 %9817, %v7627_v11   ;;  %v7556_v15 = vld [vmem:[%s14719_s7 + $0x158] sm:$0xff]  ;;  %v14862_v27 = vld [vmem:[#allocation31_spill] sm:$0xff] }
 0x26c   :  { %14858 = vst [vmem:[#allocation24_spill] sm:$0xff] %v12985_v54  ;;  %v4267_v25 = vmax.f32 %v3733_v53, 0.0  ;;  %5088 = vmatprep.mubr.f32.mxu1 %v7554_v43  ;;  %v9266_v28 = vpop.f32.mrb[198].mxu0 }
 0x26d   :  { %v3748_v8 = vadd.f32 %v9266_v28, %v12631_v24  ;;  %5089 = vmatmul.mubr.f32.gmra.mrb[56].mxu1 %v7553_v29  ;;  %v3742_v7 = vpop.f32.mrb[199].mxu0  ;;  %v7555_v24 = vld [vmem:[%s14719_s7 + $0x150] sm:$0xff] }
 0x26e   :  { %v13007_v11 = vpack.c.bf16 %v4268_v41, %v4267_v25  ;;  %9511 = vmatpush3.bf16.msra.mxu1 %v14862_v27  ;;  %v3743_v53 = vadd.f32 %v3742_v7, %v12633_v48  ;;  %v13011_v43 = vpop.permute.xlu1 %1720  ;;  %v13013_v54 = vpop.permute.xlu0 %1715  ;;  %5533 = vperm.xlu1 %9818, %v7678_v19   ;;  %v14863_v28 = vld [vmem:[#allocation40_spill] sm:$0xff]  ;;  %v7630_v41 = vld [vmem:[%s14721_s8 + $0x128] sm:$0xff]  ;;  %v7629_v7 = vld [vmem:[%s14721_s8 + $0x120] sm:$0xff] }
 0x26f   :  { %v4270_v29 = vmax.f32 %v3748_v8, 0.0  ;;  %9513 = vmatprep.subr.bf16.mxu1 %v14863_v28  ;;  %5528 = vperm.xlu0 %9817, %v7677_v36   ;;  %v7558_v8 = vld [vmem:[%s14719_s7 + $0x168] sm:$0xff]  ;;  %v14865_v28 = vld [vmem:[#allocation32_spill] sm:$0xff] }
 0x270   :  { %14861 = vst [vmem:[#allocation12_spill] sm:$0xff] %v13007_v11  ;;  %v4269_v25 = vmax.f32 %v3743_v53, 0.0  ;;  %5093 = vmatprep.mubr.f32.mxu1 %v7556_v15  ;;  %v9269_v48 = vpop.f32.mrb[200].mxu0 }
 0x271   :  { %v3758_v19 = vadd.f32 %v9269_v48, %v12653_v4  ;;  %5094 = vmatmul.mubr.f32.gmra.mrb[58].mxu1 %v7555_v24  ;;  %v3752_v27 = vpop.f32.mrb[201].mxu0  ;;  %v7557_v4 = vld [vmem:[%s14719_s7 + $0x160] sm:$0xff]  ;;  %v14866_v48 = vld [vmem:[#allocation41_spill] sm:$0xff] }
 0x272   :  { %v13029_v36 = vpack.c.bf16 %v4270_v29, %v4269_v25  ;;  %9515 = vmatpush3.bf16.msra.mxu1 %v14865_v28  ;;  %v3753_v53 = vadd.f32 %v3752_v27, %v12655_v3  ;;  %v13033_v15 = vpop.permute.xlu1 %1810  ;;  %v13035_v11 = vpop.permute.xlu0 %1805  ;;  %5242 = vperm.xlu1 %9818, %v7630_v41   ;;  %v7680_v29 = vld [vmem:[%s14721_s8 + $0x1b8] sm:$0xff]  ;;  %v7679_v27 = vld [vmem:[%s14721_s8 + $0x1b0] sm:$0xff] }
 0x273   :  { %v4272_v24 = vmax.f32 %v3758_v19, 0.0  ;;  %9517 = vmatprep.subr.bf16.mxu1 %v14866_v48  ;;  %5237 = vperm.xlu0 %9817, %v7629_v7   ;;  %v7560_v19 = vld [vmem:[%s14719_s7 + $0x178] sm:$0xff] }
 0x274   :  { %14864 = vst [vmem:[#allocation25_spill] sm:$0xff] %v13029_v36  ;;  %v4271_v25 = vmax.f32 %v3753_v53, 0.0  ;;  %5098 = vmatprep.mubr.f32.mxu1 %v7558_v8  ;;  %v9272_v3 = vpop.f32.mrb[202].mxu0  ;;  %v14868_v48 = vld [vmem:[#allocation33_spill] sm:$0xff] }
 0x275   :  { %v3768_v41 = vadd.f32 %v9272_v3, %v12675_v57  ;;  %5099 = vmatmul.mubr.f32.gmra.mrb[60].mxu1 %v7557_v4  ;;  %v3762_v28 = vpop.f32.mrb[203].mxu0  ;;  %v7559_v57 = vld [vmem:[%s14719_s7 + $0x170] sm:$0xff]  ;;  %v14869_v3 = vld [vmem:[#allocation42_spill] sm:$0xff] }
 0x276   :  { %v13051_v7 = vpack.c.bf16 %v4272_v24, %v4271_v25  ;;  %9519 = vmatpush3.bf16.msra.mxu1 %v14868_v48  ;;  %v3763_v53 = vadd.f32 %v3762_v28, %v12677_v9  ;;  %v13055_v8 = vpop.permute.xlu1 %1730  ;;  %v13057_v36 = vpop.permute.xlu0 %1725  ;;  %5543 = vperm.xlu1 %9818, %v7680_v29   ;;  %v7632_v24 = vld [vmem:[%s14721_s8 + $0x138] sm:$0xff]  ;;  %v7631_v28 = vld [vmem:[%s14721_s8 + $0x130] sm:$0xff] }
 0x277   :  { %v4274_v4 = vmax.f32 %v3768_v41, 0.0  ;;  %9521 = vmatprep.subr.bf16.mxu1 %v14869_v3  ;;  %5538 = vperm.xlu0 %9817, %v7679_v27   ;;  %v7562_v41 = vld [vmem:[%s14719_s7 + $0x188] sm:$0xff]  ;;  %v14871_v3 = vld [vmem:[#allocation34_spill] sm:$0xff] }
 0x278   :  { %14867 = vst [vmem:[#allocation14_spill] sm:$0xff] %v13051_v7  ;;  %v4273_v25 = vmax.f32 %v3763_v53, 0.0  ;;  %5103 = vmatprep.mubr.f32.mxu1 %v7560_v19  ;;  %v9275_v9 = vpop.f32.mrb[204].mxu0 }
 0x279   :  { %v3778_v29 = vadd.f32 %v9275_v9, %v12697_v62  ;;  %5104 = vmatmul.mubr.f32.gmra.mrb[62].mxu1 %v7559_v57  ;;  %v3772_v48 = vpop.f32.mrb[205].mxu0  ;;  %v7561_v62 = vld [vmem:[%s14719_s7 + $0x180] sm:$0xff]  ;;  %v14872_v9 = vld [vmem:[#allocation51_spill] sm:$0xff] }
 0x27a   :  { %v13073_v27 = vpack.c.bf16 %v4274_v4, %v4273_v25  ;;  %9523 = vmatpush3.bf16.msra.mxu1 %v14871_v3  ;;  %v3773_v53 = vadd.f32 %v3772_v48, %v12699_v58  ;;  %v13077_v19 = vpop.permute.xlu1 %1820  ;;  %v13079_v7 = vpop.permute.xlu0 %1815  ;;  %5252 = vperm.xlu1 %9818, %v7632_v24   ;;  %v7682_v4 = vld [vmem:[%s14721_s8 + $0x1c8] sm:$0xff]  ;;  %v7564_v58 = vld [vmem:[%s14719_s7 + $0x198] sm:$0xff]  ;;  %v7681_v24 = vld [vmem:[%s14721_s8 + $0x1c0] sm:$0xff] }
 0x27b   :  { %v4276_v57 = vmax.f32 %v3778_v29, 0.0  ;;  %9525 = vmatprep.subr.bf16.mxu1 %v14872_v9  ;;  %5247 = vperm.xlu0 %9817, %v7631_v28  }
 0x27c   :  { %14870 = vst [vmem:[#allocation26_spill] sm:$0xff] %v13073_v27  ;;  %v4275_v25 = vmax.f32 %v3773_v53, 0.0  ;;  %5108 = vmatprep.mubr.f32.mxu1 %v7562_v41  ;;  %v9278_v48 = vpop.f32.mrb[206].mxu0  ;;  %v7563_v41 = vld [vmem:[%s14719_s7 + $0x190] sm:$0xff] }
 0x27d   :  { %v3788_v29 = vadd.f32 %v9278_v48, %v12719_v0  ;;  %5109 = vmatmul.mubr.f32.gmra.mrb[64].mxu1 %v7561_v62  ;;  %v3782_v3 = vpop.f32.mrb[207].mxu0  ;;  %v7634_v0 = vld [vmem:[%s14721_s8 + $0x148] sm:$0xff] }
 0x27e   :  { %v13095_v28 = vpack.c.bf16 %v4276_v57, %v4275_v25  ;;  %v3783_v9 = vadd.f32 %v3782_v3, %v12721_v6  ;;  %v13098_v27 = vpop.permute.xlu1 %1740  ;;  %v13100_v37 = vpop.permute.xlu0 %1735  ;;  %5553 = vperm.xlu1 %9818, %v7682_v4   ;;  %5113 = vmatprep.mubr.f32.mxu1 %v7564_v58  ;;  %v7566_v6 = vld [vmem:[%s14719_s7 + $0x1a8] sm:$0xff]  ;;  %v7633_v4 = vld [vmem:[%s14721_s8 + $0x140] sm:$0xff] }
 0x27f   :  { %v4278_v53 = vmax.f32 %v3788_v29, 0.0  ;;  %5548 = vperm.xlu0 %9817, %v7681_v24  }
 0x280   :  { %14873 = vst [vmem:[#allocation35_spill] sm:$0xff] %v13095_v28  ;;  %v4277_v62 = vmax.f32 %v3783_v9, 0.0  ;;  %v9281_v57 = vpop.f32.mrb[208].mxu0  ;;  %v7565_v9 = vld [vmem:[%s14719_s7 + $0x1a0] sm:$0xff] }
 0x281   :  { %v3798_v58 = vadd.f32 %v9281_v57, %v12741_v20  ;;  %5114 = vmatmul.mubr.f32.gmra.mrb[66].mxu1 %v7563_v41  ;;  %v3792_v25 = vpop.f32.mrb[209].mxu0  ;;  %v7684_v20 = vld [vmem:[%s14721_s8 + $0x1d8] sm:$0xff] }
 0x282   :  { %v13115_v48 = vpack.c.bf16 %v4278_v53, %v4277_v62  ;;  %v3793_v24 = vadd.f32 %v3792_v25, %v12743_v30  ;;  %v13118_v29 = vpop.permute.xlu1 %1830  ;;  %v13120_v3 = vpop.permute.xlu0 %1825  ;;  %5262 = vperm.xlu1 %9818, %v7634_v0   ;;  %5118 = vmatprep.mubr.f32.mxu1 %v7566_v6  ;;  %v7568_v30 = vld [vmem:[%s14719_s7 + $0x1b8] sm:$0xff]  ;;  %v7683_v0 = vld [vmem:[%s14721_s8 + $0x1d0] sm:$0xff] }
 0x283   :  { %v4280_v28 = vmax.f32 %v3798_v58, 0.0  ;;  %5257 = vperm.xlu0 %9817, %v7633_v4  }
 0x284   :  { %14874 = vst [vmem:[#allocation18_spill] sm:$0xff] %v13115_v48  ;;  %v4279_v41 = vmax.f32 %v3793_v24, 0.0  ;;  %v9284_v53 = vpop.f32.mrb[210].mxu0  ;;  %v7567_v24 = vld [vmem:[%s14719_s7 + $0x1b0] sm:$0xff] }
 0x285   :  { %v3808_v6 = vadd.f32 %v9284_v53, %v12762_v55  ;;  %5119 = vmatmul.mubr.f32.gmra.mrb[68].mxu1 %v7565_v9  ;;  %v3802_v62 = vpop.f32.mrb[211].mxu0  ;;  %v7636_v55 = vld [vmem:[%s14721_s8 + $0x158] sm:$0xff] }
 0x286   :  { %v13135_v57 = vpack.c.bf16 %v4280_v28, %v4279_v41  ;;  %v3803_v4 = vadd.f32 %v3802_v62, %v12764_v31  ;;  %v13138_v58 = vpop.permute.xlu1 %1750  ;;  %v13140_v25 = vpop.permute.xlu0 %1745  ;;  %5563 = vperm.xlu1 %9818, %v7684_v20   ;;  %5123 = vmatprep.mubr.f32.mxu1 %v7568_v30  ;;  %v7570_v31 = vld [vmem:[%s14719_s7 + $0x1c8] sm:$0xff]  ;;  %v7635_v20 = vld [vmem:[%s14721_s8 + $0x150] sm:$0xff] }
 0x287   :  { %v4282_v48 = vmax.f32 %v3808_v6, 0.0  ;;  %5558 = vperm.xlu0 %9817, %v7683_v0  }
 0x288   :  { %14875 = vst [vmem:[#allocation36_spill] sm:$0xff] %v13135_v57  ;;  %v4281_v28 = vmax.f32 %v3803_v4, 0.0  ;;  %v9287_v9 = vpop.f32.mrb[212].mxu0  ;;  %v7569_v4 = vld [vmem:[%s14719_s7 + $0x1c0] sm:$0xff] }
 0x289   :  { %v3818_v30 = vadd.f32 %v9287_v9, %v12782_v22  ;;  %5124 = vmatmul.mubr.f32.gmra.mrb[70].mxu1 %v7567_v24  ;;  %v3812_v41 = vpop.f32.mrb[213].mxu0  ;;  %v7686_v22 = vld [vmem:[%s14721_s8 + $0x1e8] sm:$0xff] }
 0x28a   :  { %v13155_v53 = vpack.c.bf16 %v4282_v48, %v4281_v28  ;;  %v3813_v0 = vadd.f32 %v3812_v41, %v12784_v35  ;;  %v13158_v6 = vpop.permute.xlu1 %1840  ;;  %v13160_v62 = vpop.permute.xlu0 %1835  ;;  %5272 = vperm.xlu1 %9818, %v7636_v55   ;;  %5128 = vmatprep.mubr.f32.mxu1 %v7570_v31  ;;  %v7572_v35 = vld [vmem:[%s14719_s7 + $0x1d8] sm:$0xff]  ;;  %v7685_v55 = vld [vmem:[%s14721_s8 + $0x1e0] sm:$0xff] }
 0x28b   :  { %v4284_v57 = vmax.f32 %v3818_v30, 0.0  ;;  %5267 = vperm.xlu0 %9817, %v7635_v20  }
 0x28c   :  { %14876 = vst [vmem:[#allocation28_spill] sm:$0xff] %v13155_v53  ;;  %v4283_v48 = vmax.f32 %v3813_v0, 0.0  ;;  %v9290_v24 = vpop.f32.mrb[214].mxu0  ;;  %v7571_v0 = vld [vmem:[%s14719_s7 + $0x1d0] sm:$0xff] }
 0x28d   :  { %v3828_v31 = vadd.f32 %v9290_v24, %v12802_v59  ;;  %5129 = vmatmul.mubr.f32.gmra.mrb[72].mxu1 %v7569_v4  ;;  %v3822_v28 = vpop.f32.mrb[215].mxu0  ;;  %v7638_v59 = vld [vmem:[%s14721_s8 + $0x168] sm:$0xff] }
 0x28e   :  { %v13175_v9 = vpack.c.bf16 %v4284_v57, %v4283_v48  ;;  %v3823_v20 = vadd.f32 %v3822_v28, %v12804_v46  ;;  %v13178_v30 = vpop.permute.xlu1 %1760  ;;  %v13180_v41 = vpop.permute.xlu0 %1755  ;;  %5573 = vperm.xlu1 %9818, %v7686_v22   ;;  %5133 = vmatprep.mubr.f32.mxu1 %v7572_v35  ;;  %v7574_v46 = vld [vmem:[%s14719_s7 + $0x1e8] sm:$0xff]  ;;  %v7637_v22 = vld [vmem:[%s14721_s8 + $0x160] sm:$0xff] }
 0x28f   :  { %v4286_v53 = vmax.f32 %v3828_v31, 0.0  ;;  %5568 = vperm.xlu0 %9817, %v7685_v55  }
 0x290   :  { %14877 = vst [vmem:[#allocation37_spill] sm:$0xff] %v13175_v9  ;;  %v4285_v57 = vmax.f32 %v3823_v20, 0.0  ;;  %v9293_v4 = vpop.f32.mrb[216].mxu0  ;;  %v7573_v20 = vld [vmem:[%s14719_s7 + $0x1e0] sm:$0xff] }
 0x291   :  { %v3838_v35 = vadd.f32 %v9293_v4, %v12822_v34  ;;  %5134 = vmatmul.mubr.f32.gmra.mrb[74].mxu1 %v7571_v0  ;;  %v3832_v48 = vpop.f32.mrb[217].mxu0  ;;  %v7688_v34 = vld [vmem:[%s14721_s8 + $0x1f8] sm:$0xff] }
 0x292   :  { %v13195_v24 = vpack.c.bf16 %v4286_v53, %v4285_v57  ;;  %v3833_v55 = vadd.f32 %v3832_v48, %v12824_v5  ;;  %v1851_v31 = vpop.permute.xlu1 %1850  ;;  %v1846_v28 = vpop.permute.xlu0 %1845  ;;  %5282 = vperm.xlu1 %9818, %v7638_v59   ;;  %5138 = vmatprep.mubr.f32.mxu1 %v7574_v46  ;;  %v7576_v5 = vld [vmem:[%s14719_s7 + $0x1f8] sm:$0xff]  ;;  %v7687_v59 = vld [vmem:[%s14721_s8 + $0x1f0] sm:$0xff] }
 0x293   :  { %v4288_v9 = vmax.f32 %v3838_v35, 0.0  ;;  %v4028_v14 = vadd.f32 %v14878_v50, %v1851_v31  ;;  %v4023_v51 = vadd.f32 %v14879_v32, %v1846_v28  ;;  %5277 = vperm.xlu0 %9817, %v7637_v22   ;;  %v7575_v35 = vld [vmem:[%s14719_s7 + $0x1f0] sm:$0xff] }
 0x294   :  { %v4287_v53 = vmax.f32 %v3833_v55, 0.0  ;;  %v9296_v0 = vpop.f32.mrb[218].mxu0  ;;  %v7639_v55 = vld [vmem:[%s14721_s8 + $0x170] sm:$0xff] }
 0x295   :  { %v4326_v46 = vmax.f32 %v4028_v14, 0.0  ;;  %v4325_v57 = vmax.f32 %v4023_v51, 0.0  ;;  %v3848_v50 = vadd.f32 %v9296_v0, %v12842_v45  ;;  %5139 = vmatmul.mubr.f32.gmra.mrb[76].mxu1 %v7573_v20  ;;  %v3842_v32 = vpop.f32.mrb[219].mxu0  ;;  %v7640_v51 = vld [vmem:[%s14721_s8 + $0x178] sm:$0xff]  ;;  %v7594_v14 = vld [vmem:[%s14719_s7 + $0x208] sm:$0xff] }
 0x296   :  { %v13213_v4 = vpack.c.bf16 %v4288_v9, %v4287_v53  ;;  %v3843_v22 = vadd.f32 %v3842_v32, %v12844_v33  ;;  %5583 = vperm.xlu1 %9818, %v7688_v34   ;;  %5143 = vmatprep.mubr.f32.mxu1 %v7576_v5  ;;  %v7593_v5 = vld [vmem:[%s14719_s7 + $0x200] sm:$0xff]  ;;  %v7770_v0 = vld [vmem:[%s14721_s8 + $0x288] sm:$0xff] }
 0x297   :  { %v4290_v48 = vmax.f32 %v3848_v50, 0.0  ;;  %5578 = vperm.xlu0 %9817, %v7687_v59   ;;  %v13225_v45 = vpack.c.bf16 %v4326_v46, %v4325_v57  ;;  %v7769_v46 = vld [vmem:[%s14721_s8 + $0x280] sm:$0xff]  ;;  %v7596_v50 = vld [vmem:[%s14719_s7 + $0x218] sm:$0xff] }
 0x298   :  { %v4289_v9 = vmax.f32 %v3843_v22, 0.0  ;;  %v9299_v33 = vpop.f32.mrb[220].mxu0  ;;  %v14880_v22 = vld [vmem:[#allocation43_spill] sm:$0xff] }
 0x299   :  { %v3858_v31 = vadd.f32 %v9299_v33, %v12862_v17  ;;  %5144 = vmatmul.mubr.f32.gmra.mrb[78].mxu1 %v7575_v35  ;;  %v3852_v28 = vpop.f32.mrb[221].mxu0 }
 0x29a   :  { %v13231_v20 = vpack.c.bf16 %v4290_v48, %v4289_v9  ;;  %v3853_v34 = vadd.f32 %v3852_v28, %v12864_v12  ;;  %5292 = vperm.xlu1 %9818, %v7640_v51   ;;  %5359 = vmatprep.mubr.f32.mxu1 %v7594_v14  ;;  %v7595_v48 = vld [vmem:[%s14719_s7 + $0x210] sm:$0xff]  ;;  %v7598_v28 = vld [vmem:[%s14719_s7 + $0x228] sm:$0xff] }
 0x29b   :  { %v4292_v53 = vmax.f32 %v3858_v31, 0.0  ;;  %5287 = vperm.xlu0 %9817, %v7639_v55   ;;  %v14881_v14 = vld [vmem:[#allocation52_spill] sm:$0xff] }
 0x29c   :  { %v4291_v59 = vmax.f32 %v3853_v34, 0.0  ;;  %v9302_v17 = vpop.f32.mrb[222].mxu0 }
 0x29d   :  { %v3868_v12 = vadd.f32 %v9302_v17, %v12882_v49  ;;  %5360 = vmatmul.mubr.f32.vlgmr.msra.gmra.mrb[80].mxu1 %v7593_v5  ;;  %v3862_v57 = vpop.f32.mrb[223].mxu0  ;;  %v7722_v49 = vld [vmem:[%s14721_s8 + $0x208] sm:$0xff]  ;;  %v14882_v5 = vld [vmem:[#allocation44_spill] sm:$0xff]  ;;  %v14883_v17 = vld [vmem:[#allocation53_spill] sm:$0xff] }
 0x29e   :  { %v13247_v32 = vpack.c.bf16 %v4292_v53, %v4291_v59  ;;  %9527 = vmatpush3.bf16.msra.mxu1 %v14880_v22  ;;  %v3863_v35 = vadd.f32 %v3862_v57, %v12884_v21  ;;  %6095 = vperm.xlu1 %9818, %v7770_v0   ;;  %v7721_v21 = vld [vmem:[%s14721_s8 + $0x200] sm:$0xff]  ;;  %v7600_v22 = vld [vmem:[%s14719_s7 + $0x238] sm:$0xff] }
 0x29f   :  { %v4294_v51 = vmax.f32 %v3868_v12, 0.0  ;;  %9529 = vmatprep.subr.bf16.mxu1 %v14881_v14  ;;  %6090 = vperm.xlu0 %9817, %v7769_v46   ;;  %v7597_v0 = vld [vmem:[%s14719_s7 + $0x220] sm:$0xff]  ;;  %v7599_v14 = vld [vmem:[%s14719_s7 + $0x230] sm:$0xff] }
 0x2a0   :  { %v4293_v9 = vmax.f32 %v3863_v35, 0.0  ;;  %5364 = vmatprep.mubr.f32.mxu1 %v7596_v50  ;;  %v9305_v33 = vpop.f32.mrb[224].mxu0 }
 0x2a1   :  { %v3878_v55 = vadd.f32 %v9305_v33, %v12923_v16  ;;  %5365 = vmatmul.mubr.f32.gmra.mrb[82].mxu1 %v7595_v48  ;;  %v3872_v31 = vpop.f32.mrb[225].mxu0  ;;  %v7866_v16 = vld [vmem:[%s14721_s8 + $0x388] sm:$0xff]  ;;  %v14884_v48 = vld [vmem:[#allocation45_spill] sm:$0xff] }
 0x2a2   :  { %v13265_v34 = vpack.c.bf16 %v4294_v51, %v4293_v9  ;;  %9531 = vmatpush3.bf16.msra.mxu1 %v14882_v5  ;;  %v3873_v53 = vadd.f32 %v3872_v31, %v12904_v52  ;;  %5804 = vperm.xlu1 %9818, %v7722_v49   ;;  %v7865_v52 = vld [vmem:[%s14721_s8 + $0x380] sm:$0xff] }
 0x2a3   :  { %v4296_v59 = vmax.f32 %v3878_v55, 0.0  ;;  %9533 = vmatprep.subr.bf16.mxu1 %v14883_v17  ;;  %5799 = vperm.xlu0 %9817, %v7721_v21   ;;  %v14885_v9 = vld [vmem:[#allocation54_spill] sm:$0xff] }
 0x2a4   :  { %v4295_v46 = vmax.f32 %v3873_v53, 0.0  ;;  %5369 = vmatprep.mubr.f32.mxu1 %v7598_v28  ;;  %v9308_v12 = vpop.f32.mrb[226].mxu0  ;;  %v7602_v28 = vld [vmem:[%s14719_s7 + $0x248] sm:$0xff]  ;;  %v14886_v53 = vld [vmem:[#allocation46_spill] sm:$0xff] }
 0x2a5   :  { %v3888_v57 = vadd.f32 %v9308_v12, %v12967_v39  ;;  %5370 = vmatmul.mubr.f32.gmra.mrb[84].mxu1 %v7597_v0  ;;  %v3882_v50 = vpop.f32.mrb[227].mxu0  ;;  %v7818_v39 = vld [vmem:[%s14721_s8 + $0x308] sm:$0xff] }
 0x2a6   :  { %v13283_v35 = vpack.c.bf16 %v4296_v59, %v4295_v46  ;;  %9535 = vmatpush3.bf16.msra.mxu1 %v14884_v48  ;;  %v3883_v51 = vadd.f32 %v3882_v50, %v12969_v47  ;;  %6677 = vperm.xlu1 %9818, %v7866_v16   ;;  %v7817_v47 = vld [vmem:[%s14721_s8 + $0x300] sm:$0xff]  ;;  %v14887_v16 = vld [vmem:[#allocation55_spill] sm:$0xff]  ;;  %v7604_v50 = vld [vmem:[%s14719_s7 + $0x258] sm:$0xff] }
 0x2a7   :  { %v4298_v49 = vmax.f32 %v3888_v57, 0.0  ;;  %9537 = vmatprep.subr.bf16.mxu1 %v14885_v9  ;;  %6672 = vperm.xlu0 %9817, %v7865_v52   ;;  %v7601_v59 = vld [vmem:[%s14719_s7 + $0x240] sm:$0xff]  ;;  %v14888_v48 = vld [vmem:[#allocation47_spill] sm:$0xff]  ;;  %v14889_v9 = vld [vmem:[#allocation56_spill] sm:$0xff] }
 0x2a8   :  { %v4297_v33 = vmax.f32 %v3883_v51, 0.0  ;;  %5374 = vmatprep.mubr.f32.mxu1 %v7600_v22  ;;  %v9311_v21 = vpop.f32.mrb[228].mxu0 }
 0x2a9   :  { %v3898_v55 = vadd.f32 %v9311_v21, %v13011_v43  ;;  %5375 = vmatmul.mubr.f32.gmra.mrb[86].mxu1 %v7599_v14  ;;  %v3892_v31 = vpop.f32.mrb[229].mxu0  ;;  %v7772_v43 = vld [vmem:[%s14721_s8 + $0x298] sm:$0xff]  ;;  %v7603_v14 = vld [vmem:[%s14719_s7 + $0x250] sm:$0xff]  ;;  %v1766_v21 = vpop.permute.xlu0 %1765 }
 0x2aa   :  { %v13301_v5 = vpack.c.bf16 %v4298_v49, %v4297_v33  ;;  %9539 = vmatpush3.bf16.msra.mxu1 %v14886_v53  ;;  %v3893_v0 = vadd.f32 %v3892_v31, %v13013_v54  ;;  %6386 = vperm.xlu1 %9818, %v7818_v39   ;;  %v7771_v54 = vld [vmem:[%s14721_s8 + $0x290] sm:$0xff]  ;;  %v7606_v31 = vld [vmem:[%s14719_s7 + $0x268] sm:$0xff] }
 0x2ab   :  { %v4300_v17 = vmax.f32 %v3898_v55, 0.0  ;;  %9541 = vmatprep.subr.bf16.mxu1 %v14887_v16  ;;  %6381 = vperm.xlu0 %9817, %v7817_v47   ;;  %v14890_v53 = vld [vmem:[#allocation48_spill] sm:$0xff]  ;;  %v14891_v16 = vld [vmem:[#allocation57_spill] sm:$0xff] }
 0x2ac   :  { %v4299_v46 = vmax.f32 %v3893_v0, 0.0  ;;  %5379 = vmatprep.mubr.f32.mxu1 %v7602_v28  ;;  %v9314_v12 = vpop.f32.mrb[230].mxu0 }
 0x2ad   :  { %v3908_v52 = vadd.f32 %v9314_v12, %v13055_v8  ;;  %5380 = vmatmul.mubr.f32.gmra.mrb[88].mxu1 %v7601_v59  ;;  %v3902_v57 = vpop.f32.mrb[231].mxu0  ;;  %v7724_v8 = vld [vmem:[%s14721_s8 + $0x218] sm:$0xff]  ;;  %v7605_v59 = vld [vmem:[%s14719_s7 + $0x260] sm:$0xff]  ;;  %v1771_v12 = vpop.permute.xlu1 %1770 }
 0x2ae   :  { %v13319_v22 = vpack.c.bf16 %v4300_v17, %v4299_v46  ;;  %9543 = vmatpush3.bf16.msra.mxu1 %v14888_v48  ;;  %v3903_v51 = vadd.f32 %v3902_v57, %v13057_v36  ;;  %6105 = vperm.xlu1 %9818, %v7772_v43   ;;  %v7723_v36 = vld [vmem:[%s14721_s8 + $0x210] sm:$0xff]  ;;  %v7608_v57 = vld [vmem:[%s14719_s7 + $0x278] sm:$0xff] }
 0x2af   :  { %v4302_v49 = vmax.f32 %v3908_v52, 0.0  ;;  %9545 = vmatprep.subr.bf16.mxu1 %v14889_v9  ;;  %6100 = vperm.xlu0 %9817, %v7771_v54   ;;  %v14892_v48 = vld [vmem:[#allocation49_spill] sm:$0xff]  ;;  %v14893_v9 = vld [vmem:[#allocation58_spill] sm:$0xff] }
 0x2b0   :  { %v4301_v39 = vmax.f32 %v3903_v51, 0.0  ;;  %5384 = vmatprep.mubr.f32.mxu1 %v7604_v50  ;;  %v9317_v33 = vpop.f32.mrb[232].mxu0 }
 0x2b1   :  { %v3918_v47 = vadd.f32 %v9317_v33, %v13098_v27  ;;  %5385 = vmatmul.mubr.f32.gmra.mrb[90].mxu1 %v7603_v14  ;;  %v3912_v55 = vpop.f32.mrb[233].mxu0  ;;  %v7868_v27 = vld [vmem:[%s14721_s8 + $0x398] sm:$0xff]  ;;  %v7607_v14 = vld [vmem:[%s14719_s7 + $0x270] sm:$0xff] }
 0x2b2   :  { %v13337_v28 = vpack.c.bf16 %v4302_v49, %v4301_v39  ;;  %9547 = vmatpush3.bf16.msra.mxu1 %v14890_v53  ;;  %v3913_v0 = vadd.f32 %v3912_v55, %v13100_v37  ;;  %5814 = vperm.xlu1 %9818, %v7724_v8   ;;  %v7867_v37 = vld [vmem:[%s14721_s8 + $0x390] sm:$0xff]  ;;  %v13362_v49 = vpop.permute.xlu0 %4471  ;;  %v7820_v8 = vld [vmem:[%s14721_s8 + $0x318] sm:$0xff]  ;;  %v7610_v55 = vld [vmem:[%s14719_s7 + $0x288] sm:$0xff] }
 0x2b3   :  { %v4304_v17 = vmax.f32 %v3918_v47, 0.0  ;;  %9549 = vmatprep.subr.bf16.mxu1 %v14891_v16  ;;  %5809 = vperm.xlu0 %9817, %v7723_v36   ;;  %v14894_v53 = vld [vmem:[#allocation50_spill] sm:$0xff]  ;;  %v7774_v16 = vld [vmem:[%s14721_s8 + $0x2a8] sm:$0xff] }
 0x2b4   :  { %v4303_v43 = vmax.f32 %v3913_v0, 0.0  ;;  %5389 = vmatprep.mubr.f32.mxu1 %v7606_v31  ;;  %v9320_v46 = vpop.f32.mrb[234].mxu0 }
 0x2b5   :  { %v3928_v54 = vadd.f32 %v9320_v46, %v13138_v58  ;;  %5390 = vmatmul.mubr.f32.gmra.mrb[92].mxu1 %v7605_v59  ;;  %v3922_v52 = vpop.f32.mrb[235].mxu0  ;;  %v7609_v59 = vld [vmem:[%s14719_s7 + $0x280] sm:$0xff] }
 0x2b6   :  { %v13355_v50 = vpack.c.bf16 %v4304_v17, %v4303_v43  ;;  %9551 = vmatpush3.bf16.msra.mxu1 %v14892_v48  ;;  %v3923_v51 = vadd.f32 %v3922_v52, %v13140_v25  ;;  %6687 = vperm.xlu1 %9818, %v7868_v27   ;;  %v7819_v25 = vld [vmem:[%s14721_s8 + $0x310] sm:$0xff]  ;;  %v13382_v17 = vpop.permute.xlu1 %4476  ;;  %v7612_v27 = vld [vmem:[%s14719_s7 + $0x298] sm:$0xff]  ;;  %v7773_v46 = vld [vmem:[%s14721_s8 + $0x2a0] sm:$0xff] }
 0x2b7   :  { %v4306_v58 = vmax.f32 %v3928_v54, 0.0  ;;  %9553 = vmatprep.subr.bf16.mxu1 %v14893_v9  ;;  %6682 = vperm.xlu0 %9817, %v7867_v37   ;;  %v13394_v37 = vpop.permute.xlu0 %4635  ;;  %v7611_v48 = vld [vmem:[%s14719_s7 + $0x290] sm:$0xff] }
 0x2b8   :  { %v4305_v39 = vmax.f32 %v3923_v51, 0.0  ;;  %5394 = vmatprep.mubr.f32.mxu1 %v7608_v57  ;;  %v9323_v33 = vpop.f32.mrb[236].mxu0 }
 0x2b9   :  { %v3938_v36 = vadd.f32 %v9323_v33, %v13178_v30  ;;  %5395 = vmatmul.mubr.f32.gmra.mrb[94].mxu1 %v7607_v14  ;;  %v3932_v47 = vpop.f32.mrb[237].mxu0  ;;  %v7726_v14 = vld [vmem:[%s14721_s8 + $0x228] sm:$0xff] }
 0x2ba   :  { %v13375_v31 = vpack.c.bf16 %v4306_v58, %v4305_v39  ;;  %9555 = vmatpush3.bf16.msra.mxu1 %v14894_v53  ;;  %v3933_v0 = vadd.f32 %v3932_v47, %v13180_v41  ;;  %6396 = vperm.xlu1 %9818, %v7820_v8   ;;  %v13410_v8 = vpop.permute.xlu1 %4640  ;;  %v7613_v47 = vld [vmem:[%s14719_s7 + $0x2a0] sm:$0xff] }
 0x2bb   :  { %v4308_v30 = vmax.f32 %v3938_v36, 0.0  ;;  %9557 = vmatprep.subr.bf16.mxu1 %v12481_v10  ;;  %6391 = vperm.xlu0 %9817, %v7819_v25  }
 0x2bc   :  { %v4307_v41 = vmax.f32 %v3933_v0, 0.0  ;;  %5399 = vmatprep.mubr.f32.mxu1 %v7610_v55  ;;  %v9326_v43 = vpop.f32.mrb[238].mxu0  ;;  %v13419_v55 = vpop.permute.xlu0 %4645  ;;  %v7616_v0 = vld [vmem:[%s14719_s7 + $0x2b8] sm:$0xff] }
 0x2bd   :  { %v3948_v54 = vadd.f32 %v9326_v43, %v1771_v12  ;;  %5400 = vmatmul.mubr.f32.gmra.mrb[96].mxu1 %v7609_v59  ;;  %v3942_v10 = vpop.f32.mrb[239].mxu0  ;;  %v7614_v12 = vld [vmem:[%s14719_s7 + $0x2a8] sm:$0xff] }
 0x2be   :  { %v13396_v52 = vpack.c.bf16 %v4308_v30, %v4307_v41  ;;  %v3943_v57 = vadd.f32 %v3942_v10, %v1766_v21  ;;  %6115 = vperm.xlu1 %9818, %v7774_v16   ;;  %5404 = vmatprep.mubr.f32.mxu1 %v7612_v27  ;;  %v7725_v21 = vld [vmem:[%s14721_s8 + $0x220] sm:$0xff] }
 0x2bf   :  { %v4310_v51 = vmax.f32 %v3948_v54, 0.0  ;;  %6110 = vperm.xlu0 %9817, %v7773_v46   ;;  %v7869_v30 = vld [vmem:[%s14721_s8 + $0x3a0] sm:$0xff]  ;;  %v7615_v46 = vld [vmem:[%s14719_s7 + $0x2b0] sm:$0xff]  ;;  %v13437_v54 = vpop.permute.xlu1 %4650 }
 0x2c0   :  { %v4309_v58 = vmax.f32 %v3943_v57, 0.0  ;;  %v9329_v9 = vpop.f32.mrb[240].mxu0  ;;  %v7618_v57 = vld [vmem:[%s14719_s7 + $0x2c8] sm:$0xff] }
 0x2c1   :  { %v3958_v39 = vadd.f32 %v9329_v9, %v12925_v18  ;;  %5405 = vmatmul.mubr.f32.gmra.mrb[98].mxu1 %v7611_v48  ;;  %v3952_v33 = vpop.f32.mrb[241].mxu0  ;;  %v7870_v18 = vld [vmem:[%s14721_s8 + $0x3a8] sm:$0xff] }
 0x2c2   :  { %v13413_v25 = vpack.c.bf16 %v4310_v51, %v4309_v58  ;;  %v3953_v36 = vadd.f32 %v3952_v33, %v12902_v38  ;;  %5824 = vperm.xlu1 %9818, %v7726_v14   ;;  %5409 = vmatprep.mubr.f32.mxu1 %v7614_v12  ;;  %v7821_v51 = vld [vmem:[%s14721_s8 + $0x320] sm:$0xff]  ;;  %v13448_v14 = vpop.permute.xlu0 %4655 }
 0x2c3   :  { %v4312_v53 = vmax.f32 %v3958_v39, 0.0  ;;  %5819 = vperm.xlu0 %9817, %v7725_v21   ;;  %v7617_v39 = vld [vmem:[%s14719_s7 + $0x2c0] sm:$0xff] }
 0x2c4   :  { %14895 = vst [vmem:[#allocation29_spill] sm:$0xff] %v13413_v25  ;;  %v4311_v59 = vmax.f32 %v3953_v36, 0.0  ;;  %v9332_v38 = vpop.f32.mrb[242].mxu0  ;;  %v7776_v36 = vld [vmem:[%s14721_s8 + $0x2b8] sm:$0xff] }
 0x2c5   :  { %v3968_v16 = vadd.f32 %v9332_v38, %v12945_v63  ;;  %5410 = vmatmul.mubr.f32.gmra.mrb[100].mxu1 %v7613_v47  ;;  %v3962_v27 = vpop.f32.mrb[243].mxu0  ;;  %v7822_v63 = vld [vmem:[%s14721_s8 + $0x328] sm:$0xff] }
 0x2c6   :  { %v13431_v41 = vpack.c.bf16 %v4312_v53, %v4311_v59  ;;  %v3963_v43 = vadd.f32 %v3962_v27, %v12947_v2  ;;  %6697 = vperm.xlu1 %9818, %v7870_v18   ;;  %5414 = vmatprep.mubr.f32.mxu1 %v7616_v0  ;;  %v13466_v18 = vpop.permute.xlu1 %4660  ;;  %v13475_v27 = vpop.permute.xlu0 %4665 }
 0x2c7   :  { %v4314_v10 = vmax.f32 %v3968_v16, 0.0  ;;  %6692 = vperm.xlu0 %9817, %v7869_v30   ;;  %v7619_v16 = vld [vmem:[%s14719_s7 + $0x2d0] sm:$0xff] }
 0x2c8   :  { %v4313_v48 = vmax.f32 %v3963_v43, 0.0  ;;  %v9335_v2 = vpop.f32.mrb[244].mxu0 }
 0x2c9   :  { %v3978_v12 = vadd.f32 %v9335_v2, %v12989_v40  ;;  %5415 = vmatmul.mubr.f32.gmra.mrb[102].mxu1 %v7615_v46  ;;  %v3972_v58 = vpop.f32.mrb[245].mxu0  ;;  %v7620_v40 = vld [vmem:[%s14719_s7 + $0x2d8] sm:$0xff]  ;;  %v7622_v46 = vld [vmem:[%s14719_s7 + $0x2e8] sm:$0xff] }
 0x2ca   :  { %v13451_v9 = vpack.c.bf16 %v4314_v10, %v4313_v48  ;;  %v3973_v21 = vadd.f32 %v3972_v58, %v12991_v61  ;;  %6406 = vperm.xlu1 %9818, %v7822_v63   ;;  %5419 = vmatprep.mubr.f32.mxu1 %v7618_v57  ;;  %v7775_v61 = vld [vmem:[%s14721_s8 + $0x2b0] sm:$0xff] }
 0x2cb   :  { %v4316_v33 = vmax.f32 %v3978_v12, 0.0  ;;  %6401 = vperm.xlu0 %9817, %v7821_v51   ;;  %v7727_v57 = vld [vmem:[%s14721_s8 + $0x230] sm:$0xff] }
 0x2cc   :  { %v4315_v47 = vmax.f32 %v3973_v21, 0.0  ;;  %v9338_v53 = vpop.f32.mrb[246].mxu0 }
 0x2cd   :  { %v3988_v0 = vadd.f32 %v9338_v53, %v13033_v15  ;;  %5420 = vmatmul.mubr.f32.gmra.mrb[104].mxu1 %v7617_v39  ;;  %v3982_v59 = vpop.f32.mrb[247].mxu0  ;;  %v7728_v15 = vld [vmem:[%s14721_s8 + $0x238] sm:$0xff]  ;;  %v7871_v53 = vld [vmem:[%s14721_s8 + $0x3b0] sm:$0xff] }
 0x2ce   :  { %v13469_v38 = vpack.c.bf16 %v4316_v33, %v4315_v47  ;;  %v3983_v30 = vadd.f32 %v3982_v59, %v13035_v11  ;;  %6125 = vperm.xlu1 %9818, %v7776_v36   ;;  %5424 = vmatprep.mubr.f32.mxu1 %v7620_v40  ;;  %v7621_v33 = vld [vmem:[%s14719_s7 + $0x2e0] sm:$0xff] }
 0x2cf   :  { %v4318_v43 = vmax.f32 %v3988_v0, 0.0  ;;  %6120 = vperm.xlu0 %9817, %v7775_v61  }
 0x2d0   :  { %v4317_v10 = vmax.f32 %v3983_v30, 0.0  ;;  %v9395_v11 = vpop.f32.mrb[14].mxu1  ;;  %v9341_v63 = vpop.f32.mrb[248].mxu0 }
 0x2d1   :  { %v13487_v48 = vadd.f32 %v9395_v11, %v13382_v17  ;;  %v3998_v2 = vadd.f32 %v9341_v63, %v13077_v19  ;;  %v4551_v51 = vpop.f32.mrb[15].mxu1  ;;  %5425 = vmatmul.mubr.f32.gmra.mrb[106].mxu1 %v7619_v16  ;;  %v3992_v12 = vpop.f32.mrb[249].mxu0  ;;  %v7872_v19 = vld [vmem:[%s14721_s8 + $0x3b8] sm:$0xff] }
 0x2d2   :  { %v13490_v58 = vpack.c.bf16 %v4318_v43, %v4317_v10  ;;  %v13493_v21 = vadd.f32 %v4551_v51, %v13362_v49  ;;  %v3993_v39 = vadd.f32 %v3992_v12, %v13079_v7  ;;  %5834 = vperm.xlu1 %9818, %v7728_v15   ;;  %5429 = vmatprep.mubr.f32.mxu1 %v7622_v46  ;;  %v13499_v17 = vpop.permute.xlu1 %4670  ;;  %v7624_v49 = vld [vmem:[%s14719_s7 + $0x2f8] sm:$0xff]  ;;  %v7623_v43 = vld [vmem:[%s14719_s7 + $0x2f0] sm:$0xff]  ;;  %v13519_v15 = vpop.permute.xlu0 %4675  ;;  %v7642_v10 = vld [vmem:[%s14719_s7 + $0x308] sm:$0xff] }
 0x2d3   :  { %v4320_v36 = vmax.f32 %v3998_v2, 0.0  ;;  %5829 = vperm.xlu0 %9817, %v7727_v57   ;;  %v7823_v57 = vld [vmem:[%s14721_s8 + $0x330] sm:$0xff] }
 0x2d4   :  { %v4560_v7 = vmax.f32 %v13493_v21, %v13487_v48  ;;  %v4319_v40 = vmax.f32 %v3993_v39, 0.0  ;;  %v9344_v47 = vpop.f32.mrb[250].mxu0 }
 0x2d5   :  { %v4008_v61 = vadd.f32 %v9344_v47, %v13118_v29  ;;  %5430 = vmatmul.mubr.f32.gmra.mrb[108].mxu1 %v7621_v33  ;;  %v4002_v0 = vpop.f32.mrb[251].mxu0  ;;  %v7824_v29 = vld [vmem:[%s14721_s8 + $0x338] sm:$0xff]  ;;  %v7777_v47 = vld [vmem:[%s14721_s8 + $0x2c0] sm:$0xff] }
 0x2d6   :  { %v4561_v59 = vrot.slane %v4560_v7, 4  ;;  %v13513_v30 = vpack.c.bf16 %v4320_v36, %v4319_v40  ;;  %v4003_v16 = vadd.f32 %v4002_v0, %v13120_v3  ;;  %6707 = vperm.xlu1 %9818, %v7872_v19   ;;  %5434 = vmatprep.mubr.f32.mxu1 %v7624_v49  ;;  %v13530_v2 = vpop.permute.xlu1 %4680  ;;  %v7641_v19 = vld [vmem:[%s14719_s7 + $0x300] sm:$0xff] }
 0x2d7   :  { %v4322_v46 = vmax.f32 %v4008_v61, 0.0  ;;  %6702 = vperm.xlu0 %9817, %v7871_v53   ;;  %v13545_v53 = vpop.permute.xlu0 %4685 }
 0x2d8   :  { %v4562_v11 = vmax.f32 %v4560_v7, %v4561_v59  ;;  %v4321_v3 = vmax.f32 %v4003_v16, 0.0  ;;  %v9347_v63 = vpop.f32.mrb[252].mxu0  ;;  %v7778_v7 = vld [vmem:[%s14721_s8 + $0x2c8] sm:$0xff]  ;;  %v7643_v16 = vld [vmem:[%s14719_s7 + $0x310] sm:$0xff] }
 0x2d9   :  { %v4018_v51 = vadd.f32 %v9347_v63, %v13158_v6  ;;  %5435 = vmatmul.mubr.f32.gmra.mrb[110].mxu1 %v7623_v43  ;;  %v4012_v12 = vpop.f32.mrb[253].mxu0  ;;  %v14896_v59 = vld [vmem:[#allocation59_spill] sm:$0xff]  ;;  %v14897_v63 = vld [vmem:[#allocation61_spill] sm:$0xff] }
 0x2da   :  { %v4563_v39 = vrot.slane %v4562_v11, 2  ;;  %v13533_v33 = vpack.c.bf16 %v4322_v46, %v4321_v3  ;;  %v4013_v36 = vadd.f32 %v4012_v12, %v13160_v62  ;;  %6416 = vperm.xlu1 %9818, %v7824_v29   ;;  %5650 = vmatprep.mubr.f32.mxu1 %v7642_v10  ;;  %v7644_v62 = vld [vmem:[%s14719_s7 + $0x318] sm:$0xff]  ;;  %v13556_v43 = vpop.permute.xlu1 %4690  ;;  %v7730_v46 = vld [vmem:[%s14721_s8 + $0x248] sm:$0xff]  ;;  %v7729_v10 = vld [vmem:[%s14721_s8 + $0x240] sm:$0xff] }
 0x2db   :  { %v4324_v49 = vmax.f32 %v4018_v51, 0.0  ;;  %6411 = vperm.xlu0 %9817, %v7823_v57   ;;  %v7645_v57 = vld [vmem:[%s14719_s7 + $0x320] sm:$0xff]  ;;  %v13574_v51 = vpop.permute.xlu0 %4695  ;;  %v7874_v12 = vld [vmem:[%s14721_s8 + $0x3c8] sm:$0xff] }
 0x2dc   :  { %v4564_v6 = vmax.f32 %v4562_v11, %v4563_v39  ;;  %v4323_v40 = vmax.f32 %v4013_v36, 0.0  ;;  %v7646_v11 = vld [vmem:[%s14719_s7 + $0x328] sm:$0xff] }
 0x2dd   :  { %5651 = vmatmul.mubr.f32.vlgmr.msra.gmra.mrb[112].mxu1 %v7641_v19  ;;  %v7648_v19 = vld [vmem:[%s14719_s7 + $0x338] sm:$0xff] }
 0x2de   :  { %v4565_v61 = vrot.slane %v4564_v6, 1  ;;  %v13550_v0 = vpack.c.bf16 %v4324_v49, %v4323_v40  ;;  %9559 = vmatpush3.bf16.msra.mxu1 %v14896_v59  ;;  %6135 = vperm.xlu1 %9818, %v7778_v7   ;;  %v13583_v36 = vpop.permute.xlu1 %4700  ;;  %v7647_v49 = vld [vmem:[%s14719_s7 + $0x330] sm:$0xff]  ;;  %v7826_v7 = vld [vmem:[%s14721_s8 + $0x348] sm:$0xff] }
 0x2df   :  { %9561 = vmatprep.subr.bf16.mxu1 %v12497_v23  ;;  %6130 = vperm.xlu0 %9817, %v7777_v47   ;;  %v13599_v40 = vpop.permute.xlu0 %4705  ;;  %v7650_v47 = vld [vmem:[%s14719_s7 + $0x348] sm:$0xff]  ;;  %v7779_v59 = vld [vmem:[%s14721_s8 + $0x2d0] sm:$0xff] }
 0x2e0   :  { %v4566_v29 = vmax.f32 %v4564_v6, %v4565_v61  ;;  %5655 = vmatprep.mubr.f32.mxu1 %v7644_v62  ;;  %v7825_v6 = vld [vmem:[%s14721_s8 + $0x340] sm:$0xff]  ;;  %v7780_v61 = vld [vmem:[%s14721_s8 + $0x2d8] sm:$0xff] }
 0x2e1   :  { %5656 = vmatmul.mubr.f32.gmra.mrb[114].mxu1 %v7643_v16 }
 0x2e2   :  { %v4567_v3 = vsub.f32 %v13493_v21, %v4566_v29  ;;  %v4568_v23 = vsub.f32 %v13487_v48, %v4566_v29  ;;  %9563 = vmatpush3.bf16.msra.mxu1 %v14897_v63  ;;  %5844 = vperm.xlu1 %9818, %v7730_v46   ;;  %v7873_v48 = vld [vmem:[%s14721_s8 + $0x3c0] sm:$0xff]  ;;  %v13608_v62 = vpop.permute.xlu1 %4710  ;;  %v7732_v46 = vld [vmem:[%s14721_s8 + $0x258] sm:$0xff] }
 0x2e3   :  { %9565 = vmatprep.subr.bf16.mxu1 %v12513_v1  ;;  %5839 = vperm.xlu0 %9817, %v7729_v10   ;;  %v14898_v1 = vld [vmem:[#allocation63_spill] sm:$0xff]  ;;  %v13624_v16 = vpop.permute.xlu0 %4926 }
 0x2e4   :  { %v4569_v39 = vmul.f32 1.442695, %v4567_v3  ;;  %v4571_v21 = vmul.f32 1.442695, %v4568_v23  ;;  %5660 = vmatprep.mubr.f32.mxu1 %v7646_v11 }
 0x2e5   :  { %5661 = vmatmul.mubr.f32.gmra.mrb[116].mxu1 %v7645_v57 }
 0x2e6   :  { %9819 = vpow2.f32 %v4569_v39  ;;  %9567 = vmatpush3.bf16.msra.mxu1 %v14898_v1  ;;  %6717 = vperm.xlu1 %9818, %v7874_v12   ;;  %v13637_v3 = vpop.permute.xlu1 %4931  ;;  %v7653_v12 = vld [vmem:[%s14719_s7 + $0x360] sm:$0xff]  ;;  %v14899_v39 = vld [vmem:[#allocation7_spill] sm:$0xff]  ;;  %v7875_v1 = vld [vmem:[%s14721_s8 + $0x3d0] sm:$0xff] }
 0x2e7   :  { %9821 = vpow2.f32 %v4571_v21  ;;  %9569 = vmatprep.subr.bf16.mxu1 %v12529_v26  ;;  %6712 = vperm.xlu0 %9817, %v7873_v48   ;;  %v7649_v26 = vld [vmem:[%s14719_s7 + $0x340] sm:$0xff]  ;;  %v7876_v21 = vld [vmem:[%s14721_s8 + $0x3d8] sm:$0xff] }
 0x2e8   :  { %5665 = vmatprep.mubr.f32.mxu1 %v7648_v19 }
 0x2e9   :  { %5666 = vmatmul.mubr.f32.gmra.mrb[118].mxu1 %v7647_v49 }
 0x2ea   :  { %9571 = vmatpush3.bf16.msra.mxu1 %v12361_v56  ;;  %6426 = vperm.xlu1 %9818, %v7826_v7   ;;  %v7652_v56 = vld [vmem:[%s14719_s7 + $0x358] sm:$0xff] }
 0x2eb   :  { %9573 = vmatprep.subr.bf16.mxu1 %v12545_v13  ;;  %6421 = vperm.xlu0 %9817, %v7825_v6   ;;  %v7651_v13 = vld [vmem:[%s14719_s7 + $0x350] sm:$0xff]  ;;  %v7656_v7 = vld [vmem:[%s14719_s7 + $0x378] sm:$0xff] }
 0x2ec   :  { %5670 = vmatprep.mubr.f32.mxu1 %v7650_v47 }
 0x2ed   :  { %5671 = vmatmul.mubr.f32.gmra.mrb[120].mxu1 %v7649_v26 }
 0x2ee   :  { %9575 = vmatpush3.bf16.msra.mxu1 %v12384_v60  ;;  %6145 = vperm.xlu1 %9818, %v7780_v61   ;;  %v7731_v60 = vld [vmem:[%s14721_s8 + $0x250] sm:$0xff] }
 0x2ef   :  { %9577 = vmatprep.subr.bf16.mxu1 %v12561_v42  ;;  %6140 = vperm.xlu0 %9817, %v7779_v59   ;;  %v7654_v42 = vld [vmem:[%s14719_s7 + $0x368] sm:$0xff]  ;;  %v14900_v61 = vld [vmem:[#allocation64_spill] sm:$0xff] }
 0x2f0   :  { %v13630_v29 = vpop.eup %9819  ;;  %v8199_v10 = vpop.f32.mrb[16].mxu1  ;;  %5675 = vmatprep.mubr.f32.mxu1 %v7652_v56  ;;  %v7655_v59 = vld [vmem:[%s14719_s7 + $0x370] sm:$0xff] }
 0x2f1   :  { %v13635_v11 = vpop.eup %9821  ;;  %v8200_v23 = vpop.f32.mrb[17].mxu1  ;;  %5676 = vmatmul.mubr.f32.gmra.mrb[122].mxu1 %v7651_v13  ;;  %v14901_v13 = vld [vmem:[#allocation10_spill] sm:$0xff] }
 0x2f2   :  { %v4573_v63 = vadd.f32 %v13635_v11, %v13630_v29  ;;  %v8201_v57 = vadd.f32 %v8200_v23, %v8199_v10  ;;  %9579 = vmatpush3.bf16.msra.mxu1 %v12406_v44  ;;  %5854 = vperm.xlu1 %9818, %v7732_v46   ;;  %v13655_v44 = vpop.permute.xlu0 %4936  ;;  %v13665_v56 = vpop.permute.xlu1 %4941  ;;  %v7828_v46 = vld [vmem:[%s14721_s8 + $0x358] sm:$0xff]  ;;  %v7827_v23 = vld [vmem:[%s14721_s8 + $0x350] sm:$0xff] }
 0x2f3   :  { %9581 = vmatprep.subr.bf16.mxu1 %v14899_v39  ;;  %5849 = vperm.xlu0 %9817, %v7731_v60  }
 0x2f4   :  { %v4574_v48 = vrot.slane %v4573_v63, 4  ;;  %v8202_v19 = vpop.f32.mrb[18].mxu1  ;;  %5680 = vmatprep.mubr.f32.mxu1 %v7654_v42  ;;  %v4780_v47 = vadd.f32 %v8201_v57, %v13394_v37  ;;  %v6912_v57 = vld [vmem:[%s14722_s9 + $0x8] sm:$0xff] }
 0x2f5   :  { %v8203_v49 = vpop.f32.mrb[19].mxu1  ;;  %5681 = vmatmul.mubr.f32.gmra.mrb[124].mxu1 %v7653_v12  ;;  %7003 = vmatprep.mubr.f32.mxu0 %v6912_v57 }
 0x2f6   :  { %v4575_v6 = vadd.f32 %v4574_v48, %v4573_v63  ;;  %v8204_v26 = vadd.f32 %v8203_v49, %v8202_v19  ;;  %9583 = vmatpush3.bf16.msra.mxu1 %v14900_v61  ;;  %6727 = vperm.xlu1 %9818, %v7876_v21   ;;  %v7658_v63 = vld [vmem:[%s14719_s7 + $0x388] sm:$0xff]  ;;  %v4858_v39 = vmax.f32 %v4780_v47, 0.0  ;;  %v14902_v48 = vld [vmem:[#allocation4_spill] sm:$0xff]  ;;  %v7657_v19 = vld [vmem:[%s14719_s7 + $0x380] sm:$0xff] }
 0x2f7   :  { %9585 = vmatprep.subr.bf16.mxu1 %v14901_v13  ;;  %6722 = vperm.xlu0 %9817, %v7875_v1   ;;  %v13685_v1 = vpop.permute.xlu0 %4946  ;;  %v14903_v49 = vld [vmem:[#allocation6_spill] sm:$0xff]  ;;  %v13699_v13 = vpop.permute.xlu1 %4951 }
 0x2f8   :  { %v4576_v10 = vrot.slane %v4575_v6, 2  ;;  %v4785_v37 = vadd.f32 %v8204_v26, %v13410_v8  ;;  %v8205_v60 = vpop.f32.mrb[20].mxu1  ;;  %5685 = vmatprep.mubr.f32.mxu1 %v7656_v7  ;;  %v7782_v7 = vld [vmem:[%s14721_s8 + $0x2e8] sm:$0xff]  ;;  %v7781_v61 = vld [vmem:[%s14721_s8 + $0x2e0] sm:$0xff] }
 0x2f9   :  { %v8206_v42 = vpop.f32.mrb[21].mxu1  ;;  %5686 = vmatmul.mubr.f32.gmra.mrb[126].mxu1 %v7655_v59 }
 0x2fa   :  { %v4577_v12 = vadd.f32 %v4576_v10, %v4575_v6  ;;  %v4859_v21 = vmax.f32 %v4785_v37, 0.0  ;;  %v8207_v8 = vadd.f32 %v8206_v42, %v8205_v60  ;;  %9587 = vmatpush3.bf16.msra.mxu1 %v14902_v48  ;;  %6436 = vperm.xlu1 %9818, %v7828_v46   ;;  %v7660_v6 = vld [vmem:[%s14719_s7 + $0x398] sm:$0xff]  ;;  %v7734_v42 = vld [vmem:[%s14721_s8 + $0x268] sm:$0xff] }
 0x2fb   :  { %9589 = vmatprep.subr.bf16.mxu1 %v14903_v49  ;;  %6431 = vperm.xlu0 %9817, %v7827_v23   ;;  %v7659_v23 = vld [vmem:[%s14719_s7 + $0x390] sm:$0xff]  ;;  %v7661_v49 = vld [vmem:[%s14719_s7 + $0x3a0] sm:$0xff] }
 0x2fc   :  { %v4578_v47 = vrot.slane %v4577_v12, 1  ;;  %v8208_v26 = vpop.f32.mrb[22].mxu1  ;;  %5690 = vmatprep.mubr.f32.mxu1 %v7658_v63  ;;  %v13697_v59 = vpack.c.bf16 %v4859_v21, %v4858_v39  ;;  %v4790_v37 = vadd.f32 %v8207_v8, %v13419_v55  ;;  %v7662_v63 = vld [vmem:[%s14719_s7 + $0x3a8] sm:$0xff]  ;;  %v13715_v39 = vpop.permute.xlu0 %4956 }
 0x2fd   :  { %v8209_v46 = vpop.f32.mrb[23].mxu1  ;;  %5691 = vmatmul.mubr.f32.gmra.mrb[128].mxu1 %v7657_v19 }
 0x2fe   :  { %v4579_v10 = vadd.f32 %v4578_v47, %v4577_v12  ;;  %v8210_v60 = vadd.f32 %v8209_v46, %v8208_v26  ;;  %6155 = vperm.xlu1 %9818, %v7782_v7   ;;  %5695 = vmatprep.mubr.f32.mxu1 %v7660_v6  ;;  %v7733_v12 = vld [vmem:[%s14721_s8 + $0x260] sm:$0xff]  ;;  %v4860_v8 = vmax.f32 %v4790_v37, 0.0  ;;  %v13720_v7 = vpop.permute.xlu1 %4961  ;;  %v7664_v6 = vld [vmem:[%s14719_s7 + $0x3b8] sm:$0xff] }
 0x2ff   :  { %6150 = vperm.xlu0 %9817, %v7781_v61   ;;  %v7877_v61 = vld [vmem:[%s14721_s8 + $0x3e0] sm:$0xff] }
 0x300   :  { %9823 = vrcp.f32 %v4579_v10  ;;  %v4795_v57 = vadd.f32 %v8210_v60, %v13437_v54  ;;  %v8211_v55 = vpop.f32.mrb[24].mxu1  ;;  %v7878_v54 = vld [vmem:[%s14721_s8 + $0x3e8] sm:$0xff]  ;;  %v7663_v60 = vld [vmem:[%s14719_s7 + $0x3b0] sm:$0xff] }
 0x301   :  { %v8212_v21 = vpop.f32.mrb[25].mxu1  ;;  %5696 = vmatmul.mubr.f32.gmra.mrb[130].mxu1 %v7659_v23  ;;  %v13737_v23 = vpop.permute.xlu0 %4966 }
 0x302   :  { %v4861_v48 = vmax.f32 %v4795_v57, 0.0  ;;  %v8213_v19 = vadd.f32 %v8212_v21, %v8211_v55  ;;  %5864 = vperm.xlu1 %9818, %v7734_v42   ;;  %5700 = vmatprep.mubr.f32.mxu1 %v7662_v63  ;;  %v7830_v42 = vld [vmem:[%s14721_s8 + $0x368] sm:$0xff]  ;;  %v7829_v55 = vld [vmem:[%s14721_s8 + $0x360] sm:$0xff] }
 0x303   :  { %5859 = vperm.xlu0 %9817, %v7733_v12   ;;  %v7666_v63 = vld [vmem:[%s14719_s7 + $0x3c8] sm:$0xff]  ;;  %v13749_v12 = vpop.permute.xlu1 %4971 }
 0x304   :  { %v13728_v47 = vpack.c.bf16 %v4861_v48, %v4860_v8  ;;  %v8214_v26 = vpop.f32.mrb[26].mxu1  ;;  %v4800_v10 = vadd.f32 %v8213_v19, %v13448_v14 }
 0x305   :  { %v8215_v46 = vpop.f32.mrb[27].mxu1  ;;  %5701 = vmatmul.mubr.f32.gmra.mrb[132].mxu1 %v7661_v49 }
 0x306   :  { %v8216_v37 = vadd.f32 %v8215_v46, %v8214_v26  ;;  %6737 = vperm.xlu1 %9818, %v7878_v54   ;;  %5705 = vmatprep.mubr.f32.mxu1 %v7664_v6  ;;  %v4862_v48 = vmax.f32 %v4800_v10, 0.0  ;;  %v7665_v54 = vld [vmem:[%s14719_s7 + $0x3c0] sm:$0xff]  ;;  %v7784_v6 = vld [vmem:[%s14721_s8 + $0x2f8] sm:$0xff] }
 0x307   :  { %6732 = vperm.xlu0 %9817, %v7877_v61   ;;  %v7668_v26 = vld [vmem:[%s14719_s7 + $0x3d8] sm:$0xff] }
 0x308   :  { %v4805_v14 = vadd.f32 %v8216_v37, %v13466_v18  ;;  %v8217_v57 = vpop.f32.mrb[28].mxu1  ;;  %v7783_v37 = vld [vmem:[%s14721_s8 + $0x2f0] sm:$0xff] }
 0x309   :  { %v8218_v21 = vpop.f32.mrb[29].mxu1  ;;  %5706 = vmatmul.mubr.f32.gmra.mrb[134].mxu1 %v7663_v60 }
 0x30a   :  { %v9824_v8 = vpop.eup %9823  ;;  %v4863_v19 = vmax.f32 %v4805_v14, 0.0  ;;  %v8219_v49 = vadd.f32 %v8218_v21, %v8217_v57  ;;  %6446 = vperm.xlu1 %9818, %v7830_v42   ;;  %5710 = vmatprep.mubr.f32.mxu1 %v7666_v63  ;;  %v7667_v63 = vld [vmem:[%s14719_s7 + $0x3d0] sm:$0xff]  ;;  %v13779_v14 = vpop.permute.xlu1 %4981  ;;  %v7736_v57 = vld [vmem:[%s14721_s8 + $0x278] sm:$0xff] }
 0x30b   :  { %v4581_v18 = vmul.f32 %v9824_v8, %v13630_v29  ;;  %6441 = vperm.xlu0 %9817, %v7829_v55   ;;  %v4582_v61 = vmul.f32 %v9824_v8, %v13635_v11  ;;  %v13770_v29 = vpop.permute.xlu0 %4976  ;;  %v7670_v55 = vld [vmem:[%s14719_s7 + $0x3e8] sm:$0xff]  ;;  %v7735_v8 = vld [vmem:[%s14721_s8 + $0x270] sm:$0xff] }
 0x30c   :  { %v13762_v46 = vpack.c.bf16 %v4863_v19, %v4862_v48  ;;  %v8220_v10 = vpop.f32.mrb[30].mxu1  ;;  %v4810_v11 = vadd.f32 %v8219_v49, %v13475_v27 }
 0x30d   :  { %4583 = vst [vmem:[%s14723_s11] sm:$0xff] %v4581_v18  ;;  %v8221_v60 = vpop.f32.mrb[31].mxu1  ;;  %5711 = vmatmul.mubr.f32.gmra.mrb[136].mxu1 %v7665_v54  ;;  %4584 = vst [vmem:[%s14723_s11 + $0x8] sm:$0xff] %v4582_v61  ;;  %v7669_v18 = vld [vmem:[%s14719_s7 + $0x3e0] sm:$0xff] }
 0x30e   :  { %v8222_v42 = vadd.f32 %v8221_v60, %v8220_v10  ;;  %6165 = vperm.xlu1 %9818, %v7784_v6   ;;  %5715 = vmatprep.mubr.f32.mxu1 %v7668_v26  ;;  %v4864_v19 = vmax.f32 %v4810_v11, 0.0  ;;  %v7672_v26 = vld [vmem:[%s14719_s7 + $0x3f8] sm:$0xff]  ;;  %v13807_v60 = vpop.permute.xlu1 %4991 }
 0x30f   :  { %6160 = vperm.xlu0 %9817, %v7783_v37   ;;  %v13794_v6 = vpop.permute.xlu0 %4986  ;;  %v7879_v37 = vld [vmem:[%s14721_s8 + $0x3f0] sm:$0xff] }
 0x310   :  { %v4815_v27 = vadd.f32 %v8222_v42, %v13499_v17  ;;  %v8223_v21 = vpop.f32.mrb[32].mxu1  ;;  %v7880_v17 = vld [vmem:[%s14721_s8 + $0x3f8] sm:$0xff] }
 0x311   :  { %v8224_v48 = vpop.f32.mrb[33].mxu1  ;;  %5716 = vmatmul.mubr.f32.gmra.mrb[138].mxu1 %v7667_v63 }
 0x312   :  { %v4865_v49 = vmax.f32 %v4815_v27, 0.0  ;;  %v8225_v54 = vadd.f32 %v8224_v48, %v8223_v21  ;;  %5874 = vperm.xlu1 %9818, %v7736_v57   ;;  %5720 = vmatprep.mubr.f32.mxu1 %v7670_v55  ;;  %v7671_v57 = vld [vmem:[%s14719_s7 + $0x3f0] sm:$0xff]  ;;  %v7832_v55 = vld [vmem:[%s14721_s8 + $0x378] sm:$0xff]  ;;  %v7690_v27 = vld [vmem:[%s14719_s7 + $0x408] sm:$0xff] }
 0x313   :  { %5869 = vperm.xlu0 %9817, %v7735_v8   ;;  %v13823_v48 = vpop.permute.xlu0 %4996 }
 0x314   :  { %v13802_v61 = vpack.c.bf16 %v4865_v49, %v4864_v19  ;;  %v8226_v10 = vpop.f32.mrb[34].mxu1  ;;  %v4820_v42 = vadd.f32 %v8225_v54, %v13519_v15  ;;  %v7831_v15 = vld [vmem:[%s14721_s8 + $0x370] sm:$0xff] }
 0x315   :  { %v8227_v11 = vpop.f32.mrb[35].mxu1  ;;  %5721 = vmatmul.mubr.f32.gmra.mrb[140].mxu1 %v7669_v18 }
 0x316   :  { %v8228_v63 = vadd.f32 %v8227_v11, %v8226_v10  ;;  %6747 = vperm.xlu1 %9818, %v7880_v17   ;;  %5725 = vmatprep.mubr.f32.mxu1 %v7672_v26  ;;  %v4866_v49 = vmax.f32 %v4820_v42, 0.0  ;;  %v7689_v17 = vld [vmem:[%s14719_s7 + $0x400] sm:$0xff]  ;;  %v13828_v26 = vpop.permute.xlu1 %5001 }
 0x317   :  { %6742 = vperm.xlu0 %9817, %v7879_v37   ;;  %v6927_v11 = vld [vmem:[%s14724_s10] sm:$0xff] }
 0x318   :  { %v4825_v21 = vadd.f32 %v8228_v63, %v13530_v2  ;;  %v8229_v8 = vpop.f32.mrb[36].mxu1  ;;  %v6928_v2 = vld [vmem:[%s14724_s10 + $0x8] sm:$0xff]  ;;  %v7692_v63 = vld [vmem:[%s14719_s7 + $0x418] sm:$0xff] }
 0x319   :  { %v8230_v19 = vpop.f32.mrb[37].mxu1  ;;  %5726 = vmatmul.mubr.f32.gmra.mrb[142].mxu1 %v7671_v57 }
 0x31a   :  { %v4867_v54 = vmax.f32 %v4825_v21, 0.0  ;;  %v8231_v18 = vadd.f32 %v8230_v19, %v8229_v8  ;;  %6456 = vperm.xlu1 %9818, %v7832_v55   ;;  %5941 = vmatprep.mubr.f32.mxu1 %v7690_v27  ;;  %v14904_v27 = vld [vmem:[#allocation13_spill] sm:$0xff]  ;;  %v7691_v21 = vld [vmem:[%s14719_s7 + $0x410] sm:$0xff]  ;;  %v13846_v8 = vpop.permute.xlu0 %5508  ;;  %v7694_v19 = vld [vmem:[%s14719_s7 + $0x428] sm:$0xff] }
 0x31b   :  { %6451 = vperm.xlu0 %9817, %v7831_v15   ;;  %v14905_v15 = vld [vmem:[#allocation21_spill] sm:$0xff] }
 0x31c   :  { %v13833_v10 = vpack.c.bf16 %v4867_v54, %v4866_v49  ;;  %v8232_v37 = vpop.f32.mrb[38].mxu1  ;;  %v4830_v57 = vadd.f32 %v8231_v18, %v13545_v53  ;;  %v13853_v54 = vpop.permute.xlu1 %5513 }
 0x31d   :  { %v8233_v42 = vpop.f32.mrb[39].mxu1  ;;  %5942 = vmatmul.mubr.f32.vlgmr.msra.gmra.mrb[144].mxu1 %v7689_v17 }
 0x31e   :  { %v8234_v55 = vadd.f32 %v8233_v42, %v8232_v37  ;;  %9591 = vmatpush3.bf16.msra.mxu1 %v14904_v27  ;;  %6936 = vperm.xlu1 %9818, %v6928_v2   ;;  %v4868_v17 = vmax.f32 %v4830_v57, 0.0  ;;  %v14906_v42 = vld [vmem:[#allocation15_spill] sm:$0xff]  ;;  %v14907_v27 = vld [vmem:[#allocation8_spill] sm:$0xff] }
 0x31f   :  { %9593 = vmatprep.subr.bf16.mxu1 %v14905_v15  ;;  %6931 = vperm.xlu0 %9817, %v6927_v11   ;;  %v7693_v11 = vld [vmem:[%s14719_s7 + $0x420] sm:$0xff] }
 0x320   :  { %v4835_v49 = vadd.f32 %v8234_v55, %v13556_v43  ;;  %v8235_v53 = vpop.f32.mrb[40].mxu1  ;;  %5946 = vmatprep.mubr.f32.mxu1 %v7692_v63  ;;  %v7696_v43 = vld [vmem:[%s14719_s7 + $0x438] sm:$0xff] }
 0x321   :  { %v8236_v18 = vpop.f32.mrb[41].mxu1  ;;  %5947 = vmatmul.mubr.f32.gmra.mrb[146].mxu1 %v7691_v21  ;;  %v13865_v21 = vpop.permute.xlu0 %5217 }
 0x322   :  { %v4869_v2 = vmax.f32 %v4835_v49, 0.0  ;;  %v8237_v37 = vadd.f32 %v8236_v18, %v8235_v53  ;;  %9595 = vmatpush3.bf16.msra.mxu1 %v14906_v42  ;;  %5951 = vmatprep.mubr.f32.mxu1 %v7694_v19  ;;  %v14908_v49 = vld [vmem:[#allocation16_spill] sm:$0xff]  ;;  %v13872_v18 = vpop.permute.xlu1 %5222  ;;  %v14909_v42 = vld [vmem:[#allocation22_spill] sm:$0xff] }
 0x323   :  { %9597 = vmatprep.subr.bf16.mxu1 %v14907_v27  ;;  %v7695_v53 = vld [vmem:[%s14719_s7 + $0x430] sm:$0xff] }
 0x324   :  { %v13863_v63 = vpack.c.bf16 %v4869_v2, %v4868_v17  ;;  %v8238_v55 = vpop.f32.mrb[42].mxu1  ;;  %v4840_v15 = vadd.f32 %v8237_v37, %v13574_v51  ;;  %v7698_v17 = vld [vmem:[%s14719_s7 + $0x448] sm:$0xff] }
 0x325   :  { %v8239_v57 = vpop.f32.mrb[43].mxu1  ;;  %5952 = vmatmul.mubr.f32.gmra.mrb[148].mxu1 %v7693_v11 }
 0x326   :  { %v8240_v19 = vadd.f32 %v8239_v57, %v8238_v55  ;;  %9599 = vmatpush3.bf16.msra.mxu1 %v14908_v49  ;;  %5956 = vmatprep.mubr.f32.mxu1 %v7696_v43  ;;  %v4870_v37 = vmax.f32 %v4840_v15, 0.0  ;;  %v14910_v55 = vld [vmem:[#allocation17_spill] sm:$0xff]  ;;  %v7697_v57 = vld [vmem:[%s14719_s7 + $0x440] sm:$0xff]  ;;  %v13883_v49 = vpop.permute.xlu0 %5518 }
 0x327   :  { %9601 = vmatprep.subr.bf16.mxu1 %v14909_v42  ;;  %14911 = vst [vmem:[#allocation38_spill] sm:$0xff] %v13883_v49  ;;  %v14912_v42 = vld [vmem:[#allocation9_spill] sm:$0xff]  ;;  %v14917_v49 = vld [vmem:[#allocation11_spill] sm:$0xff] }
 0x328   :  { %v4845_v2 = vadd.f32 %v8240_v19, %v13583_v36  ;;  %v8241_v11 = vpop.f32.mrb[44].mxu1  ;;  %v7700_v36 = vld [vmem:[%s14719_s7 + $0x458] sm:$0xff] }
 0x329   :  { %v8242_v51 = vpop.f32.mrb[45].mxu1  ;;  %5957 = vmatmul.mubr.f32.gmra.mrb[150].mxu1 %v7695_v53  ;;  %v13891_v53 = vpop.permute.xlu1 %5523 }
 0x32a   :  { %v4871_v27 = vmax.f32 %v4845_v2, 0.0  ;;  %v8243_v43 = vadd.f32 %v8242_v51, %v8241_v11  ;;  %9603 = vmatpush3.bf16.msra.mxu1 %v14910_v55  ;;  %5961 = vmatprep.mubr.f32.mxu1 %v7698_v17  ;;  %14913 = vst [vmem:[#allocation30_spill] sm:$0xff] %v13891_v53  ;;  %v14914_v51 = vld [vmem:[#allocation27_spill] sm:$0xff]  ;;  %v7699_v55 = vld [vmem:[%s14719_s7 + $0x450] sm:$0xff] }
 0x32b   :  { %9605 = vmatprep.subr.bf16.mxu1 %v14912_v42  ;;  %v14915_v42 = vld [vmem:[#allocation23_spill] sm:$0xff] }
 0x32c   :  { %v13889_v19 = vpack.c.bf16 %v4871_v27, %v4870_v37  ;;  %v8244_v15 = vpop.f32.mrb[46].mxu1  ;;  %v4850_v17 = vadd.f32 %v8243_v43, %v13599_v40  ;;  %v7702_v37 = vld [vmem:[%s14719_s7 + $0x468] sm:$0xff] }
 0x32d   :  { %v8245_v2 = vpop.f32.mrb[47].mxu1  ;;  %5962 = vmatmul.mubr.f32.gmra.mrb[152].mxu1 %v7697_v57  ;;  %v13903_v57 = vpop.permute.xlu0 %5227 }
 0x32e   :  { %v8246_v11 = vadd.f32 %v8245_v2, %v8244_v15  ;;  %9607 = vmatpush3.bf16.msra.mxu1 %v14914_v51  ;;  %5966 = vmatprep.mubr.f32.mxu1 %v7700_v36  ;;  %v4872_v43 = vmax.f32 %v4850_v17, 0.0  ;;  %v14916_v2 = vld [vmem:[#allocation19_spill] sm:$0xff]  ;;  %v7701_v51 = vld [vmem:[%s14719_s7 + $0x460] sm:$0xff] }
 0x32f   :  { %9609 = vmatprep.subr.bf16.mxu1 %v14915_v42  ;;  %v13909_v42 = vpop.permute.xlu1 %5232 }
 0x330   :  { %v4855_v27 = vadd.f32 %v8246_v11, %v13608_v62  ;;  %v8279_v53 = vpop.f32.mrb[48].mxu1  ;;  %v7704_v62 = vld [vmem:[%s14719_s7 + $0x478] sm:$0xff] }
 0x331   :  { %v8280_v40 = vpop.f32.mrb[49].mxu1  ;;  %5967 = vmatmul.mubr.f32.gmra.mrb[154].mxu1 %v7699_v55 }
 0x332   :  { %v4873_v15 = vmax.f32 %v4855_v27, 0.0  ;;  %v8281_v36 = vadd.f32 %v8280_v40, %v8279_v53  ;;  %9611 = vmatpush3.bf16.msra.mxu1 %v14916_v2  ;;  %5971 = vmatprep.mubr.f32.mxu1 %v7702_v37  ;;  %v14918_v27 = vld [vmem:[#allocation5_spill] sm:$0xff]  ;;  %v7703_v40 = vld [vmem:[%s14719_s7 + $0x470] sm:$0xff] }
 0x333   :  { %9613 = vmatprep.subr.bf16.mxu1 %v14917_v49  ;;  %v13922_v49 = vpop.permute.xlu0 %5528  ;;  %v14920_v2 = vld [vmem:[#allocation60_spill] sm:$0xff] }
 0x334   :  { %v13915_v11 = vpack.c.bf16 %v4873_v15, %v4872_v43  ;;  %v8282_v17 = vpop.f32.mrb[50].mxu1  ;;  %v5071_v53 = vadd.f32 %v8281_v36, %v13624_v16  ;;  %14919 = vst [vmem:[#allocation39_spill] sm:$0xff] %v13922_v49  ;;  %v7706_v43 = vld [vmem:[%s14719_s7 + $0x488] sm:$0xff]  ;;  %v13929_v16 = vpop.permute.xlu1 %5533  ;;  %v14923_v49 = vld [vmem:[#allocation36_spill] sm:$0xff] }
 0x335   :  { %v8283_v55 = vpop.f32.mrb[51].mxu1  ;;  %5972 = vmatmul.mubr.f32.gmra.mrb[156].mxu1 %v7701_v51  ;;  %14921 = vst [vmem:[#allocation31_spill] sm:$0xff] %v13929_v16 }
 0x336   :  { %v8284_v37 = vadd.f32 %v8283_v55, %v8282_v17  ;;  %9615 = vmatpush3.bf16.msra.mxu1 %v14918_v27  ;;  %5976 = vmatprep.mubr.f32.mxu1 %v7704_v62  ;;  %v5149_v62 = vmax.f32 %v5071_v53, 0.0  ;;  %v14922_v27 = vld [vmem:[#allocation20_spill] sm:$0xff] }
 0x337   :  { %9617 = vmatprep.subr.bf16.mxu1 %v14920_v2  ;;  %v7705_v2 = vld [vmem:[%s14719_s7 + $0x480] sm:$0xff]  ;;  %v13939_v25 = vpop.permute.xlu0 %5237 }
 0x338   :  { %v5076_v15 = vadd.f32 %v8284_v37, %v13637_v3  ;;  %v8285_v51 = vpop.f32.mrb[52].mxu1  ;;  %v7708_v3 = vld [vmem:[%s14719_s7 + $0x498] sm:$0xff] }
 0x339   :  { %v8286_v36 = vpop.f32.mrb[53].mxu1  ;;  %5977 = vmatmul.mubr.f32.gmra.mrb[158].mxu1 %v7703_v40 }
 0x33a   :  { %v5150_v17 = vmax.f32 %v5076_v15, 0.0  ;;  %v8287_v55 = vadd.f32 %v8286_v36, %v8285_v51  ;;  %9619 = vmatpush3.bf16.msra.mxu1 %v14922_v27  ;;  %5981 = vmatprep.mubr.f32.mxu1 %v7706_v43  ;;  %v7707_v43 = vld [vmem:[%s14719_s7 + $0x490] sm:$0xff]  ;;  %v7710_v51 = vld [vmem:[%s14719_s7 + $0x4a8] sm:$0xff]  ;;  %v7709_v27 = vld [vmem:[%s14719_s7 + $0x4a0] sm:$0xff] }
 0x33b   :  { %9621 = vmatprep.subr.bf16.mxu1 %v14923_v49  ;;  %v13945_v49 = vpop.permute.xlu1 %5242 }
 0x33c   :  { %v8288_v37 = vpop.f32.mrb[54].mxu1  ;;  %v9684_v16 = vpack.c.bf16 %v5150_v17, %v5149_v62  ;;  %v5081_v40 = vadd.f32 %v8287_v55, %v13655_v44 }
 0x33d   :  { %v8289_v53 = vpop.f32.mrb[55].mxu1  ;;  %5982 = vmatmul.mubr.f32.gmra.mrb[160].mxu1 %v7705_v2  ;;  %v13955_v2 = vpop.permute.xlu0 %5538 }
 0x33e   :  { %v8290_v15 = vadd.f32 %v8289_v53, %v8288_v37  ;;  %9685 = vmatprep.subr.bf16.mxu0 %v9684_v16  ;;  %5986 = vmatprep.mubr.f32.mxu1 %v7708_v3  ;;  %v5151_v44 = vmax.f32 %v5081_v40, 0.0 }
 0x33f   :  { %9687 = vmatpush3.bf16.msra.mxu0 %v13697_v59  ;;  %v7712_v59 = vld [vmem:[%s14719_s7 + $0x4b8] sm:$0xff] }
 0x340   :  { %v5086_v36 = vadd.f32 %v8290_v15, %v13665_v56  ;;  %v8291_v62 = vpop.f32.mrb[56].mxu1  ;;  %v13960_v56 = vpop.permute.xlu1 %5543 }
 0x341   :  { %v8292_v17 = vpop.f32.mrb[57].mxu1  ;;  %5987 = vmatmul.mubr.f32.gmra.mrb[162].mxu1 %v7707_v43  ;;  %v7711_v43 = vld [vmem:[%s14719_s7 + $0x4b0] sm:$0xff] }
 0x342   :  { %v5152_v16 = vmax.f32 %v5086_v36, 0.0  ;;  %v8293_v55 = vadd.f32 %v8292_v17, %v8291_v62  ;;  %5991 = vmatprep.mubr.f32.mxu1 %v7710_v51  ;;  %v7714_v51 = vld [vmem:[%s14719_s7 + $0x4c8] sm:$0xff]  ;;  %v13971_v17 = vpop.permute.xlu0 %5247 }
 0x344   :  { %v8294_v3 = vpop.f32.mrb[58].mxu1  ;;  %v9688_v37 = vpack.c.bf16 %v5152_v16, %v5151_v44  ;;  %v5091_v40 = vadd.f32 %v8293_v55, %v13685_v1 }
 0x345   :  { %v8295_v53 = vpop.f32.mrb[59].mxu1  ;;  %5992 = vmatmul.mubr.f32.gmra.mrb[164].mxu1 %v7709_v27  ;;  %v7713_v27 = vld [vmem:[%s14719_s7 + $0x4c0] sm:$0xff] }
 0x346   :  { %v8296_v15 = vadd.f32 %v8295_v53, %v8294_v3  ;;  %9689 = vmatprep.subr.bf16.mxu0 %v9688_v37  ;;  %5996 = vmatprep.mubr.f32.mxu1 %v7712_v59  ;;  %v5153_v1 = vmax.f32 %v5091_v40, 0.0  ;;  %v7716_v59 = vld [vmem:[%s14719_s7 + $0x4d8] sm:$0xff] }
 0x347   :  { %9691 = vmatpush3.bf16.msra.mxu0 %v13728_v47  ;;  %v13976_v47 = vpop.permute.xlu1 %5252 }
 0x348   :  { %v5096_v36 = vadd.f32 %v8296_v15, %v13699_v13  ;;  %v8297_v62 = vpop.f32.mrb[60].mxu1  ;;  %v7715_v15 = vld [vmem:[%s14719_s7 + $0x4d0] sm:$0xff] }
 0x349   :  { %v8298_v44 = vpop.f32.mrb[61].mxu1  ;;  %5997 = vmatmul.mubr.f32.gmra.mrb[166].mxu1 %v7711_v43  ;;  %v13985_v43 = vpop.permute.xlu0 %5548 }
 0x34a   :  { %v5154_v16 = vmax.f32 %v5096_v36, 0.0  ;;  %v8299_v55 = vadd.f32 %v8298_v44, %v8297_v62  ;;  %6001 = vmatprep.mubr.f32.mxu1 %v7714_v51  ;;  %v7718_v51 = vld [vmem:[%s14719_s7 + $0x4e8] sm:$0xff] }
 0x34b   :  { %v13992_v44 = vpop.permute.xlu1 %5553 }
 0x34c   :  { %v8300_v13 = vpop.f32.mrb[62].mxu1  ;;  %v9692_v3 = vpack.c.bf16 %v5154_v16, %v5153_v1  ;;  %v5101_v53 = vadd.f32 %v8299_v55, %v13715_v39 }
 0x34d   :  { %v8301_v37 = vpop.f32.mrb[63].mxu1  ;;  %6002 = vmatmul.mubr.f32.gmra.mrb[168].mxu1 %v7713_v27  ;;  %v7717_v27 = vld [vmem:[%s14719_s7 + $0x4e0] sm:$0xff] }
 0x34e   :  { %v8302_v40 = vadd.f32 %v8301_v37, %v8300_v13  ;;  %9693 = vmatprep.subr.bf16.mxu0 %v9692_v3  ;;  %6006 = vmatprep.mubr.f32.mxu1 %v7716_v59  ;;  %v5155_v1 = vmax.f32 %v5101_v53, 0.0 }
 0x34f   :  { %9695 = vmatpush3.bf16.msra.mxu0 %v13762_v46  ;;  %v7720_v46 = vld [vmem:[%s14719_s7 + $0x4f8] sm:$0xff] }
 0x350   :  { %v5106_v36 = vadd.f32 %v8302_v40, %v13720_v7  ;;  %v8303_v62 = vpop.f32.mrb[64].mxu1  ;;  %v14000_v7 = vpop.permute.xlu0 %5257  ;;  %v7719_v40 = vld [vmem:[%s14719_s7 + $0x4f0] sm:$0xff] }
 0x351   :  { %v8304_v39 = vpop.f32.mrb[65].mxu1  ;;  %6007 = vmatmul.mubr.f32.gmra.mrb[170].mxu1 %v7715_v15  ;;  %v14006_v15 = vpop.permute.xlu1 %5262 }
 0x352   :  { %v5156_v16 = vmax.f32 %v5106_v36, 0.0  ;;  %v8305_v55 = vadd.f32 %v8304_v39, %v8303_v62  ;;  %6011 = vmatprep.mubr.f32.mxu1 %v7718_v51  ;;  %v7738_v51 = vld [vmem:[%s14719_s7 + $0x508] sm:$0xff] }
 0x354   :  { %v8306_v59 = vpop.f32.mrb[66].mxu1  ;;  %v9696_v13 = vpack.c.bf16 %v5156_v16, %v5155_v1  ;;  %v5111_v37 = vadd.f32 %v8305_v55, %v13737_v23  ;;  %v7737_v55 = vld [vmem:[%s14719_s7 + $0x500] sm:$0xff] }
 0x355   :  { %v8307_v3 = vpop.f32.mrb[67].mxu1  ;;  %6012 = vmatmul.mubr.f32.gmra.mrb[172].mxu1 %v7717_v27  ;;  %v14016_v27 = vpop.permute.xlu0 %5558 }
 0x356   :  { %v8308_v53 = vadd.f32 %v8307_v3, %v8306_v59  ;;  %9697 = vmatprep.subr.bf16.mxu0 %v9696_v13  ;;  %6016 = vmatprep.mubr.f32.mxu1 %v7720_v46  ;;  %v5157_v23 = vmax.f32 %v5111_v37, 0.0  ;;  %v14018_v59 = vpop.permute.xlu1 %5563 }
 0x357   :  { %9699 = vmatpush3.bf16.msra.mxu0 %v13802_v61 }
 0x358   :  { %v5116_v36 = vadd.f32 %v8308_v53, %v13749_v12  ;;  %v8309_v62 = vpop.f32.mrb[68].mxu1  ;;  %v7740_v12 = vld [vmem:[%s14719_s7 + $0x518] sm:$0xff]  ;;  %v14924_v53 = vld [vmem:[#allocation62_spill] sm:$0xff] }
 0x359   :  { %v8310_v39 = vpop.f32.mrb[69].mxu1  ;;  %6017 = vmatmul.mubr.f32.gmra.mrb[174].mxu1 %v7719_v40  ;;  %v7739_v40 = vld [vmem:[%s14719_s7 + $0x510] sm:$0xff] }
 0x35a   :  { %v5158_v1 = vmax.f32 %v5116_v36, 0.0  ;;  %v8311_v16 = vadd.f32 %v8310_v39, %v8309_v62  ;;  %6232 = vmatprep.mubr.f32.mxu1 %v7738_v51  ;;  %v14925_v51 = vld [vmem:[#allocation28_spill] sm:$0xff]  ;;  %v7742_v36 = vld [vmem:[%s14719_s7 + $0x528] sm:$0xff] }
 0x35c   :  { %v8312_v61 = vpop.f32.mrb[70].mxu1  ;;  %v9700_v46 = vpack.c.bf16 %v5158_v1, %v5157_v23  ;;  %v5121_v3 = vadd.f32 %v8311_v16, %v13770_v29  ;;  %v14034_v29 = vpop.permute.xlu0 %5267 }
 0x35d   :  { %v8313_v13 = vpop.f32.mrb[71].mxu1  ;;  %6233 = vmatmul.mubr.f32.vlgmr.msra.gmra.mrb[176].mxu1 %v7737_v55 }
 0x35e   :  { %v8314_v37 = vadd.f32 %v8313_v13, %v8312_v61  ;;  %9623 = vmatpush3.bf16.msra.mxu1 %v14924_v53  ;;  %9701 = vmatprep.subr.bf16.mxu0 %v9700_v46  ;;  %v5159_v1 = vmax.f32 %v5121_v3, 0.0  ;;  %v14926_v61 = vld [vmem:[#allocation24_spill] sm:$0xff]  ;;  %v14040_v46 = vpop.permute.xlu1 %5272  ;;  %v14927_v13 = vld [vmem:[#allocation37_spill] sm:$0xff] }
 0x35f   :  { %9625 = vmatprep.subr.bf16.mxu1 %v14925_v51  ;;  %9703 = vmatpush3.bf16.msra.mxu0 %v13833_v10  ;;  %v7741_v10 = vld [vmem:[%s14719_s7 + $0x520] sm:$0xff]  ;;  %v7744_v3 = vld [vmem:[%s14719_s7 + $0x538] sm:$0xff]  ;;  %v14928_v51 = vld [vmem:[#allocation12_spill] sm:$0xff] }
 0x360   :  { %v5126_v62 = vadd.f32 %v8314_v37, %v13779_v14  ;;  %v8315_v39 = vpop.f32.mrb[72].mxu1  ;;  %6237 = vmatprep.mubr.f32.mxu1 %v7740_v12 }
 0x361   :  { %v8316_v23 = vpop.f32.mrb[73].mxu1  ;;  %6238 = vmatmul.mubr.f32.gmra.mrb[178].mxu1 %v7739_v40 }
 0x362   :  { %v5160_v16 = vmax.f32 %v5126_v62, 0.0  ;;  %v8317_v55 = vadd.f32 %v8316_v23, %v8315_v39  ;;  %9627 = vmatpush3.bf16.msra.mxu1 %v14926_v61  ;;  %6242 = vmatprep.mubr.f32.mxu1 %v7742_v36  ;;  %v7743_v36 = vld [vmem:[%s14719_s7 + $0x530] sm:$0xff]  ;;  %v14051_v62 = vpop.permute.xlu0 %5568  ;;  %v7746_v39 = vld [vmem:[%s14719_s7 + $0x548] sm:$0xff] }
 0x363   :  { %9629 = vmatprep.subr.bf16.mxu1 %v14927_v13  ;;  %v14929_v13 = vld [vmem:[#allocation25_spill] sm:$0xff] }
 0x364   :  { %v8318_v14 = vpop.f32.mrb[74].mxu1  ;;  %v9704_v12 = vpack.c.bf16 %v5160_v16, %v5159_v1  ;;  %v5131_v53 = vadd.f32 %v8317_v55, %v13794_v6  ;;  %v14059_v1 = vpop.permute.xlu1 %5573 }
 0x365   :  { %v8319_v37 = vpop.f32.mrb[75].mxu1  ;;  %6243 = vmatmul.mubr.f32.gmra.mrb[180].mxu1 %v7741_v10 }
 0x366   :  { %v8320_v40 = vadd.f32 %v8319_v37, %v8318_v14  ;;  %9631 = vmatpush3.bf16.msra.mxu1 %v14928_v51  ;;  %9705 = vmatprep.subr.bf16.mxu0 %v9704_v12  ;;  %v5161_v55 = vmax.f32 %v5131_v53, 0.0  ;;  %v14066_v14 = vpop.permute.xlu0 %5277  ;;  %v7748_v37 = vld [vmem:[%s14719_s7 + $0x558] sm:$0xff] }
 0x367   :  { %9633 = vmatprep.subr.bf16.mxu1 %v13195_v24  ;;  %9707 = vmatpush3.bf16.msra.mxu0 %v13863_v63  ;;  %v7745_v24 = vld [vmem:[%s14719_s7 + $0x540] sm:$0xff] }
 0x368   :  { %v5136_v6 = vadd.f32 %v8320_v40, %v13807_v60  ;;  %v8321_v23 = vpop.f32.mrb[76].mxu1  ;;  %6247 = vmatprep.mubr.f32.mxu1 %v7744_v3  ;;  %v14930_v40 = vld [vmem:[#allocation14_spill] sm:$0xff]  ;;  %v14076_v51 = vpop.permute.xlu1 %5282 }
 0x369   :  { %v8322_v16 = vpop.f32.mrb[77].mxu1  ;;  %6248 = vmatmul.mubr.f32.gmra.mrb[182].mxu1 %v7743_v36  ;;  %v7750_v36 = vld [vmem:[%s14719_s7 + $0x568] sm:$0xff] }
 0x36a   :  { %v5162_v61 = vmax.f32 %v5136_v6, 0.0  ;;  %v8323_v10 = vadd.f32 %v8322_v16, %v8321_v23  ;;  %9635 = vmatpush3.bf16.msra.mxu1 %v14929_v13  ;;  %6252 = vmatprep.mubr.f32.mxu1 %v7746_v39 }
 0x36b   :  { %9637 = vmatprep.subr.bf16.mxu1 %v13213_v4  ;;  %v7747_v4 = vld [vmem:[%s14719_s7 + $0x550] sm:$0xff] }
 0x36c   :  { %v8324_v63 = vpop.f32.mrb[78].mxu1  ;;  %v9708_v60 = vpack.c.bf16 %v5162_v61, %v5161_v55  ;;  %v5141_v3 = vadd.f32 %v8323_v10, %v13823_v48  ;;  %v14931_v61 = vld [vmem:[#allocation26_spill] sm:$0xff]  ;;  %v14091_v13 = vpop.permute.xlu1 %5583 }
 0x36d   :  { %v8325_v12 = vpop.f32.mrb[79].mxu1  ;;  %6253 = vmatmul.mubr.f32.gmra.mrb[184].mxu1 %v7745_v24 }
 0x36e   :  { %v8326_v53 = vadd.f32 %v8325_v12, %v8324_v63  ;;  %9639 = vmatpush3.bf16.msra.mxu1 %v14930_v40  ;;  %9709 = vmatprep.subr.bf16.mxu0 %v9708_v60  ;;  %v5163_v23 = vmax.f32 %v5141_v3, 0.0  ;;  %v7752_v63 = vld [vmem:[%s14719_s7 + $0x578] sm:$0xff]  ;;  %v6911_v3 = vld [vmem:[%s14722_s9] sm:$0xff] }
 0x36f   :  { %9641 = vmatprep.subr.bf16.mxu1 %v13231_v20  ;;  %9711 = vmatpush3.bf16.msra.mxu0 %v13889_v19  ;;  %v7749_v20 = vld [vmem:[%s14719_s7 + $0x560] sm:$0xff]  ;;  %v14088_v19 = vpop.permute.xlu0 %5578 }
 0x370   :  { %v5146_v48 = vadd.f32 %v8326_v53, %v13828_v26  ;;  %v8359_v39 = vpop.f32.mrb[80].mxu1  ;;  %6257 = vmatprep.mubr.f32.mxu1 %v7748_v37  ;;  %v14932_v37 = vld [vmem:[#allocation35_spill] sm:$0xff] }
 0x371   :  { %v8360_v6 = vpop.f32.mrb[81].mxu1  ;;  %6258 = vmatmul.mubr.f32.gmra.mrb[186].mxu1 %v7747_v4 }
 0x372   :  { %v5164_v16 = vmax.f32 %v5146_v48, 0.0  ;;  %v8361_v55 = vadd.f32 %v8360_v6, %v8359_v39  ;;  %9643 = vmatpush3.bf16.msra.mxu1 %v14931_v61  ;;  %6262 = vmatprep.mubr.f32.mxu1 %v7750_v36  ;;  %v14933_v6 = vld [vmem:[#allocation18_spill] sm:$0xff] }
 0x373   :  { %9645 = vmatprep.subr.bf16.mxu1 %v13247_v32  ;;  %v7751_v32 = vld [vmem:[%s14719_s7 + $0x570] sm:$0xff]  ;;  %v14110_v4 = vpop.permute.xlu0 %5287 }
 0x374   :  { %v8362_v10 = vpop.f32.mrb[82].mxu1  ;;  %v9712_v26 = vpack.c.bf16 %v5164_v16, %v5163_v23  ;;  %v5362_v60 = vadd.f32 %v8361_v55, %v13865_v21  ;;  %v7754_v21 = vld [vmem:[%s14719_s7 + $0x588] sm:$0xff]  ;;  %v14119_v23 = vpop.permute.xlu1 %5292  ;;  %v6919_v16 = vld [vmem:[%s14722_s9 + $0x40] sm:$0xff]  ;;  %v7756_v55 = vld [vmem:[%s14719_s7 + $0x598] sm:$0xff] }
 0x375   :  { %v8363_v24 = vpop.f32.mrb[83].mxu1  ;;  %6263 = vmatmul.mubr.f32.gmra.mrb[188].mxu1 %v7749_v20 }
 0x376   :  { %v8364_v12 = vadd.f32 %v8363_v24, %v8362_v10  ;;  %9647 = vmatpush3.bf16.msra.mxu1 %v14932_v37  ;;  %9713 = vmatprep.subr.bf16.mxu0 %v9712_v26  ;;  %v6914_v10 = vld [vmem:[%s14722_s9 + $0x18] sm:$0xff] }
 0x377   :  { %9649 = vmatprep.subr.bf16.mxu1 %v13265_v34  ;;  %9715 = vmatpush3.bf16.msra.mxu0 %v13915_v11  ;;  %v6920_v34 = vld [vmem:[%s14722_s9 + $0x48] sm:$0xff]  ;;  %v5440_v11 = vmax.f32 %v5362_v60, 0.0  ;;  %v14137_v60 = vpop.permute.xlu0 %6090 }
 0x378   :  { %v5367_v53 = vadd.f32 %v8364_v12, %v13872_v18  ;;  %v8365_v40 = vpop.f32.mrb[84].mxu1  ;;  %6267 = vmatprep.mubr.f32.mxu1 %v7752_v63  ;;  %v7753_v18 = vld [vmem:[%s14719_s7 + $0x580] sm:$0xff]  ;;  %v7755_v63 = vld [vmem:[%s14719_s7 + $0x590] sm:$0xff]  ;;  %v7758_v12 = vld [vmem:[%s14719_s7 + $0x5a8] sm:$0xff] }
 0x379   :  { %v8366_v36 = vpop.f32.mrb[85].mxu1  ;;  %6268 = vmatmul.mubr.f32.gmra.mrb[190].mxu1 %v7751_v32 }
 0x37a   :  { %v5441_v48 = vmax.f32 %v5367_v53, 0.0  ;;  %v8367_v39 = vadd.f32 %v8366_v36, %v8365_v40  ;;  %9651 = vmatpush3.bf16.msra.mxu1 %v14933_v6  ;;  %7004 = vmatmul.mubr.f32.vlgmr.msra.gmra.mrb[254].mxu0 %v6911_v3  ;;  %v14143_v3 = vpop.permute.xlu1 %6095  ;;  %v7757_v36 = vld [vmem:[%s14719_s7 + $0x5a0] sm:$0xff] }
 0x37b   :  { %9653 = vmatprep.subr.bf16.mxu1 %v13431_v41  ;;  %6272 = vmatprep.mubr.f32.mxu1 %v7754_v21 }
 0x37c   :  { %v14128_v61 = vpack.c.bf16 %v5441_v48, %v5440_v11  ;;  %v8368_v20 = vpop.f32.mrb[86].mxu1  ;;  %7008 = vmatprep.mubr.f32.mxu0 %v6920_v34  ;;  %v5372_v41 = vadd.f32 %v8367_v39, %v13903_v57  ;;  %v7760_v34 = vld [vmem:[%s14719_s7 + $0x5b8] sm:$0xff]  ;;  %v14153_v48 = vpop.permute.xlu0 %5799 }
 0x37d   :  { %v8369_v26 = vpop.f32.mrb[87].mxu1  ;;  %6273 = vmatmul.mubr.f32.gmra.mrb[192].mxu1 %v7753_v18 }
 0x37e   :  { %v8370_v24 = vadd.f32 %v8369_v26, %v8368_v20  ;;  %7009 = vmatmul.mubr.f32.gmra.mrb[0].mxu0 %v6919_v16  ;;  %6277 = vmatprep.mubr.f32.mxu1 %v7756_v55  ;;  %v5442_v53 = vmax.f32 %v5372_v41, 0.0  ;;  %v7759_v16 = vld [vmem:[%s14719_s7 + $0x5b0] sm:$0xff]  ;;  %v14159_v55 = vpop.permute.xlu1 %5804  ;;  %v7762_v20 = vld [vmem:[%s14719_s7 + $0x5c8] sm:$0xff] }
 0x37f   :  { %7078 = vmatprep.mubr.f32.mxu0 %v6914_v10 }
 0x380   :  { %v5377_v37 = vadd.f32 %v8370_v24, %v13909_v42  ;;  %v8371_v32 = vpop.f32.mrb[88].mxu1 }
 0x381   :  { %v8372_v57 = vpop.f32.mrb[89].mxu1  ;;  %6278 = vmatmul.mubr.f32.gmra.mrb[194].mxu1 %v7755_v63 }
 0x382   :  { %v5443_v40 = vmax.f32 %v5377_v37, 0.0  ;;  %v8373_v21 = vadd.f32 %v8372_v57, %v8371_v32  ;;  %6282 = vmatprep.mubr.f32.mxu1 %v7758_v12  ;;  %v7761_v12 = vld [vmem:[%s14719_s7 + $0x5c0] sm:$0xff]  ;;  %v14168_v37 = vpop.permute.xlu0 %6672  ;;  %v7764_v32 = vld [vmem:[%s14719_s7 + $0x5d8] sm:$0xff] }
 0x384   :  { %v14151_v11 = vpack.c.bf16 %v5443_v40, %v5442_v53  ;;  %v8374_v42 = vpop.f32.mrb[90].mxu1  ;;  %v5382_v6 = vadd.f32 %v8373_v21, %v13939_v25  ;;  %v14175_v53 = vpop.permute.xlu1 %6677 }
 0x385   :  { %v8375_v39 = vpop.f32.mrb[91].mxu1  ;;  %6283 = vmatmul.mubr.f32.gmra.mrb[196].mxu1 %v7757_v36 }
 0x386   :  { %v8376_v18 = vadd.f32 %v8375_v39, %v8374_v42  ;;  %6287 = vmatprep.mubr.f32.mxu1 %v7760_v34  ;;  %v5444_v24 = vmax.f32 %v5382_v6, 0.0  ;;  %v7763_v34 = vld [vmem:[%s14719_s7 + $0x5d0] sm:$0xff]  ;;  %v7766_v42 = vld [vmem:[%s14719_s7 + $0x5e8] sm:$0xff] }
 0x388   :  { %v5387_v10 = vadd.f32 %v8376_v18, %v13945_v49  ;;  %v8377_v26 = vpop.f32.mrb[92].mxu1  ;;  %v14185_v18 = vpop.permute.xlu0 %6381 }
 0x389   :  { %v8378_v41 = vpop.f32.mrb[93].mxu1  ;;  %6288 = vmatmul.mubr.f32.gmra.mrb[198].mxu1 %v7759_v16 }
 0x38a   :  { %v5445_v63 = vmax.f32 %v5387_v10, 0.0  ;;  %v8379_v25 = vadd.f32 %v8378_v41, %v8377_v26  ;;  %6292 = vmatprep.mubr.f32.mxu1 %v7762_v20  ;;  %v7765_v26 = vld [vmem:[%s14719_s7 + $0x5e0] sm:$0xff]  ;;  %v14190_v41 = vpop.permute.xlu1 %6386 }
 0x38c   :  { %v14173_v57 = vpack.c.bf16 %v5445_v63, %v5444_v24  ;;  %v8380_v49 = vpop.f32.mrb[94].mxu1  ;;  %v5392_v21 = vadd.f32 %v8379_v25, %v13971_v17  ;;  %v7768_v24 = vld [vmem:[%s14719_s7 + $0x5f8] sm:$0xff] }
 0x38d   :  { %v8381_v40 = vpop.f32.mrb[95].mxu1  ;;  %6293 = vmatmul.mubr.f32.gmra.mrb[200].mxu1 %v7761_v12 }
 0x38e   :  { %v8382_v36 = vadd.f32 %v8381_v40, %v8380_v49  ;;  %6297 = vmatprep.mubr.f32.mxu1 %v7764_v32  ;;  %v5446_v20 = vmax.f32 %v5392_v21, 0.0  ;;  %v7767_v49 = vld [vmem:[%s14719_s7 + $0x5f0] sm:$0xff]  ;;  %v14201_v40 = vpop.permute.xlu0 %6100  ;;  %v7786_v21 = vld [vmem:[%s14719_s7 + $0x608] sm:$0xff] }
 0x390   :  { %v5397_v39 = vadd.f32 %v8382_v36, %v13976_v47  ;;  %v8383_v6 = vpop.f32.mrb[96].mxu1 }
 0x391   :  { %v8384_v16 = vpop.f32.mrb[97].mxu1  ;;  %6298 = vmatmul.mubr.f32.gmra.mrb[202].mxu1 %v7763_v34 }
 0x392   :  { %v5447_v10 = vmax.f32 %v5397_v39, 0.0  ;;  %v8385_v17 = vadd.f32 %v8384_v16, %v8383_v6  ;;  %6302 = vmatprep.mubr.f32.mxu1 %v7766_v42  ;;  %v14207_v42 = vpop.permute.xlu1 %6105 }
 0x394   :  { %v14195_v47 = vpack.c.bf16 %v5447_v10, %v5446_v20  ;;  %v8386_v63 = vpop.f32.mrb[98].mxu1  ;;  %v5402_v12 = vadd.f32 %v8385_v17, %v14000_v7  ;;  %v7785_v20 = vld [vmem:[%s14719_s7 + $0x600] sm:$0xff]  ;;  %v7788_v10 = vld [vmem:[%s14719_s7 + $0x618] sm:$0xff] }
 0x395   :  { %v8387_v25 = vpop.f32.mrb[99].mxu1  ;;  %6303 = vmatmul.mubr.f32.gmra.mrb[204].mxu1 %v7765_v26  ;;  %v14217_v26 = vpop.permute.xlu0 %5809 }
 0x396   :  { %v8388_v32 = vadd.f32 %v8387_v25, %v8386_v63  ;;  %6307 = vmatprep.mubr.f32.mxu1 %v7768_v24  ;;  %v5448_v7 = vmax.f32 %v5402_v12, 0.0  ;;  %v7787_v12 = vld [vmem:[%s14719_s7 + $0x610] sm:$0xff] }
 0x398   :  { %v5407_v36 = vadd.f32 %v8388_v32, %v14006_v15  ;;  %v8389_v34 = vpop.f32.mrb[100].mxu1  ;;  %v14224_v32 = vpop.permute.xlu1 %5814 }
 0x399   :  { %v8390_v39 = vpop.f32.mrb[101].mxu1  ;;  %6308 = vmatmul.mubr.f32.gmra.mrb[206].mxu1 %v7767_v49  ;;  %v7790_v49 = vld [vmem:[%s14719_s7 + $0x628] sm:$0xff] }
 0x39a   :  { %v5449_v6 = vmax.f32 %v5407_v36, 0.0  ;;  %v8391_v16 = vadd.f32 %v8390_v39, %v8389_v34  ;;  %6523 = vmatprep.mubr.f32.mxu1 %v7786_v21 }
 0x39c   :  { %v14215_v17 = vpack.c.bf16 %v5449_v6, %v5448_v7  ;;  %v8392_v15 = vpop.f32.mrb[102].mxu1  ;;  %v5412_v63 = vadd.f32 %v8391_v16, %v14034_v29  ;;  %v7789_v7 = vld [vmem:[%s14719_s7 + $0x620] sm:$0xff] }
 0x39d   :  { %v8393_v24 = vpop.f32.mrb[103].mxu1  ;;  %6524 = vmatmul.mubr.f32.vlgmr.msra.gmra.mrb[208].mxu1 %v7785_v20  ;;  %v14243_v20 = vpop.permute.xlu1 %6687 }
 0x39e   :  { %v8394_v25 = vadd.f32 %v8393_v24, %v8392_v15  ;;  %9655 = vmatpush3.bf16.msra.mxu1 %v13283_v35  ;;  %6528 = vmatprep.mubr.f32.mxu1 %v7788_v10  ;;  %v5450_v34 = vmax.f32 %v5412_v63, 0.0  ;;  %v7794_v24 = vld [vmem:[%s14719_s7 + $0x648] sm:$0xff] }
 0x39f   :  { %9657 = vmatprep.subr.bf16.mxu1 %v13451_v9  ;;  %v14235_v9 = vpop.permute.xlu0 %6682 }
 0x3a0   :  { %v5417_v21 = vadd.f32 %v8394_v25, %v14040_v46  ;;  %v8395_v36 = vpop.f32.mrb[104].mxu1  ;;  %v7792_v46 = vld [vmem:[%s14719_s7 + $0x638] sm:$0xff] }
 0x3a1   :  { %v8396_v29 = vpop.f32.mrb[105].mxu1  ;;  %6529 = vmatmul.mubr.f32.gmra.mrb[210].mxu1 %v7787_v12 }
 0x3a2   :  { %v5451_v35 = vmax.f32 %v5417_v21, 0.0  ;;  %v8397_v39 = vadd.f32 %v8396_v29, %v8395_v36  ;;  %9659 = vmatpush3.bf16.msra.mxu1 %v13301_v5  ;;  %6533 = vmatprep.mubr.f32.mxu1 %v7790_v49  ;;  %v14261_v36 = vpop.permute.xlu1 %6396 }
 0x3a3   :  { %9661 = vmatprep.subr.bf16.mxu1 %v13469_v38  ;;  %v7791_v38 = vld [vmem:[%s14719_s7 + $0x630] sm:$0xff]  ;;  %v14255_v12 = vpop.permute.xlu0 %6391 }
 0x3a4   :  { %v14241_v6 = vpack.c.bf16 %v5451_v35, %v5450_v34  ;;  %v8398_v16 = vpop.f32.mrb[106].mxu1  ;;  %v5422_v5 = vadd.f32 %v8397_v39, %v14066_v14 }
 0x3a5   :  { %v8399_v10 = vpop.f32.mrb[107].mxu1  ;;  %6534 = vmatmul.mubr.f32.gmra.mrb[212].mxu1 %v7789_v7  ;;  %v7795_v7 = vld [vmem:[%s14719_s7 + $0x650] sm:$0xff] }
 0x3a6   :  { %v8400_v15 = vadd.f32 %v8399_v10, %v8398_v16  ;;  %9663 = vmatpush3.bf16.msra.mxu1 %v13319_v22  ;;  %6538 = vmatprep.mubr.f32.mxu1 %v7792_v46  ;;  %v5452_v49 = vmax.f32 %v5422_v5, 0.0  ;;  %v7798_v46 = vld [vmem:[%s14719_s7 + $0x668] sm:$0xff] }
 0x3a7   :  { %9665 = vmatprep.subr.bf16.mxu1 %v13490_v58  ;;  %v7793_v58 = vld [vmem:[%s14719_s7 + $0x640] sm:$0xff] }
 0x3a8   :  { %v5427_v63 = vadd.f32 %v8400_v15, %v14076_v51  ;;  %v8401_v25 = vpop.f32.mrb[108].mxu1  ;;  %v7796_v51 = vld [vmem:[%s14719_s7 + $0x658] sm:$0xff] }
 0x3a9   :  { %v8402_v14 = vpop.f32.mrb[109].mxu1  ;;  %6539 = vmatmul.mubr.f32.gmra.mrb[214].mxu1 %v7791_v38 }
 0x3aa   :  { %v5453_v22 = vmax.f32 %v5427_v63, 0.0  ;;  %v8403_v21 = vadd.f32 %v8402_v14, %v8401_v25  ;;  %9667 = vmatpush3.bf16.msra.mxu1 %v13337_v28  ;;  %6543 = vmatprep.mubr.f32.mxu1 %v7794_v24 }
 0x3ab   :  { %9669 = vmatprep.subr.bf16.mxu1 %v13513_v30  ;;  %v14274_v30 = vpop.permute.xlu0 %6110 }
 0x3ac   :  { %v14267_v29 = vpack.c.bf16 %v5453_v22, %v5452_v49  ;;  %v8404_v34 = vpop.f32.mrb[110].mxu1  ;;  %v5432_v28 = vadd.f32 %v8403_v21, %v14110_v4  ;;  %v14281_v4 = vpop.permute.xlu1 %6115  ;;  %v7802_v21 = vld [vmem:[%s14719_s7 + $0x688] sm:$0xff] }
 0x3ad   :  { %v8405_v35 = vpop.f32.mrb[111].mxu1  ;;  %6544 = vmatmul.mubr.f32.gmra.mrb[216].mxu1 %v7793_v58 }
 0x3ae   :  { %v8406_v39 = vadd.f32 %v8405_v35, %v8404_v34  ;;  %9671 = vmatpush3.bf16.msra.mxu1 %v13355_v50  ;;  %6548 = vmatprep.mubr.f32.mxu1 %v7796_v51  ;;  %v5454_v50 = vmax.f32 %v5432_v28, 0.0  ;;  %v14934_v28 = vld [vmem:[#allocation29_spill] sm:$0xff] }
 0x3af   :  { %9673 = vmatprep.subr.bf16.mxu1 %v13533_v33  ;;  %v7797_v33 = vld [vmem:[%s14719_s7 + $0x660] sm:$0xff]  ;;  %v14293_v25 = vpop.permute.xlu0 %5819 }
 0x3b0   :  { %v5437_v16 = vadd.f32 %v8406_v39, %v14119_v23  ;;  %v8439_v10 = vpop.f32.mrb[112].mxu1  ;;  %v7800_v23 = vld [vmem:[%s14719_s7 + $0x678] sm:$0xff]  ;;  %v14300_v22 = vpop.permute.xlu1 %5824  ;;  %v7801_v39 = vld [vmem:[%s14719_s7 + $0x680] sm:$0xff] }
 0x3b1   :  { %v8440_v5 = vpop.f32.mrb[113].mxu1  ;;  %6549 = vmatmul.mubr.f32.gmra.mrb[218].mxu1 %v7795_v7  ;;  %v7804_v7 = vld [vmem:[%s14719_s7 + $0x698] sm:$0xff] }
 0x3b2   :  { %v5455_v15 = vmax.f32 %v5437_v16, 0.0  ;;  %v8441_v38 = vadd.f32 %v8440_v5, %v8439_v10  ;;  %9675 = vmatpush3.bf16.msra.mxu1 %v13375_v31  ;;  %6553 = vmatprep.mubr.f32.mxu1 %v7798_v46  ;;  %v14935_v5 = vld [vmem:[#allocation38_spill] sm:$0xff] }
 0x3b3   :  { %9677 = vmatprep.subr.bf16.mxu1 %v13550_v0  ;;  %v7799_v0 = vld [vmem:[%s14719_s7 + $0x670] sm:$0xff] }
 0x3b4   :  { %v14291_v24 = vpack.c.bf16 %v5455_v15, %v5454_v50  ;;  %v8442_v63 = vpop.f32.mrb[114].mxu1  ;;  %v5653_v31 = vadd.f32 %v8441_v38, %v13846_v8  ;;  %v14316_v16 = vpop.permute.xlu1 %6697  ;;  %v7803_v38 = vld [vmem:[%s14719_s7 + $0x690] sm:$0xff] }
 0x3b5   :  { %v8443_v14 = vpop.f32.mrb[115].mxu1  ;;  %6554 = vmatmul.mubr.f32.gmra.mrb[220].mxu1 %v7797_v33  ;;  %v7806_v33 = vld [vmem:[%s14719_s7 + $0x6a8] sm:$0xff] }
 0x3b6   :  { %v8444_v49 = vadd.f32 %v8443_v14, %v8442_v63  ;;  %9679 = vmatpush3.bf16.msra.mxu1 %v13396_v52  ;;  %6558 = vmatprep.mubr.f32.mxu1 %v7800_v23  ;;  %v5731_v34 = vmax.f32 %v5653_v31, 0.0  ;;  %v14936_v23 = vld [vmem:[#allocation30_spill] sm:$0xff] }
 0x3b7   :  { %9681 = vmatprep.subr.bf16.mxu1 %v13225_v45  ;;  %v14311_v45 = vpop.permute.xlu0 %6692 }
 0x3b8   :  { %v5658_v58 = vadd.f32 %v8444_v49, %v13853_v54  ;;  %v8445_v51 = vpop.f32.mrb[116].mxu1 }
 0x3b9   :  { %v8446_v8 = vpop.f32.mrb[117].mxu1  ;;  %6559 = vmatmul.mubr.f32.gmra.mrb[222].mxu1 %v7799_v0 }
 0x3ba   :  { %v5732_v52 = vmax.f32 %v5658_v58, 0.0  ;;  %v8447_v35 = vadd.f32 %v8446_v8, %v8445_v51  ;;  %9683 = vmatpush3.bf16.msra.mxu1 %v14934_v28  ;;  %6563 = vmatprep.mubr.f32.mxu1 %v7802_v21  ;;  %v7805_v51 = vld [vmem:[%s14719_s7 + $0x6a0] sm:$0xff]  ;;  %v7808_v8 = vld [vmem:[%s14719_s7 + $0x6b8] sm:$0xff]  ;;  %v14937_v28 = vld [vmem:[#allocation39_spill] sm:$0xff] }
 0x3bb   :  { %v14327_v31 = vpop.permute.xlu0 %6401 }
 0x3bc   :  { %v8448_v54 = vpop.f32.mrb[118].mxu1  ;;  %v9716_v46 = vpack.c.bf16 %v5732_v52, %v5731_v34  ;;  %v5663_v50 = vadd.f32 %v8447_v35, %v14935_v5  ;;  %v14938_v5 = vld [vmem:[#allocation31_spill] sm:$0xff] }
 0x3bd   :  { %v8449_v10 = vpop.f32.mrb[119].mxu1  ;;  %6564 = vmatmul.mubr.f32.gmra.mrb[224].mxu1 %v7801_v39 }
 0x3be   :  { %v8450_v15 = vadd.f32 %v8449_v10, %v8448_v54  ;;  %9717 = vmatprep.subr.bf16.mxu0 %v9716_v46  ;;  %6568 = vmatprep.mubr.f32.mxu1 %v7804_v7  ;;  %v5733_v0 = vmax.f32 %v5663_v50, 0.0  ;;  %v7807_v54 = vld [vmem:[%s14719_s7 + $0x6b0] sm:$0xff]  ;;  %v7810_v10 = vld [vmem:[%s14719_s7 + $0x6c8] sm:$0xff] }
 0x3bf   :  { %9719 = vmatpush3.bf16.msra.mxu0 %v14128_v61  ;;  %v14332_v61 = vpop.permute.xlu1 %6406  ;;  %v14341_v46 = vpop.permute.xlu0 %6120 }
 0x3c0   :  { %v5668_v63 = vadd.f32 %v8450_v15, %v14936_v23  ;;  %v8451_v14 = vpop.f32.mrb[120].mxu1 }
 0x3c1   :  { %v8452_v49 = vpop.f32.mrb[121].mxu1  ;;  %6569 = vmatmul.mubr.f32.gmra.mrb[226].mxu1 %v7803_v38 }
 0x3c2   :  { %v5734_v21 = vmax.f32 %v5668_v63, 0.0  ;;  %v8453_v58 = vadd.f32 %v8452_v49, %v8451_v14  ;;  %6573 = vmatprep.mubr.f32.mxu1 %v7806_v33  ;;  %v7809_v49 = vld [vmem:[%s14719_s7 + $0x6c0] sm:$0xff] }
 0x3c3   :  { %v14348_v38 = vpop.permute.xlu1 %6125 }
 0x3c4   :  { %v8454_v34 = vpop.f32.mrb[122].mxu1  ;;  %v9720_v52 = vpack.c.bf16 %v5734_v21, %v5733_v0  ;;  %v5673_v39 = vadd.f32 %v8453_v58, %v14937_v28  ;;  %v14356_v58 = vpop.permute.xlu0 %5829  ;;  %v7814_v28 = vld [vmem:[%s14719_s7 + $0x6e8] sm:$0xff] }
 0x3c5   :  { %v8455_v35 = vpop.f32.mrb[123].mxu1  ;;  %6574 = vmatmul.mubr.f32.gmra.mrb[228].mxu1 %v7805_v51 }
 0x3c6   :  { %v8456_v7 = vadd.f32 %v8455_v35, %v8454_v34  ;;  %9721 = vmatprep.subr.bf16.mxu0 %v9720_v52  ;;  %6578 = vmatprep.mubr.f32.mxu1 %v7808_v8  ;;  %v5735_v23 = vmax.f32 %v5673_v39, 0.0  ;;  %v7811_v52 = vld [vmem:[%s14719_s7 + $0x6d0] sm:$0xff] }
 0x3c7   :  { %9723 = vmatpush3.bf16.msra.mxu0 %v14151_v11  ;;  %v7812_v11 = vld [vmem:[%s14719_s7 + $0x6d8] sm:$0xff]  ;;  %v14362_v35 = vpop.permute.xlu1 %5834 }
 0x3c8   :  { %v5678_v50 = vadd.f32 %v8456_v7, %v14938_v5  ;;  %v8457_v15 = vpop.f32.mrb[124].mxu1 }
 0x3c9   :  { %v8458_v33 = vpop.f32.mrb[125].mxu1  ;;  %6579 = vmatmul.mubr.f32.gmra.mrb[230].mxu1 %v7807_v54 }
 0x3ca   :  { %v5736_v63 = vmax.f32 %v5678_v50, 0.0  ;;  %v8459_v14 = vadd.f32 %v8458_v33, %v8457_v15  ;;  %6583 = vmatprep.mubr.f32.mxu1 %v7810_v10  ;;  %v7813_v50 = vld [vmem:[%s14719_s7 + $0x6e0] sm:$0xff]  ;;  %v14372_v15 = vpop.permute.xlu0 %6702 }
 0x3cb   :  { %14939 = vst [vmem:[#allocation40_spill] sm:$0xff] %v14372_v15 }
 0x3cc   :  { %v8460_v0 = vpop.f32.mrb[126].mxu1  ;;  %v9724_v21 = vpack.c.bf16 %v5736_v63, %v5735_v23  ;;  %v5683_v8 = vadd.f32 %v8459_v14, %v13955_v2 }
 0x3cd   :  { %v8461_v51 = vpop.f32.mrb[127].mxu1  ;;  %6584 = vmatmul.mubr.f32.gmra.mrb[232].mxu1 %v7809_v49 }
 0x3ce   :  { %v8462_v34 = vadd.f32 %v8461_v51, %v8460_v0  ;;  %9725 = vmatprep.subr.bf16.mxu0 %v9724_v21  ;;  %6588 = vmatprep.mubr.f32.mxu1 %v7812_v11  ;;  %v5737_v2 = vmax.f32 %v5683_v8, 0.0  ;;  %v7815_v11 = vld [vmem:[%s14719_s7 + $0x6f0] sm:$0xff]  ;;  %v7834_v0 = vld [vmem:[%s14719_s7 + $0x708] sm:$0xff]  ;;  %v14388_v8 = vpop.permute.xlu0 %6411 }
 0x3cf   :  { %9727 = vmatpush3.bf16.msra.mxu0 %v14173_v57  ;;  %v7816_v57 = vld [vmem:[%s14719_s7 + $0x6f8] sm:$0xff] }
 0x3d0   :  { %v5688_v39 = vadd.f32 %v8462_v34, %v13960_v56  ;;  %v8463_v7 = vpop.f32.mrb[128].mxu1  ;;  %v14377_v56 = vpop.permute.xlu1 %6707 }
 0x3d1   :  { %v8464_v54 = vpop.f32.mrb[129].mxu1  ;;  %6589 = vmatmul.mubr.f32.gmra.mrb[234].mxu1 %v7811_v52  ;;  %14940 = vst [vmem:[#allocation32_spill] sm:$0xff] %v14377_v56 }
 0x3d2   :  { %v5738_v10 = vmax.f32 %v5688_v39, 0.0  ;;  %v8465_v5 = vadd.f32 %v8464_v54, %v8463_v7  ;;  %6593 = vmatprep.mubr.f32.mxu1 %v7814_v28  ;;  %v7833_v39 = vld [vmem:[%s14719_s7 + $0x700] sm:$0xff]  ;;  %v7836_v7 = vld [vmem:[%s14719_s7 + $0x718] sm:$0xff] }
 0x3d4   :  { %v8466_v33 = vpop.f32.mrb[130].mxu1  ;;  %v9728_v23 = vpack.c.bf16 %v5738_v10, %v5737_v2  ;;  %v5693_v14 = vadd.f32 %v8465_v5, %v13985_v43 }
 0x3d5   :  { %v8467_v63 = vpop.f32.mrb[131].mxu1  ;;  %6594 = vmatmul.mubr.f32.gmra.mrb[236].mxu1 %v7813_v50  ;;  %v7835_v50 = vld [vmem:[%s14719_s7 + $0x710] sm:$0xff] }
 0x3d6   :  { %v8468_v49 = vadd.f32 %v8467_v63, %v8466_v33  ;;  %9729 = vmatprep.subr.bf16.mxu0 %v9728_v23  ;;  %6598 = vmatprep.mubr.f32.mxu1 %v7816_v57  ;;  %v5739_v43 = vmax.f32 %v5693_v14, 0.0  ;;  %v14402_v57 = vpop.permute.xlu0 %6130  ;;  %v7838_v33 = vld [vmem:[%s14719_s7 + $0x728] sm:$0xff] }
 0x3d7   :  { %9731 = vmatpush3.bf16.msra.mxu0 %v14195_v47  ;;  %v14393_v47 = vpop.permute.xlu1 %6416 }
 0x3d8   :  { %v5698_v21 = vadd.f32 %v8468_v49, %v13992_v44  ;;  %v8469_v51 = vpop.f32.mrb[132].mxu1 }
 0x3d9   :  { %v8470_v34 = vpop.f32.mrb[133].mxu1  ;;  %6599 = vmatmul.mubr.f32.gmra.mrb[238].mxu1 %v7815_v11 }
 0x3da   :  { %v5740_v52 = vmax.f32 %v5698_v21, 0.0  ;;  %v8471_v28 = vadd.f32 %v8470_v34, %v8469_v51  ;;  %6814 = vmatprep.mubr.f32.mxu1 %v7834_v0  ;;  %v7837_v21 = vld [vmem:[%s14719_s7 + $0x720] sm:$0xff] }
 0x3db   :  { %v14409_v14 = vpop.permute.xlu1 %6135 }
 0x3dc   :  { %v8472_v44 = vpop.f32.mrb[134].mxu1  ;;  %v9732_v54 = vpack.c.bf16 %v5740_v52, %v5739_v43  ;;  %v5703_v10 = vadd.f32 %v8471_v28, %v14016_v27 }
 0x3dd   :  { %v8473_v2 = vpop.f32.mrb[135].mxu1  ;;  %6815 = vmatmul.mubr.f32.vlgmr.msra.gmra.mrb[240].mxu1 %v7833_v39  ;;  %v7839_v39 = vld [vmem:[%s14719_s7 + $0x730] sm:$0xff] }
 0x3de   :  { %v8474_v5 = vadd.f32 %v8473_v2, %v8472_v44  ;;  %9733 = vmatprep.subr.bf16.mxu0 %v9732_v54  ;;  %6819 = vmatprep.mubr.f32.mxu1 %v7836_v7  ;;  %v5741_v49 = vmax.f32 %v5703_v10, 0.0  ;;  %v7842_v44 = vld [vmem:[%s14719_s7 + $0x748] sm:$0xff] }
 0x3df   :  { %9735 = vmatpush3.bf16.msra.mxu0 %v14215_v17  ;;  %v7840_v17 = vld [vmem:[%s14719_s7 + $0x738] sm:$0xff]  ;;  %v14423_v7 = vpop.permute.xlu1 %5844 }
 0x3e0   :  { %v5708_v23 = vadd.f32 %v8474_v5, %v14018_v59  ;;  %v8475_v63 = vpop.f32.mrb[136].mxu1  ;;  %v14417_v59 = vpop.permute.xlu0 %5839 }
 0x3e1   :  { %v8476_v27 = vpop.f32.mrb[137].mxu1  ;;  %6820 = vmatmul.mubr.f32.gmra.mrb[242].mxu1 %v7835_v50 }
 0x3e2   :  { %v5742_v11 = vmax.f32 %v5708_v23, 0.0  ;;  %v8477_v0 = vadd.f32 %v8476_v27, %v8475_v63  ;;  %6824 = vmatprep.mubr.f32.mxu1 %v7838_v33  ;;  %v7841_v33 = vld [vmem:[%s14719_s7 + $0x740] sm:$0xff] }
 0x3e4   :  { %v8478_v51 = vpop.f32.mrb[138].mxu1  ;;  %v9736_v34 = vpack.c.bf16 %v5742_v11, %v5741_v49  ;;  %v5713_v52 = vadd.f32 %v8477_v0, %v14051_v62  ;;  %v14433_v23 = vpop.permute.xlu0 %6712 }
 0x3e5   :  { %v8479_v43 = vpop.f32.mrb[139].mxu1  ;;  %6825 = vmatmul.mubr.f32.gmra.mrb[244].mxu1 %v7837_v21  ;;  %14941 = vst [vmem:[#allocation41_spill] sm:$0xff] %v14433_v23  ;;  %v7843_v21 = vld [vmem:[%s14719_s7 + $0x750] sm:$0xff] }
 0x3e6   :  { %v8480_v28 = vadd.f32 %v8479_v43, %v8478_v51  ;;  %9737 = vmatprep.subr.bf16.mxu0 %v9736_v34  ;;  %6829 = vmatprep.mubr.f32.mxu1 %v7840_v17  ;;  %v5743_v62 = vmax.f32 %v5713_v52, 0.0  ;;  %v7846_v17 = vld [vmem:[%s14719_s7 + $0x768] sm:$0xff] }
 0x3e7   :  { %9739 = vmatpush3.bf16.msra.mxu0 %v14241_v6  ;;  %v7844_v6 = vld [vmem:[%s14719_s7 + $0x758] sm:$0xff] }
 0x3e8   :  { %v5718_v54 = vadd.f32 %v8480_v28, %v14059_v1  ;;  %v8481_v2 = vpop.f32.mrb[140].mxu1  ;;  %v14438_v1 = vpop.permute.xlu1 %6717 }
 0x3e9   :  { %v8482_v10 = vpop.f32.mrb[141].mxu1  ;;  %6830 = vmatmul.mubr.f32.gmra.mrb[246].mxu1 %v7839_v39  ;;  %14942 = vst [vmem:[#allocation33_spill] sm:$0xff] %v14438_v1  ;;  %v14449_v43 = vpop.permute.xlu0 %6421 }
 0x3ea   :  { %v5744_v5 = vmax.f32 %v5718_v54, 0.0  ;;  %v8483_v50 = vadd.f32 %v8482_v10, %v8481_v2  ;;  %6834 = vmatprep.mubr.f32.mxu1 %v7842_v44  ;;  %v7845_v44 = vld [vmem:[%s14719_s7 + $0x760] sm:$0xff]  ;;  %v7848_v54 = vld [vmem:[%s14719_s7 + $0x778] sm:$0xff] }
 0x3ec   :  { %v8484_v63 = vpop.f32.mrb[142].mxu1  ;;  %v9740_v27 = vpack.c.bf16 %v5744_v5, %v5743_v62  ;;  %v5723_v11 = vadd.f32 %v8483_v50, %v14088_v19  ;;  %v7847_v50 = vld [vmem:[%s14719_s7 + $0x770] sm:$0xff] }
 0x3ed   :  { %v8485_v49 = vpop.f32.mrb[143].mxu1  ;;  %6835 = vmatmul.mubr.f32.gmra.mrb[248].mxu1 %v7841_v33  ;;  %v14463_v33 = vpop.permute.xlu0 %6140 }
 0x3ee   :  { %v8486_v0 = vadd.f32 %v8485_v49, %v8484_v63  ;;  %9741 = vmatprep.subr.bf16.mxu0 %v9740_v27  ;;  %6839 = vmatprep.mubr.f32.mxu1 %v7844_v6  ;;  %v5745_v19 = vmax.f32 %v5723_v11, 0.0  ;;  %v6913_v6 = vld [vmem:[%s14722_s9 + $0x10] sm:$0xff]  ;;  %v7850_v63 = vld [vmem:[%s14719_s7 + $0x788] sm:$0xff]  ;;  %v6922_v49 = vld [vmem:[%s14722_s9 + $0x58] sm:$0xff] }
 0x3ef   :  { %9743 = vmatpush3.bf16.msra.mxu0 %v14267_v29  ;;  %v14454_v29 = vpop.permute.xlu1 %6426 }
 0x3f0   :  { %v5728_v51 = vadd.f32 %v8486_v0, %v14091_v13  ;;  %v8519_v34 = vpop.f32.mrb[144].mxu1 }
 0x3f1   :  { %v8520_v52 = vpop.f32.mrb[145].mxu1  ;;  %6840 = vmatmul.mubr.f32.gmra.mrb[250].mxu1 %v7843_v21 }
 0x3f2   :  { %v5746_v28 = vmax.f32 %v5728_v51, 0.0  ;;  %v8521_v39 = vadd.f32 %v8520_v52, %v8519_v34  ;;  %6844 = vmatprep.mubr.f32.mxu1 %v7846_v17  ;;  %v7849_v51 = vld [vmem:[%s14719_s7 + $0x780] sm:$0xff]  ;;  %v7852_v34 = vld [vmem:[%s14719_s7 + $0x798] sm:$0xff] }
 0x3f3   :  { %v14476_v11 = vpop.permute.xlu1 %6145 }
 0x3f4   :  { %v8522_v13 = vpop.f32.mrb[146].mxu1  ;;  %v9744_v2 = vpack.c.bf16 %v5746_v28, %v5745_v19  ;;  %v5944_v62 = vadd.f32 %v8521_v39, %v14153_v48  ;;  %v14489_v28 = vpop.permute.xlu0 %5849 }
 0x3f5   :  { %v8523_v10 = vpop.f32.mrb[147].mxu1  ;;  %6845 = vmatmul.mubr.f32.gmra.mrb[252].mxu1 %v7845_v44 }
 0x3f6   :  { %v8524_v5 = vadd.f32 %v8523_v10, %v8522_v13  ;;  %9745 = vmatprep.subr.bf16.mxu0 %v9744_v2  ;;  %6849 = vmatprep.mubr.f32.mxu1 %v7848_v54  ;;  %v7851_v13 = vld [vmem:[%s14719_s7 + $0x790] sm:$0xff]  ;;  %v7854_v10 = vld [vmem:[%s14719_s7 + $0x7a8] sm:$0xff] }
 0x3f7   :  { %9747 = vmatpush3.bf16.msra.mxu0 %v14291_v24  ;;  %v6022_v24 = vmax.f32 %v5944_v62, 0.0  ;;  %v14495_v2 = vpop.permute.xlu1 %5854 }
 0x3f8   :  { %v5949_v48 = vadd.f32 %v8524_v5, %v14159_v55  ;;  %v8525_v27 = vpop.f32.mrb[148].mxu1  ;;  %v6921_v55 = vld [vmem:[%s14722_s9 + $0x50] sm:$0xff] }
 0x3f9   :  { %v8526_v0 = vpop.f32.mrb[149].mxu1  ;;  %6850 = vmatmul.mubr.f32.gmra.mrb[254].mxu1 %v7847_v50 }
 0x3fa   :  { %v6023_v21 = vmax.f32 %v5949_v48, 0.0  ;;  %v8527_v17 = vadd.f32 %v8526_v0, %v8525_v27  ;;  %7079 = vmatmul.mubr.f32.vlgmr.msra.gmra.mrb[2].mxu0 %v6913_v6  ;;  %6854 = vmatprep.mubr.f32.mxu1 %v7850_v63  ;;  %v7853_v48 = vld [vmem:[%s14719_s7 + $0x7a0] sm:$0xff]  ;;  %v14504_v27 = vpop.permute.xlu0 %6722 }
 0x3fb   :  { %7083 = vmatprep.mubr.f32.mxu0 %v6922_v49  ;;  %14943 = vst [vmem:[#allocation42_spill] sm:$0xff] %v14504_v27  ;;  %v7856_v49 = vld [vmem:[%s14719_s7 + $0x7b8] sm:$0xff] }
 0x3fc   :  { %v14487_v52 = vpack.c.bf16 %v6023_v21, %v6022_v24  ;;  %v8528_v19 = vpop.f32.mrb[150].mxu1  ;;  %v5954_v44 = vadd.f32 %v8527_v17, %v14217_v26  ;;  %v14511_v24 = vpop.permute.xlu1 %6727 }
 0x3fd   :  { %v8529_v39 = vpop.f32.mrb[151].mxu1  ;;  %6855 = vmatmul.mubr.f32.gmra.mrb[0].mxu1 %v7849_v51  ;;  %14944 = vst [vmem:[#allocation34_spill] sm:$0xff] %v14511_v24 }
 0x3fe   :  { %v8530_v54 = vadd.f32 %v8529_v39, %v8528_v19  ;;  %7084 = vmatmul.mubr.f32.gmra.mrb[4].mxu0 %v6921_v55  ;;  %6859 = vmatprep.mubr.f32.mxu1 %v7852_v34  ;;  %v6024_v6 = vmax.f32 %v5954_v44, 0.0  ;;  %v7855_v55 = vld [vmem:[%s14719_s7 + $0x7b0] sm:$0xff]  ;;  %v7858_v34 = vld [vmem:[%s14719_s7 + $0x7c8] sm:$0xff]  ;;  %v14521_v44 = vpop.permute.xlu0 %6431 }
 0x400   :  { %v5959_v62 = vadd.f32 %v8530_v54, %v14224_v32  ;;  %v8531_v5 = vpop.f32.mrb[152].mxu1 }
 0x401   :  { %v8532_v50 = vpop.f32.mrb[153].mxu1  ;;  %6860 = vmatmul.mubr.f32.gmra.mrb[2].mxu1 %v7851_v13 }
 0x402   :  { %v6025_v26 = vmax.f32 %v5959_v62, 0.0  ;;  %v8533_v63 = vadd.f32 %v8532_v50, %v8531_v5  ;;  %6864 = vmatprep.mubr.f32.mxu1 %v7854_v10  ;;  %v7857_v62 = vld [vmem:[%s14719_s7 + $0x7c0] sm:$0xff]  ;;  %v14526_v5 = vpop.permute.xlu1 %6436  ;;  %v7860_v50 = vld [vmem:[%s14719_s7 + $0x7d8] sm:$0xff] }
 0x404   :  { %v14509_v0 = vpack.c.bf16 %v6025_v26, %v6024_v6  ;;  %v8534_v32 = vpop.f32.mrb[154].mxu1  ;;  %v5964_v17 = vadd.f32 %v8533_v63, %v14293_v25 }
 0x405   :  { %v8535_v21 = vpop.f32.mrb[155].mxu1  ;;  %6865 = vmatmul.mubr.f32.gmra.mrb[4].mxu1 %v7853_v48 }
 0x406   :  { %v8536_v51 = vadd.f32 %v8535_v21, %v8534_v32  ;;  %6869 = vmatprep.mubr.f32.mxu1 %v7856_v49  ;;  %v6026_v13 = vmax.f32 %v5964_v17, 0.0  ;;  %v7859_v49 = vld [vmem:[%s14719_s7 + $0x7d0] sm:$0xff]  ;;  %v14537_v32 = vpop.permute.xlu0 %6150  ;;  %v7862_v21 = vld [vmem:[%s14719_s7 + $0x7e8] sm:$0xff] }
 0x408   :  { %v5969_v19 = vadd.f32 %v8536_v51, %v14300_v22  ;;  %v8537_v39 = vpop.f32.mrb[156].mxu1 }
 0x409   :  { %v8538_v54 = vpop.f32.mrb[157].mxu1  ;;  %6870 = vmatmul.mubr.f32.gmra.mrb[6].mxu1 %v7855_v55  ;;  %v14543_v55 = vpop.permute.xlu1 %6155 }
 0x40a   :  { %v6027_v10 = vmax.f32 %v5969_v19, 0.0  ;;  %v8539_v25 = vadd.f32 %v8538_v54, %v8537_v39  ;;  %6874 = vmatprep.mubr.f32.mxu1 %v7858_v34  ;;  %v7861_v54 = vld [vmem:[%s14719_s7 + $0x7e0] sm:$0xff] }
 0x40c   :  { %v14531_v22 = vpack.c.bf16 %v6027_v10, %v6026_v13  ;;  %v8540_v6 = vpop.f32.mrb[158].mxu1  ;;  %v5974_v63 = vadd.f32 %v8539_v25, %v14356_v58  ;;  %v7864_v13 = vld [vmem:[%s14719_s7 + $0x7f8] sm:$0xff]  ;;  %v5860_v25 = vpop.permute.xlu0 %5859 }
 0x40d   :  { %v8541_v26 = vpop.f32.mrb[159].mxu1  ;;  %6875 = vmatmul.mubr.f32.gmra.mrb[8].mxu1 %v7857_v62 }
 0x40e   :  { %v8542_v48 = vadd.f32 %v8541_v26, %v8540_v6  ;;  %6879 = vmatprep.mubr.f32.mxu1 %v7860_v50  ;;  %v6028_v58 = vmax.f32 %v5974_v63, 0.0  ;;  %v7863_v26 = vld [vmem:[%s14719_s7 + $0x7f0] sm:$0xff]  ;;  %v5865_v63 = vpop.permute.xlu1 %5864 }
 0x410   :  { %v5979_v17 = vadd.f32 %v8542_v48, %v14362_v35  ;;  %v8543_v51 = vpop.f32.mrb[160].mxu1  ;;  %v6916_v48 = vld [vmem:[%s14722_s9 + $0x28] sm:$0xff] }
 0x411   :  { %v8544_v34 = vpop.f32.mrb[161].mxu1  ;;  %6880 = vmatmul.mubr.f32.gmra.mrb[10].mxu1 %v7859_v49 }
 0x412   :  { %v6029_v19 = vmax.f32 %v5979_v17, 0.0  ;;  %v8545_v39 = vadd.f32 %v8544_v34, %v8543_v51  ;;  %6884 = vmatprep.mubr.f32.mxu1 %v7862_v21 }
 0x414   :  { %v14551_v10 = vpack.c.bf16 %v6029_v19, %v6028_v58  ;;  %v8546_v35 = vpop.f32.mrb[162].mxu1  ;;  %v5984_v50 = vadd.f32 %v8545_v39, %v14417_v59  ;;  %v14561_v59 = vpop.permute.xlu0 %6732 }
 0x415   :  { %v8547_v62 = vpop.f32.mrb[163].mxu1  ;;  %6885 = vmatmul.mubr.f32.gmra.mrb[12].mxu1 %v7861_v54  ;;  %14945 = vst [vmem:[#allocation51_spill] sm:$0xff] %v14561_v59  ;;  %v14565_v54 = vpop.permute.xlu1 %6737 }
 0x416   :  { %v8548_v6 = vadd.f32 %v8547_v62, %v8546_v35  ;;  %6889 = vmatprep.mubr.f32.mxu1 %v7864_v13  ;;  %v6030_v51 = vmax.f32 %v5984_v50, 0.0  ;;  %14946 = vst [vmem:[#allocation2_spill] sm:$0xff] %v14565_v54 }
 0x418   :  { %v5989_v49 = vadd.f32 %v8548_v6, %v14423_v7  ;;  %v8549_v21 = vpop.f32.mrb[164].mxu1  ;;  %v14569_v24 = vpop.permute.xlu0 %6441 }
 0x419   :  { %v8550_v17 = vpop.f32.mrb[165].mxu1  ;;  %6890 = vmatmul.mubr.f32.gmra.mrb[14].mxu1 %v7863_v26 }
 0x41a   :  { %v6031_v34 = vmax.f32 %v5989_v49, 0.0  ;;  %v8551_v58 = vadd.f32 %v8550_v17, %v8549_v21  ;;  %7153 = vmatprep.mubr.f32.mxu1 %v6916_v48  ;;  %v14571_v21 = vpop.permute.xlu1 %6446 }
 0x41c   :  { %v14563_v19 = vpack.c.bf16 %v6031_v34, %v6030_v51  ;;  %v8552_v39 = vpop.f32.mrb[166].mxu1  ;;  %v5994_v35 = vadd.f32 %v8551_v58, %v14489_v28  ;;  %v14575_v27 = vpop.permute.xlu0 %6160 }
 0x41d   :  { %v8553_v13 = vpop.f32.mrb[167].mxu1 }
 0x41e   :  { %v8554_v62 = vadd.f32 %v8553_v13, %v8552_v39  ;;  %v6032_v26 = vmax.f32 %v5994_v35, 0.0 }
 0x420   :  { %v5999_v7 = vadd.f32 %v8554_v62, %v14495_v2  ;;  %v8555_v6 = vpop.f32.mrb[168].mxu1  ;;  %v14577_v2 = vpop.permute.xlu1 %6165 }
 0x421   :  { %v8556_v50 = vpop.f32.mrb[169].mxu1 }
 0x422   :  { %v6033_v49 = vmax.f32 %v5999_v7, 0.0  ;;  %v8557_v48 = vadd.f32 %v8556_v50, %v8555_v6  ;;  %v5870_v50 = vpop.permute.xlu0 %5869 }
 0x424   :  { %v14573_v17 = vpack.c.bf16 %v6033_v49, %v6032_v26  ;;  %v8558_v51 = vpop.f32.mrb[170].mxu1  ;;  %v6004_v54 = vadd.f32 %v8557_v48, %v5860_v25  ;;  %v5875_v23 = vpop.permute.xlu1 %5874 }
 0x425   :  { %v8559_v34 = vpop.f32.mrb[171].mxu1 }
 0x426   :  { %v8560_v59 = vadd.f32 %v8559_v34, %v8558_v51  ;;  %v6034_v13 = vmax.f32 %v6004_v54, 0.0 }
 0x428   :  { %v6009_v28 = vadd.f32 %v8560_v59, %v5865_v63  ;;  %v8561_v58 = vpop.f32.mrb[172].mxu1 }
 0x429   :  { %v8562_v39 = vpop.f32.mrb[173].mxu1 }
 0x42a   :  { %v6035_v62 = vmax.f32 %v6009_v28, 0.0  ;;  %v8563_v35 = vadd.f32 %v8562_v39, %v8561_v58 }
 0x42c   :  { %v14579_v7 = vpack.c.bf16 %v6035_v62, %v6034_v13  ;;  %v8564_v6 = vpop.f32.mrb[174].mxu1  ;;  %v6014_v49 = vadd.f32 %v8563_v35, %v5870_v50 }
 0x42d   :  { %v8565_v26 = vpop.f32.mrb[175].mxu1 }
 0x42e   :  { %v8566_v1 = vadd.f32 %v8565_v26, %v8564_v6  ;;  %v6036_v34 = vmax.f32 %v6014_v49, 0.0 }
 0x430   :  { %v6019_v25 = vadd.f32 %v8566_v1, %v5875_v23  ;;  %v8599_v48 = vpop.f32.mrb[176].mxu1 }
 0x431   :  { %v8600_v51 = vpop.f32.mrb[177].mxu1 }
 0x432   :  { %v6037_v63 = vmax.f32 %v6019_v25, 0.0  ;;  %v8601_v59 = vadd.f32 %v8600_v51, %v8599_v48 }
 0x434   :  { %v14581_v56 = vpack.c.bf16 %v6037_v63, %v6036_v34  ;;  %v8602_v15 = vpop.f32.mrb[178].mxu1  ;;  %v6235_v28 = vadd.f32 %v8601_v59, %v14137_v60 }
 0x435   :  { %v8603_v54 = vpop.f32.mrb[179].mxu1 }
 0x436   :  { %v8604_v58 = vadd.f32 %v8603_v54, %v8602_v15  ;;  %v6313_v35 = vmax.f32 %v6235_v28, 0.0 }
 0x438   :  { %v6240_v39 = vadd.f32 %v8604_v58, %v14143_v3  ;;  %v8605_v13 = vpop.f32.mrb[180].mxu1 }
 0x439   :  { %v8606_v62 = vpop.f32.mrb[181].mxu1 }
 0x43a   :  { %v6314_v6 = vmax.f32 %v6240_v39, 0.0  ;;  %v8607_v50 = vadd.f32 %v8606_v62, %v8605_v13 }
 0x43c   :  { %v8608_v23 = vpop.f32.mrb[182].mxu1  ;;  %v9748_v1 = vpack.c.bf16 %v6314_v6, %v6313_v35  ;;  %v6245_v49 = vadd.f32 %v8607_v50, %v14201_v40 }
 0x43d   :  { %v8609_v26 = vpop.f32.mrb[183].mxu1 }
 0x43e   :  { %v8610_v25 = vadd.f32 %v8609_v26, %v8608_v23  ;;  %9749 = vmatprep.subr.bf16.mxu1 %v9748_v1  ;;  %v6315_v51 = vmax.f32 %v6245_v49, 0.0 }
 0x43f   :  { %9751 = vmatpush3.bf16.msra.mxu1 %v14487_v52 }
 0x440   :  { %v6250_v48 = vadd.f32 %v8610_v25, %v14207_v42  ;;  %v8611_v60 = vpop.f32.mrb[184].mxu1 }
 0x441   :  { %v8612_v15 = vpop.f32.mrb[185].mxu1 }
 0x442   :  { %v6316_v3 = vmax.f32 %v6250_v48, 0.0  ;;  %v8613_v34 = vadd.f32 %v8612_v15, %v8611_v60 }
 0x444   :  { %v8614_v63 = vpop.f32.mrb[186].mxu1  ;;  %v9752_v59 = vpack.c.bf16 %v6316_v3, %v6315_v51  ;;  %v6255_v28 = vadd.f32 %v8613_v34, %v14274_v30 }
 0x445   :  { %v8615_v54 = vpop.f32.mrb[187].mxu1 }
 0x446   :  { %v8616_v58 = vadd.f32 %v8615_v54, %v8614_v63  ;;  %9753 = vmatprep.subr.bf16.mxu1 %v9752_v59  ;;  %v6317_v13 = vmax.f32 %v6255_v28, 0.0 }
 0x447   :  { %9755 = vmatpush3.bf16.msra.mxu1 %v14509_v0 }
 0x448   :  { %v6260_v40 = vadd.f32 %v8616_v58, %v14281_v4  ;;  %v8617_v39 = vpop.f32.mrb[188].mxu1 }
 0x449   :  { %v8618_v52 = vpop.f32.mrb[189].mxu1 }
 0x44a   :  { %v6318_v42 = vmax.f32 %v6260_v40, 0.0  ;;  %v8619_v62 = vadd.f32 %v8618_v52, %v8617_v39 }
 0x44c   :  { %v8620_v35 = vpop.f32.mrb[190].mxu1  ;;  %v9756_v6 = vpack.c.bf16 %v6318_v42, %v6317_v13  ;;  %v6265_v1 = vadd.f32 %v8619_v62, %v14341_v46 }
 0x44d   :  { %v8621_v50 = vpop.f32.mrb[191].mxu1  ;;  %v8839_v23 = vpop.f32.mrb[254].mxu0 }
 0x44e   :  { %v8622_v26 = vadd.f32 %v8621_v50, %v8620_v35  ;;  %v8840_v49 = vpop.f32.mrb[255].mxu0  ;;  %9757 = vmatprep.subr.bf16.mxu1 %v9756_v6  ;;  %v6319_v60 = vmax.f32 %v6265_v1, 0.0 }
 0x44f   :  { %v14592_v30 = vadd.f32 %v8840_v49, %v8839_v23  ;;  %9759 = vmatpush3.bf16.msra.mxu1 %v14531_v22 }
 0x450   :  { %v6270_v4 = vadd.f32 %v8622_v26, %v14348_v38  ;;  %v8623_v0 = vpop.f32.mrb[192].mxu1 }
 0x451   :  { %v8624_v25 = vpop.f32.mrb[193].mxu1  ;;  %v8842_v48 = vpop.f32.mrb[0].mxu0 }
 0x452   :  { %v6320_v15 = vmax.f32 %v6270_v4, 0.0  ;;  %v8625_v51 = vadd.f32 %v8624_v25, %v8623_v0  ;;  %v8843_v3 = vpop.f32.mrb[1].mxu0 }
 0x453   :  { %v14596_v34 = vadd.f32 %v8843_v3, %v8842_v48 }
 0x454   :  { %v8626_v63 = vpop.f32.mrb[194].mxu1  ;;  %v9760_v46 = vpack.c.bf16 %v6320_v15, %v6319_v60  ;;  %v6275_v54 = vadd.f32 %v8625_v51, %v14402_v57 }
 0x455   :  { %v8627_v59 = vpop.f32.mrb[195].mxu1 }
 0x456   :  { %v8628_v28 = vadd.f32 %v8627_v59, %v8626_v63  ;;  %9761 = vmatprep.subr.bf16.mxu1 %v9760_v46  ;;  %v6321_v40 = vmax.f32 %v6275_v54, 0.0 }
 0x457   :  { %9763 = vmatpush3.bf16.msra.mxu1 %v14551_v10 }
 0x458   :  { %v6280_v38 = vadd.f32 %v8628_v28, %v14409_v14  ;;  %v8629_v22 = vpop.f32.mrb[196].mxu1 }
 0x459   :  { %v8630_v58 = vpop.f32.mrb[197].mxu1 }
 0x45a   :  { %v6322_v39 = vmax.f32 %v6280_v38, 0.0  ;;  %v8631_v52 = vadd.f32 %v8630_v58, %v8629_v22 }
 0x45c   :  { %v8632_v13 = vpop.f32.mrb[198].mxu1  ;;  %v9764_v42 = vpack.c.bf16 %v6322_v39, %v6321_v40  ;;  %v6285_v35 = vadd.f32 %v8631_v52, %v14463_v33 }
 0x45d   :  { %v8633_v62 = vpop.f32.mrb[199].mxu1 }
 0x45e   :  { %v8634_v6 = vadd.f32 %v8633_v62, %v8632_v13  ;;  %9765 = vmatprep.subr.bf16.mxu1 %v9764_v42  ;;  %v6323_v23 = vmax.f32 %v6285_v35, 0.0  ;;  %v6924_v42 = vld [vmem:[%s14722_s9 + $0x68] sm:$0xff] }
 0x45f   :  { %9767 = vmatpush3.bf16.msra.mxu1 %v14563_v19 }
 0x460   :  { %v6290_v57 = vadd.f32 %v8634_v6, %v14476_v11  ;;  %v8635_v50 = vpop.f32.mrb[200].mxu1  ;;  %v6923_v6 = vld [vmem:[%s14722_s9 + $0x60] sm:$0xff] }
 0x461   :  { %v8636_v10 = vpop.f32.mrb[201].mxu1 }
 0x462   :  { %v6324_v14 = vmax.f32 %v6290_v57, 0.0  ;;  %v8637_v1 = vadd.f32 %v8636_v10, %v8635_v50 }
 0x464   :  { %v8638_v26 = vpop.f32.mrb[202].mxu1  ;;  %v9768_v49 = vpack.c.bf16 %v6324_v14, %v6323_v23  ;;  %v6295_v0 = vadd.f32 %v8637_v1, %v14537_v32 }
 0x465   :  { %v8639_v4 = vpop.f32.mrb[203].mxu1 }
 0x466   :  { %v8640_v25 = vadd.f32 %v8639_v4, %v8638_v26  ;;  %9769 = vmatprep.subr.bf16.mxu1 %v9768_v49  ;;  %v6325_v60 = vmax.f32 %v6295_v0, 0.0 }
 0x467   :  { %9771 = vmatpush3.bf16.msra.mxu1 %v14573_v17 }
 0x468   :  { %v6300_v33 = vadd.f32 %v8640_v25, %v14543_v55  ;;  %v8641_v48 = vpop.f32.mrb[204].mxu1 }
 0x469   :  { %v8642_v19 = vpop.f32.mrb[205].mxu1 }
 0x46a   :  { %v6326_v11 = vmax.f32 %v6300_v33, 0.0  ;;  %v8643_v15 = vadd.f32 %v8642_v19, %v8641_v48 }
 0x46c   :  { %v8644_v51 = vpop.f32.mrb[206].mxu1  ;;  %v9772_v3 = vpack.c.bf16 %v6326_v11, %v6325_v60  ;;  %v6305_v46 = vadd.f32 %v8643_v15, %v14575_v27  ;;  %v6915_v27 = vld [vmem:[%s14722_s9 + $0x20] sm:$0xff] }
 0x46d   :  { %v8645_v63 = vpop.f32.mrb[207].mxu1 }
 0x46e   :  { %v8646_v59 = vadd.f32 %v8645_v63, %v8644_v51  ;;  %9773 = vmatprep.subr.bf16.mxu1 %v9772_v3  ;;  %v6327_v28 = vmax.f32 %v6305_v46, 0.0 }
 0x46f   :  { %9775 = vmatpush3.bf16.msra.mxu1 %v14579_v7 }
 0x470   :  { %v6310_v32 = vadd.f32 %v8646_v59, %v14577_v2  ;;  %v8679_v54 = vpop.f32.mrb[208].mxu1  ;;  %v6918_v2 = vld [vmem:[%s14722_s9 + $0x38] sm:$0xff] }
 0x471   :  { %v8680_v17 = vpop.f32.mrb[209].mxu1  ;;  %7228 = vmatprep.mubr.f32.mxu0 %v6918_v2 }
 0x472   :  { %v6328_v55 = vmax.f32 %v6310_v32, 0.0  ;;  %v8681_v38 = vadd.f32 %v8680_v17, %v8679_v54 }
 0x474   :  { %v8682_v22 = vpop.f32.mrb[210].mxu1  ;;  %v9776_v58 = vpack.c.bf16 %v6328_v55, %v6327_v28  ;;  %v6526_v39 = vadd.f32 %v8681_v38, %v14185_v18 }
 0x475   :  { %v8683_v40 = vpop.f32.mrb[211].mxu1 }
 0x476   :  { %v8684_v52 = vadd.f32 %v8683_v40, %v8682_v22  ;;  %9777 = vmatprep.subr.bf16.mxu1 %v9776_v58  ;;  %v6604_v62 = vmax.f32 %v6526_v39, 0.0 }
 0x477   :  { %9779 = vmatpush3.bf16.msra.mxu1 %v14581_v56 }
 0x478   :  { %v6531_v7 = vadd.f32 %v8684_v52, %v14190_v41  ;;  %v8685_v13 = vpop.f32.mrb[212].mxu1 }
 0x479   :  { %v8686_v18 = vpop.f32.mrb[213].mxu1 }
 0x47a   :  { %v6605_v35 = vmax.f32 %v6531_v7, 0.0  ;;  %v8687_v56 = vadd.f32 %v8686_v18, %v8685_v13  ;;  %7154 = vmatmul.mubr.f32.vlgmr.msra.gmra.mrb[16].mxu1 %v6915_v27 }
 0x47b   :  { %7158 = vmatprep.mubr.f32.mxu1 %v6924_v42 }
 0x47c   :  { %v14625_v57 = vpack.c.bf16 %v6605_v35, %v6604_v62  ;;  %v8688_v50 = vpop.f32.mrb[214].mxu1  ;;  %v6536_v10 = vadd.f32 %v8687_v56, %v14255_v12 }
 0x47d   :  { %v8689_v41 = vpop.f32.mrb[215].mxu1 }
 0x47e   :  { %v8690_v23 = vadd.f32 %v8689_v41, %v8688_v50  ;;  %7159 = vmatmul.mubr.f32.gmra.mrb[18].mxu1 %v6923_v6  ;;  %v6606_v49 = vmax.f32 %v6536_v10, 0.0 }
 0x480   :  { %v6541_v14 = vadd.f32 %v8690_v23, %v14261_v36  ;;  %v8691_v1 = vpop.f32.mrb[216].mxu1 }
 0x481   :  { %v8692_v26 = vpop.f32.mrb[217].mxu1 }
 0x482   :  { %v6607_v4 = vmax.f32 %v6541_v14, 0.0  ;;  %v8693_v0 = vadd.f32 %v8692_v26, %v8691_v1 }
 0x484   :  { %v14629_v25 = vpack.c.bf16 %v6607_v4, %v6606_v49  ;;  %v8694_v33 = vpop.f32.mrb[218].mxu1  ;;  %v6546_v19 = vadd.f32 %v8693_v0, %v14327_v31  ;;  %v14648_v4 = vpop.permute.xlu0 %6742 }
 0x485   :  { %v8695_v48 = vpop.f32.mrb[219].mxu1 }
 0x486   :  { %v8696_v60 = vadd.f32 %v8695_v48, %v8694_v33  ;;  %v6608_v51 = vmax.f32 %v6546_v19, 0.0  ;;  %v14651_v33 = vpop.permute.xlu1 %6747 }
 0x488   :  { %v6551_v11 = vadd.f32 %v8696_v60, %v14332_v61  ;;  %v8697_v15 = vpop.f32.mrb[220].mxu1 }
 0x489   :  { %v8698_v12 = vpop.f32.mrb[221].mxu1 }
 0x48a   :  { %v6609_v3 = vmax.f32 %v6551_v11, 0.0  ;;  %v8699_v63 = vadd.f32 %v8698_v12, %v8697_v15  ;;  %v6452_v12 = vpop.permute.xlu0 %6451 }
 0x48c   :  { %v14633_v36 = vpack.c.bf16 %v6609_v3, %v6608_v51  ;;  %v8700_v46 = vpop.f32.mrb[222].mxu1  ;;  %v6556_v32 = vadd.f32 %v8699_v63, %v14388_v8 }
 0x48d   :  { %v8701_v59 = vpop.f32.mrb[223].mxu1 }
 0x48e   :  { %v8702_v54 = vadd.f32 %v8701_v59, %v8700_v46  ;;  %v6610_v31 = vmax.f32 %v6556_v32, 0.0 }
 0x490   :  { %v6561_v17 = vadd.f32 %v8702_v54, %v14393_v47  ;;  %v8703_v28 = vpop.f32.mrb[224].mxu1 }
 0x491   :  { %v8704_v55 = vpop.f32.mrb[225].mxu1 }
 0x492   :  { %v6611_v38 = vmax.f32 %v6561_v17, 0.0  ;;  %v8705_v22 = vadd.f32 %v8704_v55, %v8703_v28 }
 0x494   :  { %v14637_v61 = vpack.c.bf16 %v6611_v38, %v6610_v31  ;;  %v8706_v58 = vpop.f32.mrb[226].mxu1  ;;  %v6566_v39 = vadd.f32 %v8705_v22, %v14449_v43 }
 0x495   :  { %v8707_v40 = vpop.f32.mrb[227].mxu1 }
 0x496   :  { %v8708_v52 = vadd.f32 %v8707_v40, %v8706_v58  ;;  %v6612_v8 = vmax.f32 %v6566_v39, 0.0 }
 0x498   :  { %v6571_v27 = vadd.f32 %v8708_v52, %v14454_v29  ;;  %v8709_v2 = vpop.f32.mrb[228].mxu1 }
 0x499   :  { %v8710_v7 = vpop.f32.mrb[229].mxu1 }
 0x49a   :  { %v6613_v13 = vmax.f32 %v6571_v27, 0.0  ;;  %v8711_v42 = vadd.f32 %v8710_v7, %v8709_v2 }
 0x49c   :  { %v14641_v47 = vpack.c.bf16 %v6613_v13, %v6612_v8  ;;  %v8712_v18 = vpop.f32.mrb[230].mxu1  ;;  %v6576_v35 = vadd.f32 %v8711_v42, %v14521_v44 }
 0x49d   :  { %v8713_v62 = vpop.f32.mrb[231].mxu1 }
 0x49e   :  { %v8714_v56 = vadd.f32 %v8713_v62, %v8712_v18  ;;  %v6614_v43 = vmax.f32 %v6576_v35, 0.0 }
 0x4a0   :  { %v6581_v6 = vadd.f32 %v8714_v56, %v14526_v5  ;;  %v8715_v50 = vpop.f32.mrb[232].mxu1 }
 0x4a1   :  { %v8716_v41 = vpop.f32.mrb[233].mxu1 }
 0x4a2   :  { %v6615_v10 = vmax.f32 %v6581_v6, 0.0  ;;  %v8717_v23 = vadd.f32 %v8716_v41, %v8715_v50 }
 0x4a4   :  { %v14645_v29 = vpack.c.bf16 %v6615_v10, %v6614_v43  ;;  %v8718_v14 = vpop.f32.mrb[234].mxu1  ;;  %v6586_v26 = vadd.f32 %v8717_v23, %v14569_v24  ;;  %v6457_v24 = vpop.permute.xlu1 %6456 }
 0x4a5   :  { %v8719_v1 = vpop.f32.mrb[235].mxu1 }
 0x4a6   :  { %v8720_v49 = vadd.f32 %v8719_v1, %v8718_v14  ;;  %v6616_v48 = vmax.f32 %v6586_v26, 0.0 }
 0x4a8   :  { %v6591_v0 = vadd.f32 %v8720_v49, %v14571_v21  ;;  %v8721_v44 = vpop.f32.mrb[236].mxu1 }
 0x4a9   :  { %v8722_v5 = vpop.f32.mrb[237].mxu1 }
 0x4aa   :  { %v6617_v19 = vmax.f32 %v6591_v0, 0.0  ;;  %v8723_v60 = vadd.f32 %v8722_v5, %v8721_v44 }
 0x4ac   :  { %v14653_v11 = vpack.c.bf16 %v6617_v19, %v6616_v48  ;;  %v8724_v15 = vpop.f32.mrb[238].mxu1  ;;  %v6596_v3 = vadd.f32 %v8723_v60, %v6452_v12  ;;  %v6932_v48 = vpop.permute.xlu0 %6931  ;;  %v14947_v19 = vld [vmem:[#allocation40_spill] sm:$0xff] }
 0x4ad   :  { %v8725_v51 = vpop.f32.mrb[239].mxu1  ;;  %v7006_v12 = vadd.f32 %v14592_v30, %v6932_v48 }
 0x4ae   :  { %v8726_v63 = vadd.f32 %v8725_v51, %v8724_v15  ;;  %v6618_v54 = vmax.f32 %v6596_v3, 0.0 }
 0x4b0   :  { %v6601_v46 = vadd.f32 %v8726_v63, %v6457_v24  ;;  %v8759_v59 = vpop.f32.mrb[240].mxu1 }
 0x4b1   :  { %v8760_v32 = vpop.f32.mrb[241].mxu1 }
 0x4b2   :  { %v6619_v21 = vmax.f32 %v6601_v46, 0.0  ;;  %v8761_v17 = vadd.f32 %v8760_v32, %v8759_v59  ;;  %v6937_v59 = vpop.permute.xlu1 %6936 }
 0x4b4   :  { %v14655_v28 = vpack.c.bf16 %v6619_v21, %v6618_v54  ;;  %v8762_v55 = vpop.f32.mrb[242].mxu1  ;;  %v6817_v38 = vadd.f32 %v8761_v17, %v14168_v37 }
 0x4b5   :  { %v8763_v31 = vpop.f32.mrb[243].mxu1 }
 0x4b6   :  { %v8764_v22 = vadd.f32 %v8763_v31, %v8762_v55  ;;  %v6895_v52 = vmax.f32 %v6817_v38, 0.0  ;;  %v7011_v55 = vadd.f32 %v14596_v34, %v6937_v59 }
 0x4b8   :  { %v6822_v58 = vadd.f32 %v8764_v22, %v14175_v53  ;;  %v8765_v40 = vpop.f32.mrb[244].mxu1 }
 0x4b9   :  { %v8766_v39 = vpop.f32.mrb[245].mxu1 }
 0x4ba   :  { %v6896_v27 = vmax.f32 %v6822_v58, 0.0  ;;  %v8767_v2 = vadd.f32 %v8766_v39, %v8765_v40  ;;  %v14949_v58 = vld [vmem:[#allocation41_spill] sm:$0xff] }
 0x4bc   :  { %v8768_v7 = vpop.f32.mrb[246].mxu1  ;;  %v9780_v8 = vpack.c.bf16 %v6896_v27, %v6895_v52  ;;  %v6827_v42 = vadd.f32 %v8767_v2, %v14235_v9  ;;  %v14950_v52 = vld [vmem:[#allocation33_spill] sm:$0xff] }
 0x4bd   :  { %v8769_v13 = vpop.f32.mrb[247].mxu1 }
 0x4be   :  { %v8770_v18 = vadd.f32 %v8769_v13, %v8768_v7  ;;  %9781 = vmatprep.subr.bf16.mxu0 %v9780_v8  ;;  %v6897_v56 = vmax.f32 %v6827_v42, 0.0 }
 0x4bf   :  { %9783 = vmatpush3.bf16.msra.mxu0 %v14625_v57 }
 0x4c0   :  { %v6832_v62 = vadd.f32 %v8770_v18, %v14243_v20  ;;  %v8771_v37 = vpop.f32.mrb[248].mxu1 }
 0x4c1   :  { %v8772_v35 = vpop.f32.mrb[249].mxu1 }
 0x4c2   :  { %v6898_v53 = vmax.f32 %v6832_v62, 0.0  ;;  %v8773_v6 = vadd.f32 %v8772_v35, %v8771_v37  ;;  %v14951_v37 = vld [vmem:[#allocation42_spill] sm:$0xff] }
 0x4c4   :  { %v8774_v50 = vpop.f32.mrb[250].mxu1  ;;  %v9784_v41 = vpack.c.bf16 %v6898_v53, %v6897_v56  ;;  %v6837_v10 = vadd.f32 %v8773_v6, %v14311_v45  ;;  %v14952_v53 = vld [vmem:[#allocation34_spill] sm:$0xff] }
 0x4c5   :  { %v8775_v43 = vpop.f32.mrb[251].mxu1 }
 0x4c6   :  { %v8776_v23 = vadd.f32 %v8775_v43, %v8774_v50  ;;  %9785 = vmatprep.subr.bf16.mxu0 %v9784_v41  ;;  %v6899_v1 = vmax.f32 %v6837_v10, 0.0 }
 0x4c7   :  { %9787 = vmatpush3.bf16.msra.mxu0 %v14629_v25 }
 0x4c8   :  { %v6842_v9 = vadd.f32 %v8776_v23, %v14316_v16  ;;  %v8777_v14 = vpop.f32.mrb[252].mxu1  ;;  %v14948_v16 = vld [vmem:[#allocation32_spill] sm:$0xff] }
 0x4c9   :  { %v8778_v57 = vpop.f32.mrb[253].mxu1 }
 0x4ca   :  { %v6900_v20 = vmax.f32 %v6842_v9, 0.0  ;;  %v8779_v26 = vadd.f32 %v8778_v57, %v8777_v14  ;;  %v14953_v57 = vld [vmem:[#allocation51_spill] sm:$0xff] }
 0x4cc   :  { %v8780_v49 = vpop.f32.mrb[254].mxu1  ;;  %v9788_v0 = vpack.c.bf16 %v6900_v20, %v6899_v1  ;;  %v6847_v60 = vadd.f32 %v8779_v26, %v14947_v19  ;;  %v14954_v26 = vld [vmem:[#allocation2_spill] sm:$0xff] }
 0x4cd   :  { %v8781_v44 = vpop.f32.mrb[255].mxu1  ;;  %v8877_v5 = vpop.f32.mrb[2].mxu0 }
 0x4ce   :  { %v8782_v15 = vadd.f32 %v8781_v44, %v8780_v49  ;;  %v8878_v45 = vpop.f32.mrb[3].mxu0  ;;  %9789 = vmatprep.subr.bf16.mxu0 %v9788_v0  ;;  %v6901_v32 = vmax.f32 %v6847_v60, 0.0 }
 0x4cf   :  { %v8879_v25 = vadd.f32 %v8878_v45, %v8877_v5  ;;  %9791 = vmatpush3.bf16.msra.mxu0 %v14633_v36 }
 0x4d0   :  { %v6852_v51 = vadd.f32 %v8782_v15, %v14948_v16  ;;  %v8783_v3 = vpop.f32.mrb[0].mxu1 }
 0x4d1   :  { %v14669_v63 = vadd.f32 %v8879_v25, %v7006_v12  ;;  %v8784_v24 = vpop.f32.mrb[1].mxu1  ;;  %v8880_v46 = vpop.f32.mrb[4].mxu0 }
 0x4d2   :  { %v6902_v54 = vmax.f32 %v6852_v51, 0.0  ;;  %v8785_v21 = vadd.f32 %v8784_v24, %v8783_v3  ;;  %v8881_v17 = vpop.f32.mrb[5].mxu0  ;;  %v6917_v3 = vld [vmem:[%s14722_s9 + $0x30] sm:$0xff] }
 0x4d3   :  { %v8882_v31 = vadd.f32 %v8881_v17, %v8880_v46 }
 0x4d4   :  { %v8786_v38 = vpop.f32.mrb[2].mxu1  ;;  %v9792_v30 = vpack.c.bf16 %v6902_v54, %v6901_v32  ;;  %v6857_v40 = vadd.f32 %v8785_v21, %v14949_v58 }
 0x4d5   :  { %v14672_v22 = vadd.f32 %v8882_v31, %v7011_v55  ;;  %v8787_v36 = vpop.f32.mrb[3].mxu1 }
 0x4d6   :  { %v8788_v39 = vadd.f32 %v8787_v36, %v8786_v38  ;;  %9793 = vmatprep.subr.bf16.mxu0 %v9792_v30  ;;  %v6903_v8 = vmax.f32 %v6857_v40, 0.0 }
 0x4d7   :  { %9795 = vmatpush3.bf16.msra.mxu0 %v14637_v61 }
 0x4d8   :  { %v6862_v27 = vadd.f32 %v8788_v39, %v14950_v52  ;;  %v8789_v2 = vpop.f32.mrb[4].mxu1 }
 0x4d9   :  { %v8790_v7 = vpop.f32.mrb[5].mxu1 }
 0x4da   :  { %v6904_v13 = vmax.f32 %v6862_v27, 0.0  ;;  %v8791_v42 = vadd.f32 %v8790_v7, %v8789_v2 }
 0x4dc   :  { %v8792_v34 = vpop.f32.mrb[6].mxu1  ;;  %v9796_v18 = vpack.c.bf16 %v6904_v13, %v6903_v8  ;;  %v6867_v35 = vadd.f32 %v8791_v42, %v14951_v37 }
 0x4dd   :  { %v8793_v62 = vpop.f32.mrb[7].mxu1 }
 0x4de   :  { %v8794_v56 = vadd.f32 %v8793_v62, %v8792_v34  ;;  %9797 = vmatprep.subr.bf16.mxu0 %v9796_v18  ;;  %v6905_v41 = vmax.f32 %v6867_v35, 0.0  ;;  %v9833_v62 = vld [vmem:[%s14723_s11] sm:$0xff]  ;;  %v9834_v35 = vld [vmem:[%s14723_s11 + $0x8] sm:$0xff] }
 0x4df   :  { %9799 = vmatpush3.bf16.msra.mxu0 %v14641_v47 }
 0x4e0   :  { %v6872_v6 = vadd.f32 %v8794_v56, %v14952_v53  ;;  %v8795_v50 = vpop.f32.mrb[8].mxu1 }
 0x4e1   :  { %v8796_v61 = vpop.f32.mrb[9].mxu1 }
 0x4e2   :  { %v6906_v43 = vmax.f32 %v6872_v6, 0.0  ;;  %v8797_v10 = vadd.f32 %v8796_v61, %v8795_v50 }
 0x4e4   :  { %v8798_v23 = vpop.f32.mrb[10].mxu1  ;;  %v9800_v9 = vpack.c.bf16 %v6906_v43, %v6905_v41  ;;  %v6877_v1 = vadd.f32 %v8797_v10, %v14953_v57 }
 0x4e5   :  { %v8799_v14 = vpop.f32.mrb[11].mxu1 }
 0x4e6   :  { %v8800_v20 = vadd.f32 %v8799_v14, %v8798_v23  ;;  %9801 = vmatprep.subr.bf16.mxu0 %v9800_v9  ;;  %v6907_v44 = vmax.f32 %v6877_v1, 0.0 }
 0x4e7   :  { %9803 = vmatpush3.bf16.msra.mxu0 %v14645_v29 }
 0x4e8   :  { %v6882_v49 = vadd.f32 %v8800_v20, %v14954_v26  ;;  %v8801_v0 = vpop.f32.mrb[12].mxu1 }
 0x4e9   :  { %v8802_v47 = vpop.f32.mrb[13].mxu1 }
 0x4ea   :  { %v6908_v5 = vmax.f32 %v6882_v49, 0.0  ;;  %v8803_v48 = vadd.f32 %v8802_v47, %v8801_v0 }
 0x4ec   :  { %v8804_v19 = vpop.f32.mrb[14].mxu1  ;;  %v9804_v60 = vpack.c.bf16 %v6908_v5, %v6907_v44  ;;  %v6887_v45 = vadd.f32 %v8803_v48, %v14648_v4  ;;  %v6926_v4 = vld [vmem:[%s14722_s9 + $0x78] sm:$0xff] }
 0x4ed   :  { %v8805_v15 = vpop.f32.mrb[15].mxu1 }
 0x4ee   :  { %v8806_v12 = vadd.f32 %v8805_v15, %v8804_v19  ;;  %9805 = vmatprep.subr.bf16.mxu0 %v9804_v60  ;;  %v6909_v16 = vmax.f32 %v6887_v45, 0.0 }
 0x4ef   :  { %9807 = vmatpush3.bf16.msra.mxu0 %v14653_v11 }
 0x4f0   :  { %v6892_v25 = vadd.f32 %v8806_v12, %v14651_v33  ;;  %v6925_v33 = vld [vmem:[%s14722_s9 + $0x70] sm:$0xff] }
 0x4f2   :  { %v6910_v29 = vmax.f32 %v6892_v25, 0.0 }
 0x4f4   :  { %v9808_v51 = vpack.c.bf16 %v6910_v29, %v6909_v16 }
 0x4f6   :  { %9809 = vmatprep.subr.bf16.mxu0 %v9808_v51 }
 0x4f7   :  { %9811 = vmatpush3.bf16.msra.mxu0 %v14655_v28 }
 0x4fa   :  { %7229 = vmatmul.mubr.f32.vlgmr.msra.gmra.mrb[6].mxu0 %v6917_v3 }
 0x4fb   :  { %7233 = vmatprep.mubr.f32.mxu0 %v6926_v4 }
 0x4fe   :  { %7234 = vmatmul.mubr.f32.gmra.mrb[8].mxu0 %v6925_v33 }
 0x54d   :  { %v8915_v11 = vpop.f32.mrb[16].mxu1 }
 0x54e   :  { %v8916_v24 = vpop.f32.mrb[17].mxu1 }
 0x54f   :  { %v8917_v46 = vadd.f32 %v8916_v24, %v8915_v11 }
 0x551   :  { %v7156_v28 = vadd.f32 %v8917_v46, %v14669_v63  ;;  %v8918_v59 = vpop.f32.mrb[18].mxu1 }
 0x552   :  { %v8919_v32 = vpop.f32.mrb[19].mxu1 }
 0x553   :  { %v8920_v54 = vadd.f32 %v8919_v32, %v8918_v59 }
 0x555   :  { %v7161_v21 = vadd.f32 %v8920_v54, %v14672_v22 }
 0x5cd   :  { %v8953_v17 = vpop.f32.mrb[6].mxu0 }
 0x5ce   :  { %v8954_v55 = vpop.f32.mrb[7].mxu0 }
 0x5cf   :  { %v8955_v31 = vadd.f32 %v8954_v55, %v8953_v17 }
 0x5d1   :  { %v7231_v38 = vadd.f32 %v8955_v31, %v7156_v28  ;;  %v8956_v30 = vpop.f32.mrb[8].mxu0 }
 0x5d2   :  { %v8957_v36 = vpop.f32.mrb[9].mxu0 }
 0x5d3   :  { %v7239_v58 = vsub.f32 0.0, %v7231_v38  ;;  %v8958_v40 = vadd.f32 %v8957_v36, %v8956_v30 }
 0x5d5   :  { %v7241_v39 = vmin.f32 %v7239_v58, 30.0  ;;  %v7236_v52 = vadd.f32 %v8958_v40, %v7161_v21 }
 0x5d7   :  { %v7243_v27 = vmul.f32 1.442695, %v7241_v39  ;;  %v7240_v2 = vsub.f32 0.0, %v7236_v52 }
 0x5d9   :  { %9825 = vpow2.f32 %v7243_v27  ;;  %v7242_v7 = vmin.f32 %v7240_v2, 30.0 }
 0x5db   :  { %v7245_v63 = vmul.f32 1.442695, %v7242_v7 }
 0x5dd   :  { %9827 = vpow2.f32 %v7245_v63 }
 0x5e3   :  { %v9826_v8 = vpop.eup %9825 }
 0x5e4   :  { %v7247_v13 = vadd.f32 1.0, %v9826_v8 }
 0x5e6   :  { %9829 = vrcp.f32 %v7247_v13 }
 0x5e7   :  { %v9828_v22 = vpop.eup %9827 }
 0x5e8   :  { %v7248_v42 = vadd.f32 1.0, %v9828_v22 }
 0x5ea   :  { %9831 = vrcp.f32 %v7248_v42 }
 0x5f0   :  { %v9830_v34 = vpop.eup %9829 }
 0x5f1   :  { %7251 = vst [vmem:[%s14725_s12] sm:$0xff] %v9830_v34  ;;  %v7253_v37 = vmul.f32 %v9833_v62, %v9830_v34 }
 0x5f4   :  { %v9832_v18 = vpop.eup %9831 }
 0x5f5   :  { %7252 = vst [vmem:[%s14725_s12 + $0x8] sm:$0xff] %v9832_v18  ;;  %v7254_v56 = vmul.f32 %v9834_v35, %v9832_v18 }
 0x5f7   :  { %v7255_v53 = vadd.f32 %v7254_v56, %v7253_v37 }
 0x5f9   :  { %v7256_v6 = vrot.slane %v7255_v53, 4 }
 0x5fb   :  { %v7257_v50 = vadd.f32 %v7256_v6, %v7255_v53 }
 0x5fd   :  { %v7258_v61 = vrot.slane %v7257_v50, 2 }
 0x5ff   :  { %v7259_v41 = vadd.f32 %v7258_v61, %v7257_v50 }
 0x601   :  { %v7260_v43 = vrot.slane %v7259_v41, 1 }
 0x603   :  { %v7261_v10 = vadd.f32 %v7260_v43, %v7259_v41 }
 0x605   :  { %7262 = vst [vmem:[%s14726_s13] sm:$0x1] %v7261_v10 }

</bundles_post_ra>
